<compile_context>
chip_gen: v7x
topology: tpu7x:2x2x1
jax: 0.10.0
libtpu: 0.0.40
codegen_flags: <defaults>
</compile_context>

<pallas_src>
import numpy as np
import jax
import jax.numpy as jnp
from jax.experimental import pallas as pl
from jax.experimental.pallas import tpu as pltpu

# ---- model geometry (fixed by the PyTorch module) ----
BT = 128                    # batch tile (examples per grid step), multiple of 16
H1, W1, C1 = 40, 5, 64      # conv1 output (spatial == input, Cout=64)
H2, W2, C2 = 20, 3, 128     # after pool1 / conv2 output
H3, W3 = 10, 2              # after pool2
FC_IN, FC1, FC2, NCLS, NPAD = H3 * W3 * C2, 256, 512, 10, 128


# ---------------------------- fused Pallas kernel ----------------------------

def _fused_kernel(x_ref, w1_ref, b1_ref, wr2_ref, b2_ref,
                  wfc1_ref, bfc1_ref, wfc2_ref, bfc2_ref, wfc3_ref, bfc3_ref,
                  out_ref,
                  pad2_ref, fcin_ref):
    f32, bf16 = jnp.float32, jnp.bfloat16

    # Zero only the 2-row H halos of conv2's padded input; the 20 interior rows
    # are fully rewritten below.  Done every step (only ~0.2 MB of stores) so
    # correctness never depends on which TensorCore ran grid step 0.
    zero_halo = jnp.zeros((2 * BT, W2 * C1), bf16)
    pad2_ref[0:2 * BT, :] = zero_halo
    pad2_ref[(2 + H2) * BT:(4 + H2) * BT, :] = zero_halo

    b1_row = b1_ref[...]           # hoisted out of the loops
    b2_row = b2_ref[...]

    # ---- conv1 (5x5, pad 2) + bias + ReLU + 2x2 maxpool (W pad 1), fused ----
    # Each output-row pair is ONE K=25 MXU matmul (kh,w lane packing built in
    # the wrapper).  conv1 output lane-blocks are ordered [w1, w3, w2, w4, w0]
    # (folded into w1_ref offline) so the W-pooling only uses 128-lane-aligned
    # slices; the pooled row is written once, directly into conv2's padded
    # input in lane order [max(w1,w2) | max(w3,w4) | w0].
    @pl.loop(0, H2)
    def _conv1_pool1(i):
        r = pl.multiple_of(2 * i * BT, BT)
        y = jnp.dot(x_ref[pl.ds(r, 2 * BT), :], w1_ref[...],
                    preferred_element_type=f32)
        y = jnp.maximum(y + b1_row, 0.0)                          # (2*BT, 5*C1)
        hm = jnp.maximum(y[:BT, :], y[BT:, :])                    # H-pool
        wm = jnp.maximum(hm[:, 0:2 * C1], hm[:, 2 * C1:4 * C1])   # [p1 | p2]
        row = jnp.concatenate([wm, hm[:, 4 * C1:5 * C1]], axis=1)  # + [p0]
        d = pl.multiple_of((2 + i) * BT, BT)
        pad2_ref[pl.ds(d, BT), :] = row.astype(bf16)

    # ---- conv2 (5x5, pad 2) + bias + ReLU + 2x2 maxpool (W pad 1) + flatten ----
    # 5 row-tap K=192 matmuls per output-row pair, accumulated in a value (no
    # scratch RMW); bias/ReLU/pool fused into the single store of the pooled,
    # flattened fc1-input chunk.
    @pl.loop(0, H3)
    def _conv2_pool2(j):
        acc = None
        for kh in range(5):
            r = pl.multiple_of((2 * j + kh) * BT, BT)
            part = jnp.dot(pad2_ref[pl.ds(r, 2 * BT), :], wr2_ref[kh],
                           preferred_element_type=f32)
            acc = part if acc is None else acc + part
        y = jnp.maximum(acc + b2_row, 0.0)                        # (2*BT, 3*C2)
        hm = jnp.maximum(y[:BT, :], y[BT:, :])                    # H-pool
        pooled = jnp.concatenate(
            [hm[:, 0:C2],
             jnp.maximum(hm[:, C2:2 * C2], hm[:, 2 * C2:3 * C2])],
            axis=1)                                               # (BT, 2*C2)
        fcin_ref[j] = pooled.astype(bf16)

    # TODO(synk): nn.Dropout(0.3) layers are inference-mode identities here.

    # ---- fc1 + ReLU (K accumulated over the 10 pooled-h chunks) ----
    acc = None
    for h in range(H3):
        part = jnp.dot(fcin_ref[h], wfc1_ref[h], preferred_element_type=f32)
        acc = part if acc is None else acc + part
    h1 = jnp.maximum(acc + bfc1_ref[...], 0.0)

    # ---- fc2 + ReLU ----
    h2 = jnp.maximum(
        jnp.dot(h1.astype(bf16), wfc2_ref[...], preferred_element_type=f32)
        + bfc2_ref[...], 0.0)

    # ---- fc3 (padded to 128 output lanes, pad lanes carry -1e30 f32 bias) + softmax ----
    logits = jnp.dot(h2.astype(bf16), wfc3_ref[...],
                     preferred_element_type=f32) + bfc3_ref[...]
    m = jnp.max(logits, axis=1, keepdims=True)
    e = jnp.exp(logits - m)
    out_ref[...] = (e / jnp.sum(e, axis=1, keepdims=True)).astype(out_ref.dtype)


# ---------------------------- wrapper ----------------------------

def sound_cnnet_forward(x, kp):
    """x: (B, 200) MFCC features -> (B, 10) class probabilities."""
    B = x.shape[0]
    nt = -(-B // BT)
    Bp = nt * BT
    xr = x.reshape(B, H1, W1).astype(jnp.bfloat16)
    if Bp != B:
        xr = jnp.pad(xr, ((0, Bp - B), (0, 0), (0, 0)))
    # (kh, w) lane packing (layout plumbing only): one K=25 matmul per conv1
    # output row in-kernel instead of 5 K=5 taps.  H zero-padding is folded in.
    xp = jnp.pad(xr, ((0, 0), (2, 2), (0, 0)))                    # (Bp, 44, 5)
    xim = jnp.stack([xp[:, kh:kh + H1, :] for kh in range(5)], axis=2)
    xim = xim.reshape(Bp, H1, 5 * W1)
    # per-tile rows are (h-major, example-minor) so conv row slices are contiguous
    x2 = xim.reshape(nt, BT, H1, 5 * W1).transpose(0, 2, 1, 3)
    x2 = x2.reshape(nt * H1 * BT, 5 * W1)

    out = pl.pallas_call(
        _fused_kernel,
        out_shape=jax.ShapeDtypeStruct((Bp, NPAD), jnp.float32),
        grid_spec=pltpu.PrefetchScalarGridSpec(
            num_scalar_prefetch=0,
            grid=(nt,),
            in_specs=[
                pl.BlockSpec((H1 * BT, 5 * W1), lambda i: (i, 0)),        # conv1 im2row tile
                pl.BlockSpec((5 * W1, W1 * C1), lambda i: (0, 0)),        # conv1 K=25 weight
                pl.BlockSpec((1, W1 * C1), lambda i: (0, 0)),
                pl.BlockSpec((5, W2 * C1, W2 * C2), lambda i: (0, 0, 0)),  # conv2 row-tap weights
                pl.BlockSpec((1, W2 * C2), lambda i: (0, 0)),
                pl.BlockSpec((H3, W3 * C2, FC1), lambda i: (0, 0, 0)),    # fc1 (chunked over h)
                pl.BlockSpec((1, FC1), lambda i: (0, 0)),
                pl.BlockSpec((FC1, FC2), lambda i: (0, 0)),
                pl.BlockSpec((1, FC2), lambda i: (0, 0)),
                pl.BlockSpec((FC2, NPAD), lambda i: (0, 0)),
                pl.BlockSpec((1, NPAD), lambda i: (0, 0)),
            ],
            out_specs=pl.BlockSpec((BT, NPAD), lambda i: (i, 0)),
            scratch_shapes=[
                pltpu.VMEM(((H2 + 4) * BT, W2 * C1), jnp.bfloat16),  # conv2 padded input
                pltpu.VMEM((H3, BT, W3 * C2), jnp.bfloat16),         # pooled/flattened fc1 input
            ],
        ),
        compiler_params=pltpu.CompilerParams(
            dimension_semantics=("parallel",),
            vmem_limit_bytes=32 * 1024 * 1024),
    )(x2, kp["w1"], kp["b1"], kp["wr2"], kp["b2"],
      kp["wfc1"], kp["bfc1"], kp["wfc2"], kp["bfc2"], kp["wfc3"], kp["bfc3"])
    return out[:B, :NCLS]


# ---------------------------- parameter preparation ----------------------------

def init_params(key):
    """Natural layout: conv HWIO (PyTorch OIHW -> transpose(2,3,1,0)); linear (in,out)
    with fc1 rows in PyTorch's NCHW-flatten order (c*20 + h*2 + w)."""
    ks = jax.random.split(key, 10)

    def nrm(k, shape, scale):
        return scale * jax.random.normal(k, shape, dtype=jnp.float32)

    return {
        "w_conv1": nrm(ks[0], (5, 5, 1, C1), 0.2), "b_conv1": nrm(ks[1], (C1,), 0.1),
        "w_conv2": nrm(ks[2], (5, 5, C1, C2), 0.05), "b_conv2": nrm(ks[3], (C2,), 0.1),
        "w_fc1": nrm(ks[4], (FC_IN, FC1), 0.02), "b_fc1": nrm(ks[5], (FC1,), 0.1),
        "w_fc2": nrm(ks[6], (FC1, FC2), 0.05), "b_fc2": nrm(ks[7], (FC2,), 0.1),
        "w_fc3": nrm(ks[8], (FC2, NCLS), 0.05), "b_fc3": nrm(ks[9], (NCLS,), 0.1),
    }


def prepare_params(p):
    """One-time conversion to kernel layout (conv1 folded to K=25, conv2 row-tap
    weights, pooling-friendly lane-block orders, folded flatten permutation,
    padded fc3, bf16 MXU weights)."""
    # conv1: fold kh+kw taps and W zero padding into one (25, 5*C1) matrix.
    # Output lane-block order [w=1, w=3, w=2, w=4, w=0] so in-kernel pooling
    # (max of lanes [0:128] vs [128:256], plus lanes [256:320] as-is) is aligned.
    pos1 = {1: 0, 3: 1, 2: 2, 4: 3, 0: 4}
    w1 = np.asarray(p["w_conv1"], np.float32)                     # (5,5,1,64)
    w1k = np.zeros((5 * W1, W1 * C1), np.float32)
    for kh in range(5):
        for wo in range(W1):
            blk = pos1[wo]
            for j in range(W1):
                kw = j - wo + 2
                if 0 <= kw < 5:
                    w1k[kh * W1 + j, blk * C1:(blk + 1) * C1] = w1[kh, kw, 0, :]

    # conv2 row-tap weights: input rows follow pad2's pooled-w lane order
    # [p1, p2, p0]; output columns natural [w0 | w1 | w2] (x 128 channels).
    pos2 = {1: 0, 2: 1, 0: 2}
    w2 = np.asarray(p["w_conv2"], np.float32)                     # (5,5,64,128)
    wr2 = np.zeros((5, W2 * C1, W2 * C2), np.float32)
    for kh in range(5):
        for wo in range(W2):
            for j in range(W2):
                kw = j - wo + 2
                if 0 <= kw < 5:
                    blk = pos2[j]
                    wr2[kh, blk * C1:(blk + 1) * C1, wo * C2:(wo + 1) * C2] = w2[kh, kw]

    b1 = jnp.tile(p["b_conv1"], W1).reshape(1, W1 * C1).astype(jnp.float32)
    b2 = jnp.tile(p["b_conv2"], W2).reshape(1, W2 * C2).astype(jnp.float32)

    # fc1: fold the NCHW flatten permutation (PyTorch index = c*20 + h*2 + w)
    # into the weight, chunked over the 10 pooled h rows -> (10, W3*C2, 256).
    wfc1_np = np.asarray(p["w_fc1"], np.float32)                  # (2560, 256)
    wfc1_r = wfc1_np.reshape(C2, H3, W3, FC1).transpose(1, 2, 0, 3)
    wfc1_r = wfc1_r.reshape(H3, W3 * C2, FC1)

    wfc3 = jnp.zeros((FC2, NPAD), jnp.bfloat16).at[:, :NCLS].set(
        p["w_fc3"].astype(jnp.bfloat16))
    bfc3 = jnp.full((1, NPAD), -1e30, jnp.float32).at[0, :NCLS].set(p["b_fc3"])

    return dict(
        w1=jnp.asarray(w1k, jnp.bfloat16), b1=b1,
        wr2=jnp.asarray(wr2, jnp.bfloat16), b2=b2,
        wfc1=jnp.asarray(wfc1_r, jnp.bfloat16),
        bfc1=p["b_fc1"].reshape(1, FC1).astype(jnp.float32),
        wfc2=p["w_fc2"].astype(jnp.bfloat16),
        bfc2=p["b_fc2"].reshape(1, FC2).astype(jnp.float32),
        wfc3=wfc3, bfc3=bfc3)


# ---------------------------- pure-JAX reference ----------------------------

def reference_forward(x, p):
    bf16, f32 = jnp.bfloat16, jnp.float32
    B = x.shape[0]
    h = x.reshape(B, H1, W1, 1).astype(bf16)

    def conv(h, w, b):
        y = jax.lax.conv_general_dilated(
            h, w.astype(bf16), window_strides=(1, 1), padding=((2, 2), (2, 2)),
            dimension_numbers=("NHWC", "HWIO", "NHWC"), preferred_element_type=f32)
        return jnp.maximum(y + b, 0.0)

    def pool(h):
        return jax.lax.reduce_window(
            h, -jnp.inf, jax.lax.max, window_dimensions=(1, 2, 2, 1),
            window_strides=(1, 2, 2, 1), padding=((0, 0), (0, 0), (1, 1), (0, 0)))

    h = pool(conv(h, p["w_conv1"], p["b_conv1"])).astype(bf16)
    h = pool(conv(h, p["w_conv2"], p["b_conv2"])).astype(bf16)
    h = jnp.transpose(h, (0, 3, 1, 2)).reshape(B, -1)            # NCHW flatten
    h = jnp.maximum(jnp.dot(h, p["w_fc1"].astype(bf16),
                            preferred_element_type=f32) + p["b_fc1"], 0.0).astype(bf16)
    h = jnp.maximum(jnp.dot(h, p["w_fc2"].astype(bf16),
                            preferred_element_type=f32) + p["b_fc2"], 0.0).astype(bf16)
    logits = jnp.dot(h, p["w_fc3"].astype(bf16),
                     preferred_element_type=f32) + p["b_fc3"]
    return jax.nn.softmax(logits, axis=1)


# ---------------------------- demo ----------------------------

if __name__ == "__main__":
    key = jax.random.PRNGKey(0)
    pkey, xkey = jax.random.split(key)
    params = init_params(pkey)
    kparams = prepare_params(params)

    # UrbanSounds8K features: 40 MFCC bins x 5 frames = 200 floats per example.
    B = 200  # pads to 256 -> two batch tiles of 128 (exercises grid + batch pad)
    x = jax.random.normal(xkey, (B, 200), dtype=jnp.float32)

    fwd = jax.jit(sound_cnnet_forward)
    out = jax.block_until_ready(fwd(x, kparams))
    assert out.shape == (B, NCLS), out.shape

    ref = jax.block_until_ready(jax.jit(reference_forward)(x, params))
    max_err = float(jnp.max(jnp.abs(out - ref)))
    row_err = float(jnp.max(jnp.abs(jnp.sum(out, axis=1) - 1.0)))
    assert max_err < 5e-2, f"max abs diff vs reference = {max_err}"
    assert row_err < 1e-3, f"softmax rows do not sum to 1 (err {row_err})"
    print("KERNEL_OK")
</pallas_src>

<mosaic_0001>
module attributes {stable_mosaic.version = 11 : i64} {
  func.func @_fused_kernel(%arg0: i32, %arg1: memref<5120x25xbf16, #tpu.memory_space<vmem>>, %arg2: memref<25x320xbf16, #tpu.memory_space<vmem>>, %arg3: memref<1x320xf32, #tpu.memory_space<vmem>>, %arg4: memref<5x192x384xbf16, #tpu.memory_space<vmem>>, %arg5: memref<1x384xf32, #tpu.memory_space<vmem>>, %arg6: memref<10x256x256xbf16, #tpu.memory_space<vmem>>, %arg7: memref<1x256xf32, #tpu.memory_space<vmem>>, %arg8: memref<256x512xbf16, #tpu.memory_space<vmem>>, %arg9: memref<1x512xf32, #tpu.memory_space<vmem>>, %arg10: memref<512x128xbf16, #tpu.memory_space<vmem>>, %arg11: memref<1x128xf32, #tpu.memory_space<vmem>>, %arg12: memref<128x128xf32, #tpu.memory_space<vmem>>, %arg13: memref<3072x192xbf16, #tpu.memory_space<vmem>>, %arg14: memref<10x128x256xbf16, #tpu.memory_space<vmem>>) attributes {dimension_semantics = [#tpu.dimension_semantics<parallel>], iteration_bounds = array<i64: 2>, scalar_prefetch = 0 : i64, scratch_operands = 2 : i64, tpu.core_type = #tpu.core_type<tc>, window_params = [{transform_indices = @transform_0, window_bounds = array<i64: 5120, 25>}, {pipeline_mode = #tpu.pipeline_mode<synchronous>, transform_indices = @transform_1, window_bounds = array<i64: 25, 320>}, {pipeline_mode = #tpu.pipeline_mode<synchronous>, transform_indices = @transform_2, window_bounds = array<i64: 1, 320>}, {pipeline_mode = #tpu.pipeline_mode<synchronous>, transform_indices = @transform_3, window_bounds = array<i64: 5, 192, 384>}, {pipeline_mode = #tpu.pipeline_mode<synchronous>, transform_indices = @transform_4, window_bounds = array<i64: 1, 384>}, {pipeline_mode = #tpu.pipeline_mode<synchronous>, transform_indices = @transform_5, window_bounds = array<i64: 10, 256, 256>}, {pipeline_mode = #tpu.pipeline_mode<synchronous>, transform_indices = @transform_6, window_bounds = array<i64: 1, 256>}, {pipeline_mode = #tpu.pipeline_mode<synchronous>, transform_indices = @transform_7, window_bounds = array<i64: 256, 512>}, {pipeline_mode = #tpu.pipeline_mode<synchronous>, transform_indices = @transform_8, window_bounds = array<i64: 1, 512>}, {pipeline_mode = #tpu.pipeline_mode<synchronous>, transform_indices = @transform_9, window_bounds = array<i64: 512, 128>}, {pipeline_mode = #tpu.pipeline_mode<synchronous>, transform_indices = @transform_10, window_bounds = array<i64: 1, 128>}, {transform_indices = @transform_11, window_bounds = array<i64: 128, 128>}]} {
    %cst = arith.constant 0.000000e+00 : bf16
    %0 = vector.broadcast %cst : bf16 to vector<256x192xbf16>
    %c0 = arith.constant 0 : index
    %c0_0 = arith.constant 0 : index
    %1 = vector.load %arg13[%c0, %c0_0] : memref<3072x192xbf16, #tpu.memory_space<vmem>>, vector<256x192xbf16>
    tpu.vector_store %arg13[%c0, %c0_0], %0 {strides = array<i32>} : memref<3072x192xbf16, #tpu.memory_space<vmem>>, vector<256x192xbf16>,
    %c2816 = arith.constant 2816 : index
    %c0_1 = arith.constant 0 : index
    %2 = vector.load %arg13[%c2816, %c0_1] : memref<3072x192xbf16, #tpu.memory_space<vmem>>, vector<256x192xbf16>
    tpu.vector_store %arg13[%c2816, %c0_1], %0 {strides = array<i32>} : memref<3072x192xbf16, #tpu.memory_space<vmem>>, vector<256x192xbf16>,
    %c0_2 = arith.constant 0 : index
    %c0_3 = arith.constant 0 : index
    %3 = vector.load %arg3[%c0_2, %c0_3] : memref<1x320xf32, #tpu.memory_space<vmem>>, vector<1x320xf32>
    %c0_4 = arith.constant 0 : index
    %c0_5 = arith.constant 0 : index
    %4 = vector.load %arg5[%c0_4, %c0_5] : memref<1x384xf32, #tpu.memory_space<vmem>>, vector<1x384xf32>
    %c0_i32 = arith.constant 0 : i32
    %c20_i32 = arith.constant 20 : i32
    %5 = arith.addi %c0_i32, %c20_i32 : i32
    %c1_i32 = arith.constant 1 : i32
    scf.for %arg15 = %c0_i32 to %5 step %c1_i32  : i32 {
      %c1_i32_89 = arith.constant 1 : i32
      %95 = arith.muli %arg15, %c1_i32_89 : i32
      %c0_i32_90 = arith.constant 0 : i32
      %96 = arith.addi %c0_i32_90, %95 : i32
      %c2_i32 = arith.constant 2 : i32
      %97 = arith.muli %c2_i32, %96 : i32
      %c128_i32 = arith.constant 128 : i32
      %98 = arith.muli %97, %c128_i32 : i32
      %99 = tpu.assume_multiple %98, 128 : i32
      %100 = arith.index_cast %99 : i32 to index
      %c0_91 = arith.constant 0 : index
      %101 = vector.load %arg1[%100, %c0_91] : memref<5120x25xbf16, #tpu.memory_space<vmem>>, vector<256x25xbf16>
      %c0_92 = arith.constant 0 : index
      %c0_93 = arith.constant 0 : index
      %102 = vector.load %arg2[%c0_92, %c0_93] : memref<25x320xbf16, #tpu.memory_space<vmem>>, vector<25x320xbf16>
      %cst_94 = arith.constant dense<0.000000e+00> : vector<256x320xf32>
      %103 = tpu.matmul %101, %102, %cst_94 {dimension_numbers = #tpu.dot_dimension_numbers<[1], [0], [0], [1], [0, 0, 1, 1], [], []>} : vector<256x25xbf16>, vector<25x320xbf16>, vector<256x320xf32> -> vector<256x320xf32>
      %104 = vector.broadcast %3 : vector<1x320xf32> to vector<256x320xf32>
      %105 = arith.addf %103, %104 : vector<256x320xf32>
      %cst_95 = arith.constant 0.000000e+00 : f32
      %106 = vector.broadcast %cst_95 : f32 to vector<256x320xf32>
      %107 = arith.maximumf %105, %106 : vector<256x320xf32>
      %108 = vector.extract_strided_slice %107 {offsets = [0, 0], sizes = [128, 320], strides = [1, 1]} : vector<256x320xf32> to vector<128x320xf32>
      %109 = vector.extract_strided_slice %107 {offsets = [128, 0], sizes = [128, 320], strides = [1, 1]} : vector<256x320xf32> to vector<128x320xf32>
      %110 = arith.maximumf %108, %109 : vector<128x320xf32>
      %111 = vector.extract_strided_slice %110 {offsets = [0, 0], sizes = [128, 128], strides = [1, 1]} : vector<128x320xf32> to vector<128x128xf32>
      %112 = vector.extract_strided_slice %110 {offsets = [0, 128], sizes = [128, 128], strides = [1, 1]} : vector<128x320xf32> to vector<128x128xf32>
      %113 = arith.maximumf %111, %112 : vector<128x128xf32>
      %114 = vector.extract_strided_slice %110 {offsets = [0, 256], sizes = [128, 64], strides = [1, 1]} : vector<128x320xf32> to vector<128x64xf32>
      %115 = tpu.concatenate %113, %114 in 1 : vector<128x128xf32>, vector<128x64xf32> -> vector<128x192xf32>
      %c2_i32_96 = arith.constant 2 : i32
      %116 = arith.addi %c2_i32_96, %96 : i32
      %c128_i32_97 = arith.constant 128 : i32
      %117 = arith.muli %116, %c128_i32_97 : i32
      %118 = tpu.assume_multiple %117, 128 : i32
      %119 = arith.truncf %115 : vector<128x192xf32> to vector<128x192xbf16>
      %120 = arith.index_cast %118 : i32 to index
      %c0_98 = arith.constant 0 : index
      %121 = vector.load %arg13[%120, %c0_98] : memref<3072x192xbf16, #tpu.memory_space<vmem>>, vector<128x192xbf16>
      tpu.vector_store %arg13[%120, %c0_98], %119 {strides = array<i32>} : memref<3072x192xbf16, #tpu.memory_space<vmem>>, vector<128x192xbf16>,
    }
    %c20_i32_6 = arith.constant 20 : i32
    %c0_i32_7 = arith.constant 0 : i32
    %c10_i32 = arith.constant 10 : i32
    %6 = arith.addi %c0_i32_7, %c10_i32 : i32
    %c1_i32_8 = arith.constant 1 : i32
    scf.for %arg15 = %c0_i32_7 to %6 step %c1_i32_8  : i32 {
      %c1_i32_89 = arith.constant 1 : i32
      %95 = arith.muli %arg15, %c1_i32_89 : i32
      %c0_i32_90 = arith.constant 0 : i32
      %96 = arith.addi %c0_i32_90, %95 : i32
      %c2_i32 = arith.constant 2 : i32
      %97 = arith.muli %c2_i32, %96 : i32
      %c0_i32_91 = arith.constant 0 : i32
      %98 = arith.addi %97, %c0_i32_91 : i32
      %c128_i32 = arith.constant 128 : i32
      %99 = arith.muli %98, %c128_i32 : i32
      %100 = tpu.assume_multiple %99, 128 : i32
      %101 = arith.index_cast %100 : i32 to index
      %c0_92 = arith.constant 0 : index
      %102 = vector.load %arg13[%101, %c0_92] : memref<3072x192xbf16, #tpu.memory_space<vmem>>, vector<256x192xbf16>
      %c0_93 = arith.constant 0 : index
      %c0_94 = arith.constant 0 : index
      %c0_95 = arith.constant 0 : index
      %103 = vector.load %arg4[%c0_93, %c0_94, %c0_95] : memref<5x192x384xbf16, #tpu.memory_space<vmem>>, vector<1x192x384xbf16>
      %104 = vector.shape_cast %103 : vector<1x192x384xbf16> to vector<192x384xbf16>
      %cst_96 = arith.constant dense<0.000000e+00> : vector<256x384xf32>
      %105 = tpu.matmul %102, %104, %cst_96 {dimension_numbers = #tpu.dot_dimension_numbers<[1], [0], [0], [1], [0, 0, 1, 1], [], []>} : vector<256x192xbf16>, vector<192x384xbf16>, vector<256x384xf32> -> vector<256x384xf32>
      %c2_i32_97 = arith.constant 2 : i32
      %106 = arith.muli %c2_i32_97, %96 : i32
      %c1_i32_98 = arith.constant 1 : i32
      %107 = arith.addi %106, %c1_i32_98 : i32
      %c128_i32_99 = arith.constant 128 : i32
      %108 = arith.muli %107, %c128_i32_99 : i32
      %109 = tpu.assume_multiple %108, 128 : i32
      %110 = arith.index_cast %109 : i32 to index
      %c0_100 = arith.constant 0 : index
      %111 = vector.load %arg13[%110, %c0_100] : memref<3072x192xbf16, #tpu.memory_space<vmem>>, vector<256x192xbf16>
      %c1_101 = arith.constant 1 : index
      %c0_102 = arith.constant 0 : index
      %c0_103 = arith.constant 0 : index
      %112 = vector.load %arg4[%c1_101, %c0_102, %c0_103] : memref<5x192x384xbf16, #tpu.memory_space<vmem>>, vector<1x192x384xbf16>
      %113 = vector.shape_cast %112 : vector<1x192x384xbf16> to vector<192x384xbf16>
      %cst_104 = arith.constant dense<0.000000e+00> : vector<256x384xf32>
      %114 = tpu.matmul %111, %113, %cst_104 {dimension_numbers = #tpu.dot_dimension_numbers<[1], [0], [0], [1], [0, 0, 1, 1], [], []>} : vector<256x192xbf16>, vector<192x384xbf16>, vector<256x384xf32> -> vector<256x384xf32>
      %115 = arith.addf %105, %114 : vector<256x384xf32>
      %c2_i32_105 = arith.constant 2 : i32
      %116 = arith.muli %c2_i32_105, %96 : i32
      %c2_i32_106 = arith.constant 2 : i32
      %117 = arith.addi %116, %c2_i32_106 : i32
      %c128_i32_107 = arith.constant 128 : i32
      %118 = arith.muli %117, %c128_i32_107 : i32
      %119 = tpu.assume_multiple %118, 128 : i32
      %120 = arith.index_cast %119 : i32 to index
      %c0_108 = arith.constant 0 : index
      %121 = vector.load %arg13[%120, %c0_108] : memref<3072x192xbf16, #tpu.memory_space<vmem>>, vector<256x192xbf16>
      %c2_109 = arith.constant 2 : index
      %c0_110 = arith.constant 0 : index
      %c0_111 = arith.constant 0 : index
      %122 = vector.load %arg4[%c2_109, %c0_110, %c0_111] : memref<5x192x384xbf16, #tpu.memory_space<vmem>>, vector<1x192x384xbf16>
      %123 = vector.shape_cast %122 : vector<1x192x384xbf16> to vector<192x384xbf16>
      %cst_112 = arith.constant dense<0.000000e+00> : vector<256x384xf32>
      %124 = tpu.matmul %121, %123, %cst_112 {dimension_numbers = #tpu.dot_dimension_numbers<[1], [0], [0], [1], [0, 0, 1, 1], [], []>} : vector<256x192xbf16>, vector<192x384xbf16>, vector<256x384xf32> -> vector<256x384xf32>
      %125 = arith.addf %115, %124 : vector<256x384xf32>
      %c2_i32_113 = arith.constant 2 : i32
      %126 = arith.muli %c2_i32_113, %96 : i32
      %c3_i32 = arith.constant 3 : i32
      %127 = arith.addi %126, %c3_i32 : i32
      %c128_i32_114 = arith.constant 128 : i32
      %128 = arith.muli %127, %c128_i32_114 : i32
      %129 = tpu.assume_multiple %128, 128 : i32
      %130 = arith.index_cast %129 : i32 to index
      %c0_115 = arith.constant 0 : index
      %131 = vector.load %arg13[%130, %c0_115] : memref<3072x192xbf16, #tpu.memory_space<vmem>>, vector<256x192xbf16>
      %c3_116 = arith.constant 3 : index
      %c0_117 = arith.constant 0 : index
      %c0_118 = arith.constant 0 : index
      %132 = vector.load %arg4[%c3_116, %c0_117, %c0_118] : memref<5x192x384xbf16, #tpu.memory_space<vmem>>, vector<1x192x384xbf16>
      %133 = vector.shape_cast %132 : vector<1x192x384xbf16> to vector<192x384xbf16>
      %cst_119 = arith.constant dense<0.000000e+00> : vector<256x384xf32>
      %134 = tpu.matmul %131, %133, %cst_119 {dimension_numbers = #tpu.dot_dimension_numbers<[1], [0], [0], [1], [0, 0, 1, 1], [], []>} : vector<256x192xbf16>, vector<192x384xbf16>, vector<256x384xf32> -> vector<256x384xf32>
      %135 = arith.addf %125, %134 : vector<256x384xf32>
      %c2_i32_120 = arith.constant 2 : i32
      %136 = arith.muli %c2_i32_120, %96 : i32
      %c4_i32 = arith.constant 4 : i32
      %137 = arith.addi %136, %c4_i32 : i32
      %c128_i32_121 = arith.constant 128 : i32
      %138 = arith.muli %137, %c128_i32_121 : i32
      %139 = tpu.assume_multiple %138, 128 : i32
      %140 = arith.index_cast %139 : i32 to index
      %c0_122 = arith.constant 0 : index
      %141 = vector.load %arg13[%140, %c0_122] : memref<3072x192xbf16, #tpu.memory_space<vmem>>, vector<256x192xbf16>
      %c4_123 = arith.constant 4 : index
      %c0_124 = arith.constant 0 : index
      %c0_125 = arith.constant 0 : index
      %142 = vector.load %arg4[%c4_123, %c0_124, %c0_125] : memref<5x192x384xbf16, #tpu.memory_space<vmem>>, vector<1x192x384xbf16>
      %143 = vector.shape_cast %142 : vector<1x192x384xbf16> to vector<192x384xbf16>
      %cst_126 = arith.constant dense<0.000000e+00> : vector<256x384xf32>
      %144 = tpu.matmul %141, %143, %cst_126 {dimension_numbers = #tpu.dot_dimension_numbers<[1], [0], [0], [1], [0, 0, 1, 1], [], []>} : vector<256x192xbf16>, vector<192x384xbf16>, vector<256x384xf32> -> vector<256x384xf32>
      %145 = arith.addf %135, %144 : vector<256x384xf32>
      %146 = vector.broadcast %4 : vector<1x384xf32> to vector<256x384xf32>
      %147 = arith.addf %145, %146 : vector<256x384xf32>
      %cst_127 = arith.constant 0.000000e+00 : f32
      %148 = vector.broadcast %cst_127 : f32 to vector<256x384xf32>
      %149 = arith.maximumf %147, %148 : vector<256x384xf32>
      %150 = vector.extract_strided_slice %149 {offsets = [0, 0], sizes = [128, 384], strides = [1, 1]} : vector<256x384xf32> to vector<128x384xf32>
      %151 = vector.extract_strided_slice %149 {offsets = [128, 0], sizes = [128, 384], strides = [1, 1]} : vector<256x384xf32> to vector<128x384xf32>
      %152 = arith.maximumf %150, %151 : vector<128x384xf32>
      %153 = vector.extract_strided_slice %152 {offsets = [0, 0], sizes = [128, 128], strides = [1, 1]} : vector<128x384xf32> to vector<128x128xf32>
      %154 = vector.extract_strided_slice %152 {offsets = [0, 128], sizes = [128, 128], strides = [1, 1]} : vector<128x384xf32> to vector<128x128xf32>
      %155 = vector.extract_strided_slice %152 {offsets = [0, 256], sizes = [128, 128], strides = [1, 1]} : vector<128x384xf32> to vector<128x128xf32>
      %156 = arith.maximumf %154, %155 : vector<128x128xf32>
      %157 = tpu.concatenate %153, %156 in 1 : vector<128x128xf32>, vector<128x128xf32> -> vector<128x256xf32>
      %158 = arith.truncf %157 : vector<128x256xf32> to vector<128x256xbf16>
      %159 = arith.index_cast %96 : i32 to index
      %c0_128 = arith.constant 0 : index
      %c0_129 = arith.constant 0 : index
      %160 = vector.load %arg14[%159, %c0_128, %c0_129] : memref<10x128x256xbf16, #tpu.memory_space<vmem>>, vector<1x128x256xbf16>
      %161 = vector.shape_cast %160 : vector<1x128x256xbf16> to vector<128x256xbf16>
      %162 = vector.shape_cast %158 : vector<128x256xbf16> to vector<1x128x256xbf16>
      tpu.vector_store %arg14[%159, %c0_128, %c0_129], %162 {strides = array<i32>} : memref<10x128x256xbf16, #tpu.memory_space<vmem>>, vector<1x128x256xbf16>,
    }
    %c10_i32_9 = arith.constant 10 : i32
    %c0_10 = arith.constant 0 : index
    %c0_11 = arith.constant 0 : index
    %c0_12 = arith.constant 0 : index
    %7 = vector.load %arg14[%c0_10, %c0_11, %c0_12] : memref<10x128x256xbf16, #tpu.memory_space<vmem>>, vector<1x128x256xbf16>
    %8 = vector.shape_cast %7 : vector<1x128x256xbf16> to vector<128x256xbf16>
    %c0_13 = arith.constant 0 : index
    %c0_14 = arith.constant 0 : index
    %c0_15 = arith.constant 0 : index
    %9 = vector.load %arg6[%c0_13, %c0_14, %c0_15] : memref<10x256x256xbf16, #tpu.memory_space<vmem>>, vector<1x256x256xbf16>
    %10 = vector.shape_cast %9 : vector<1x256x256xbf16> to vector<256x256xbf16>
    %cst_16 = arith.constant dense<0.000000e+00> : vector<128x256xf32>
    %11 = tpu.matmul %8, %10, %cst_16 {dimension_numbers = #tpu.dot_dimension_numbers<[1], [0], [0], [1], [0, 0, 1, 1], [], []>} : vector<128x256xbf16>, vector<256x256xbf16>, vector<128x256xf32> -> vector<128x256xf32>
    %c1 = arith.constant 1 : index
    %c0_17 = arith.constant 0 : index
    %c0_18 = arith.constant 0 : index
    %12 = vector.load %arg14[%c1, %c0_17, %c0_18] : memref<10x128x256xbf16, #tpu.memory_space<vmem>>, vector<1x128x256xbf16>
    %13 = vector.shape_cast %12 : vector<1x128x256xbf16> to vector<128x256xbf16>
    %c1_19 = arith.constant 1 : index
    %c0_20 = arith.constant 0 : index
    %c0_21 = arith.constant 0 : index
    %14 = vector.load %arg6[%c1_19, %c0_20, %c0_21] : memref<10x256x256xbf16, #tpu.memory_space<vmem>>, vector<1x256x256xbf16>
    %15 = vector.shape_cast %14 : vector<1x256x256xbf16> to vector<256x256xbf16>
    %cst_22 = arith.constant dense<0.000000e+00> : vector<128x256xf32>
    %16 = tpu.matmul %13, %15, %cst_22 {dimension_numbers = #tpu.dot_dimension_numbers<[1], [0], [0], [1], [0, 0, 1, 1], [], []>} : vector<128x256xbf16>, vector<256x256xbf16>, vector<128x256xf32> -> vector<128x256xf32>
    %17 = arith.addf %11, %16 : vector<128x256xf32>
    %c2 = arith.constant 2 : index
    %c0_23 = arith.constant 0 : index
    %c0_24 = arith.constant 0 : index
    %18 = vector.load %arg14[%c2, %c0_23, %c0_24] : memref<10x128x256xbf16, #tpu.memory_space<vmem>>, vector<1x128x256xbf16>
    %19 = vector.shape_cast %18 : vector<1x128x256xbf16> to vector<128x256xbf16>
    %c2_25 = arith.constant 2 : index
    %c0_26 = arith.constant 0 : index
    %c0_27 = arith.constant 0 : index
    %20 = vector.load %arg6[%c2_25, %c0_26, %c0_27] : memref<10x256x256xbf16, #tpu.memory_space<vmem>>, vector<1x256x256xbf16>
    %21 = vector.shape_cast %20 : vector<1x256x256xbf16> to vector<256x256xbf16>
    %cst_28 = arith.constant dense<0.000000e+00> : vector<128x256xf32>
    %22 = tpu.matmul %19, %21, %cst_28 {dimension_numbers = #tpu.dot_dimension_numbers<[1], [0], [0], [1], [0, 0, 1, 1], [], []>} : vector<128x256xbf16>, vector<256x256xbf16>, vector<128x256xf32> -> vector<128x256xf32>
    %23 = arith.addf %17, %22 : vector<128x256xf32>
    %c3 = arith.constant 3 : index
    %c0_29 = arith.constant 0 : index
    %c0_30 = arith.constant 0 : index
    %24 = vector.load %arg14[%c3, %c0_29, %c0_30] : memref<10x128x256xbf16, #tpu.memory_space<vmem>>, vector<1x128x256xbf16>
    %25 = vector.shape_cast %24 : vector<1x128x256xbf16> to vector<128x256xbf16>
    %c3_31 = arith.constant 3 : index
    %c0_32 = arith.constant 0 : index
    %c0_33 = arith.constant 0 : index
    %26 = vector.load %arg6[%c3_31, %c0_32, %c0_33] : memref<10x256x256xbf16, #tpu.memory_space<vmem>>, vector<1x256x256xbf16>
    %27 = vector.shape_cast %26 : vector<1x256x256xbf16> to vector<256x256xbf16>
    %cst_34 = arith.constant dense<0.000000e+00> : vector<128x256xf32>
    %28 = tpu.matmul %25, %27, %cst_34 {dimension_numbers = #tpu.dot_dimension_numbers<[1], [0], [0], [1], [0, 0, 1, 1], [], []>} : vector<128x256xbf16>, vector<256x256xbf16>, vector<128x256xf32> -> vector<128x256xf32>
    %29 = arith.addf %23, %28 : vector<128x256xf32>
    %c4 = arith.constant 4 : index
    %c0_35 = arith.constant 0 : index
    %c0_36 = arith.constant 0 : index
    %30 = vector.load %arg14[%c4, %c0_35, %c0_36] : memref<10x128x256xbf16, #tpu.memory_space<vmem>>, vector<1x128x256xbf16>
    %31 = vector.shape_cast %30 : vector<1x128x256xbf16> to vector<128x256xbf16>
    %c4_37 = arith.constant 4 : index
    %c0_38 = arith.constant 0 : index
    %c0_39 = arith.constant 0 : index
    %32 = vector.load %arg6[%c4_37, %c0_38, %c0_39] : memref<10x256x256xbf16, #tpu.memory_space<vmem>>, vector<1x256x256xbf16>
    %33 = vector.shape_cast %32 : vector<1x256x256xbf16> to vector<256x256xbf16>
    %cst_40 = arith.constant dense<0.000000e+00> : vector<128x256xf32>
    %34 = tpu.matmul %31, %33, %cst_40 {dimension_numbers = #tpu.dot_dimension_numbers<[1], [0], [0], [1], [0, 0, 1, 1], [], []>} : vector<128x256xbf16>, vector<256x256xbf16>, vector<128x256xf32> -> vector<128x256xf32>
    %35 = arith.addf %29, %34 : vector<128x256xf32>
    %c5 = arith.constant 5 : index
    %c0_41 = arith.constant 0 : index
    %c0_42 = arith.constant 0 : index
    %36 = vector.load %arg14[%c5, %c0_41, %c0_42] : memref<10x128x256xbf16, #tpu.memory_space<vmem>>, vector<1x128x256xbf16>
    %37 = vector.shape_cast %36 : vector<1x128x256xbf16> to vector<128x256xbf16>
    %c5_43 = arith.constant 5 : index
    %c0_44 = arith.constant 0 : index
    %c0_45 = arith.constant 0 : index
    %38 = vector.load %arg6[%c5_43, %c0_44, %c0_45] : memref<10x256x256xbf16, #tpu.memory_space<vmem>>, vector<1x256x256xbf16>
    %39 = vector.shape_cast %38 : vector<1x256x256xbf16> to vector<256x256xbf16>
    %cst_46 = arith.constant dense<0.000000e+00> : vector<128x256xf32>
    %40 = tpu.matmul %37, %39, %cst_46 {dimension_numbers = #tpu.dot_dimension_numbers<[1], [0], [0], [1], [0, 0, 1, 1], [], []>} : vector<128x256xbf16>, vector<256x256xbf16>, vector<128x256xf32> -> vector<128x256xf32>
    %41 = arith.addf %35, %40 : vector<128x256xf32>
    %c6 = arith.constant 6 : index
    %c0_47 = arith.constant 0 : index
    %c0_48 = arith.constant 0 : index
    %42 = vector.load %arg14[%c6, %c0_47, %c0_48] : memref<10x128x256xbf16, #tpu.memory_space<vmem>>, vector<1x128x256xbf16>
    %43 = vector.shape_cast %42 : vector<1x128x256xbf16> to vector<128x256xbf16>
    %c6_49 = arith.constant 6 : index
    %c0_50 = arith.constant 0 : index
    %c0_51 = arith.constant 0 : index
    %44 = vector.load %arg6[%c6_49, %c0_50, %c0_51] : memref<10x256x256xbf16, #tpu.memory_space<vmem>>, vector<1x256x256xbf16>
    %45 = vector.shape_cast %44 : vector<1x256x256xbf16> to vector<256x256xbf16>
    %cst_52 = arith.constant dense<0.000000e+00> : vector<128x256xf32>
    %46 = tpu.matmul %43, %45, %cst_52 {dimension_numbers = #tpu.dot_dimension_numbers<[1], [0], [0], [1], [0, 0, 1, 1], [], []>} : vector<128x256xbf16>, vector<256x256xbf16>, vector<128x256xf32> -> vector<128x256xf32>
    %47 = arith.addf %41, %46 : vector<128x256xf32>
    %c7 = arith.constant 7 : index
    %c0_53 = arith.constant 0 : index
    %c0_54 = arith.constant 0 : index
    %48 = vector.load %arg14[%c7, %c0_53, %c0_54] : memref<10x128x256xbf16, #tpu.memory_space<vmem>>, vector<1x128x256xbf16>
    %49 = vector.shape_cast %48 : vector<1x128x256xbf16> to vector<128x256xbf16>
    %c7_55 = arith.constant 7 : index
    %c0_56 = arith.constant 0 : index
    %c0_57 = arith.constant 0 : index
    %50 = vector.load %arg6[%c7_55, %c0_56, %c0_57] : memref<10x256x256xbf16, #tpu.memory_space<vmem>>, vector<1x256x256xbf16>
    %51 = vector.shape_cast %50 : vector<1x256x256xbf16> to vector<256x256xbf16>
    %cst_58 = arith.constant dense<0.000000e+00> : vector<128x256xf32>
    %52 = tpu.matmul %49, %51, %cst_58 {dimension_numbers = #tpu.dot_dimension_numbers<[1], [0], [0], [1], [0, 0, 1, 1], [], []>} : vector<128x256xbf16>, vector<256x256xbf16>, vector<128x256xf32> -> vector<128x256xf32>
    %53 = arith.addf %47, %52 : vector<128x256xf32>
    %c8 = arith.constant 8 : index
    %c0_59 = arith.constant 0 : index
    %c0_60 = arith.constant 0 : index
    %54 = vector.load %arg14[%c8, %c0_59, %c0_60] : memref<10x128x256xbf16, #tpu.memory_space<vmem>>, vector<1x128x256xbf16>
    %55 = vector.shape_cast %54 : vector<1x128x256xbf16> to vector<128x256xbf16>
    %c8_61 = arith.constant 8 : index
    %c0_62 = arith.constant 0 : index
    %c0_63 = arith.constant 0 : index
    %56 = vector.load %arg6[%c8_61, %c0_62, %c0_63] : memref<10x256x256xbf16, #tpu.memory_space<vmem>>, vector<1x256x256xbf16>
    %57 = vector.shape_cast %56 : vector<1x256x256xbf16> to vector<256x256xbf16>
    %cst_64 = arith.constant dense<0.000000e+00> : vector<128x256xf32>
    %58 = tpu.matmul %55, %57, %cst_64 {dimension_numbers = #tpu.dot_dimension_numbers<[1], [0], [0], [1], [0, 0, 1, 1], [], []>} : vector<128x256xbf16>, vector<256x256xbf16>, vector<128x256xf32> -> vector<128x256xf32>
    %59 = arith.addf %53, %58 : vector<128x256xf32>
    %c9 = arith.constant 9 : index
    %c0_65 = arith.constant 0 : index
    %c0_66 = arith.constant 0 : index
    %60 = vector.load %arg14[%c9, %c0_65, %c0_66] : memref<10x128x256xbf16, #tpu.memory_space<vmem>>, vector<1x128x256xbf16>
    %61 = vector.shape_cast %60 : vector<1x128x256xbf16> to vector<128x256xbf16>
    %c9_67 = arith.constant 9 : index
    %c0_68 = arith.constant 0 : index
    %c0_69 = arith.constant 0 : index
    %62 = vector.load %arg6[%c9_67, %c0_68, %c0_69] : memref<10x256x256xbf16, #tpu.memory_space<vmem>>, vector<1x256x256xbf16>
    %63 = vector.shape_cast %62 : vector<1x256x256xbf16> to vector<256x256xbf16>
    %cst_70 = arith.constant dense<0.000000e+00> : vector<128x256xf32>
    %64 = tpu.matmul %61, %63, %cst_70 {dimension_numbers = #tpu.dot_dimension_numbers<[1], [0], [0], [1], [0, 0, 1, 1], [], []>} : vector<128x256xbf16>, vector<256x256xbf16>, vector<128x256xf32> -> vector<128x256xf32>
    %65 = arith.addf %59, %64 : vector<128x256xf32>
    %c0_71 = arith.constant 0 : index
    %c0_72 = arith.constant 0 : index
    %66 = vector.load %arg7[%c0_71, %c0_72] : memref<1x256xf32, #tpu.memory_space<vmem>>, vector<1x256xf32>
    %67 = vector.broadcast %66 : vector<1x256xf32> to vector<128x256xf32>
    %68 = arith.addf %65, %67 : vector<128x256xf32>
    %cst_73 = arith.constant 0.000000e+00 : f32
    %69 = vector.broadcast %cst_73 : f32 to vector<128x256xf32>
    %70 = arith.maximumf %68, %69 : vector<128x256xf32>
    %71 = arith.truncf %70 : vector<128x256xf32> to vector<128x256xbf16>
    %c0_74 = arith.constant 0 : index
    %c0_75 = arith.constant 0 : index
    %72 = vector.load %arg8[%c0_74, %c0_75] : memref<256x512xbf16, #tpu.memory_space<vmem>>, vector<256x512xbf16>
    %cst_76 = arith.constant dense<0.000000e+00> : vector<128x512xf32>
    %73 = tpu.matmul %71, %72, %cst_76 {dimension_numbers = #tpu.dot_dimension_numbers<[1], [0], [0], [1], [0, 0, 1, 1], [], []>} : vector<128x256xbf16>, vector<256x512xbf16>, vector<128x512xf32> -> vector<128x512xf32>
    %c0_77 = arith.constant 0 : index
    %c0_78 = arith.constant 0 : index
    %74 = vector.load %arg9[%c0_77, %c0_78] : memref<1x512xf32, #tpu.memory_space<vmem>>, vector<1x512xf32>
    %75 = vector.broadcast %74 : vector<1x512xf32> to vector<128x512xf32>
    %76 = arith.addf %73, %75 : vector<128x512xf32>
    %cst_79 = arith.constant 0.000000e+00 : f32
    %77 = vector.broadcast %cst_79 : f32 to vector<128x512xf32>
    %78 = arith.maximumf %76, %77 : vector<128x512xf32>
    %79 = arith.truncf %78 : vector<128x512xf32> to vector<128x512xbf16>
    %c0_80 = arith.constant 0 : index
    %c0_81 = arith.constant 0 : index
    %80 = vector.load %arg10[%c0_80, %c0_81] : memref<512x128xbf16, #tpu.memory_space<vmem>>, vector<512x128xbf16>
    %cst_82 = arith.constant dense<0.000000e+00> : vector<128x128xf32>
    %81 = tpu.matmul %79, %80, %cst_82 {dimension_numbers = #tpu.dot_dimension_numbers<[1], [0], [0], [1], [0, 0, 1, 1], [], []>} : vector<128x512xbf16>, vector<512x128xbf16>, vector<128x128xf32> -> vector<128x128xf32>
    %c0_83 = arith.constant 0 : index
    %c0_84 = arith.constant 0 : index
    %82 = vector.load %arg11[%c0_83, %c0_84] : memref<1x128xf32, #tpu.memory_space<vmem>>, vector<1x128xf32>
    %83 = vector.broadcast %82 : vector<1x128xf32> to vector<128x128xf32>
    %84 = arith.addf %81, %83 : vector<128x128xf32>
    %cst_85 = arith.constant dense<0xFF800000> : vector<128xf32>
    %85 = vector.multi_reduction <maximumf>, %84, %cst_85 [1] : vector<128x128xf32> to vector<128xf32>
    %86 = vector.shape_cast %85 : vector<128xf32> to vector<128x1xf32>
    %87 = vector.broadcast %86 : vector<128x1xf32> to vector<128x128xf32>
    %88 = arith.subf %84, %87 : vector<128x128xf32>
    %89 = math.exp %88 : vector<128x128xf32>
    %cst_86 = arith.constant dense<0.000000e+00> : vector<128xf32>
    %90 = vector.multi_reduction <add>, %89, %cst_86 [1] : vector<128x128xf32> to vector<128xf32>
    %91 = vector.shape_cast %90 : vector<128xf32> to vector<128x1xf32>
    %92 = vector.broadcast %91 : vector<128x1xf32> to vector<128x128xf32>
    %93 = arith.divf %89, %92 : vector<128x128xf32>
    %c0_87 = arith.constant 0 : index
    %c0_88 = arith.constant 0 : index
    %94 = vector.load %arg12[%c0_87, %c0_88] : memref<128x128xf32, #tpu.memory_space<vmem>>, vector<128x128xf32>
    tpu.vector_store %arg12[%c0_87, %c0_88], %93 {strides = array<i32>} : memref<128x128xf32, #tpu.memory_space<vmem>>, vector<128x128xf32>,
    return
  }
  func.func @transform_0(%arg0: i32) -> (i32, i32) {
    %c0_i32 = arith.constant 0 : i32
    %c0_i32_0 = arith.constant 0 : i32
    return %arg0, %c0_i32 : i32, i32
  }
  func.func @transform_1(%arg0: i32) -> (i32, i32) {
    %c0_i32 = arith.constant 0 : i32
    %c0_i32_0 = arith.constant 0 : i32
    %c0_i32_1 = arith.constant 0 : i32
    return %c0_i32, %c0_i32_0 : i32, i32
  }
  func.func @transform_2(%arg0: i32) -> (i32, i32) {
    %c0_i32 = arith.constant 0 : i32
    %c0_i32_0 = arith.constant 0 : i32
    %c0_i32_1 = arith.constant 0 : i32
    return %c0_i32, %c0_i32_0 : i32, i32
  }
  func.func @transform_3(%arg0: i32) -> (i32, i32, i32) {
    %c0_i32 = arith.constant 0 : i32
    %c0_i32_0 = arith.constant 0 : i32
    %c0_i32_1 = arith.constant 0 : i32
    %c0_i32_2 = arith.constant 0 : i32
    return %c0_i32, %c0_i32_0, %c0_i32_1 : i32, i32, i32
  }
  func.func @transform_4(%arg0: i32) -> (i32, i32) {
    %c0_i32 = arith.constant 0 : i32
    %c0_i32_0 = arith.constant 0 : i32
    %c0_i32_1 = arith.constant 0 : i32
    return %c0_i32, %c0_i32_0 : i32, i32
  }
  func.func @transform_5(%arg0: i32) -> (i32, i32, i32) {
    %c0_i32 = arith.constant 0 : i32
    %c0_i32_0 = arith.constant 0 : i32
    %c0_i32_1 = arith.constant 0 : i32
    %c0_i32_2 = arith.constant 0 : i32
    return %c0_i32, %c0_i32_0, %c0_i32_1 : i32, i32, i32
  }
  func.func @transform_6(%arg0: i32) -> (i32, i32) {
    %c0_i32 = arith.constant 0 : i32
    %c0_i32_0 = arith.constant 0 : i32
    %c0_i32_1 = arith.constant 0 : i32
    return %c0_i32, %c0_i32_0 : i32, i32
  }
  func.func @transform_7(%arg0: i32) -> (i32, i32) {
    %c0_i32 = arith.constant 0 : i32
    %c0_i32_0 = arith.constant 0 : i32
    %c0_i32_1 = arith.constant 0 : i32
    return %c0_i32, %c0_i32_0 : i32, i32
  }
  func.func @transform_8(%arg0: i32) -> (i32, i32) {
    %c0_i32 = arith.constant 0 : i32
    %c0_i32_0 = arith.constant 0 : i32
    %c0_i32_1 = arith.constant 0 : i32
    return %c0_i32, %c0_i32_0 : i32, i32
  }
  func.func @transform_9(%arg0: i32) -> (i32, i32) {
    %c0_i32 = arith.constant 0 : i32
    %c0_i32_0 = arith.constant 0 : i32
    %c0_i32_1 = arith.constant 0 : i32
    return %c0_i32, %c0_i32_0 : i32, i32
  }
  func.func @transform_10(%arg0: i32) -> (i32, i32) {
    %c0_i32 = arith.constant 0 : i32
    %c0_i32_0 = arith.constant 0 : i32
    %c0_i32_1 = arith.constant 0 : i32
    return %c0_i32, %c0_i32_0 : i32, i32
  }
  func.func @transform_11(%arg0: i32) -> (i32, i32) {
    %c0_i32 = arith.constant 0 : i32
    %c0_i32_0 = arith.constant 0 : i32
    return %arg0, %c0_i32 : i32, i32
  }
}

</mosaic_0001>

<bundles_post_ra>
// kernel: sound_cnnet_forward.1
= control target key start
LH: loop header
LB: loop body
LE: loop exit
PB: predicated region body
PF: predicated region fallthrough
CT: control target
= control target key end

     0   :  { %s13389_s17 = smov 0   ;;  %s17501_s0 = inlined_call_operand.vmem [shape: bf16[10240,25], index: 0, kind: input, shape index: {}]   ;;  %s17502_s1 = inlined_call_operand.vmem [shape: bf16[25,320], index: 1, kind: input, shape index: {}]   ;;  %s17503_s2 = inlined_call_operand.vmem [shape: f32[1,320], index: 2, kind: input, shape index: {}]   ;;  %s17504_s3 = inlined_call_operand.vmem [shape: bf16[5,192,384], index: 3, kind: input, shape index: {}]   ;;  %s17505_s4 = inlined_call_operand.vmem [shape: f32[1,384], index: 4, kind: input, shape index: {}]   ;;  %s17506_s5 = inlined_call_operand.vmem [shape: bf16[10,256,256], index: 5, kind: input, shape index: {}]   ;;  %s17507_s6 = inlined_call_operand.vmem [shape: f32[1,256], index: 6, kind: input, shape index: {}]   ;;  %s17508_s7 = inlined_call_operand.vmem [shape: bf16[256,512], index: 7, kind: input, shape index: {}]   ;;  %s17509_s8 = inlined_call_operand.vmem [shape: f32[1,512], index: 8, kind: input, shape index: {}]   ;;  %s17510_s9 = inlined_call_operand.vmem [shape: bf16[512,128], index: 9, kind: input, shape index: {}]   ;;  %s17511_s10 = inlined_call_operand.vmem [shape: f32[1,128], index: 10, kind: input, shape index: {}]   ;;  %s17512_s11 = inlined_call_operand.vmem [shape: f32[256,128], index: 11, kind: output, shape index: {}]  }
   0x1 LB: > { %s10262_s18 = sadd.s32 4294967295, %s13315_s17   ;;  %p10266_p0 = scmp.ge.s32.totalorder %s13315_s17, 1  ;;  %s13315_s17 = sphi %s13389_s17, %s21_s17  }
   0x2   : > { %p338_p1 = scmp.lt.s32.totalorder %s13315_s17, 3 }
   0x4   : > { %p339_p2 = pnand %p10266_p0, %p338_p1 }
   0x6   : > { %342 = sbr.rel (%p339_p2) target bundleno = 2825 (0xb09), region = 64 }
   0xd   : > { %s13397_s19 = smul.u32 640, %s10262_s18  ;;  %s13399_s20 = sshll.u32 %s10262_s18, 4  ;;  %vm392_vm0 = vcmask 523264   ;;  %v13404_v0 = vld [vmem:[%s17503_s2] sm:$0x7]  ;;  %v13325_v1 = vmov 0  }
   0xe   : > { %17521 = vst [vmem:[#allocation4_spill] sm:$0xff] %v13404_v0  ;;  %p385_p3 = scmp.lt.s32.totalorder %s13399_s20, 31  ;;  %391 = vst [vmem:[#allocation2] sm:$0xff] %v13325_v1  ;;  %v13506_v2 = vld [vmem:[%s17505_s4] sm:$0x7]  ;;  %s13523_s14 = smov 0  }
   0xf   : > { %394 = vst [vmem:[#allocation2 + $0x10] sm:$0xff] %v13325_v1  ;;  %396 = vst [vmem:[#allocation2 + $0x20] sm:$0xff] %v13325_v1  ;;  %p379_p4 = scmp.lt.s32.totalorder %s13397_s19, 1279 }
  0x10   : > { %398 = vst [vmem:[#allocation2 + $0x30] sm:$0xff] %v13325_v1  ;;  %400 = vst [vmem:[#allocation2 + $0x40] sm:$0xff] %v13325_v1  ;;  %s17609_s20 = smov (!%p385_p3, %s13399_s20), 31 }
  0x11   : > { %402 = vst [vmem:[#allocation2 + $0x50] sm:$0xff] %v13325_v1  ;;  %404 = vst [vmem:[#allocation2 + $0x60] sm:$0xff] %v13325_v1  ;;  %s17611_s19 = smov (!%p379_p4, %s13397_s19), 1279  ;;  %s10269_s25 = sshll.u32 %s17609_s20, 3 }
  0x12   : > { %406 = vst [vmem:[#allocation2 + $0x70] sm:$0xff] %v13325_v1  ;;  %408 = vst [vmem:[#allocation2 + $0x80] sm:$0xff] %v13325_v1  ;;  %s10267_s26 = sshll.u32 %s17611_s19, 2  ;;  %s13516_s29 = scalar_lea.vmem %s17512_s11, %s10269_s25 }
  0x13   : > { %410 = vst [vmem:[#allocation2 + $0x90] sm:$0xff] %v13325_v1  ;;  %412 = vst [vmem:[#allocation2 + $0xa0] sm:$0xff] %v13325_v1  ;;  %s13521_s13 = scalar_lea.vmem %s17501_s0, %s10267_s26 }
  0x14   : > { %414 = vst [vmem:[#allocation2 + $0xb0] sm:$0xff] %v13325_v1  ;;  %416 = vst [vmem:[#allocation2 + $0xc0] sm:$0xff] %v13325_v1 }
  0x15   : > { %418 = vst [vmem:[#allocation2 + $0xd0] sm:$0xff] %v13325_v1  ;;  %420 = vst [vmem:[#allocation2 + $0xe0] sm:$0xff] %v13325_v1 }
  0x16   : > { %422 = vst [vmem:[#allocation2 + $0xf0] sm:$0xff] %v13325_v1  ;;  %424 = vst [vmem:[#allocation2 + $0xb00] sm:$0xff] %v13325_v1 }
  0x17   : > { %426 = vst [vmem:[#allocation2 + $0xb10] sm:$0xff] %v13325_v1  ;;  %428 = vst [vmem:[#allocation2 + $0xb20] sm:$0xff] %v13325_v1 }
  0x18   : > { %430 = vst [vmem:[#allocation2 + $0xb30] sm:$0xff] %v13325_v1  ;;  %432 = vst [vmem:[#allocation2 + $0xb40] sm:$0xff] %v13325_v1 }
  0x19   : > { %434 = vst [vmem:[#allocation2 + $0xb50] sm:$0xff] %v13325_v1  ;;  %436 = vst [vmem:[#allocation2 + $0xb60] sm:$0xff] %v13325_v1 }
  0x1a   : > { %438 = vst [vmem:[#allocation2 + $0xb70] sm:$0xff] %v13325_v1  ;;  %440 = vst [vmem:[#allocation2 + $0xb80] sm:$0xff] %v13325_v1 }
  0x1b   : > { %442 = vst [vmem:[#allocation2 + $0xb90] sm:$0xff] %v13325_v1  ;;  %444 = vst [vmem:[#allocation2 + $0xba0] sm:$0xff] %v13325_v1 }
  0x1c   : > { %446 = vst [vmem:[#allocation2 + $0xbb0] sm:$0xff] %v13325_v1  ;;  %448 = vst [vmem:[#allocation2 + $0xbc0] sm:$0xff] %v13325_v1 }
  0x1d   : > { %450 = vst [vmem:[#allocation2 + $0xbd0] sm:$0xff] %v13325_v1  ;;  %452 = vst [vmem:[#allocation2 + $0xbe0] sm:$0xff] %v13325_v1 }
  0x1e   : > { %454 = vst [vmem:[#allocation2 + $0xbf0] sm:$0xff] %v13325_v1  ;;  %393 = vst.msk [vmem:[#allocation2 + $0x8] sm:$0xff] %vm392_vm0, %v13325_v1 }
  0x1f   : > { %395 = vst.msk [vmem:[#allocation2 + $0x18] sm:$0xff] %vm392_vm0, %v13325_v1  ;;  %397 = vst.msk [vmem:[#allocation2 + $0x28] sm:$0xff] %vm392_vm0, %v13325_v1 }
  0x20   : > { %399 = vst.msk [vmem:[#allocation2 + $0x38] sm:$0xff] %vm392_vm0, %v13325_v1  ;;  %401 = vst.msk [vmem:[#allocation2 + $0x48] sm:$0xff] %vm392_vm0, %v13325_v1 }
  0x21   : > { %403 = vst.msk [vmem:[#allocation2 + $0x58] sm:$0xff] %vm392_vm0, %v13325_v1  ;;  %405 = vst.msk [vmem:[#allocation2 + $0x68] sm:$0xff] %vm392_vm0, %v13325_v1 }
  0x22   : > { %407 = vst.msk [vmem:[#allocation2 + $0x78] sm:$0xff] %vm392_vm0, %v13325_v1  ;;  %409 = vst.msk [vmem:[#allocation2 + $0x88] sm:$0xff] %vm392_vm0, %v13325_v1 }
  0x23   : > { %411 = vst.msk [vmem:[#allocation2 + $0x98] sm:$0xff] %vm392_vm0, %v13325_v1  ;;  %413 = vst.msk [vmem:[#allocation2 + $0xa8] sm:$0xff] %vm392_vm0, %v13325_v1 }
  0x24   : > { %415 = vst.msk [vmem:[#allocation2 + $0xb8] sm:$0xff] %vm392_vm0, %v13325_v1  ;;  %417 = vst.msk [vmem:[#allocation2 + $0xc8] sm:$0xff] %vm392_vm0, %v13325_v1 }
  0x25   : > { %419 = vst.msk [vmem:[#allocation2 + $0xd8] sm:$0xff] %vm392_vm0, %v13325_v1  ;;  %421 = vst.msk [vmem:[#allocation2 + $0xe8] sm:$0xff] %vm392_vm0, %v13325_v1 }
  0x26   : > { %423 = vst.msk [vmem:[#allocation2 + $0xf8] sm:$0xff] %vm392_vm0, %v13325_v1  ;;  %425 = vst.msk [vmem:[#allocation2 + $0xb08] sm:$0xff] %vm392_vm0, %v13325_v1 }
  0x27   : > { %427 = vst.msk [vmem:[#allocation2 + $0xb18] sm:$0xff] %vm392_vm0, %v13325_v1  ;;  %429 = vst.msk [vmem:[#allocation2 + $0xb28] sm:$0xff] %vm392_vm0, %v13325_v1 }
  0x28   : > { %431 = vst.msk [vmem:[#allocation2 + $0xb38] sm:$0xff] %vm392_vm0, %v13325_v1  ;;  %433 = vst.msk [vmem:[#allocation2 + $0xb48] sm:$0xff] %vm392_vm0, %v13325_v1 }
  0x29   : > { %435 = vst.msk [vmem:[#allocation2 + $0xb58] sm:$0xff] %vm392_vm0, %v13325_v1  ;;  %437 = vst.msk [vmem:[#allocation2 + $0xb68] sm:$0xff] %vm392_vm0, %v13325_v1 }
  0x2a   : > { %439 = vst.msk [vmem:[#allocation2 + $0xb78] sm:$0xff] %vm392_vm0, %v13325_v1  ;;  %441 = vst.msk [vmem:[#allocation2 + $0xb88] sm:$0xff] %vm392_vm0, %v13325_v1 }
  0x2b   : > { %443 = vst.msk [vmem:[#allocation2 + $0xb98] sm:$0xff] %vm392_vm0, %v13325_v1  ;;  %445 = vst.msk [vmem:[#allocation2 + $0xba8] sm:$0xff] %vm392_vm0, %v13325_v1 }
  0x2c   : > { %447 = vst.msk [vmem:[#allocation2 + $0xbb8] sm:$0xff] %vm392_vm0, %v13325_v1  ;;  %449 = vst.msk [vmem:[#allocation2 + $0xbc8] sm:$0xff] %vm392_vm0, %v13325_v1 }
  0x2d   : > { %451 = vst.msk [vmem:[#allocation2 + $0xbd8] sm:$0xff] %vm392_vm0, %v13325_v1  ;;  %453 = vst.msk [vmem:[#allocation2 + $0xbe8] sm:$0xff] %vm392_vm0, %v13325_v1 }
  0x2e   : > { %455 = vst.msk [vmem:[#allocation2 + $0xbf8] sm:$0xff] %vm392_vm0, %v13325_v1  ;;  %17522 = vst [vmem:[#allocation5_spill] sm:$0xff] %v13506_v2 }
  0x2f LB: >> { %v17523_v0 = vld [vmem:[#allocation4_spill] sm:$0xff]  ;;  %vm683_vm1 = vcmask 1043456   ;;  %vm684_vm2 = vcmask 1044480   ;;  %v12368_v5 = vld [vmem:[%s17502_s1 + $0x1c] ss:$12 sps:$4 sm:$0x1f]   ;;  %v510_v48 = vlaneseq  ;;  %s13319_s14 = sphi %s13523_s14, %s463_s14  }
  0x30   : >> { %v12365_v3 = vld [vmem:[%s17502_s1 + $0x4] ss:$12 sps:$4 sm:$0xff]   ;;  %v12367_v4 = vld [vmem:[%s17502_s1] ss:$12 sps:$4 sm:$0xff]   ;;  %v13326_v6 = vmov 65535   ;;  %s10270_s22 = sshll.u32 %s13319_s14, 8 }
  0x31   : >> { %696 = vmatprep.subr.bf16.mxu0 %v12365_v3  ;;  %11789 = vmatprep.subr.bf16.mxu1 %v12365_v3  ;;  %v685_v7 = vsel %vm683_vm1, 4294967295, %v13326_v6  ;;  %v12370_v9 = vld [vmem:[%s17502_s1 + $0x18] ss:$12 sps:$4 sm:$0x1f]   ;;  %s465_s25 = sshra.s32 %s10270_s22, 3  ;;  %v13327_v11 = vmov 0  }
  0x32   : >> { %697 = vmatpush1.bf16.msra.mxu0 %v12367_v4  ;;  %11791 = vmatpush1.bf16.msra.mxu1 %v12367_v4  ;;  %v686_v8 = vsel %vm684_vm2, %v685_v7, 0  ;;  %s10271_s26 = sshll.u32 %s465_s25, 2  ;;  %v12373_v13 = vld [vmem:[%s17502_s1 + $0x8] ss:$12 sps:$4 sm:$0xff]   ;;  %vm634_vm3 = vcmask 203776   ;;  %v13616_v49 = vshrl.u32 %v510_v48, 7 }
  0x33   : >> { %v691_v10 = vand.u32 %v12368_v5, %v686_v8  ;;  %728 = vmatprep.mubr.bf16.mxu0 %v13327_v11  ;;  %848 = vmatprep.mubr.bf16.mxu1 %v13327_v11  ;;  %v688_v12 = vand.u32 %v12370_v9, %v686_v8  ;;  %s13544_s27 = scalar_lea.vmem %s13521_s13, %s10271_s26  ;;  %v12378_v17 = vld [vmem:[%s17502_s1 + $0x20] ss:$12 sps:$4 sm:$0x1f]   ;;  %s11586_s16 = sshll.u32 %s13319_s14, 7 }
  0x34   : >> { %v12371_v14 = vld [vmem:[%s13544_s27] sm:$0xff]   ;;  %v12374_v16 = vld [vmem:[%s13544_s27 + $0x8] sm:$0xff]   ;;  %v694_v19 = vand.u32 %v12378_v17, %v686_v8  ;;  %v12376_v20 = vld [vmem:[%s13544_s27 + $0x10] sm:$0xff]   ;;  %17524 = vst [vmem:[#allocation6_spill] sm:$0xff] %v13616_v49  ;;  %v13635_v58 = vsub.s32 0, %v13616_v49  ;;  %v13638_v59 = vsub.s32 1, %v13616_v49 }
  0x35   : >> { %698 = vmatprep.subr.bf16.mxu0 %v691_v10  ;;  %11790 = vmatprep.subr.bf16.mxu1 %v691_v10  ;;  %v12372_v15 = vld [vmem:[%s13544_s27 + $0x60] sm:$0xff]   ;;  %v12375_v18 = vld [vmem:[%s13544_s27 + $0x68] sm:$0xff]   ;;  %v12377_v21 = vld [vmem:[%s13544_s27 + $0x70] sm:$0xff]   ;;  %s11587_s18 = sadd.s32 256, %s11586_s16  ;;  %s463_s14 = sadd.s32 1, %s13319_s14  }
  0x36   : >> { %699 = vmatpush1.bf16.msra.mxu0 %v688_v12  ;;  %11792 = vmatpush1.bf16.msra.mxu1 %v688_v12  ;;  %v12379_v22 = vld [vmem:[%s13544_s27 + $0x18] sm:$0xff]   ;;  %v12381_v24 = vld [vmem:[%s13544_s27 + $0x20] sm:$0xff]   ;;  %v12382_v25 = vld [vmem:[%s13544_s27 + $0x28] sm:$0xff]   ;;  %17525 = vst [vmem:[#allocation7_spill] sm:$0xff] %v13635_v58  ;;  %v13642_v60 = vrot.slane %v17523_v0, %v13635_v58  ;;  %v13646_v61 = vrot.slane %v17523_v0, %v13638_v59  ;;  %s1228_s19 = sshra.s32 %s11587_s18, 4  ;;  %p460_p5 = scmp.ge.s32.totalorder %s463_s14, 20  }
  0x37   : >> { %11753 = vmatprep.subr.bf16.mxu1 %v12373_v13  ;;  %v12380_v23 = vld [vmem:[%s13544_s27 + $0x78] sm:$0xff]   ;;  %v12383_v26 = vld [vmem:[%s13544_s27 + $0x30] sm:$0xff]   ;;  %v12385_v28 = vld [vmem:[%s13544_s27 + $0x40] sm:$0xff]   ;;  %17526 = vst [vmem:[#allocation8_spill] sm:$0xff] %v13638_v59  ;;  %s13723_s20 = sshll.u32 %s1228_s19, 4  ;;  %s14004_s22 = smov (%p460_p5), 0  }
  0x38   : >> { %v12384_v27 = vld [vmem:[%s13544_s27 + $0x38] sm:$0xff]   ;;  %v12386_v29 = vld [vmem:[%s13544_s27 + $0x48] sm:$0xff]   ;;  %v12387_v30 = vld [vmem:[%s13544_s27 + $0x50] sm:$0xff]   ;;  %s13763_s21 = scalar_lea.vmem [#allocation2], %s13723_s20 }
  0x39   : >> { %10294 = vmatmul.mubr.msk.bf16.vlgmr.msra.gmra.mrb[0].mxu0 %vm634_vm3, %v12371_v14  ;;  %10306 = vmatmul.mubr.msk.bf16.vlgmr.msra.gmra.mrb[0].mxu1 %vm634_vm3, %v12372_v15  ;;  %v12388_v31 = vld [vmem:[%s13544_s27 + $0x58] sm:$0xff]  }
  0x3a   : >> { %11754 = vmatpush3.bf16.msra.mxu1 %v12373_v13  ;;  %738 = vmatprep.mubr.bf16.mxu0 %v13327_v11 }
  0x3b   : >> { %858 = vmatprep.mubr.bf16.mxu1 %v13327_v11  ;;  %11755 = vmatprep.subr.bf16.mxu1 %v694_v19 }
  0x3e   : >> { %11756 = vmatpush3.bf16.msra.mxu1 %v694_v19 }
  0x41   : >> { %10295 = vmatmul.mubr.msk.bf16.gmra.mrb[4].mxu0 %vm634_vm3, %v12374_v16  ;;  %10307 = vmatmul.mubr.msk.bf16.gmra.mrb[4].mxu1 %vm634_vm3, %v12375_v18 }
  0x42   : >> { %748 = vmatprep.mubr.bf16.mxu0 %v13327_v11  ;;  %868 = vmatprep.mubr.bf16.mxu1 %v13327_v11 }
  0x49   : >> { %10296 = vmatmul.mubr.msk.bf16.gmra.mrb[8].mxu0 %vm634_vm3, %v12376_v20  ;;  %10308 = vmatmul.mubr.msk.bf16.gmra.mrb[8].mxu1 %vm634_vm3, %v12377_v21 }
  0x4a   : >> { %758 = vmatprep.mubr.bf16.mxu0 %v13327_v11  ;;  %878 = vmatprep.mubr.bf16.mxu1 %v13327_v11 }
  0x51   : >> { %10297 = vmatmul.mubr.msk.bf16.gmra.mrb[12].mxu0 %vm634_vm3, %v12379_v22  ;;  %10309 = vmatmul.mubr.msk.bf16.gmra.mrb[12].mxu1 %vm634_vm3, %v12380_v23 }
  0x52   : >> { %768 = vmatprep.mubr.bf16.mxu0 %v13327_v11  ;;  %11757 = vmatprep.mubr.msk.bf16.mxu1 %vm634_vm3, %v12371_v14 }
  0x59   : >> { %10298 = vmatmul.mubr.msk.bf16.gmra.mrb[16].mxu0 %vm634_vm3, %v12381_v24  ;;  %11758 = vmatmul.mubr.msk.bf16.vlgmr.msra.gmra.mrb[16].mxu1 %vm634_vm3, %v12374_v16 }
  0x5a   : >> { %778 = vmatprep.mubr.bf16.mxu0 %v13327_v11  ;;  %11761 = vmatprep.mubr.msk.bf16.mxu1 %vm634_vm3, %v12376_v20 }
  0x61   : >> { %10299 = vmatmul.mubr.msk.bf16.gmra.mrb[20].mxu0 %vm634_vm3, %v12382_v25  ;;  %11762 = vmatmul.mubr.msk.bf16.gmra.mrb[20].mxu1 %vm634_vm3, %v12379_v22 }
  0x62   : >> { %788 = vmatprep.mubr.bf16.mxu0 %v13327_v11  ;;  %11765 = vmatprep.mubr.msk.bf16.mxu1 %vm634_vm3, %v12381_v24 }
  0x69   : >> { %10300 = vmatmul.mubr.msk.bf16.gmra.mrb[24].mxu0 %vm634_vm3, %v12383_v26  ;;  %11766 = vmatmul.mubr.msk.bf16.gmra.mrb[24].mxu1 %vm634_vm3, %v12382_v25 }
  0x6a   : >> { %798 = vmatprep.mubr.bf16.mxu0 %v13327_v11  ;;  %11769 = vmatprep.mubr.msk.bf16.mxu1 %vm634_vm3, %v12383_v26 }
  0x71   : >> { %10301 = vmatmul.mubr.msk.bf16.gmra.mrb[28].mxu0 %vm634_vm3, %v12384_v27  ;;  %11770 = vmatmul.mubr.msk.bf16.gmra.mrb[28].mxu1 %vm634_vm3, %v12384_v27 }
  0x72   : >> { %808 = vmatprep.mubr.bf16.mxu0 %v13327_v11  ;;  %11773 = vmatprep.mubr.msk.bf16.mxu1 %vm634_vm3, %v12385_v28 }
  0x79   : >> { %10302 = vmatmul.mubr.msk.bf16.gmra.mrb[32].mxu0 %vm634_vm3, %v12385_v28  ;;  %11774 = vmatmul.mubr.msk.bf16.gmra.mrb[32].mxu1 %vm634_vm3, %v12386_v29 }
  0x7a   : >> { %818 = vmatprep.mubr.bf16.mxu0 %v13327_v11  ;;  %11777 = vmatprep.mubr.msk.bf16.mxu1 %vm634_vm3, %v12387_v30 }
  0x81   : >> { %10303 = vmatmul.mubr.msk.bf16.gmra.mrb[36].mxu0 %vm634_vm3, %v12386_v29  ;;  %11778 = vmatmul.mubr.msk.bf16.gmra.mrb[36].mxu1 %vm634_vm3, %v12388_v31 }
  0x82   : >> { %828 = vmatprep.mubr.bf16.mxu0 %v13327_v11  ;;  %11781 = vmatprep.mubr.msk.bf16.mxu1 %vm634_vm3, %v12372_v15 }
  0x89   : >> { %10304 = vmatmul.mubr.msk.bf16.gmra.mrb[40].mxu0 %vm634_vm3, %v12387_v30  ;;  %11782 = vmatmul.mubr.msk.bf16.gmra.mrb[40].mxu1 %vm634_vm3, %v12375_v18 }
  0x8a   : >> { %838 = vmatprep.mubr.bf16.mxu0 %v13327_v11  ;;  %11785 = vmatprep.mubr.msk.bf16.mxu1 %vm634_vm3, %v12377_v21  ;;  %v13672_v11 = vsub.s32 2, %v13616_v49 }
  0x8c   : >> { %17527 = vst [vmem:[#allocation9_spill] sm:$0xff] %v13672_v11  ;;  %v13684_v19 = vrot.slane %v17523_v0, %v13672_v11 }
  0x91   : >> { %10305 = vmatmul.mubr.msk.bf16.gmra.mrb[44].mxu0 %vm634_vm3, %v12388_v31  ;;  %11786 = vmatmul.mubr.msk.bf16.gmra.mrb[44].mxu1 %vm634_vm3, %v12380_v23 }
 0x10c   : >> { %v730_v32 = vpop.f32.mrb[0].mxu0  ;;  %v850_v33 = vpop.f32.mrb[0].mxu1 }
 0x10d   : >> { %v732_v34 = vpop.f32.mrb[1].mxu0  ;;  %v852_v35 = vpop.f32.mrb[1].mxu1  ;;  %v13665_v8 = vadd.f32 %v730_v32, %v13642_v60  ;;  %v851_v9 = vadd.f32 %v850_v33, %v13642_v60 }
 0x10e   : >> { %v734_v36 = vpop.f32.mrb[2].mxu0  ;;  %v854_v37 = vpop.f32.mrb[2].mxu1  ;;  %v13669_v10 = vadd.f32 %v732_v34, %v13646_v61  ;;  %v853_v12 = vadd.f32 %v852_v35, %v13646_v61 }
 0x10f   : >> { %v736_v38 = vpop.f32.mrb[3].mxu0  ;;  %v856_v39 = vpop.f32.mrb[3].mxu1  ;;  %v13676_v13 = vadd.f32 %v734_v36, %v13642_v60  ;;  %v855_v14 = vadd.f32 %v854_v37, %v13642_v60  ;;  %v1122_v16 = vmax.f32 %v851_v9, 0.0 }
 0x110   : >> { %v1123_v21 = vmax.f32 %v853_v12, 0.0  ;;  %v13689_v22 = vadd.f32 %v736_v38, %v13646_v61  ;;  %v857_v23 = vadd.f32 %v856_v39, %v13646_v61 }
 0x111   : >> { %v1125_v28 = vmax.f32 %v855_v14, 0.0 }
 0x114   : >> { %v740_v40 = vpop.f32.mrb[4].mxu0  ;;  %v860_v41 = vpop.f32.mrb[4].mxu1 }
 0x115   : >> { %v742_v42 = vpop.f32.mrb[5].mxu0  ;;  %v862_v43 = vpop.f32.mrb[5].mxu1  ;;  %v13697_v29 = vadd.f32 %v740_v40, %v13642_v60  ;;  %v861_v33 = vadd.f32 %v860_v41, %v13642_v60 }
 0x116   : >> { %v744_v44 = vpop.f32.mrb[6].mxu0  ;;  %v864_v45 = vpop.f32.mrb[6].mxu1  ;;  %v13704_v34 = vadd.f32 %v742_v42, %v13646_v61  ;;  %v863_v39 = vadd.f32 %v862_v43, %v13646_v61 }
 0x117   : >> { %v746_v46 = vpop.f32.mrb[7].mxu0  ;;  %v13614_v47 = vpop.f32.mrb[7].mxu1  ;;  %v13711_v40 = vadd.f32 %v744_v44, %v13642_v60  ;;  %v865_v12 = vadd.f32 %v864_v45, %v13642_v60  ;;  %v1128_v44 = vmax.f32 %v861_v33, 0.0 }
 0x118   : >> { %v13716_v41 = vadd.f32 %v746_v46, %v13646_v61  ;;  %v867_v45 = vadd.f32 %v13614_v47, %v13646_v61 }
 0x11c   : >> { %v13618_v50 = vpop.f32.mrb[8].mxu0  ;;  %v13620_v51 = vpop.f32.mrb[8].mxu1 }
 0x11d   : >> { %v13622_v52 = vpop.f32.mrb[9].mxu0  ;;  %v13624_v53 = vpop.f32.mrb[9].mxu1  ;;  %v13734_v47 = vadd.f32 %v13618_v50, %v13642_v60 }
 0x11e   : >> { %v13626_v54 = vpop.f32.mrb[10].mxu0  ;;  %v13628_v55 = vpop.f32.mrb[10].mxu1 }
 0x11f   : >> { %v13630_v56 = vpop.f32.mrb[11].mxu0  ;;  %v13632_v57 = vpop.f32.mrb[11].mxu1 }
 0x124   : >> { %v13648_v62 = vpop.f32.mrb[12].mxu0  ;;  %v13650_v63 = vpop.f32.mrb[12].mxu1 }
 0x125   : >> { %v13652_v1 = vpop.f32.mrb[13].mxu0  ;;  %v13654_v3 = vpop.f32.mrb[13].mxu1 }
 0x126   : >> { %v13656_v4 = vpop.f32.mrb[14].mxu0  ;;  %v13658_v5 = vpop.f32.mrb[14].mxu1 }
 0x127   : >> { %v13660_v6 = vpop.f32.mrb[15].mxu0  ;;  %v13662_v7 = vpop.f32.mrb[15].mxu1 }
 0x128   : >> { %v13806_v0 = vadd.f32 %v13660_v6, %v13646_v61 }
 0x12c   : >> { %v770_v18 = vpop.f32.mrb[16].mxu0  ;;  %v13686_v20 = vpop.f32.mrb[16].mxu1 }
 0x12d   : >> { %v771_v24 = vadd.f32 %v770_v18, %v13642_v60  ;;  %v772_v25 = vpop.f32.mrb[17].mxu0  ;;  %v13693_v26 = vpop.f32.mrb[17].mxu1 }
 0x12e   : >> { %v773_v30 = vadd.f32 %v772_v25, %v13646_v61  ;;  %v774_v31 = vpop.f32.mrb[18].mxu0  ;;  %v13700_v32 = vpop.f32.mrb[18].mxu1  ;;  %v13819_v6 = vadd.f32 %v13693_v26, %v13684_v19 }
 0x12f   : >> { %v1074_v35 = vmax.f32 %v771_v24, 0.0  ;;  %v775_v36 = vadd.f32 %v774_v31, %v13642_v60  ;;  %v776_v37 = vpop.f32.mrb[19].mxu0  ;;  %v13707_v38 = vpop.f32.mrb[19].mxu1  ;;  %v1126_v24 = vmax.f32 %v857_v23, 0.0  ;;  %v1131_v23 = vmax.f32 %v865_v12, 0.0 }
 0x130   : >> { %v1075_v48 = vmax.f32 %v773_v30, 0.0  ;;  %v777_v9 = vadd.f32 %v776_v37, %v13646_v61  ;;  %v1129_v37 = vmax.f32 %v863_v39, 0.0  ;;  %v871_v39 = vadd.f32 %v13620_v51, %v13642_v60 }
 0x131   : >> { %v1170_v42 = vmax.f32 %v1074_v35, %v1122_v16  ;;  %v1077_v14 = vmax.f32 %v775_v36, 0.0  ;;  %v13743_v12 = vadd.f32 %v13622_v52, %v13646_v61  ;;  %v13752_v51 = vadd.f32 %v13626_v54, %v13642_v60 }
 0x132   : >> { %v1171_v25 = vmax.f32 %v1075_v48, %v1123_v21  ;;  %v1078_v31 = vmax.f32 %v777_v9, 0.0  ;;  %v875_v52 = vadd.f32 %v13628_v55, %v13642_v60  ;;  %v1132_v21 = vmax.f32 %v867_v45, 0.0 }
 0x133   : >> { %v1173_v27 = vmax.f32 %v1077_v14, %v1125_v28 }
 0x134   : >> { %v1202_v46 = vmax.f32 %v1170_v42, %v1171_v25  ;;  %v1174_v17 = vmax.f32 %v1078_v31, %v1126_v24  ;;  %v780_v16 = vpop.f32.mrb[20].mxu0  ;;  %v13725_v35 = vpop.f32.mrb[20].mxu1  ;;  %v873_v25 = vadd.f32 %v13624_v53, %v13646_v61  ;;  %v13759_v53 = vadd.f32 %v13630_v56, %v13646_v61 }
 0x135   : >> { %v781_v33 = vadd.f32 %v780_v16, %v13642_v60  ;;  %v782_v48 = vpop.f32.mrb[21].mxu0  ;;  %v13730_v28 = vpop.f32.mrb[21].mxu1  ;;  %v877_v56 = vadd.f32 %v13632_v57, %v13646_v61  ;;  %v1137_v30 = vmax.f32 %v875_v52, 0.0  ;;  %v881_v57 = vadd.f32 %v13650_v63, %v13642_v60 }
 0x136   : >> { %v1203_v9 = vmax.f32 %v1173_v27, %v1174_v17  ;;  %v783_v42 = vadd.f32 %v782_v48, %v13646_v61  ;;  %v784_v14 = vpop.f32.mrb[22].mxu0  ;;  %v13739_v24 = vpop.f32.mrb[22].mxu1 }
 0x137   : >> { %v1080_v31 = vmax.f32 %v781_v33, 0.0  ;;  %v785_v50 = vadd.f32 %v784_v14, %v13642_v60  ;;  %v786_v16 = vpop.f32.mrb[23].mxu0  ;;  %v13748_v36 = vpop.f32.mrb[23].mxu1 }
 0x138   : >> { %v1220_v17 = vpack.c.bf16 %v1203_v9, %v1202_v46  ;;  %v1081_v27 = vmax.f32 %v783_v42, 0.0  ;;  %v787_v48 = vadd.f32 %v786_v16, %v13646_v61  ;;  %v1134_v9 = vmax.f32 %v871_v39, 0.0 }
 0x139   : >> { %v1176_v33 = vmax.f32 %v1080_v31, %v1128_v44  ;;  %v1083_v14 = vmax.f32 %v785_v50, 0.0  ;;  %v1135_v16 = vmax.f32 %v873_v25, 0.0 }
 0x13a   : >> { %1241 = vst [vmem:[%s13763_s21 + $0x40] sm:$0xff] %v1220_v17  ;;  %v1177_v54 = vmax.f32 %v1081_v27, %v1129_v37  ;;  %v1084_v46 = vmax.f32 %v787_v48, 0.0  ;;  %v13775_v37 = vadd.f32 %v13648_v62, %v13642_v60  ;;  %v883_v62 = vadd.f32 %v13654_v3, %v13646_v61 }
 0x13b   : >> { %v1179_v55 = vmax.f32 %v1083_v14, %v1131_v23  ;;  %v13793_v14 = vadd.f32 %v13656_v4, %v13642_v60  ;;  %v1138_v17 = vmax.f32 %v877_v56, 0.0  ;;  %v1140_v4 = vmax.f32 %v881_v57, 0.0 }
 0x13c   : >> { %v1204_v44 = vmax.f32 %v1176_v33, %v1177_v54  ;;  %v1180_v45 = vmax.f32 %v1084_v46, %v1132_v21  ;;  %v790_v31 = vpop.f32.mrb[24].mxu0  ;;  %v13770_v50 = vpop.f32.mrb[24].mxu1  ;;  %v13784_v21 = vadd.f32 %v13652_v1, %v13646_v61  ;;  %v1141_v15 = vmax.f32 %v883_v62, 0.0 }
 0x13d   : >> { %v791_v39 = vadd.f32 %v790_v31, %v13642_v60  ;;  %v792_v23 = vpop.f32.mrb[25].mxu0  ;;  %v13778_v25 = vpop.f32.mrb[25].mxu1 }
 0x13e   : >> { %v1205_v27 = vmax.f32 %v1179_v55, %v1180_v45  ;;  %v793_v48 = vadd.f32 %v792_v23, %v13646_v61  ;;  %v794_v52 = vpop.f32.mrb[26].mxu0  ;;  %v13787_v33 = vpop.f32.mrb[26].mxu1  ;;  %v885_v55 = vadd.f32 %v13658_v5, %v13642_v60  ;;  %v887_v5 = vadd.f32 %v13662_v7, %v13646_v61 }
 0x13f   : >> { %v1086_v54 = vmax.f32 %v791_v39, 0.0  ;;  %v795_v63 = vadd.f32 %v794_v52, %v13642_v60  ;;  %v796_v46 = vpop.f32.mrb[27].mxu0  ;;  %v13796_v1 = vpop.f32.mrb[27].mxu1  ;;  %v13823_v7 = vadd.f32 %v13700_v32, %v13684_v19  ;;  %v13841_v32 = vadd.f32 %v13730_v28, %v13684_v19 }
 0x140   : >> { %v1222_v45 = vpack.c.bf16 %v1205_v27, %v1204_v44  ;;  %v1087_v31 = vmax.f32 %v793_v48, 0.0  ;;  %v797_v23 = vadd.f32 %v796_v46, %v13646_v61  ;;  %v1143_v27 = vmax.f32 %v885_v55, 0.0 }
 0x141   : >> { %v1182_v43 = vmax.f32 %v1086_v54, %v1134_v9  ;;  %v1089_v42 = vmax.f32 %v795_v63, 0.0  ;;  %v13845_v46 = vadd.f32 %v13739_v24, %v13684_v19 }
 0x142   : >> { %1243 = vst [vmem:[%s13763_s21 + $0x50] sm:$0xff] %v1222_v45  ;;  %v1183_v52 = vmax.f32 %v1087_v31, %v1135_v16  ;;  %v1090_v18 = vmax.f32 %v797_v23, 0.0  ;;  %v13815_v16 = vadd.f32 %v13686_v20, %v13684_v19  ;;  %v13834_v20 = vadd.f32 %v13725_v35, %v13684_v19 }
 0x143   : >> { %v1185_v44 = vmax.f32 %v1089_v42, %v1137_v30  ;;  %v13852_v31 = vadd.f32 %v13748_v36, %v13684_v19 }
 0x144   : >> { %v1206_v9 = vmax.f32 %v1182_v43, %v1183_v52  ;;  %v1186_v48 = vmax.f32 %v1090_v18, %v1138_v17  ;;  %v800_v57 = vpop.f32.mrb[28].mxu0  ;;  %v13811_v54 = vpop.f32.mrb[28].mxu1  ;;  %v13830_v18 = vadd.f32 %v13707_v38, %v13684_v19 }
 0x145   : >> { %v801_v30 = vadd.f32 %v800_v57, %v13642_v60  ;;  %v802_v42 = vpop.f32.mrb[29].mxu0  ;;  %v13826_v43 = vpop.f32.mrb[29].mxu1 }
 0x146   : >> { %v1207_v17 = vmax.f32 %v1185_v44, %v1186_v48  ;;  %v803_v26 = vadd.f32 %v802_v42, %v13646_v61  ;;  %v804_v62 = vpop.f32.mrb[30].mxu0  ;;  %v13837_v63 = vpop.f32.mrb[30].mxu1  ;;  %v1144_v44 = vmax.f32 %v887_v5, 0.0  ;;  %v1058_v48 = vmax.f32 %v13815_v16, 0.0 }
 0x147   : >> { %v1092_v38 = vmax.f32 %v801_v30, 0.0  ;;  %v805_v55 = vadd.f32 %v804_v62, %v13642_v60  ;;  %v806_v35 = vpop.f32.mrb[31].mxu0  ;;  %v13848_v45 = vpop.f32.mrb[31].mxu1  ;;  %v1052_v30 = vmax.f32 %v13819_v6, 0.0  ;;  %v1061_v42 = vmax.f32 %v13823_v7, 0.0 }
 0x148   : >> { %v1224_v23 = vpack.c.bf16 %v1207_v17, %v1206_v9  ;;  %v1093_v52 = vmax.f32 %v803_v26, 0.0  ;;  %v807_v28 = vadd.f32 %v806_v35, %v13646_v61  ;;  %v1055_v39 = vmax.f32 %v13830_v18, 0.0 }
 0x149   : >> { %v1188_v57 = vmax.f32 %v1092_v38, %v1140_v4  ;;  %v1095_v24 = vmax.f32 %v805_v55, 0.0  ;;  %v13866_v7 = vadd.f32 %v13770_v50, %v13684_v19 }
 0x14a   : >> { %1245 = vst [vmem:[%s13763_s21 + $0x60] sm:$0xff] %v1224_v23  ;;  %v1189_v62 = vmax.f32 %v1093_v52, %v1141_v15  ;;  %v1096_v56 = vmax.f32 %v807_v28, 0.0  ;;  %v13870_v15 = vadd.f32 %v13778_v25, %v13684_v19  ;;  %v13876_v23 = vadd.f32 %v13787_v33, %v13684_v19 }
 0x14b   : >> { %v1191_v17 = vmax.f32 %v1095_v24, %v1143_v27 }
 0x14c   : >> { %v1208_v4 = vmax.f32 %v1188_v57, %v1189_v62  ;;  %v1192_v26 = vmax.f32 %v1096_v56, %v1144_v44  ;;  %v810_v38 = vpop.f32.mrb[32].mxu0  ;;  %v11775_v6 = vpop.f32.mrb[32].mxu1 }
 0x14d   : >> { %v811_v18 = vadd.f32 %v810_v38, %v13642_v60  ;;  %v996_v27 = vadd.f32 %v11775_v6, %v13684_v19  ;;  %v812_v55 = vpop.f32.mrb[33].mxu0  ;;  %v987_v35 = vpop.f32.mrb[33].mxu1 }
 0x14e   : >> { %v1209_v56 = vmax.f32 %v1191_v17, %v1192_v26  ;;  %v813_v52 = vadd.f32 %v812_v55, %v13646_v61  ;;  %v988_v50 = vadd.f32 %v987_v35, %v13684_v19  ;;  %v814_v28 = vpop.f32.mrb[34].mxu0  ;;  %v11776_v44 = vpop.f32.mrb[34].mxu1  ;;  %v17528_v26 = vmax.f32 %v13665_v8, 0.0 }
 0x14f   : >> { %v1098_v25 = vmax.f32 %v811_v18, 0.0  ;;  %v1106_v57 = vmax.f32 %v996_v27, 0.0  ;;  %v815_v24 = vadd.f32 %v814_v28, %v13642_v60  ;;  %v999_v62 = vadd.f32 %v11776_v44, %v13684_v19  ;;  %v816_v38 = vpop.f32.mrb[35].mxu0  ;;  %v990_v6 = vpop.f32.mrb[35].mxu1 }
 0x150   : >> { %v1226_v3 = vpack.c.bf16 %v1209_v56, %v1208_v4  ;;  %v1099_v16 = vmax.f32 %v813_v52, 0.0  ;;  %v1100_v33 = vmax.f32 %v988_v50, 0.0  ;;  %v817_v17 = vadd.f32 %v816_v38, %v13646_v61 }
 0x151   : >> { %v1146_v55 = vmax.f32 %v17528_v26, %v1098_v25  ;;  %v1154_v35 = vmax.f32 %v1058_v48, %v1106_v57  ;;  %v1101_v5 = vmax.f32 %v815_v24, 0.0  ;;  %v1109_v9 = vmax.f32 %v999_v62, 0.0 }
 0x152   : >> { %1247 = vst [vmem:[%s13763_s21 + $0x70] sm:$0xff] %v1226_v3  ;;  %v17529_v18 = vmax.f32 %v13669_v10, 0.0  ;;  %v1148_v28 = vmax.f32 %v1052_v30, %v1100_v33  ;;  %v1102_v36 = vmax.f32 %v817_v17, 0.0  ;;  %v991_v44 = vadd.f32 %v990_v6, %v13684_v19 }
 0x153   : >> { %v1082_v4 = vmax.f32 %v13866_v7, 0.0  ;;  %v1076_v56 = vmax.f32 %v13870_v15, 0.0  ;;  %v17530_v52 = vmax.f32 %v13676_v13, 0.0  ;;  %v1157_v8 = vmax.f32 %v1061_v42, %v1109_v9 }
 0x154   : >> { %v1147_v27 = vmax.f32 %v17529_v18, %v1099_v16  ;;  %v1085_v48 = vmax.f32 %v13876_v23, 0.0  ;;  %v17531_v3 = vmax.f32 %v13689_v22, 0.0  ;;  %v1103_v10 = vmax.f32 %v991_v44, 0.0  ;;  %v820_v30 = vpop.f32.mrb[36].mxu0  ;;  %v11779_v16 = vpop.f32.mrb[36].mxu1 }
 0x155   : >> { %v1149_v50 = vmax.f32 %v17530_v52, %v1101_v5  ;;  %v13898_v24 = vadd.f32 %v13796_v1, %v13684_v19  ;;  %v1215_v62 = vpack.c.bf16 %v1157_v8, %v1154_v35  ;;  %v821_v38 = vadd.f32 %v820_v30, %v13642_v60  ;;  %v822_v42 = vpop.f32.mrb[37].mxu0  ;;  %v1003_v9 = vpop.f32.mrb[37].mxu1 }
 0x156   : >> { %v1194_v25 = vmax.f32 %v1146_v55, %v1147_v27  ;;  %v1150_v57 = vmax.f32 %v17531_v3, %v1102_v36  ;;  %v1012_v13 = vadd.f32 %v11779_v16, %v13684_v19  ;;  %v1151_v6 = vmax.f32 %v1055_v39, %v1103_v10  ;;  %v824_v33 = vpop.f32.mrb[38].mxu0  ;;  %v11780_v17 = vpop.f32.mrb[38].mxu1 }
 0x157   : >> { %v823_v22 = vadd.f32 %v822_v42, %v13646_v61  ;;  %v1004_v36 = vadd.f32 %v1003_v9, %v13684_v19  ;;  %1236 = vst.msk [vmem:[%s13763_s21 + $0x18] sm:$0xff] %vm392_vm0, %v1215_v62  ;;  %v1104_v1 = vmax.f32 %v821_v38, 0.0  ;;  %v825_v55 = vadd.f32 %v824_v33, %v13642_v60  ;;  %v826_v18 = vpop.f32.mrb[39].mxu0  ;;  %v1006_v27 = vpop.f32.mrb[39].mxu1 }
 0x158   : >> { %v1195_v5 = vmax.f32 %v1149_v50, %v1150_v57  ;;  %v1118_v26 = vmax.f32 %v1012_v13, 0.0  ;;  %v1015_v35 = vadd.f32 %v11780_v17, %v13684_v19  ;;  %v1213_v39 = vpack.c.bf16 %v1151_v6, %v1148_v28 }
 0x159   : >> { %v1105_v52 = vmax.f32 %v823_v22, 0.0  ;;  %v1112_v50 = vmax.f32 %v1004_v36, 0.0  ;;  %v17532_v8 = vmax.f32 %v13697_v29, 0.0  ;;  %v17533_v57 = vmax.f32 %v13834_v20, 0.0 }
 0x15a   : >> { %v1212_v44 = vpack.c.bf16 %v1195_v5, %v1194_v25  ;;  %v1107_v30 = vmax.f32 %v825_v55, 0.0  ;;  %v1121_v16 = vmax.f32 %v1015_v35, 0.0  ;;  %1234 = vst.msk [vmem:[%s13763_s21 + $0x8] sm:$0xff] %vm392_vm0, %v1213_v39  ;;  %v17534_v62 = vmax.f32 %v13704_v34, 0.0 }
 0x15b   : >> { %v1152_v3 = vmax.f32 %v17532_v8, %v1104_v1  ;;  %v1166_v10 = vmax.f32 %v17533_v57, %v1118_v26  ;;  %v17535_v13 = vmax.f32 %v13841_v32, 0.0  ;;  %v827_v28 = vadd.f32 %v826_v18, %v13646_v61 }
 0x15c   : >> { %1233 = vst [vmem:[%s13763_s21] sm:$0xff] %v1212_v44  ;;  %v1153_v38 = vmax.f32 %v17534_v62, %v1105_v52  ;;  %v1007_v42 = vadd.f32 %v1006_v27, %v13684_v19  ;;  %v1079_v29 = vmax.f32 %v13898_v24, 0.0  ;;  %v13924_v20 = vadd.f32 %v13811_v54, %v13684_v19  ;;  %v830_v17 = vpop.f32.mrb[40].mxu0  ;;  %v11783_v1 = vpop.f32.mrb[40].mxu1 }
 0x15d   : >> { %v1160_v25 = vmax.f32 %v17535_v13, %v1112_v50  ;;  %v17536_v9 = vmax.f32 %v13711_v40, 0.0  ;;  %v17537_v6 = vmax.f32 %v13845_v46, 0.0  ;;  %v13932_v32 = vadd.f32 %v13826_v43, %v13684_v19  ;;  %v832_v55 = vpop.f32.mrb[41].mxu0  ;;  %v1019_v35 = vpop.f32.mrb[41].mxu1 }
 0x15e   : >> { %v1196_v22 = vmax.f32 %v1152_v3, %v1153_v38  ;;  %v1108_v36 = vmax.f32 %v827_v28, 0.0  ;;  %v1115_v33 = vmax.f32 %v1007_v42, 0.0  ;;  %v13936_v54 = vadd.f32 %v13837_v63, %v13684_v19  ;;  %v834_v50 = vpop.f32.mrb[42].mxu0  ;;  %v11784_v63 = vpop.f32.mrb[42].mxu1 }
 0x15f   : >> { %v1155_v5 = vmax.f32 %v17536_v9, %v1107_v30  ;;  %v1169_v34 = vmax.f32 %v17537_v6, %v1121_v16  ;;  %v831_v40 = vadd.f32 %v830_v17, %v13642_v60  ;;  %v1028_v46 = vadd.f32 %v11783_v1, %v13684_v19  ;;  %v1022_v30 = vpop.f32.mrb[43].mxu1 }
 0x160   : >> { %v17538_v43 = vmax.f32 %v13716_v41, 0.0  ;;  %v17539_v27 = vmax.f32 %v13852_v31, 0.0  ;;  %v833_v39 = vadd.f32 %v832_v55, %v13646_v61  ;;  %v1020_v52 = vadd.f32 %v1019_v35, %v13684_v19  ;;  %v836_v41 = vpop.f32.mrb[43].mxu0 }
 0x161   : >> { %v1219_v26 = vpack.c.bf16 %v1169_v34, %v1166_v10  ;;  %v1110_v8 = vmax.f32 %v831_v40, 0.0  ;;  %v1130_v3 = vmax.f32 %v1028_v46, 0.0  ;;  %v835_v57 = vadd.f32 %v834_v50, %v13642_v60 }
 0x162   : >> { %v1156_v18 = vmax.f32 %v17538_v43, %v1108_v36  ;;  %v1163_v44 = vmax.f32 %v17539_v27, %v1115_v33  ;;  %v1031_v10 = vadd.f32 %v11784_v63, %v13684_v19  ;;  %v1111_v62 = vmax.f32 %v833_v39, 0.0 }
 0x163   : >> { %1240 = vst.msk [vmem:[%s13763_s21 + $0x38] sm:$0xff] %vm392_vm0, %v1219_v26  ;;  %v1124_v38 = vmax.f32 %v1020_v52, 0.0  ;;  %v17540_v13 = vmax.f32 %v13734_v47, 0.0  ;;  %v1178_v42 = vmax.f32 %v1082_v4, %v1130_v3  ;;  %v1113_v9 = vmax.f32 %v835_v57, 0.0 }
 0x164   : >> { %v1197_v16 = vmax.f32 %v1155_v5, %v1156_v18  ;;  %v1217_v31 = vpack.c.bf16 %v1163_v44, %v1160_v25  ;;  %v1133_v6 = vmax.f32 %v1031_v10, 0.0  ;;  %v17541_v36 = vmax.f32 %v13743_v12, 0.0  ;;  %v11787_v40 = vpop.f32.mrb[44].mxu1 }
 0x165   : >> { %v1158_v28 = vmax.f32 %v17540_v13, %v1110_v8  ;;  %v1172_v25 = vmax.f32 %v1076_v56, %v1124_v38  ;;  %v837_v5 = vadd.f32 %v836_v41, %v13646_v61  ;;  %v1094_v47 = vmax.f32 %v13924_v20, 0.0  ;;  %v840_v56 = vpop.f32.mrb[44].mxu0 }
 0x166   : >> { %v1214_v34 = vpack.c.bf16 %v1197_v16, %v1196_v22  ;;  %1238 = vst.msk [vmem:[%s13763_s21 + $0x28] sm:$0xff] %vm392_vm0, %v1217_v31  ;;  %v1159_v33 = vmax.f32 %v17541_v36, %v1111_v62  ;;  %v17542_v17 = vmax.f32 %v13752_v51, 0.0  ;;  %v1181_v7 = vmax.f32 %v1085_v48, %v1133_v6  ;;  %v842_v23 = vpop.f32.mrb[45].mxu0  ;;  %v1035_v48 = vpop.f32.mrb[45].mxu1 }
 0x167   : >> { %v1023_v4 = vadd.f32 %v1022_v30, %v13684_v19  ;;  %v1088_v22 = vmax.f32 %v13932_v32, 0.0  ;;  %v1097_v12 = vmax.f32 %v13936_v54, 0.0  ;;  %v1114_v15 = vmax.f32 %v837_v5, 0.0  ;;  %v844_v27 = vpop.f32.mrb[46].mxu0  ;;  %v11788_v44 = vpop.f32.mrb[46].mxu1 }
 0x168   : >> { %v1161_v1 = vmax.f32 %v17542_v17, %v1113_v9  ;;  %1235 = vst [vmem:[%s13763_s21 + $0x10] sm:$0xff] %v1214_v34  ;;  %v1198_v26 = vmax.f32 %v1158_v28, %v1159_v33  ;;  %v1223_v46 = vpack.c.bf16 %v1181_v7, %v1178_v42  ;;  %v841_v51 = vadd.f32 %v840_v56, %v13642_v60  ;;  %v1038_v8 = vpop.f32.mrb[47].mxu1 }
 0x169   : >> { %v1127_v20 = vmax.f32 %v1023_v4, 0.0  ;;  %v1044_v55 = vadd.f32 %v11787_v40, %v13684_v19  ;;  %v975_v35 = vadd.f32 %v13848_v45, %v13684_v19  ;;  %v17543_v32 = vmax.f32 %v13759_v53, 0.0  ;;  %v846_v45 = vpop.f32.mrb[47].mxu0 }
 0x16a   : >> { %v843_v43 = vadd.f32 %v842_v23, %v13646_v61  ;;  %v1036_v18 = vadd.f32 %v1035_v48, %v13684_v19  ;;  %1244 = vst.msk [vmem:[%s13763_s21 + $0x58] sm:$0xff] %vm392_vm0, %v1223_v46  ;;  %v1116_v52 = vmax.f32 %v841_v51, 0.0  ;;  %v845_v63 = vadd.f32 %v844_v27, %v13642_v60 }
 0x16b   : >> { %v1162_v54 = vmax.f32 %v17543_v32, %v1114_v15  ;;  %v1175_v39 = vmax.f32 %v1079_v29, %v1127_v20  ;;  %v1142_v50 = vmax.f32 %v1044_v55, 0.0  ;;  %v1047_v10 = vadd.f32 %v11788_v44, %v13684_v19 }
 0x16c   : >> { %v1117_v3 = vmax.f32 %v843_v43, 0.0  ;;  %v1136_v57 = vmax.f32 %v1036_v18, 0.0  ;;  %v17544_v30 = vmax.f32 %v13775_v37, 0.0  ;;  %v1119_v24 = vmax.f32 %v845_v63, 0.0 }
 0x16d   : >> { %v1199_v53 = vmax.f32 %v1161_v1, %v1162_v54  ;;  %v1221_v41 = vpack.c.bf16 %v1175_v39, %v1172_v25  ;;  %v1190_v31 = vmax.f32 %v1094_v47, %v1142_v50  ;;  %v17545_v62 = vmax.f32 %v13784_v21, 0.0 }
 0x16e   : >> { %v1164_v16 = vmax.f32 %v17544_v30, %v1116_v52  ;;  %v1184_v13 = vmax.f32 %v1088_v22, %v1136_v57  ;;  %v1145_v60 = vmax.f32 %v1047_v10, 0.0  ;;  %v17546_v28 = vmax.f32 %v13793_v14, 0.0 }
 0x16f   : >> { %v1216_v29 = vpack.c.bf16 %v1199_v53, %v1198_v26  ;;  %v1165_v38 = vmax.f32 %v17545_v62, %v1117_v3  ;;  %1242 = vst.msk [vmem:[%s13763_s21 + $0x48] sm:$0xff] %vm392_vm0, %v1221_v41  ;;  %v847_v9 = vadd.f32 %v846_v45, %v13646_v61  ;;  %v1039_v37 = vadd.f32 %v1038_v8, %v13684_v19 }
 0x170   : >> { %v1167_v42 = vmax.f32 %v17546_v28, %v1119_v24  ;;  %v1193_v34 = vmax.f32 %v1097_v12, %v1145_v60  ;;  %v1072_v21 = vmax.f32 %v13806_v0, 0.0  ;;  %v1091_v36 = vmax.f32 %v975_v35, 0.0 }
 0x171   : >> { %1237 = vst [vmem:[%s13763_s21 + $0x20] sm:$0xff] %v1216_v29  ;;  %v1200_v6 = vmax.f32 %v1164_v16, %v1165_v38  ;;  %v1120_v33 = vmax.f32 %v847_v9, 0.0  ;;  %v1139_v25 = vmax.f32 %v1039_v37, 0.0 }
 0x172   : >> { %v1227_v5 = vpack.c.bf16 %v1193_v34, %v1190_v31 }
 0x173   : >> { %v1168_v47 = vmax.f32 %v1072_v21, %v1120_v33  ;;  %v1187_v17 = vmax.f32 %v1091_v36, %v1139_v25  ;;  %462 = sbr.rel (!%p460_p5) target bundleno = 47 (0x2f), region = 138 }
 0x174   : >> { %1248 = vst.msk [vmem:[%s13763_s21 + $0x78] sm:$0xff] %vm392_vm0, %v1227_v5 }
 0x175   : >> { %v1201_v14 = vmax.f32 %v1167_v42, %v1168_v47  ;;  %v1225_v1 = vpack.c.bf16 %v1187_v17, %v1184_v13 }
 0x177   : >> { %v1218_v61 = vpack.c.bf16 %v1201_v14, %v1200_v6  ;;  %1246 = vst.msk [vmem:[%s13763_s21 + $0x68] sm:$0xff] %vm392_vm0, %v1225_v1 }
 0x179   : >> { %1239 = vst [vmem:[%s13763_s21 + $0x30] sm:$0xff] %v1218_v61 }
 0x17a LB: >> { %v17547_v2 = vld [vmem:[#allocation5_spill] sm:$0xff]  ;;  %v12389_v0 = vld [vmem:[%s17504_s3 + $0x124] ss:$12 sps:$4 sm:$0xff]   ;;  %v13328_v19 = vmov 0   ;;  %v12397_v15 = vld [vmem:[%s17504_s3 + $0x154] ss:$12 sps:$4 sm:$0xff]   ;;  %s13323_s22 = sphi %s14004_s22, %s1254_s22  }
 0x17b   : >> { %1863 = vmatprep.subr.bf16.mxu1 %v13328_v19  ;;  %v12391_v7 = vld [vmem:[%s17504_s3 + $0x128] ss:$12 sps:$4 sm:$0xff]   ;;  %1670 = vmatprep.subr.bf16.mxu0 %v12389_v0  ;;  %v12392_v4 = vld [vmem:[%s17504_s3 + $0x120] ss:$12 sps:$4 sm:$0xff]   ;;  %v12396_v26 = vld [vmem:[%s17504_s3 + $0x138] ss:$12 sps:$4 sm:$0xff]  }
 0x17c   : >> { %1864 = vmatpush1.bf16.msra.mxu1 %v12391_v7  ;;  %v12393_v22 = vld [vmem:[%s17504_s3 + $0x13c] ss:$12 sps:$4 sm:$0xff]   ;;  %1671 = vmatpush1.bf16.msra.mxu0 %v12392_v4  ;;  %v12395_v12 = vld [vmem:[%s17504_s3 + $0x140] ss:$12 sps:$4 sm:$0xff]   ;;  %v12399_v56 = vld [vmem:[%s17504_s3 + $0x158] ss:$12 sps:$4 sm:$0xff]  }
 0x17d   : >> { %1865 = vmatprep.subr.bf16.mxu1 %v13328_v19  ;;  %1672 = vmatprep.subr.bf16.mxu0 %v12393_v22  ;;  %v12400_v40 = vld [vmem:[%s17504_s3 + $0x150] ss:$12 sps:$4 sm:$0xff]   ;;  %v12401_v46 = vld [vmem:[%s17504_s3 + $0x16c] ss:$12 sps:$4 sm:$0xff]   ;;  %v12404_v51 = vld [vmem:[%s17504_s3 + $0x168] ss:$12 sps:$4 sm:$0xff]  }
 0x17e   : >> { %v12403_v20 = vld [vmem:[%s17504_s3 + $0x170] ss:$12 sps:$4 sm:$0xff]   ;;  %s14053_s15 = sshll.u32 %s13323_s22, 8  ;;  %v12407_v23 = vld [vmem:[%s17504_s3 + $0x188] ss:$12 sps:$4 sm:$0xff]   ;;  %v17565_v59 = vld [vmem:[#allocation8_spill] sm:$0xff] }
 0x17f   : >> { %v12405_v55 = vld [vmem:[%s17504_s3 + $0x184] ss:$12 sps:$4 sm:$0xff]   ;;  %v12408_v48 = vld [vmem:[%s17504_s3 + $0x180] ss:$12 sps:$4 sm:$0xff]   ;;  %s11591_s21 = sadd.s32 128, %s14053_s15  ;;  %s14324_s27 = scalar_lea.vmem [#allocation2], %s14053_s15 }
 0x180   : >> { %1866 = vmatpush1.bf16.msra.mxu1 %v12395_v12  ;;  %1673 = vmatpush1.bf16.msra.mxu0 %v12396_v26  ;;  %v12409_v35 = vld [vmem:[%s17504_s3 + $0x19c] ss:$12 sps:$4 sm:$0xff]   ;;  %v12411_v32 = vld [vmem:[%s17504_s3 + $0x1a0] ss:$12 sps:$4 sm:$0xff]   ;;  %s1344_s14 = sshra.s32 %s11591_s21, 4  ;;  %s11594_s16 = sadd.s32 256, %s14053_s15 }
 0x181   : >> { %1867 = vmatprep.subr.bf16.mxu1 %v13328_v19  ;;  %1674 = vmatprep.subr.bf16.mxu0 %v12397_v15  ;;  %v12412_v54 = vld [vmem:[%s17504_s3 + $0x198] ss:$12 sps:$4 sm:$0xff]   ;;  %v12413_v43 = vld [vmem:[%s17504_s3 + $0x1b4] ss:$12 sps:$4 sm:$0xff]   ;;  %s11592_s12 = sshll.u32 %s1344_s14, 4  ;;  %s11597_s20 = sadd.s32 384, %s14053_s15 }
 0x182   : >> { %v12415_v18 = vld [vmem:[%s17504_s3 + $0x1b8] ss:$12 sps:$4 sm:$0xff]   ;;  %v12416_v27 = vld [vmem:[%s17504_s3 + $0x1b0] ss:$12 sps:$4 sm:$0xff]   ;;  %v12420_v52 = vld [vmem:[%s17504_s3 + $0x1c8] ss:$12 sps:$4 sm:$0xff]  }
 0x183   : >> { %v12417_v44 = vld [vmem:[%s17504_s3 + $0x1cc] ss:$12 sps:$4 sm:$0xff]   ;;  %v12419_v39 = vld [vmem:[%s17504_s3 + $0x1d0] ss:$12 sps:$4 sm:$0xff]   ;;  %s14093_s13 = scalar_lea.vmem [#allocation2], %s11592_s12  ;;  %s3398_s21 = sshra.s32 %s11597_s20, 4 }
 0x184   : >> { %1868 = vmatpush1.bf16.msra.mxu1 %v12399_v56  ;;  %1675 = vmatpush1.bf16.msra.mxu0 %v12400_v40  ;;  %v1350_v50 = vld [vmem:[%s14093_s13 + $0x8] sm:$0xff]  ;;  %v12421_v63 = vld [vmem:[%s17504_s3 + $0x1e4] ss:$12 sps:$4 sm:$0xff]   ;;  %v12429_v10 = vld [vmem:[%s17504_s3 + $0x214] ss:$12 sps:$4 sm:$0xff]   ;;  %s11598_s23 = sshll.u32 %s3398_s21, 4 }
 0x185   : >> { %1869 = vmatprep.subr.bf16.mxu1 %v13328_v19  ;;  %1676 = vmatprep.subr.bf16.mxu0 %v12401_v46  ;;  %v12423_v45 = vld [vmem:[%s17504_s3 + $0x1e8] ss:$12 sps:$4 sm:$0xff]   ;;  %v12424_v8 = vld [vmem:[%s17504_s3 + $0x1e0] ss:$12 sps:$4 sm:$0xff]   ;;  %v12428_v57 = vld [vmem:[%s17504_s3 + $0x1f8] ss:$12 sps:$4 sm:$0xff]  }
 0x186   : >> { %10436 = vmatprep.mubr.msk.bf16.mxu1 %vm392_vm0, %v1350_v50  ;;  %10420 = vmatprep.mubr.msk.bf16.mxu0 %vm392_vm0, %v1350_v50  ;;  %v12425_v53 = vld [vmem:[%s17504_s3 + $0x1fc] ss:$12 sps:$4 sm:$0xff]   ;;  %v12427_v3 = vld [vmem:[%s17504_s3 + $0x200] ss:$12 sps:$4 sm:$0xff]   ;;  %v12431_v41 = vld [vmem:[%s17504_s3 + $0x218] ss:$12 sps:$4 sm:$0xff]  }
 0x187   : >> { %v12432_v30 = vld [vmem:[%s17504_s3 + $0x210] ss:$12 sps:$4 sm:$0xff]   ;;  %v12433_v16 = vld [vmem:[%s17504_s3 + $0x22c] ss:$12 sps:$4 sm:$0xff]   ;;  %v12436_v24 = vld [vmem:[%s17504_s3 + $0x228] ss:$12 sps:$4 sm:$0xff]  }
 0x188   : >> { %1870 = vmatpush1.bf16.msra.mxu1 %v12403_v20  ;;  %1677 = vmatpush1.bf16.msra.mxu0 %v12404_v51  ;;  %v12435_v31 = vld [vmem:[%s17504_s3 + $0x230] ss:$12 sps:$4 sm:$0xff]   ;;  %v1349_v62 = vld [vmem:[%s14093_s13] sm:$0xff]  ;;  %v12440_v38 = vld [vmem:[%s17504_s3 + $0x8] ss:$12 sps:$4 sm:$0xff]   ;;  %s14792_s24 = scalar_lea.vmem [#allocation2], %s11598_s23 }
 0x189   : >> { %1871 = vmatprep.subr.bf16.mxu1 %v13328_v19  ;;  %1678 = vmatprep.subr.bf16.mxu0 %v12405_v55  ;;  %v12439_v29 = vld [vmem:[%s17504_s3 + $0x4] ss:$12 sps:$4 sm:$0xff]   ;;  %v12437_v13 = vld [vmem:[%s17504_s3] ss:$12 sps:$4 sm:$0xff]   ;;  %v1352_v60 = vld [vmem:[%s14093_s13 + $0x18] sm:$0xff] }
 0x18a   : >> { %v12443_v28 = vld [vmem:[%s17504_s3 + $0x1c] ss:$12 sps:$4 sm:$0xff]   ;;  %v12444_v42 = vld [vmem:[%s17504_s3 + $0x20] ss:$12 sps:$4 sm:$0xff]   ;;  %v12441_v9 = vld [vmem:[%s17504_s3 + $0x18] ss:$12 sps:$4 sm:$0xff]  }
 0x18b   : >> { %v12447_v37 = vld [vmem:[%s17504_s3 + $0x34] ss:$12 sps:$4 sm:$0xff]   ;;  %v1354_v34 = vld [vmem:[%s14093_s13 + $0x28] sm:$0xff]  ;;  %v12448_v21 = vld [vmem:[%s17504_s3 + $0x38] ss:$12 sps:$4 sm:$0xff]  }
 0x18c   : >> { %1872 = vmatpush1.bf16.msra.mxu1 %v12407_v23  ;;  %1679 = vmatpush1.bf16.msra.mxu0 %v12408_v48  ;;  %v1351_v6 = vld [vmem:[%s14093_s13 + $0x10] sm:$0xff]  ;;  %v12451_v33 = vld [vmem:[%s17504_s3 + $0x4c] ss:$12 sps:$4 sm:$0xff]   ;;  %v1353_v17 = vld [vmem:[%s14093_s13 + $0x20] sm:$0xff] }
 0x18d   : >> { %1873 = vmatprep.subr.bf16.mxu1 %v13328_v19  ;;  %1680 = vmatprep.subr.bf16.mxu0 %v12409_v35  ;;  %v12445_v36 = vld [vmem:[%s17504_s3 + $0x30] ss:$12 sps:$4 sm:$0xff]   ;;  %v12449_v5 = vld [vmem:[%s17504_s3 + $0x48] ss:$12 sps:$4 sm:$0xff]   ;;  %v12453_v61 = vld [vmem:[%s17504_s3 + $0x60] ss:$12 sps:$4 sm:$0xff]  }
 0x18e   : >> { %v12452_v25 = vld [vmem:[%s17504_s3 + $0x50] ss:$12 sps:$4 sm:$0xff]   ;;  %v12456_v1 = vld [vmem:[%s17504_s3 + $0x68] ss:$12 sps:$4 sm:$0xff]   ;;  %v12460_v7 = vld [vmem:[%s17504_s3 + $0x80] ss:$12 sps:$4 sm:$0xff]  }
 0x18f   : >> { %v12455_v47 = vld [vmem:[%s17504_s3 + $0x64] ss:$12 sps:$4 sm:$0xff]   ;;  %v1356_v14 = vld [vmem:[%s14093_s13 + $0x38] sm:$0xff]  ;;  %v12463_v22 = vld [vmem:[%s17504_s3 + $0x94] ss:$12 sps:$4 sm:$0xff]  }
 0x190   : >> { %1874 = vmatpush1.bf16.msra.mxu1 %v12411_v32  ;;  %1681 = vmatpush1.bf16.msra.mxu0 %v12412_v54  ;;  %v12459_v0 = vld [vmem:[%s17504_s3 + $0x7c] ss:$12 sps:$4 sm:$0xff]   ;;  %v12457_v4 = vld [vmem:[%s17504_s3 + $0x78] ss:$12 sps:$4 sm:$0xff]   ;;  %v1355_v12 = vld [vmem:[%s14093_s13 + $0x30] sm:$0xff] }
 0x191   : >> { %1875 = vmatprep.subr.bf16.mxu1 %v13328_v19  ;;  %1682 = vmatprep.subr.bf16.mxu0 %v12413_v43  ;;  %v1358_v26 = vld [vmem:[%s14093_s13 + $0x48] sm:$0xff]  ;;  %v12464_v15 = vld [vmem:[%s17504_s3 + $0x98] ss:$12 sps:$4 sm:$0xff]   ;;  %v12461_v56 = vld [vmem:[%s17504_s3 + $0x90] ss:$12 sps:$4 sm:$0xff]  }
 0x192   : >> { %v12467_v40 = vld [vmem:[%s17504_s3 + $0xac] ss:$12 sps:$4 sm:$0xff]   ;;  %v12465_v46 = vld [vmem:[%s17504_s3 + $0xa8] ss:$12 sps:$4 sm:$0xff]   ;;  %v12468_v20 = vld [vmem:[%s17504_s3 + $0xb0] ss:$12 sps:$4 sm:$0xff]  }
 0x193   : >> { %v12471_v51 = vld [vmem:[%s17504_s3 + $0xc4] ss:$12 sps:$4 sm:$0xff]   ;;  %v1360_v23 = vld [vmem:[%s14093_s13 + $0x58] sm:$0xff]  ;;  %v12472_v48 = vld [vmem:[%s17504_s3 + $0xc8] ss:$12 sps:$4 sm:$0xff]  }
 0x194   : >> { %1876 = vmatpush1.bf16.msra.mxu1 %v12415_v18  ;;  %1683 = vmatpush1.bf16.msra.mxu0 %v12416_v27  ;;  %v1357_v55 = vld [vmem:[%s14093_s13 + $0x40] sm:$0xff]  ;;  %v12475_v32 = vld [vmem:[%s17504_s3 + $0xdc] ss:$12 sps:$4 sm:$0xff]   ;;  %v1359_v27 = vld [vmem:[%s14093_s13 + $0x50] sm:$0xff] }
 0x195   : >> { %1877 = vmatprep.subr.bf16.mxu1 %v13328_v19  ;;  %1684 = vmatprep.subr.bf16.mxu0 %v12417_v44  ;;  %v12469_v35 = vld [vmem:[%s17504_s3 + $0xc0] ss:$12 sps:$4 sm:$0xff]   ;;  %v12473_v54 = vld [vmem:[%s17504_s3 + $0xd8] ss:$12 sps:$4 sm:$0xff]  }
 0x196   : >> { %v12476_v43 = vld [vmem:[%s17504_s3 + $0xe0] ss:$12 sps:$4 sm:$0xff]   ;;  %v17562_v58 = vld [vmem:[#allocation7_spill] sm:$0xff] }
 0x197   : >> { %v12479_v18 = vld [vmem:[%s17504_s3 + $0xf4] ss:$12 sps:$4 sm:$0xff]   ;;  %v1362_v44 = vld [vmem:[%s14093_s13 + $0x68] sm:$0xff] }
 0x198   : >> { %1878 = vmatpush1.bf16.msra.mxu1 %v12419_v39  ;;  %1685 = vmatpush1.bf16.msra.mxu0 %v12420_v52  ;;  %v12480_v39 = vld [vmem:[%s17504_s3 + $0xf8] ss:$12 sps:$4 sm:$0xff]   ;;  %v12477_v52 = vld [vmem:[%s17504_s3 + $0xf0] ss:$12 sps:$4 sm:$0xff]   ;;  %v17564_v11 = vld [vmem:[#allocation9_spill] sm:$0xff] }
 0x199   : >> { %1879 = vmatprep.subr.bf16.mxu1 %v13328_v19  ;;  %1686 = vmatprep.subr.bf16.mxu0 %v12421_v63  ;;  %v12483_v50 = vld [vmem:[%s17504_s3 + $0x10c] ss:$12 sps:$4 sm:$0xff]   ;;  %v12481_v63 = vld [vmem:[%s17504_s3 + $0x108] ss:$12 sps:$4 sm:$0xff]  }
 0x19c   : >> { %1880 = vmatpush1.bf16.msra.mxu1 %v12423_v45  ;;  %1687 = vmatpush1.bf16.msra.mxu0 %v12424_v8  ;;  %v12484_v45 = vld [vmem:[%s17504_s3 + $0x110] ss:$12 sps:$4 sm:$0xff]  }
 0x19d   : >> { %1881 = vmatprep.subr.bf16.mxu1 %v13328_v19  ;;  %1688 = vmatprep.subr.bf16.mxu0 %v12425_v53  ;;  %v12487_v8 = vld [vmem:[%s17504_s3 + $0x244] ss:$12 sps:$4 sm:$0xff]  }
 0x19e   : >> { %v1361_v53 = vld [vmem:[%s14093_s13 + $0x60] sm:$0xff] }
 0x1a0   : >> { %1882 = vmatpush1.bf16.msra.mxu1 %v12427_v3  ;;  %1689 = vmatpush1.bf16.msra.mxu0 %v12428_v57  ;;  %v1364_v3 = vld [vmem:[%s14093_s13 + $0x78] sm:$0xff]  ;;  %v1363_v57 = vld [vmem:[%s14093_s13 + $0x70] sm:$0xff] }
 0x1a1   : >> { %1883 = vmatprep.subr.bf16.mxu1 %v13328_v19  ;;  %1690 = vmatprep.subr.bf16.mxu0 %v12429_v10  ;;  %v1366_v10 = vld [vmem:[%s14093_s13 + $0x88] sm:$0xff] }
 0x1a4   : >> { %1884 = vmatpush1.bf16.msra.mxu1 %v12431_v41  ;;  %1691 = vmatpush1.bf16.msra.mxu0 %v12432_v30  ;;  %v1365_v41 = vld [vmem:[%s14093_s13 + $0x80] sm:$0xff]  ;;  %v1368_v30 = vld [vmem:[%s14093_s13 + $0x98] sm:$0xff] }
 0x1a5   : >> { %1885 = vmatprep.subr.bf16.mxu1 %v13328_v19  ;;  %1692 = vmatprep.subr.bf16.mxu0 %v12433_v16  ;;  %v1367_v16 = vld [vmem:[%s14093_s13 + $0x90] sm:$0xff] }
 0x1a8   : >> { %1886 = vmatpush1.bf16.msra.mxu1 %v12435_v31  ;;  %1693 = vmatpush1.bf16.msra.mxu0 %v12436_v24  ;;  %v1370_v31 = vld [vmem:[%s14093_s13 + $0xa8] sm:$0xff]  ;;  %v1369_v24 = vld [vmem:[%s14093_s13 + $0xa0] sm:$0xff] }
 0x1a9   : >> { %2457 = vmatprep.subr.bf16.mxu1 %v13328_v19  ;;  %2264 = vmatprep.subr.bf16.mxu0 %v12439_v29  ;;  %v1372_v29 = vld [vmem:[%s14093_s13 + $0xb8] sm:$0xff] }
 0x1ab   : >> { %1896 = vmatmul.mubr.bf16.vlgmr.msra.gmra.mrb[0].mxu1 %v1349_v62  ;;  %1703 = vmatmul.mubr.bf16.vlgmr.msra.gmra.mrb[0].mxu0 %v1349_v62  ;;  %v1371_v62 = vld [vmem:[%s14093_s13 + $0xb0] sm:$0xff] }
 0x1ac   : >> { %2458 = vmatpush1.bf16.msra.mxu1 %v12440_v38  ;;  %2265 = vmatpush1.bf16.msra.mxu0 %v12437_v13  ;;  %v1374_v38 = vld [vmem:[%s14093_s13 + $0xc8] sm:$0xff]  ;;  %v1373_v13 = vld [vmem:[%s14093_s13 + $0xc0] sm:$0xff] }
 0x1ad   : >> { %10437 = vmatprep.mubr.msk.bf16.mxu1 %vm392_vm0, %v1352_v60  ;;  %10421 = vmatprep.mubr.msk.bf16.mxu0 %vm392_vm0, %v1352_v60  ;;  %v1376_v60 = vld [vmem:[%s14093_s13 + $0xd8] sm:$0xff] }
 0x1ae   : >> { %2459 = vmatprep.subr.bf16.mxu1 %v13328_v19  ;;  %2266 = vmatprep.subr.bf16.mxu0 %v12443_v28  ;;  %v1375_v28 = vld [vmem:[%s14093_s13 + $0xd0] sm:$0xff] }
 0x1b0   : >> { %2460 = vmatpush1.bf16.msra.mxu1 %v12444_v42  ;;  %2267 = vmatpush1.bf16.msra.mxu0 %v12441_v9  ;;  %v1378_v42 = vld [vmem:[%s14093_s13 + $0xe8] sm:$0xff]  ;;  %v1377_v9 = vld [vmem:[%s14093_s13 + $0xe0] sm:$0xff] }
 0x1b1   : >> { %2461 = vmatprep.subr.bf16.mxu1 %v13328_v19  ;;  %2268 = vmatprep.subr.bf16.mxu0 %v12447_v37  ;;  %v1380_v37 = vld [vmem:[%s14093_s13 + $0xf8] sm:$0xff] }
 0x1b3   : >> { %1904 = vmatmul.mubr.bf16.gmra.mrb[4].mxu1 %v1351_v6  ;;  %1713 = vmatmul.mubr.bf16.gmra.mrb[4].mxu0 %v1351_v6  ;;  %v1379_v6 = vld [vmem:[%s14093_s13 + $0xf0] sm:$0xff]  ;;  %s2620_s13 = sshra.s32 %s11594_s16, 4 }
 0x1b4   : >> { %10438 = vmatprep.mubr.msk.bf16.mxu1 %vm392_vm0, %v1354_v34  ;;  %10422 = vmatprep.mubr.msk.bf16.mxu0 %vm392_vm0, %v1354_v34  ;;  %v1262_v34 = vld [vmem:[%s14324_s27 + $0x8] sm:$0xff]  ;;  %s11595_s12 = sshll.u32 %s2620_s13, 4 }
 0x1b5   : >> { %2462 = vmatpush1.bf16.msra.mxu1 %v12448_v21  ;;  %2269 = vmatpush1.bf16.msra.mxu0 %v12445_v36  ;;  %v1261_v21 = vld [vmem:[%s14324_s27] sm:$0xff]  ;;  %v12488_v36 = vld [vmem:[%s17504_s3 + $0x248] ss:$12 sps:$4 sm:$0xff]   ;;  %s14531_s18 = scalar_lea.vmem [#allocation2], %s11595_s12 }
 0x1b6   : >> { %2463 = vmatprep.subr.bf16.mxu1 %v13328_v19  ;;  %2270 = vmatprep.subr.bf16.mxu0 %v12451_v33  ;;  %v12485_v33 = vld [vmem:[%s17504_s3 + $0x240] ss:$12 sps:$4 sm:$0xff]  }
 0x1b9   : >> { %2464 = vmatpush1.bf16.msra.mxu1 %v12452_v25  ;;  %2271 = vmatpush1.bf16.msra.mxu0 %v12449_v5  ;;  %v1264_v25 = vld [vmem:[%s14324_s27 + $0x18] sm:$0xff] }
 0x1ba   : >> { %2465 = vmatprep.subr.bf16.mxu1 %v13328_v19  ;;  %2272 = vmatprep.subr.bf16.mxu0 %v12455_v47  ;;  %v12491_v5 = vld [vmem:[%s17504_s3 + $0x25c] ss:$12 sps:$4 sm:$0xff]   ;;  %v12492_v47 = vld [vmem:[%s17504_s3 + $0x260] ss:$12 sps:$4 sm:$0xff]  }
 0x1bb   : >> { %1912 = vmatmul.mubr.bf16.gmra.mrb[8].mxu1 %v1353_v17  ;;  %1723 = vmatmul.mubr.bf16.gmra.mrb[8].mxu0 %v1353_v17  ;;  %v12489_v17 = vld [vmem:[%s17504_s3 + $0x258] ss:$12 sps:$4 sm:$0xff]  }
 0x1bc   : >> { %10439 = vmatprep.mubr.msk.bf16.mxu1 %vm392_vm0, %v1356_v14  ;;  %10423 = vmatprep.mubr.msk.bf16.mxu0 %vm392_vm0, %v1356_v14  ;;  %v12495_v14 = vld [vmem:[%s17504_s3 + $0x274] ss:$12 sps:$4 sm:$0xff]  }
 0x1bd   : >> { %2466 = vmatpush1.bf16.msra.mxu1 %v12456_v1  ;;  %2273 = vmatpush1.bf16.msra.mxu0 %v12453_v61  ;;  %v1263_v1 = vld [vmem:[%s14324_s27 + $0x10] sm:$0xff]  ;;  %v1266_v61 = vld [vmem:[%s14324_s27 + $0x28] sm:$0xff] }
 0x1be   : >> { %2467 = vmatprep.subr.bf16.mxu1 %v13328_v19  ;;  %2274 = vmatprep.subr.bf16.mxu0 %v12459_v0  ;;  %v12496_v0 = vld [vmem:[%s17504_s3 + $0x278] ss:$12 sps:$4 sm:$0xff]  }
 0x1c1   : >> { %2468 = vmatpush1.bf16.msra.mxu1 %v12460_v7  ;;  %2275 = vmatpush1.bf16.msra.mxu0 %v12457_v4  ;;  %v12493_v7 = vld [vmem:[%s17504_s3 + $0x270] ss:$12 sps:$4 sm:$0xff]   ;;  %v12499_v4 = vld [vmem:[%s17504_s3 + $0x28c] ss:$12 sps:$4 sm:$0xff]  }
 0x1c2   : >> { %2469 = vmatprep.subr.bf16.mxu1 %v13328_v19  ;;  %2276 = vmatprep.subr.bf16.mxu0 %v12463_v22  ;;  %v12500_v22 = vld [vmem:[%s17504_s3 + $0x290] ss:$12 sps:$4 sm:$0xff]  }
 0x1c3   : >> { %1920 = vmatmul.mubr.bf16.gmra.mrb[12].mxu1 %v1355_v12  ;;  %1733 = vmatmul.mubr.bf16.gmra.mrb[12].mxu0 %v1355_v12  ;;  %v12497_v12 = vld [vmem:[%s17504_s3 + $0x288] ss:$12 sps:$4 sm:$0xff]  }
 0x1c4   : >> { %10440 = vmatprep.mubr.msk.bf16.mxu1 %vm392_vm0, %v1358_v26  ;;  %10424 = vmatprep.mubr.msk.bf16.mxu0 %vm392_vm0, %v1358_v26  ;;  %v12503_v26 = vld [vmem:[%s17504_s3 + $0x2a4] ss:$12 sps:$4 sm:$0xff]  }
 0x1c5   : >> { %2470 = vmatpush1.bf16.msra.mxu1 %v12464_v15  ;;  %2277 = vmatpush1.bf16.msra.mxu0 %v12461_v56  ;;  %v1265_v15 = vld [vmem:[%s14324_s27 + $0x20] sm:$0xff]  ;;  %v1268_v56 = vld [vmem:[%s14324_s27 + $0x38] sm:$0xff] }
 0x1c6   : >> { %2471 = vmatprep.subr.bf16.mxu1 %v13328_v19  ;;  %2278 = vmatprep.subr.bf16.mxu0 %v12467_v40  ;;  %v12504_v40 = vld [vmem:[%s17504_s3 + $0x2a8] ss:$12 sps:$4 sm:$0xff]  }
 0x1c9   : >> { %2472 = vmatpush1.bf16.msra.mxu1 %v12468_v20  ;;  %2279 = vmatpush1.bf16.msra.mxu0 %v12465_v46  ;;  %v12501_v46 = vld [vmem:[%s17504_s3 + $0x2a0] ss:$12 sps:$4 sm:$0xff]   ;;  %v12507_v20 = vld [vmem:[%s17504_s3 + $0x2bc] ss:$12 sps:$4 sm:$0xff]  }
 0x1ca   : >> { %2473 = vmatprep.subr.bf16.mxu1 %v13328_v19  ;;  %2280 = vmatprep.subr.bf16.mxu0 %v12471_v51  ;;  %v12508_v51 = vld [vmem:[%s17504_s3 + $0x2c0] ss:$12 sps:$4 sm:$0xff]  }
 0x1cb   : >> { %1928 = vmatmul.mubr.bf16.gmra.mrb[16].mxu1 %v1357_v55  ;;  %1743 = vmatmul.mubr.bf16.gmra.mrb[16].mxu0 %v1357_v55  ;;  %v12505_v55 = vld [vmem:[%s17504_s3 + $0x2b8] ss:$12 sps:$4 sm:$0xff]  }
 0x1cc   : >> { %10441 = vmatprep.mubr.msk.bf16.mxu1 %vm392_vm0, %v1360_v23  ;;  %10425 = vmatprep.mubr.msk.bf16.mxu0 %vm392_vm0, %v1360_v23  ;;  %v12511_v23 = vld [vmem:[%s17504_s3 + $0x2d4] ss:$12 sps:$4 sm:$0xff]  }
 0x1cd   : >> { %2474 = vmatpush1.bf16.msra.mxu1 %v12472_v48  ;;  %2281 = vmatpush1.bf16.msra.mxu0 %v12469_v35  ;;  %v1267_v48 = vld [vmem:[%s14324_s27 + $0x30] sm:$0xff]  ;;  %v1270_v35 = vld [vmem:[%s14324_s27 + $0x48] sm:$0xff] }
 0x1ce   : >> { %2475 = vmatprep.subr.bf16.mxu1 %v13328_v19  ;;  %2282 = vmatprep.subr.bf16.mxu0 %v12475_v32  ;;  %v12512_v32 = vld [vmem:[%s17504_s3 + $0x2d8] ss:$12 sps:$4 sm:$0xff]  }
 0x1d1   : >> { %2476 = vmatpush1.bf16.msra.mxu1 %v12476_v43  ;;  %2283 = vmatpush1.bf16.msra.mxu0 %v12473_v54  ;;  %v12509_v54 = vld [vmem:[%s17504_s3 + $0x2d0] ss:$12 sps:$4 sm:$0xff]   ;;  %v12515_v43 = vld [vmem:[%s17504_s3 + $0x2ec] ss:$12 sps:$4 sm:$0xff]  }
 0x1d2   : >> { %2477 = vmatprep.subr.bf16.mxu1 %v13328_v19  ;;  %2284 = vmatprep.subr.bf16.mxu0 %v12479_v18  ;;  %v12516_v18 = vld [vmem:[%s17504_s3 + $0x2f0] ss:$12 sps:$4 sm:$0xff]  }
 0x1d3   : >> { %1936 = vmatmul.mubr.bf16.gmra.mrb[20].mxu1 %v1359_v27  ;;  %1753 = vmatmul.mubr.bf16.gmra.mrb[20].mxu0 %v1359_v27  ;;  %v12513_v27 = vld [vmem:[%s17504_s3 + $0x2e8] ss:$12 sps:$4 sm:$0xff]  }
 0x1d4   : >> { %10442 = vmatprep.mubr.msk.bf16.mxu1 %vm392_vm0, %v1362_v44  ;;  %10426 = vmatprep.mubr.msk.bf16.mxu0 %vm392_vm0, %v1362_v44  ;;  %v12519_v44 = vld [vmem:[%s17504_s3 + $0x304] ss:$12 sps:$4 sm:$0xff]  }
 0x1d5   : >> { %2478 = vmatpush1.bf16.msra.mxu1 %v12480_v39  ;;  %2285 = vmatpush1.bf16.msra.mxu0 %v12477_v52  ;;  %v1269_v39 = vld [vmem:[%s14324_s27 + $0x40] sm:$0xff]  ;;  %v1272_v52 = vld [vmem:[%s14324_s27 + $0x58] sm:$0xff] }
 0x1d6   : >> { %2479 = vmatprep.subr.bf16.mxu1 %v13328_v19  ;;  %2286 = vmatprep.subr.bf16.mxu0 %v12483_v50  ;;  %v12520_v50 = vld [vmem:[%s17504_s3 + $0x308] ss:$12 sps:$4 sm:$0xff]  }
 0x1d9   : >> { %2480 = vmatpush1.bf16.msra.mxu1 %v12484_v45  ;;  %2287 = vmatpush1.bf16.msra.mxu0 %v12481_v63  ;;  %v12517_v63 = vld [vmem:[%s17504_s3 + $0x300] ss:$12 sps:$4 sm:$0xff]   ;;  %v12523_v45 = vld [vmem:[%s17504_s3 + $0x31c] ss:$12 sps:$4 sm:$0xff]  }
 0x1da   : >> { %3139 = vmatprep.subr.bf16.mxu1 %v13328_v19  ;;  %2946 = vmatprep.subr.bf16.mxu0 %v12487_v8  ;;  %v12524_v8 = vld [vmem:[%s17504_s3 + $0x320] ss:$12 sps:$4 sm:$0xff]  }
 0x1db   : >> { %1944 = vmatmul.mubr.bf16.gmra.mrb[24].mxu1 %v1361_v53  ;;  %1763 = vmatmul.mubr.bf16.gmra.mrb[24].mxu0 %v1361_v53  ;;  %v12521_v53 = vld [vmem:[%s17504_s3 + $0x318] ss:$12 sps:$4 sm:$0xff]  }
 0x1dc   : >> { %10443 = vmatprep.mubr.msk.bf16.mxu1 %vm392_vm0, %v1364_v3  ;;  %10427 = vmatprep.mubr.msk.bf16.mxu0 %vm392_vm0, %v1364_v3  ;;  %v12527_v3 = vld [vmem:[%s17504_s3 + $0x334] ss:$12 sps:$4 sm:$0xff]  }
 0x1e3   : >> { %1952 = vmatmul.mubr.bf16.gmra.mrb[28].mxu1 %v1363_v57  ;;  %1773 = vmatmul.mubr.bf16.gmra.mrb[28].mxu0 %v1363_v57  ;;  %v1271_v57 = vld [vmem:[%s14324_s27 + $0x50] sm:$0xff] }
 0x1e4   : >> { %10444 = vmatprep.mubr.msk.bf16.mxu1 %vm392_vm0, %v1366_v10  ;;  %10428 = vmatprep.mubr.msk.bf16.mxu0 %vm392_vm0, %v1366_v10  ;;  %v1274_v10 = vld [vmem:[%s14324_s27 + $0x68] sm:$0xff] }
 0x1eb   : >> { %1960 = vmatmul.mubr.bf16.gmra.mrb[32].mxu1 %v1365_v41  ;;  %1783 = vmatmul.mubr.bf16.gmra.mrb[32].mxu0 %v1365_v41  ;;  %v12528_v41 = vld [vmem:[%s17504_s3 + $0x338] ss:$12 sps:$4 sm:$0xff]  }
 0x1ec   : >> { %10445 = vmatprep.mubr.msk.bf16.mxu1 %vm392_vm0, %v1368_v30  ;;  %10429 = vmatprep.mubr.msk.bf16.mxu0 %vm392_vm0, %v1368_v30  ;;  %v12525_v30 = vld [vmem:[%s17504_s3 + $0x330] ss:$12 sps:$4 sm:$0xff]  }
 0x1f3   : >> { %1968 = vmatmul.mubr.bf16.gmra.mrb[36].mxu1 %v1367_v16  ;;  %1793 = vmatmul.mubr.bf16.gmra.mrb[36].mxu0 %v1367_v16  ;;  %v12531_v16 = vld [vmem:[%s17504_s3 + $0x34c] ss:$12 sps:$4 sm:$0xff]  }
 0x1f4   : >> { %10446 = vmatprep.mubr.msk.bf16.mxu1 %vm392_vm0, %v1370_v31  ;;  %10430 = vmatprep.mubr.msk.bf16.mxu0 %vm392_vm0, %v1370_v31  ;;  %v12532_v31 = vld [vmem:[%s17504_s3 + $0x350] ss:$12 sps:$4 sm:$0xff]  }
 0x1fb   : >> { %1976 = vmatmul.mubr.bf16.gmra.mrb[40].mxu1 %v1369_v24  ;;  %1803 = vmatmul.mubr.bf16.gmra.mrb[40].mxu0 %v1369_v24  ;;  %v12529_v24 = vld [vmem:[%s17504_s3 + $0x348] ss:$12 sps:$4 sm:$0xff]  }
 0x1fc   : >> { %10447 = vmatprep.mubr.msk.bf16.mxu1 %vm392_vm0, %v1372_v29  ;;  %10431 = vmatprep.mubr.msk.bf16.mxu0 %vm392_vm0, %v1372_v29  ;;  %v12535_v29 = vld [vmem:[%s17504_s3 + $0x364] ss:$12 sps:$4 sm:$0xff]  }
 0x203   : >> { %1984 = vmatmul.mubr.bf16.gmra.mrb[44].mxu1 %v1371_v62  ;;  %1813 = vmatmul.mubr.bf16.gmra.mrb[44].mxu0 %v1371_v62  ;;  %v1273_v62 = vld [vmem:[%s14324_s27 + $0x60] sm:$0xff] }
 0x204   : >> { %10448 = vmatprep.mubr.msk.bf16.mxu1 %vm392_vm0, %v1374_v38  ;;  %10432 = vmatprep.mubr.msk.bf16.mxu0 %vm392_vm0, %v1374_v38  ;;  %v1276_v38 = vld [vmem:[%s14324_s27 + $0x78] sm:$0xff] }
 0x20b   : >> { %1992 = vmatmul.mubr.bf16.gmra.mrb[48].mxu1 %v1373_v13  ;;  %1823 = vmatmul.mubr.bf16.gmra.mrb[48].mxu0 %v1373_v13  ;;  %v1275_v13 = vld [vmem:[%s14324_s27 + $0x70] sm:$0xff] }
 0x20c   : >> { %10449 = vmatprep.mubr.msk.bf16.mxu1 %vm392_vm0, %v1376_v60  ;;  %10433 = vmatprep.mubr.msk.bf16.mxu0 %vm392_vm0, %v1376_v60  ;;  %v1278_v60 = vld [vmem:[%s14324_s27 + $0x88] sm:$0xff] }
 0x213   : >> { %2000 = vmatmul.mubr.bf16.gmra.mrb[52].mxu1 %v1375_v28  ;;  %1833 = vmatmul.mubr.bf16.gmra.mrb[52].mxu0 %v1375_v28  ;;  %v1277_v28 = vld [vmem:[%s14324_s27 + $0x80] sm:$0xff] }
 0x214   : >> { %10450 = vmatprep.mubr.msk.bf16.mxu1 %vm392_vm0, %v1378_v42  ;;  %10434 = vmatprep.mubr.msk.bf16.mxu0 %vm392_vm0, %v1378_v42  ;;  %v1280_v42 = vld [vmem:[%s14324_s27 + $0x98] sm:$0xff] }
 0x21b   : >> { %2008 = vmatmul.mubr.bf16.gmra.mrb[56].mxu1 %v1377_v9  ;;  %1843 = vmatmul.mubr.bf16.gmra.mrb[56].mxu0 %v1377_v9  ;;  %v1279_v9 = vld [vmem:[%s14324_s27 + $0x90] sm:$0xff] }
 0x21c   : >> { %10451 = vmatprep.mubr.msk.bf16.mxu1 %vm392_vm0, %v1380_v37  ;;  %10435 = vmatprep.mubr.msk.bf16.mxu0 %vm392_vm0, %v1380_v37  ;;  %v1282_v37 = vld [vmem:[%s14324_s27 + $0xa8] sm:$0xff] }
 0x223   : >> { %2016 = vmatmul.mubr.bf16.gmra.mrb[60].mxu1 %v1379_v6  ;;  %1853 = vmatmul.mubr.bf16.gmra.mrb[60].mxu0 %v1379_v6  ;;  %v1281_v6 = vld [vmem:[%s14324_s27 + $0xa0] sm:$0xff] }
 0x224   : >> { %10504 = vmatprep.mubr.msk.bf16.mxu1 %vm392_vm0, %v1262_v34  ;;  %10488 = vmatprep.mubr.msk.bf16.mxu0 %vm392_vm0, %v1262_v34  ;;  %v1284_v34 = vld [vmem:[%s14324_s27 + $0xb8] sm:$0xff] }
 0x22b   : >> { %2490 = vmatmul.mubr.bf16.vlgmr.msra.gmra.mrb[64].mxu1 %v1261_v21  ;;  %2297 = vmatmul.mubr.bf16.vlgmr.msra.gmra.mrb[0].mxu0 %v1261_v21 }
 0x22c   : >> { %3140 = vmatpush1.bf16.msra.mxu1 %v12488_v36  ;;  %2947 = vmatpush1.bf16.msra.mxu0 %v12485_v33 }
 0x22d   : >> { %10505 = vmatprep.mubr.msk.bf16.mxu1 %vm392_vm0, %v1264_v25  ;;  %10489 = vmatprep.mubr.msk.bf16.mxu0 %vm392_vm0, %v1264_v25  ;;  %v1283_v25 = vld [vmem:[%s14324_s27 + $0xb0] sm:$0xff] }
 0x22e   : >> { %3141 = vmatprep.subr.bf16.mxu1 %v13328_v19  ;;  %2948 = vmatprep.subr.bf16.mxu0 %v12491_v5 }
 0x230   : >> { %3142 = vmatpush1.bf16.msra.mxu1 %v12492_v47  ;;  %2949 = vmatpush1.bf16.msra.mxu0 %v12489_v17  ;;  %v1286_v47 = vld [vmem:[%s14324_s27 + $0xc8] sm:$0xff] }
 0x231   : >> { %3143 = vmatprep.subr.bf16.mxu1 %v13328_v19  ;;  %2950 = vmatprep.subr.bf16.mxu0 %v12495_v14 }
 0x233   : >> { %2498 = vmatmul.mubr.bf16.gmra.mrb[68].mxu1 %v1263_v1  ;;  %2307 = vmatmul.mubr.bf16.gmra.mrb[4].mxu0 %v1263_v1 }
 0x234   : >> { %10506 = vmatprep.mubr.msk.bf16.mxu1 %vm392_vm0, %v1266_v61  ;;  %10490 = vmatprep.mubr.msk.bf16.mxu0 %vm392_vm0, %v1266_v61  ;;  %v1285_v61 = vld [vmem:[%s14324_s27 + $0xc0] sm:$0xff] }
 0x235   : >> { %3144 = vmatpush1.bf16.msra.mxu1 %v12496_v0  ;;  %2951 = vmatpush1.bf16.msra.mxu0 %v12493_v7  ;;  %v1288_v7 = vld [vmem:[%s14324_s27 + $0xd8] sm:$0xff] }
 0x236   : >> { %3145 = vmatprep.subr.bf16.mxu1 %v13328_v19  ;;  %2952 = vmatprep.subr.bf16.mxu0 %v12499_v4 }
 0x239   : >> { %3146 = vmatpush1.bf16.msra.mxu1 %v12500_v22  ;;  %2953 = vmatpush1.bf16.msra.mxu0 %v12497_v12 }
 0x23a   : >> { %3147 = vmatprep.subr.bf16.mxu1 %v13328_v19  ;;  %2954 = vmatprep.subr.bf16.mxu0 %v12503_v26  ;;  %v1287_v26 = vld [vmem:[%s14324_s27 + $0xd0] sm:$0xff] }
 0x23b   : >> { %2506 = vmatmul.mubr.bf16.gmra.mrb[72].mxu1 %v1265_v15  ;;  %2317 = vmatmul.mubr.bf16.gmra.mrb[8].mxu0 %v1265_v15 }
 0x23c   : >> { %10507 = vmatprep.mubr.msk.bf16.mxu1 %vm392_vm0, %v1268_v56  ;;  %10491 = vmatprep.mubr.msk.bf16.mxu0 %vm392_vm0, %v1268_v56  ;;  %v1290_v56 = vld [vmem:[%s14324_s27 + $0xe8] sm:$0xff] }
 0x23d   : >> { %3148 = vmatpush1.bf16.msra.mxu1 %v12504_v40  ;;  %2955 = vmatpush1.bf16.msra.mxu0 %v12501_v46 }
 0x23e   : >> { %3149 = vmatprep.subr.bf16.mxu1 %v13328_v19  ;;  %2956 = vmatprep.subr.bf16.mxu0 %v12507_v20 }
 0x241   : >> { %3150 = vmatpush1.bf16.msra.mxu1 %v12508_v51  ;;  %2957 = vmatpush1.bf16.msra.mxu0 %v12505_v55  ;;  %v1289_v51 = vld [vmem:[%s14324_s27 + $0xe0] sm:$0xff] }
 0x242   : >> { %3151 = vmatprep.subr.bf16.mxu1 %v13328_v19  ;;  %2958 = vmatprep.subr.bf16.mxu0 %v12511_v23  ;;  %v1292_v23 = vld [vmem:[%s14324_s27 + $0xf8] sm:$0xff] }
 0x243   : >> { %2514 = vmatmul.mubr.bf16.gmra.mrb[76].mxu1 %v1267_v48  ;;  %2327 = vmatmul.mubr.bf16.gmra.mrb[12].mxu0 %v1267_v48 }
 0x244   : >> { %10508 = vmatprep.mubr.msk.bf16.mxu1 %vm392_vm0, %v1270_v35  ;;  %10492 = vmatprep.mubr.msk.bf16.mxu0 %vm392_vm0, %v1270_v35 }
 0x245   : >> { %3152 = vmatpush1.bf16.msra.mxu1 %v12512_v32  ;;  %2959 = vmatpush1.bf16.msra.mxu0 %v12509_v54  ;;  %v1291_v54 = vld [vmem:[%s14324_s27 + $0xf0] sm:$0xff] }
 0x246   : >> { %3153 = vmatprep.subr.bf16.mxu1 %v13328_v19  ;;  %2960 = vmatprep.subr.bf16.mxu0 %v12515_v43 }
 0x249   : >> { %3154 = vmatpush1.bf16.msra.mxu1 %v12516_v18  ;;  %2961 = vmatpush1.bf16.msra.mxu0 %v12513_v27  ;;  %v2626_v18 = vld [vmem:[%s14531_s18 + $0x8] sm:$0xff] }
 0x24a   : >> { %3155 = vmatprep.subr.bf16.mxu1 %v13328_v19  ;;  %2962 = vmatprep.subr.bf16.mxu0 %v12519_v44 }
 0x24b   : >> { %2522 = vmatmul.mubr.bf16.gmra.mrb[80].mxu1 %v1269_v39  ;;  %2337 = vmatmul.mubr.bf16.gmra.mrb[16].mxu0 %v1269_v39 }
 0x24c   : >> { %10509 = vmatprep.mubr.msk.bf16.mxu1 %vm392_vm0, %v1272_v52  ;;  %10493 = vmatprep.mubr.msk.bf16.mxu0 %vm392_vm0, %v1272_v52  ;;  %v2625_v52 = vld [vmem:[%s14531_s18] sm:$0xff] }
 0x24d   : >> { %3156 = vmatpush1.bf16.msra.mxu1 %v12520_v50  ;;  %2963 = vmatpush1.bf16.msra.mxu0 %v12517_v63  ;;  %v12536_v50 = vld [vmem:[%s17504_s3 + $0x368] ss:$12 sps:$4 sm:$0xff]  }
 0x24e   : >> { %3157 = vmatprep.subr.bf16.mxu1 %v13328_v19  ;;  %2964 = vmatprep.subr.bf16.mxu0 %v12523_v45  ;;  %v12533_v45 = vld [vmem:[%s17504_s3 + $0x360] ss:$12 sps:$4 sm:$0xff]  }
 0x251   : >> { %3158 = vmatpush1.bf16.msra.mxu1 %v12524_v8  ;;  %2965 = vmatpush1.bf16.msra.mxu0 %v12521_v53  ;;  %v2628_v8 = vld [vmem:[%s14531_s18 + $0x18] sm:$0xff] }
 0x252   : >> { %3159 = vmatprep.subr.bf16.mxu1 %v13328_v19  ;;  %2966 = vmatprep.subr.bf16.mxu0 %v12527_v3  ;;  %v12539_v53 = vld [vmem:[%s17504_s3 + $0x37c] ss:$12 sps:$4 sm:$0xff]   ;;  %v12540_v3 = vld [vmem:[%s17504_s3 + $0x380] ss:$12 sps:$4 sm:$0xff]  }
 0x253   : >> { %2530 = vmatmul.mubr.bf16.gmra.mrb[84].mxu1 %v1271_v57  ;;  %2347 = vmatmul.mubr.bf16.gmra.mrb[20].mxu0 %v1271_v57  ;;  %v12537_v57 = vld [vmem:[%s17504_s3 + $0x378] ss:$12 sps:$4 sm:$0xff]  }
 0x254   : >> { %10510 = vmatprep.mubr.msk.bf16.mxu1 %vm392_vm0, %v1274_v10  ;;  %10494 = vmatprep.mubr.msk.bf16.mxu0 %vm392_vm0, %v1274_v10 }
 0x255   : >> { %3160 = vmatpush1.bf16.msra.mxu1 %v12528_v41  ;;  %2967 = vmatpush1.bf16.msra.mxu0 %v12525_v30  ;;  %v12543_v41 = vld [vmem:[%s17504_s3 + $0x394] ss:$12 sps:$4 sm:$0xff]  }
 0x256   : >> { %3161 = vmatprep.subr.bf16.mxu1 %v13328_v19  ;;  %2968 = vmatprep.subr.bf16.mxu0 %v12531_v16 }
 0x259   : >> { %3162 = vmatpush1.bf16.msra.mxu1 %v12532_v31  ;;  %2969 = vmatpush1.bf16.msra.mxu0 %v12529_v24  ;;  %v2627_v31 = vld [vmem:[%s14531_s18 + $0x10] sm:$0xff] }
 0x25a   : >> { %3917 = vmatprep.subr.bf16.mxu1 %v13328_v19  ;;  %3724 = vmatprep.subr.bf16.mxu0 %v12535_v29  ;;  %v2630_v29 = vld [vmem:[%s14531_s18 + $0x28] sm:$0xff] }
 0x25b   : >> { %2538 = vmatmul.mubr.bf16.gmra.mrb[88].mxu1 %v1273_v62  ;;  %2357 = vmatmul.mubr.bf16.gmra.mrb[24].mxu0 %v1273_v62  ;;  %v12544_v62 = vld [vmem:[%s17504_s3 + $0x398] ss:$12 sps:$4 sm:$0xff]  }
 0x25c   : >> { %10511 = vmatprep.mubr.msk.bf16.mxu1 %vm392_vm0, %v1276_v38  ;;  %10495 = vmatprep.mubr.msk.bf16.mxu0 %vm392_vm0, %v1276_v38  ;;  %v12541_v38 = vld [vmem:[%s17504_s3 + $0x390] ss:$12 sps:$4 sm:$0xff]  }
 0x263   : >> { %2546 = vmatmul.mubr.bf16.gmra.mrb[92].mxu1 %v1275_v13  ;;  %2367 = vmatmul.mubr.bf16.gmra.mrb[28].mxu0 %v1275_v13  ;;  %v12547_v13 = vld [vmem:[%s17504_s3 + $0x3ac] ss:$12 sps:$4 sm:$0xff]  }
 0x264   : >> { %10512 = vmatprep.mubr.msk.bf16.mxu1 %vm392_vm0, %v1278_v60  ;;  %10496 = vmatprep.mubr.msk.bf16.mxu0 %vm392_vm0, %v1278_v60  ;;  %v12548_v60 = vld [vmem:[%s17504_s3 + $0x3b0] ss:$12 sps:$4 sm:$0xff]  }
 0x26b   : >> { %2554 = vmatmul.mubr.bf16.gmra.mrb[96].mxu1 %v1277_v28  ;;  %2377 = vmatmul.mubr.bf16.gmra.mrb[32].mxu0 %v1277_v28 }
 0x26c   : >> { %10513 = vmatprep.mubr.msk.bf16.mxu1 %vm392_vm0, %v1280_v42  ;;  %10497 = vmatprep.mubr.msk.bf16.mxu0 %vm392_vm0, %v1280_v42  ;;  %v12545_v42 = vld [vmem:[%s17504_s3 + $0x3a8] ss:$12 sps:$4 sm:$0xff]  }
 0x273   : >> { %2562 = vmatmul.mubr.bf16.gmra.mrb[100].mxu1 %v1279_v9  ;;  %2387 = vmatmul.mubr.bf16.gmra.mrb[36].mxu0 %v1279_v9 }
 0x274   : >> { %10514 = vmatprep.mubr.msk.bf16.mxu1 %vm392_vm0, %v1282_v37  ;;  %10498 = vmatprep.mubr.msk.bf16.mxu0 %vm392_vm0, %v1282_v37  ;;  %v12551_v37 = vld [vmem:[%s17504_s3 + $0x3c4] ss:$12 sps:$4 sm:$0xff]  }
 0x27b   : >> { %2570 = vmatmul.mubr.bf16.gmra.mrb[104].mxu1 %v1281_v6  ;;  %2397 = vmatmul.mubr.bf16.gmra.mrb[40].mxu0 %v1281_v6 }
 0x27c   : >> { %10515 = vmatprep.mubr.msk.bf16.mxu1 %vm392_vm0, %v1284_v34  ;;  %10499 = vmatprep.mubr.msk.bf16.mxu0 %vm392_vm0, %v1284_v34  ;;  %v2629_v34 = vld [vmem:[%s14531_s18 + $0x20] sm:$0xff] }
 0x27e   : >> { %v14493_v21 = vpop.f32.mrb[0].mxu1 }
 0x27f   : >> { %v1899_v36 = vpop.f32.mrb[1].mxu1 }
 0x280   : >> { %v14495_v33 = vpop.f32.mrb[2].mxu1 }
 0x281   : >> { %v1902_v5 = vpop.f32.mrb[3].mxu1 }
 0x282   : >> { %v12552_v5 = vld [vmem:[%s17504_s3 + $0x3c8] ss:$12 sps:$4 sm:$0xff]  }
 0x283   : >> { %2578 = vmatmul.mubr.bf16.gmra.mrb[108].mxu1 %v1283_v25  ;;  %2407 = vmatmul.mubr.bf16.gmra.mrb[44].mxu0 %v1283_v25  ;;  %v2632_v25 = vld [vmem:[%s14531_s18 + $0x38] sm:$0xff] }
 0x284   : >> { %10516 = vmatprep.mubr.msk.bf16.mxu1 %vm392_vm0, %v1286_v47  ;;  %10500 = vmatprep.mubr.msk.bf16.mxu0 %vm392_vm0, %v1286_v47  ;;  %v12549_v47 = vld [vmem:[%s17504_s3 + $0x3c0] ss:$12 sps:$4 sm:$0xff]  }
 0x286   : >> { %v14501_v17 = vpop.f32.mrb[4].mxu1 }
 0x287   : >> { %v1907_v14 = vpop.f32.mrb[5].mxu1 }
 0x288   : >> { %v14503_v1 = vpop.f32.mrb[6].mxu1  ;;  %v12555_v14 = vld [vmem:[%s17504_s3 + $0x3dc] ss:$12 sps:$4 sm:$0xff]  }
 0x289   : >> { %v1910_v0 = vpop.f32.mrb[7].mxu1 }
 0x28b   : >> { %2586 = vmatmul.mubr.bf16.gmra.mrb[112].mxu1 %v1285_v61  ;;  %2417 = vmatmul.mubr.bf16.gmra.mrb[48].mxu0 %v1285_v61  ;;  %v12556_v61 = vld [vmem:[%s17504_s3 + $0x3e0] ss:$12 sps:$4 sm:$0xff]  }
 0x28c   : >> { %10517 = vmatprep.mubr.msk.bf16.mxu1 %vm392_vm0, %v1288_v7  ;;  %10501 = vmatprep.mubr.msk.bf16.mxu0 %vm392_vm0, %v1288_v7  ;;  %v12553_v7 = vld [vmem:[%s17504_s3 + $0x3d8] ss:$12 sps:$4 sm:$0xff]  }
 0x28e   : >> { %v14509_v4 = vpop.f32.mrb[8].mxu1 }
 0x28f   : >> { %v1915_v22 = vpop.f32.mrb[9].mxu1 }
 0x290   : >> { %v14511_v12 = vpop.f32.mrb[10].mxu1 }
 0x291   : >> { %v1918_v15 = vpop.f32.mrb[11].mxu1 }
 0x293   : >> { %2594 = vmatmul.mubr.bf16.gmra.mrb[116].mxu1 %v1287_v26  ;;  %2427 = vmatmul.mubr.bf16.gmra.mrb[52].mxu0 %v1287_v26  ;;  %v12559_v26 = vld [vmem:[%s17504_s3 + $0x3f4] ss:$12 sps:$4 sm:$0xff]  }
 0x294   : >> { %10518 = vmatprep.mubr.msk.bf16.mxu1 %vm392_vm0, %v1290_v56  ;;  %10502 = vmatprep.mubr.msk.bf16.mxu0 %vm392_vm0, %v1290_v56  ;;  %v2631_v56 = vld [vmem:[%s14531_s18 + $0x30] sm:$0xff] }
 0x296   : >> { %v14518_v40 = vpop.f32.mrb[12].mxu1 }
 0x297   : >> { %v1923_v46 = vpop.f32.mrb[13].mxu1 }
 0x298   : >> { %v14520_v20 = vpop.f32.mrb[14].mxu1 }
 0x299   : >> { %v1926_v55 = vpop.f32.mrb[15].mxu1 }
 0x29a   : >> { %v12560_v55 = vld [vmem:[%s17504_s3 + $0x3f8] ss:$12 sps:$4 sm:$0xff]  }
 0x29b   : >> { %2602 = vmatmul.mubr.bf16.gmra.mrb[120].mxu1 %v1289_v51  ;;  %2437 = vmatmul.mubr.bf16.gmra.mrb[56].mxu0 %v1289_v51  ;;  %v2634_v51 = vld [vmem:[%s14531_s18 + $0x48] sm:$0xff] }
 0x29c   : >> { %10519 = vmatprep.mubr.msk.bf16.mxu1 %vm392_vm0, %v1292_v23  ;;  %10503 = vmatprep.mubr.msk.bf16.mxu0 %vm392_vm0, %v1292_v23  ;;  %v12557_v23 = vld [vmem:[%s17504_s3 + $0x3f0] ss:$12 sps:$4 sm:$0xff]  }
 0x29e   : >> { %v14526_v48 = vpop.f32.mrb[16].mxu1 }
 0x29f   : >> { %v1931_v35 = vpop.f32.mrb[17].mxu1 }
 0x2a0   : >> { %v14528_v32 = vpop.f32.mrb[18].mxu1  ;;  %v12563_v35 = vld [vmem:[%s17504_s3 + $0x40c] ss:$12 sps:$4 sm:$0xff]  }
 0x2a1   : >> { %v1934_v43 = vpop.f32.mrb[19].mxu1 }
 0x2a3   : >> { %2610 = vmatmul.mubr.bf16.gmra.mrb[124].mxu1 %v1291_v54  ;;  %2447 = vmatmul.mubr.bf16.gmra.mrb[60].mxu0 %v1291_v54  ;;  %v12564_v54 = vld [vmem:[%s17504_s3 + $0x410] ss:$12 sps:$4 sm:$0xff]  }
 0x2a4   : >> { %10623 = vmatprep.mubr.msk.bf16.mxu1 %vm392_vm0, %v2626_v18  ;;  %10607 = vmatprep.mubr.msk.bf16.mxu0 %vm392_vm0, %v2626_v18  ;;  %v12561_v18 = vld [vmem:[%s17504_s3 + $0x408] ss:$12 sps:$4 sm:$0xff]  }
 0x2a6   : >> { %v14536_v27 = vpop.f32.mrb[20].mxu1 }
 0x2a7   : >> { %v1939_v44 = vpop.f32.mrb[21].mxu1 }
 0x2a8   : >> { %v14538_v39 = vpop.f32.mrb[22].mxu1 }
 0x2a9   : >> { %v1942_v63 = vpop.f32.mrb[23].mxu1 }
 0x2aa   : >> { %v2633_v63 = vld [vmem:[%s14531_s18 + $0x40] sm:$0xff] }
 0x2ab   : >> { %3172 = vmatmul.mubr.bf16.vlgmr.msra.gmra.mrb[128].mxu1 %v2625_v52  ;;  %2979 = vmatmul.mubr.bf16.vlgmr.msra.gmra.mrb[0].mxu0 %v2625_v52  ;;  %v12567_v52 = vld [vmem:[%s17504_s3 + $0x424] ss:$12 sps:$4 sm:$0xff]  }
 0x2ac   : >> { %3918 = vmatpush1.bf16.msra.mxu1 %v12536_v50  ;;  %3725 = vmatpush1.bf16.msra.mxu0 %v12533_v45 }
 0x2ad   : >> { %10624 = vmatprep.mubr.msk.bf16.mxu1 %vm392_vm0, %v2628_v8  ;;  %10608 = vmatprep.mubr.msk.bf16.mxu0 %vm392_vm0, %v2628_v8  ;;  %v2636_v8 = vld [vmem:[%s14531_s18 + $0x58] sm:$0xff] }
 0x2ae   : >> { %v14558_v10 = vpop.f32.mrb[24].mxu1  ;;  %3919 = vmatprep.subr.bf16.mxu1 %v13328_v19  ;;  %3726 = vmatprep.subr.bf16.mxu0 %v12539_v53  ;;  %v12568_v53 = vld [vmem:[%s17504_s3 + $0x428] ss:$12 sps:$4 sm:$0xff]  }
 0x2af   : >> { %v1947_v30 = vpop.f32.mrb[25].mxu1 }
 0x2b0   : >> { %v14565_v16 = vpop.f32.mrb[26].mxu1  ;;  %3920 = vmatpush1.bf16.msra.mxu1 %v12540_v3  ;;  %3727 = vmatpush1.bf16.msra.mxu0 %v12537_v57  ;;  %v12565_v3 = vld [vmem:[%s17504_s3 + $0x420] ss:$12 sps:$4 sm:$0xff]   ;;  %v12571_v57 = vld [vmem:[%s17504_s3 + $0x43c] ss:$12 sps:$4 sm:$0xff]  }
 0x2b1   : >> { %v1950_v24 = vpop.f32.mrb[27].mxu1  ;;  %3921 = vmatprep.subr.bf16.mxu1 %v13328_v19  ;;  %3728 = vmatprep.subr.bf16.mxu0 %v12543_v41  ;;  %v12572_v41 = vld [vmem:[%s17504_s3 + $0x440] ss:$12 sps:$4 sm:$0xff]  }
 0x2b3   : >> { %3180 = vmatmul.mubr.bf16.gmra.mrb[132].mxu1 %v2627_v31  ;;  %2989 = vmatmul.mubr.bf16.gmra.mrb[4].mxu0 %v2627_v31  ;;  %v12569_v31 = vld [vmem:[%s17504_s3 + $0x438] ss:$12 sps:$4 sm:$0xff]  }
 0x2b4   : >> { %10625 = vmatprep.mubr.msk.bf16.mxu1 %vm392_vm0, %v2630_v29  ;;  %10609 = vmatprep.mubr.msk.bf16.mxu0 %vm392_vm0, %v2630_v29  ;;  %v12575_v29 = vld [vmem:[%s17504_s3 + $0x454] ss:$12 sps:$4 sm:$0xff]  }
 0x2b5   : >> { %3922 = vmatpush1.bf16.msra.mxu1 %v12544_v62  ;;  %3729 = vmatpush1.bf16.msra.mxu0 %v12541_v38  ;;  %v2635_v38 = vld [vmem:[%s14531_s18 + $0x50] sm:$0xff] }
 0x2b6   : >> { %v14584_v28 = vpop.f32.mrb[28].mxu1  ;;  %3923 = vmatprep.subr.bf16.mxu1 %v13328_v19  ;;  %3730 = vmatprep.subr.bf16.mxu0 %v12547_v13 }
 0x2b7   : >> { %v1955_v9 = vpop.f32.mrb[29].mxu1 }
 0x2b8   : >> { %v14593_v6 = vpop.f32.mrb[30].mxu1  ;;  %v12573_v9 = vld [vmem:[%s17504_s3 + $0x450] ss:$12 sps:$4 sm:$0xff]  }
 0x2b9   : >> { %v1958_v36 = vpop.f32.mrb[31].mxu1  ;;  %3924 = vmatpush1.bf16.msra.mxu1 %v12548_v60  ;;  %3731 = vmatpush1.bf16.msra.mxu0 %v12545_v42  ;;  %v2638_v60 = vld [vmem:[%s14531_s18 + $0x68] sm:$0xff]  ;;  %v12576_v42 = vld [vmem:[%s17504_s3 + $0x458] ss:$12 sps:$4 sm:$0xff]  }
 0x2ba   : >> { %3925 = vmatprep.subr.bf16.mxu1 %v13328_v19  ;;  %3732 = vmatprep.subr.bf16.mxu0 %v12551_v37  ;;  %v12579_v37 = vld [vmem:[%s17504_s3 + $0x46c] ss:$12 sps:$4 sm:$0xff]  }
 0x2bb   : >> { %3188 = vmatmul.mubr.bf16.gmra.mrb[136].mxu1 %v2629_v34  ;;  %2999 = vmatmul.mubr.bf16.gmra.mrb[8].mxu0 %v2629_v34  ;;  %v12580_v34 = vld [vmem:[%s17504_s3 + $0x470] ss:$12 sps:$4 sm:$0xff]  }
 0x2bc   : >> { %10626 = vmatprep.mubr.msk.bf16.mxu1 %vm392_vm0, %v2632_v25  ;;  %10610 = vmatprep.mubr.msk.bf16.mxu0 %vm392_vm0, %v2632_v25  ;;  %v12577_v25 = vld [vmem:[%s17504_s3 + $0x468] ss:$12 sps:$4 sm:$0xff]  }
 0x2bd   : >> { %3926 = vmatpush1.bf16.msra.mxu1 %v12552_v5  ;;  %3733 = vmatpush1.bf16.msra.mxu0 %v12549_v47  ;;  %v12583_v47 = vld [vmem:[%s17504_s3 + $0x484] ss:$12 sps:$4 sm:$0xff]  }
 0x2be   : >> { %v14612_v0 = vpop.f32.mrb[32].mxu1  ;;  %3927 = vmatprep.subr.bf16.mxu1 %v13328_v19  ;;  %3734 = vmatprep.subr.bf16.mxu0 %v12555_v14 }
 0x2bf   : >> { %v1963_v22 = vpop.f32.mrb[33].mxu1 }
 0x2c0   : >> { %v14621_v15 = vpop.f32.mrb[34].mxu1  ;;  %v2640_v22 = vld [vmem:[%s14531_s18 + $0x78] sm:$0xff] }
 0x2c1   : >> { %v1966_v46 = vpop.f32.mrb[35].mxu1  ;;  %3928 = vmatpush1.bf16.msra.mxu1 %v12556_v61  ;;  %3735 = vmatpush1.bf16.msra.mxu0 %v12553_v7  ;;  %v2637_v61 = vld [vmem:[%s14531_s18 + $0x60] sm:$0xff] }
 0x2c2   : >> { %3929 = vmatprep.subr.bf16.mxu1 %v13328_v19  ;;  %3736 = vmatprep.subr.bf16.mxu0 %v12559_v26 }
 0x2c3   : >> { %3196 = vmatmul.mubr.bf16.gmra.mrb[140].mxu1 %v2631_v56  ;;  %3009 = vmatmul.mubr.bf16.gmra.mrb[12].mxu0 %v2631_v56 }
 0x2c4   : >> { %10627 = vmatprep.mubr.msk.bf16.mxu1 %vm392_vm0, %v2634_v51  ;;  %10611 = vmatprep.mubr.msk.bf16.mxu0 %vm392_vm0, %v2634_v51  ;;  %v2639_v51 = vld [vmem:[%s14531_s18 + $0x70] sm:$0xff] }
 0x2c5   : >> { %3930 = vmatpush1.bf16.msra.mxu1 %v12560_v55  ;;  %3737 = vmatpush1.bf16.msra.mxu0 %v12557_v23  ;;  %v2642_v23 = vld [vmem:[%s14531_s18 + $0x88] sm:$0xff] }
 0x2c6   : >> { %v14640_v43 = vpop.f32.mrb[36].mxu1  ;;  %3931 = vmatprep.subr.bf16.mxu1 %v13328_v19  ;;  %3738 = vmatprep.subr.bf16.mxu0 %v12563_v35 }
 0x2c7   : >> { %v1971_v44 = vpop.f32.mrb[37].mxu1 }
 0x2c8   : >> { %v14649_v50 = vpop.f32.mrb[38].mxu1  ;;  %v2641_v44 = vld [vmem:[%s14531_s18 + $0x80] sm:$0xff] }
 0x2c9   : >> { %v1974_v45 = vpop.f32.mrb[39].mxu1  ;;  %3932 = vmatpush1.bf16.msra.mxu1 %v12564_v54  ;;  %3739 = vmatpush1.bf16.msra.mxu0 %v12561_v18 }
 0x2ca   : >> { %3933 = vmatprep.subr.bf16.mxu1 %v13328_v19  ;;  %3740 = vmatprep.subr.bf16.mxu0 %v12567_v52 }
 0x2cb   : >> { %3204 = vmatmul.mubr.bf16.gmra.mrb[144].mxu1 %v2633_v63  ;;  %3019 = vmatmul.mubr.bf16.gmra.mrb[16].mxu0 %v2633_v63  ;;  %v2644_v63 = vld [vmem:[%s14531_s18 + $0x98] sm:$0xff] }
 0x2cc   : >> { %10628 = vmatprep.mubr.msk.bf16.mxu1 %vm392_vm0, %v2636_v8  ;;  %10612 = vmatprep.mubr.msk.bf16.mxu0 %vm392_vm0, %v2636_v8 }
 0x2cd   : >> { %3934 = vmatpush1.bf16.msra.mxu1 %v12568_v53  ;;  %3741 = vmatpush1.bf16.msra.mxu0 %v12565_v3  ;;  %v2643_v3 = vld [vmem:[%s14531_s18 + $0x90] sm:$0xff] }
 0x2ce   : >> { %v14668_v30 = vpop.f32.mrb[40].mxu1  ;;  %3935 = vmatprep.subr.bf16.mxu1 %v13328_v19  ;;  %3742 = vmatprep.subr.bf16.mxu0 %v12571_v57 }
 0x2cf   : >> { %v1979_v24 = vpop.f32.mrb[41].mxu1 }
 0x2d0   : >> { %v14677_v62 = vpop.f32.mrb[42].mxu1 }
 0x2d1   : >> { %v1982_v13 = vpop.f32.mrb[43].mxu1  ;;  %3936 = vmatpush1.bf16.msra.mxu1 %v12572_v41  ;;  %3743 = vmatpush1.bf16.msra.mxu0 %v12569_v31  ;;  %v2646_v41 = vld [vmem:[%s14531_s18 + $0xa8] sm:$0xff] }
 0x2d2   : >> { %3937 = vmatprep.subr.bf16.mxu1 %v13328_v19  ;;  %3744 = vmatprep.subr.bf16.mxu0 %v12575_v29 }
 0x2d3   : >> { %3212 = vmatmul.mubr.bf16.gmra.mrb[148].mxu1 %v2635_v38  ;;  %3029 = vmatmul.mubr.bf16.gmra.mrb[20].mxu0 %v2635_v38  ;;  %v2645_v38 = vld [vmem:[%s14531_s18 + $0xa0] sm:$0xff] }
 0x2d4   : >> { %10629 = vmatprep.mubr.msk.bf16.mxu1 %vm392_vm0, %v2638_v60  ;;  %10613 = vmatprep.mubr.msk.bf16.mxu0 %vm392_vm0, %v2638_v60  ;;  %v2648_v60 = vld [vmem:[%s14531_s18 + $0xb8] sm:$0xff] }
 0x2d5   : >> { %3938 = vmatpush1.bf16.msra.mxu1 %v12576_v42  ;;  %3745 = vmatpush1.bf16.msra.mxu0 %v12573_v9 }
 0x2d6   : >> { %v14696_v36 = vpop.f32.mrb[44].mxu1  ;;  %3939 = vmatprep.subr.bf16.mxu1 %v13328_v19  ;;  %3746 = vmatprep.subr.bf16.mxu0 %v12579_v37 }
 0x2d7   : >> { %v1987_v5 = vpop.f32.mrb[45].mxu1 }
 0x2d8   : >> { %v14705_v14 = vpop.f32.mrb[46].mxu1 }
 0x2d9   : >> { %v1990_v7 = vpop.f32.mrb[47].mxu1  ;;  %3940 = vmatpush1.bf16.msra.mxu1 %v12580_v34  ;;  %3747 = vmatpush1.bf16.msra.mxu0 %v12577_v25  ;;  %v2647_v25 = vld [vmem:[%s14531_s18 + $0xb0] sm:$0xff] }
 0x2da   : >> { %4695 = vmatprep.subr.bf16.mxu1 %v13328_v19  ;;  %4502 = vmatprep.subr.bf16.mxu0 %v12583_v47 }
 0x2db   : >> { %3220 = vmatmul.mubr.bf16.gmra.mrb[152].mxu1 %v2637_v61  ;;  %3039 = vmatmul.mubr.bf16.gmra.mrb[24].mxu0 %v2637_v61  ;;  %v2650_v61 = vld [vmem:[%s14531_s18 + $0xc8] sm:$0xff] }
 0x2dc   : >> { %10630 = vmatprep.mubr.msk.bf16.mxu1 %vm392_vm0, %v2640_v22  ;;  %10614 = vmatprep.mubr.msk.bf16.mxu0 %vm392_vm0, %v2640_v22 }
 0x2de   : >> { %v14712_v26 = vpop.f32.mrb[48].mxu1 }
 0x2df   : >> { %v1995_v56 = vpop.f32.mrb[49].mxu1 }
 0x2e0   : >> { %v14714_v46 = vpop.f32.mrb[50].mxu1 }
 0x2e1   : >> { %v1998_v55 = vpop.f32.mrb[51].mxu1 }
 0x2e3   : >> { %3228 = vmatmul.mubr.bf16.gmra.mrb[156].mxu1 %v2639_v51  ;;  %3049 = vmatmul.mubr.bf16.gmra.mrb[28].mxu0 %v2639_v51  ;;  %v2649_v51 = vld [vmem:[%s14531_s18 + $0xc0] sm:$0xff] }
 0x2e4   : >> { %10631 = vmatprep.mubr.msk.bf16.mxu1 %vm392_vm0, %v2642_v23  ;;  %10615 = vmatprep.mubr.msk.bf16.mxu0 %vm392_vm0, %v2642_v23  ;;  %v2652_v23 = vld [vmem:[%s14531_s18 + $0xd8] sm:$0xff] }
 0x2e6   : >> { %v14720_v35 = vpop.f32.mrb[52].mxu1 }
 0x2e7   : >> { %v2003_v54 = vpop.f32.mrb[53].mxu1 }
 0x2e8   : >> { %v14722_v18 = vpop.f32.mrb[54].mxu1 }
 0x2e9   : >> { %v2006_v52 = vpop.f32.mrb[55].mxu1 }
 0x2eb   : >> { %3236 = vmatmul.mubr.bf16.gmra.mrb[160].mxu1 %v2641_v44  ;;  %3059 = vmatmul.mubr.bf16.gmra.mrb[32].mxu0 %v2641_v44 }
 0x2ec   : >> { %10632 = vmatprep.mubr.msk.bf16.mxu1 %vm392_vm0, %v2644_v63  ;;  %10616 = vmatprep.mubr.msk.bf16.mxu0 %vm392_vm0, %v2644_v63  ;;  %v2651_v63 = vld [vmem:[%s14531_s18 + $0xd0] sm:$0xff] }
 0x2ee   : >> { %v14728_v45 = vpop.f32.mrb[56].mxu1 }
 0x2ef   : >> { %v2011_v8 = vpop.f32.mrb[57].mxu1 }
 0x2f0   : >> { %v14730_v53 = vpop.f32.mrb[58].mxu1 }
 0x2f1   : >> { %v2014_v57 = vpop.f32.mrb[59].mxu1 }
 0x2f3   : >> { %3244 = vmatmul.mubr.bf16.gmra.mrb[164].mxu1 %v2643_v3  ;;  %3069 = vmatmul.mubr.bf16.gmra.mrb[36].mxu0 %v2643_v3  ;;  %v2654_v3 = vld [vmem:[%s14531_s18 + $0xe8] sm:$0xff] }
 0x2f4   : >> { %10633 = vmatprep.mubr.msk.bf16.mxu1 %vm392_vm0, %v2646_v41  ;;  %10617 = vmatprep.mubr.msk.bf16.mxu0 %vm392_vm0, %v2646_v41 }
 0x2f6   : >> { %v14736_v31 = vpop.f32.mrb[60].mxu1 }
 0x2f7   : >> { %v2019_v24 = vpop.f32.mrb[61].mxu1 }
 0x2f8   : >> { %v14738_v29 = vpop.f32.mrb[62].mxu1 }
 0x2f9   : >> { %v2022_v13 = vpop.f32.mrb[63].mxu1 }
 0x2fb   : >> { %3252 = vmatmul.mubr.bf16.gmra.mrb[168].mxu1 %v2645_v38  ;;  %3079 = vmatmul.mubr.bf16.gmra.mrb[40].mxu0 %v2645_v38  ;;  %v2653_v38 = vld [vmem:[%s14531_s18 + $0xe0] sm:$0xff] }
 0x2fc   : >> { %10634 = vmatprep.mubr.msk.bf16.mxu1 %vm392_vm0, %v2648_v60  ;;  %10618 = vmatprep.mubr.msk.bf16.mxu0 %vm392_vm0, %v2648_v60  ;;  %v2656_v60 = vld [vmem:[%s14531_s18 + $0xf8] sm:$0xff] }
 0x2fe   : >> { %v2491_v42 = vpop.f32.mrb[64].mxu1 }
 0x2ff   : >> { %v14745_v9 = vadd.f32 %v2491_v42, %v14493_v21  ;;  %v2493_v37 = vpop.f32.mrb[65].mxu1 }
 0x300   : >> { %v2494_v34 = vpop.f32.mrb[66].mxu1 }
 0x301   : >> { %v14749_v5 = vadd.f32 %v2494_v34, %v14495_v33  ;;  %v2496_v47 = vpop.f32.mrb[67].mxu1 }
 0x303   : >> { %3260 = vmatmul.mubr.bf16.gmra.mrb[172].mxu1 %v2647_v25  ;;  %3089 = vmatmul.mubr.bf16.gmra.mrb[44].mxu0 %v2647_v25  ;;  %v2655_v25 = vld [vmem:[%s14531_s18 + $0xf0] sm:$0xff]  ;;  %s11600_s18 = sadd.s32 512, %s14053_s15 }
 0x304   : >> { %10635 = vmatprep.mubr.msk.bf16.mxu1 %vm392_vm0, %v2650_v61  ;;  %10619 = vmatprep.mubr.msk.bf16.mxu0 %vm392_vm0, %v2650_v61  ;;  %v3404_v61 = vld [vmem:[%s14792_s24 + $0x8] sm:$0xff]  ;;  %s4176_s25 = sshra.s32 %s11600_s18, 4 }
 0x305   : >> { %s11601_s26 = sshll.u32 %s4176_s25, 4 }
 0x306   : >> { %v2499_v7 = vpop.f32.mrb[68].mxu1  ;;  %s15071_s15 = scalar_lea.vmem [#allocation2], %s11601_s26 }
 0x307   : >> { %v14755_v21 = vadd.f32 %v2499_v7, %v14501_v17  ;;  %v2501_v22 = vpop.f32.mrb[69].mxu1 }
 0x308   : >> { %v2502_v56 = vpop.f32.mrb[70].mxu1 }
 0x309   : >> { %v14759_v33 = vadd.f32 %v2502_v56, %v14503_v1  ;;  %v2504_v55 = vpop.f32.mrb[71].mxu1  ;;  %v3403_v56 = vld [vmem:[%s14792_s24] sm:$0xff] }
 0x30b   : >> { %3268 = vmatmul.mubr.bf16.gmra.mrb[176].mxu1 %v2649_v51  ;;  %3099 = vmatmul.mubr.bf16.gmra.mrb[48].mxu0 %v2649_v51  ;;  %v12584_v51 = vld [vmem:[%s17504_s3 + $0x488] ss:$12 sps:$4 sm:$0xff]  }
 0x30c   : >> { %10636 = vmatprep.mubr.msk.bf16.mxu1 %vm392_vm0, %v2652_v23  ;;  %10620 = vmatprep.mubr.msk.bf16.mxu0 %vm392_vm0, %v2652_v23 }
 0x30e   : >> { %v2507_v54 = vpop.f32.mrb[72].mxu1 }
 0x30f   : >> { %v14765_v17 = vadd.f32 %v2507_v54, %v14509_v4  ;;  %v2509_v44 = vpop.f32.mrb[73].mxu1  ;;  %v12581_v54 = vld [vmem:[%s17504_s3 + $0x480] ss:$12 sps:$4 sm:$0xff]  }
 0x310   : >> { %v2510_v52 = vpop.f32.mrb[74].mxu1  ;;  %v3406_v44 = vld [vmem:[%s14792_s24 + $0x18] sm:$0xff] }
 0x311   : >> { %v14769_v1 = vadd.f32 %v2510_v52, %v14511_v12  ;;  %v2512_v8 = vpop.f32.mrb[75].mxu1  ;;  %v12588_v52 = vld [vmem:[%s17504_s3 + $0x4a0] ss:$12 sps:$4 sm:$0xff]  }
 0x312   : >> { %v12591_v8 = vld [vmem:[%s17504_s3 + $0x4b4] ss:$12 sps:$4 sm:$0xff]  }
 0x313   : >> { %3276 = vmatmul.mubr.bf16.gmra.mrb[180].mxu1 %v2651_v63  ;;  %3109 = vmatmul.mubr.bf16.gmra.mrb[52].mxu0 %v2651_v63 }
 0x314   : >> { %10637 = vmatprep.mubr.msk.bf16.mxu1 %vm392_vm0, %v2654_v3  ;;  %10621 = vmatprep.mubr.msk.bf16.mxu0 %vm392_vm0, %v2654_v3 }
 0x316   : >> { %v2515_v57 = vpop.f32.mrb[76].mxu1 }
 0x317   : >> { %v14776_v4 = vadd.f32 %v2515_v57, %v14518_v40  ;;  %v2517_v41 = vpop.f32.mrb[77].mxu1 }
 0x318   : >> { %v2518_v24 = vpop.f32.mrb[78].mxu1 }
 0x319   : >> { %v14780_v12 = vadd.f32 %v2518_v24, %v14520_v20  ;;  %v2520_v13 = vpop.f32.mrb[79].mxu1  ;;  %v3405_v24 = vld [vmem:[%s14792_s24 + $0x10] sm:$0xff] }
 0x31b   : >> { %3284 = vmatmul.mubr.bf16.gmra.mrb[184].mxu1 %v2653_v38  ;;  %3119 = vmatmul.mubr.bf16.gmra.mrb[56].mxu0 %v2653_v38 }
 0x31c   : >> { %10638 = vmatprep.mubr.msk.bf16.mxu1 %vm392_vm0, %v2656_v60  ;;  %10622 = vmatprep.mubr.msk.bf16.mxu0 %vm392_vm0, %v2656_v60  ;;  %v3408_v60 = vld [vmem:[%s14792_s24 + $0x28] sm:$0xff] }
 0x31e   : >> { %v2523_v42 = vpop.f32.mrb[80].mxu1 }
 0x31f   : >> { %v14786_v40 = vadd.f32 %v2523_v42, %v14526_v48  ;;  %v2525_v37 = vpop.f32.mrb[81].mxu1  ;;  %v12592_v42 = vld [vmem:[%s17504_s3 + $0x4b8] ss:$12 sps:$4 sm:$0xff]  }
 0x320   : >> { %v2526_v34 = vpop.f32.mrb[82].mxu1  ;;  %v12596_v37 = vld [vmem:[%s17504_s3 + $0x4d0] ss:$12 sps:$4 sm:$0xff]  }
 0x321   : >> { %v14790_v47 = vadd.f32 %v2526_v34, %v14528_v32  ;;  %v2528_v20 = vpop.f32.mrb[83].mxu1 }
 0x323   : >> { %3292 = vmatmul.mubr.bf16.gmra.mrb[188].mxu1 %v2655_v25  ;;  %3129 = vmatmul.mubr.bf16.gmra.mrb[60].mxu0 %v2655_v25  ;;  %v12593_v25 = vld [vmem:[%s17504_s3 + $0x4c8] ss:$12 sps:$4 sm:$0xff]  }
 0x324   : >> { %10742 = vmatprep.mubr.msk.bf16.mxu1 %vm392_vm0, %v3404_v61  ;;  %10726 = vmatprep.mubr.msk.bf16.mxu0 %vm392_vm0, %v3404_v61 }
 0x326   : >> { %v2531_v48 = vpop.f32.mrb[84].mxu1 }
 0x327   : >> { %v14798_v7 = vadd.f32 %v2531_v48, %v14536_v27  ;;  %v2533_v22 = vpop.f32.mrb[85].mxu1  ;;  %v12587_v27 = vld [vmem:[%s17504_s3 + $0x49c] ss:$12 sps:$4 sm:$0xff]   ;;  %v12599_v48 = vld [vmem:[%s17504_s3 + $0x4e4] ss:$12 sps:$4 sm:$0xff]  }
 0x328   : >> { %v2534_v32 = vpop.f32.mrb[86].mxu1 }
 0x329   : >> { %v14805_v55 = vadd.f32 %v2534_v32, %v14538_v39  ;;  %v2536_v23 = vpop.f32.mrb[87].mxu1  ;;  %v12585_v39 = vld [vmem:[%s17504_s3 + $0x498] ss:$12 sps:$4 sm:$0xff]  }
 0x32a   : >> { %v3407_v32 = vld [vmem:[%s14792_s24 + $0x20] sm:$0xff]  ;;  %v3410_v23 = vld [vmem:[%s14792_s24 + $0x38] sm:$0xff] }
 0x32b   : >> { %3950 = vmatmul.mubr.bf16.vlgmr.msra.gmra.mrb[192].mxu1 %v3403_v56  ;;  %3757 = vmatmul.mubr.bf16.vlgmr.msra.gmra.mrb[0].mxu0 %v3403_v56 }
 0x32c   : >> { %4696 = vmatpush1.bf16.msra.mxu1 %v12584_v51  ;;  %4503 = vmatpush1.bf16.msra.mxu0 %v12581_v54  ;;  %v12600_v54 = vld [vmem:[%s17504_s3 + $0x4e8] ss:$12 sps:$4 sm:$0xff]  }
 0x32d   : >> { %10743 = vmatprep.mubr.msk.bf16.mxu1 %vm392_vm0, %v3406_v44  ;;  %10727 = vmatprep.mubr.msk.bf16.mxu0 %vm392_vm0, %v3406_v44  ;;  %v12604_v44 = vld [vmem:[%s17504_s3 + $0x500] ss:$12 sps:$4 sm:$0xff]  }
 0x32e   : >> { %v2539_v63 = vpop.f32.mrb[88].mxu1  ;;  %4697 = vmatprep.subr.bf16.mxu1 %v13328_v19  ;;  %4504 = vmatprep.subr.bf16.mxu0 %v12587_v27 }
 0x32f   : >> { %v14827_v3 = vadd.f32 %v2539_v63, %v14558_v10  ;;  %v2541_v57 = vpop.f32.mrb[89].mxu1  ;;  %v12589_v10 = vld [vmem:[%s17504_s3 + $0x4b0] ss:$12 sps:$4 sm:$0xff]  }
 0x330   : >> { %v2542_v41 = vpop.f32.mrb[90].mxu1  ;;  %4698 = vmatpush1.bf16.msra.mxu1 %v12588_v52  ;;  %4505 = vmatpush1.bf16.msra.mxu0 %v12585_v39  ;;  %v12601_v52 = vld [vmem:[%s17504_s3 + $0x4f8] ss:$12 sps:$4 sm:$0xff]  }
 0x331   : >> { %v14831_v38 = vadd.f32 %v2542_v41, %v14565_v16  ;;  %v2544_v13 = vpop.f32.mrb[91].mxu1  ;;  %4699 = vmatprep.subr.bf16.mxu1 %v13328_v19  ;;  %4506 = vmatprep.subr.bf16.mxu0 %v12591_v8  ;;  %v12595_v16 = vld [vmem:[%s17504_s3 + $0x4cc] ss:$12 sps:$4 sm:$0xff]   ;;  %v12607_v8 = vld [vmem:[%s17504_s3 + $0x514] ss:$12 sps:$4 sm:$0xff]  }
 0x332   : >> { %v3409_v41 = vld [vmem:[%s14792_s24 + $0x30] sm:$0xff] }
 0x333   : >> { %3958 = vmatmul.mubr.bf16.gmra.mrb[196].mxu1 %v3405_v24  ;;  %3767 = vmatmul.mubr.bf16.gmra.mrb[4].mxu0 %v3405_v24 }
 0x334   : >> { %10744 = vmatprep.mubr.msk.bf16.mxu1 %vm392_vm0, %v3408_v60  ;;  %10728 = vmatprep.mubr.msk.bf16.mxu0 %vm392_vm0, %v3408_v60  ;;  %v3412_v60 = vld [vmem:[%s14792_s24 + $0x48] sm:$0xff] }
 0x335   : >> { %4700 = vmatpush1.bf16.msra.mxu1 %v12592_v42  ;;  %4507 = vmatpush1.bf16.msra.mxu0 %v12589_v10  ;;  %v12608_v42 = vld [vmem:[%s17504_s3 + $0x518] ss:$12 sps:$4 sm:$0xff]   ;;  %v12612_v10 = vld [vmem:[%s17504_s3 + $0x530] ss:$12 sps:$4 sm:$0xff]  }
 0x336   : >> { %v2547_v34 = vpop.f32.mrb[92].mxu1  ;;  %4701 = vmatprep.subr.bf16.mxu1 %v13328_v19  ;;  %4508 = vmatprep.subr.bf16.mxu0 %v12595_v16 }
 0x337   : >> { %v14854_v20 = vadd.f32 %v2547_v34, %v14584_v28  ;;  %v2549_v61 = vpop.f32.mrb[93].mxu1  ;;  %v12597_v28 = vld [vmem:[%s17504_s3 + $0x4e0] ss:$12 sps:$4 sm:$0xff]  }
 0x338   : >> { %v2550_v22 = vpop.f32.mrb[94].mxu1  ;;  %v12615_v61 = vld [vmem:[%s17504_s3 + $0x544] ss:$12 sps:$4 sm:$0xff]  }
 0x339   : >> { %v14861_v56 = vadd.f32 %v2550_v22, %v14593_v6  ;;  %v2552_v51 = vpop.f32.mrb[95].mxu1  ;;  %4702 = vmatpush1.bf16.msra.mxu1 %v12596_v37  ;;  %4509 = vmatpush1.bf16.msra.mxu0 %v12593_v25  ;;  %v12603_v6 = vld [vmem:[%s17504_s3 + $0x4fc] ss:$12 sps:$4 sm:$0xff]   ;;  %v3411_v22 = vld [vmem:[%s14792_s24 + $0x40] sm:$0xff] }
 0x33a   : >> { %4703 = vmatprep.subr.bf16.mxu1 %v13328_v19  ;;  %4510 = vmatprep.subr.bf16.mxu0 %v12599_v48  ;;  %v12609_v37 = vld [vmem:[%s17504_s3 + $0x528] ss:$12 sps:$4 sm:$0xff]  }
 0x33b   : >> { %3966 = vmatmul.mubr.bf16.gmra.mrb[200].mxu1 %v3407_v32  ;;  %3777 = vmatmul.mubr.bf16.gmra.mrb[8].mxu0 %v3407_v32 }
 0x33c   : >> { %10745 = vmatprep.mubr.msk.bf16.mxu1 %vm392_vm0, %v3410_v23  ;;  %10729 = vmatprep.mubr.msk.bf16.mxu0 %vm392_vm0, %v3410_v23  ;;  %v3414_v23 = vld [vmem:[%s14792_s24 + $0x58] sm:$0xff] }
 0x33d   : >> { %4704 = vmatpush1.bf16.msra.mxu1 %v12600_v54  ;;  %4511 = vmatpush1.bf16.msra.mxu0 %v12597_v28  ;;  %v12616_v54 = vld [vmem:[%s17504_s3 + $0x548] ss:$12 sps:$4 sm:$0xff]   ;;  %v12620_v28 = vld [vmem:[%s17504_s3 + $0x560] ss:$12 sps:$4 sm:$0xff]  }
 0x33e   : >> { %v2555_v27 = vpop.f32.mrb[96].mxu1  ;;  %4705 = vmatprep.subr.bf16.mxu1 %v13328_v19  ;;  %4512 = vmatprep.subr.bf16.mxu0 %v12603_v6 }
 0x33f   : >> { %v14884_v39 = vadd.f32 %v2555_v27, %v14612_v0  ;;  %v2557_v63 = vpop.f32.mrb[97].mxu1  ;;  %v12605_v0 = vld [vmem:[%s17504_s3 + $0x510] ss:$12 sps:$4 sm:$0xff]  }
 0x340   : >> { %v2558_v57 = vpop.f32.mrb[98].mxu1  ;;  %v12623_v63 = vld [vmem:[%s17504_s3 + $0x574] ss:$12 sps:$4 sm:$0xff]  }
 0x341   : >> { %v14891_v24 = vadd.f32 %v2558_v57, %v14621_v15  ;;  %v2560_v13 = vpop.f32.mrb[99].mxu1  ;;  %4706 = vmatpush1.bf16.msra.mxu1 %v12604_v44  ;;  %4513 = vmatpush1.bf16.msra.mxu0 %v12601_v52  ;;  %v12611_v15 = vld [vmem:[%s17504_s3 + $0x52c] ss:$12 sps:$4 sm:$0xff]   ;;  %v3413_v57 = vld [vmem:[%s14792_s24 + $0x50] sm:$0xff] }
 0x342   : >> { %4707 = vmatprep.subr.bf16.mxu1 %v13328_v19  ;;  %4514 = vmatprep.subr.bf16.mxu0 %v12607_v8  ;;  %v12617_v44 = vld [vmem:[%s17504_s3 + $0x558] ss:$12 sps:$4 sm:$0xff]  }
 0x343   : >> { %3974 = vmatmul.mubr.bf16.gmra.mrb[204].mxu1 %v3409_v41  ;;  %3787 = vmatmul.mubr.bf16.gmra.mrb[12].mxu0 %v3409_v41 }
 0x344   : >> { %10746 = vmatprep.mubr.msk.bf16.mxu1 %vm392_vm0, %v3412_v60  ;;  %10730 = vmatprep.mubr.msk.bf16.mxu0 %vm392_vm0, %v3412_v60  ;;  %v3416_v60 = vld [vmem:[%s14792_s24 + $0x68] sm:$0xff] }
 0x345   : >> { %4708 = vmatpush1.bf16.msra.mxu1 %v12608_v42  ;;  %4515 = vmatpush1.bf16.msra.mxu0 %v12605_v0  ;;  %v12624_v42 = vld [vmem:[%s17504_s3 + $0x578] ss:$12 sps:$4 sm:$0xff]   ;;  %v12628_v0 = vld [vmem:[%s17504_s3 + $0x590] ss:$12 sps:$4 sm:$0xff]  }
 0x346   : >> { %v2563_v16 = vpop.f32.mrb[100].mxu1  ;;  %4709 = vmatprep.subr.bf16.mxu1 %v13328_v19  ;;  %4516 = vmatprep.subr.bf16.mxu0 %v12611_v15 }
 0x347   : >> { %v14914_v34 = vadd.f32 %v2563_v16, %v14640_v43  ;;  %v2565_v25 = vpop.f32.mrb[101].mxu1  ;;  %v12613_v43 = vld [vmem:[%s17504_s3 + $0x540] ss:$12 sps:$4 sm:$0xff]  }
 0x348   : >> { %v2566_v48 = vpop.f32.mrb[102].mxu1 }
 0x349   : >> { %v14921_v32 = vadd.f32 %v2566_v48, %v14649_v50  ;;  %v2568_v51 = vpop.f32.mrb[103].mxu1  ;;  %4710 = vmatpush1.bf16.msra.mxu1 %v12612_v10  ;;  %4517 = vmatpush1.bf16.msra.mxu0 %v12609_v37  ;;  %v12619_v50 = vld [vmem:[%s17504_s3 + $0x55c] ss:$12 sps:$4 sm:$0xff]  }
 0x34a   : >> { %4711 = vmatprep.subr.bf16.mxu1 %v13328_v19  ;;  %4518 = vmatprep.subr.bf16.mxu0 %v12615_v61  ;;  %v12625_v10 = vld [vmem:[%s17504_s3 + $0x588] ss:$12 sps:$4 sm:$0xff]   ;;  %v3415_v61 = vld [vmem:[%s14792_s24 + $0x60] sm:$0xff]  ;;  %v3418_v51 = vld [vmem:[%s14792_s24 + $0x78] sm:$0xff] }
 0x34b   : >> { %3982 = vmatmul.mubr.bf16.gmra.mrb[208].mxu1 %v3411_v22  ;;  %3797 = vmatmul.mubr.bf16.gmra.mrb[16].mxu0 %v3411_v22 }
 0x34c   : >> { %10747 = vmatprep.mubr.msk.bf16.mxu1 %vm392_vm0, %v3414_v23  ;;  %10731 = vmatprep.mubr.msk.bf16.mxu0 %vm392_vm0, %v3414_v23 }
 0x34d   : >> { %4712 = vmatpush1.bf16.msra.mxu1 %v12616_v54  ;;  %4519 = vmatpush1.bf16.msra.mxu0 %v12613_v43 }
 0x34e   : >> { %v2571_v6 = vpop.f32.mrb[104].mxu1  ;;  %4713 = vmatprep.subr.bf16.mxu1 %v13328_v19  ;;  %4520 = vmatprep.subr.bf16.mxu0 %v12619_v50 }
 0x34f   : >> { %v14944_v27 = vadd.f32 %v2571_v6, %v14668_v30  ;;  %v2573_v52 = vpop.f32.mrb[105].mxu1  ;;  %v12621_v30 = vld [vmem:[%s17504_s3 + $0x570] ss:$12 sps:$4 sm:$0xff]  }
 0x350   : >> { %v2574_v8 = vpop.f32.mrb[106].mxu1 }
 0x351   : >> { %v14951_v41 = vadd.f32 %v2574_v8, %v14677_v62  ;;  %v2576_v13 = vpop.f32.mrb[107].mxu1  ;;  %4714 = vmatpush1.bf16.msra.mxu1 %v12620_v28  ;;  %4521 = vmatpush1.bf16.msra.mxu0 %v12617_v44  ;;  %v12627_v62 = vld [vmem:[%s17504_s3 + $0x58c] ss:$12 sps:$4 sm:$0xff]  }
 0x352   : >> { %4715 = vmatprep.subr.bf16.mxu1 %v13328_v19  ;;  %4522 = vmatprep.subr.bf16.mxu0 %v12623_v63  ;;  %v3420_v28 = vld [vmem:[%s14792_s24 + $0x88] sm:$0xff]  ;;  %v3419_v63 = vld [vmem:[%s14792_s24 + $0x80] sm:$0xff] }
 0x353   : >> { %3990 = vmatmul.mubr.bf16.gmra.mrb[212].mxu1 %v3413_v57  ;;  %3807 = vmatmul.mubr.bf16.gmra.mrb[20].mxu0 %v3413_v57  ;;  %v3422_v57 = vld [vmem:[%s14792_s24 + $0x98] sm:$0xff] }
 0x354   : >> { %10748 = vmatprep.mubr.msk.bf16.mxu1 %vm392_vm0, %v3416_v60  ;;  %10732 = vmatprep.mubr.msk.bf16.mxu0 %vm392_vm0, %v3416_v60 }
 0x355   : >> { %4716 = vmatpush1.bf16.msra.mxu1 %v12624_v42  ;;  %4523 = vmatpush1.bf16.msra.mxu0 %v12621_v30  ;;  %v3421_v30 = vld [vmem:[%s14792_s24 + $0x90] sm:$0xff] }
 0x356   : >> { %v2579_v15 = vpop.f32.mrb[108].mxu1  ;;  %4717 = vmatprep.subr.bf16.mxu1 %v13328_v19  ;;  %4524 = vmatprep.subr.bf16.mxu0 %v12627_v62 }
 0x357   : >> { %v14974_v16 = vadd.f32 %v2579_v15, %v14696_v36  ;;  %v2581_v37 = vpop.f32.mrb[109].mxu1 }
 0x358   : >> { %v2582_v25 = vpop.f32.mrb[110].mxu1 }
 0x359   : >> { %v14978_v48 = vadd.f32 %v2582_v25, %v14705_v14  ;;  %v2584_v22 = vpop.f32.mrb[111].mxu1  ;;  %4718 = vmatpush1.bf16.msra.mxu1 %v12628_v0  ;;  %4525 = vmatpush1.bf16.msra.mxu0 %v12625_v10  ;;  %v3417_v14 = vld [vmem:[%s14792_s24 + $0x70] sm:$0xff]  ;;  %v3424_v0 = vld [vmem:[%s14792_s24 + $0xa8] sm:$0xff]  ;;  %v3423_v25 = vld [vmem:[%s14792_s24 + $0xa0] sm:$0xff] }
 0x35a   : >> { %v3426_v22 = vld [vmem:[%s14792_s24 + $0xb8] sm:$0xff] }
 0x35b   : >> { %3998 = vmatmul.mubr.bf16.gmra.mrb[216].mxu1 %v3415_v61  ;;  %3817 = vmatmul.mubr.bf16.gmra.mrb[24].mxu0 %v3415_v61 }
 0x35c   : >> { %10749 = vmatprep.mubr.msk.bf16.mxu1 %vm392_vm0, %v3418_v51  ;;  %10733 = vmatprep.mubr.msk.bf16.mxu0 %vm392_vm0, %v3418_v51 }
 0x35e   : >> { %v2587_v19 = vpop.f32.mrb[112].mxu1 }
 0x35f   : >> { %v14984_v36 = vadd.f32 %v2587_v19, %v14712_v26  ;;  %v2589_v23 = vpop.f32.mrb[113].mxu1 }
 0x360   : >> { %v2590_v54 = vpop.f32.mrb[114].mxu1 }
 0x361   : >> { %v14988_v43 = vadd.f32 %v2590_v54, %v14714_v46  ;;  %v2592_v50 = vpop.f32.mrb[115].mxu1  ;;  %v3425_v54 = vld [vmem:[%s14792_s24 + $0xb0] sm:$0xff] }
 0x362   : >> { %v3428_v50 = vld [vmem:[%s14792_s24 + $0xc8] sm:$0xff] }
 0x363   : >> { %4006 = vmatmul.mubr.bf16.gmra.mrb[220].mxu1 %v3417_v14  ;;  %3827 = vmatmul.mubr.bf16.gmra.mrb[28].mxu0 %v3417_v14 }
 0x364   : >> { %10750 = vmatprep.mubr.msk.bf16.mxu1 %vm392_vm0, %v3420_v28  ;;  %10734 = vmatprep.mubr.msk.bf16.mxu0 %vm392_vm0, %v3420_v28 }
 0x366   : >> { %v2595_v6 = vpop.f32.mrb[116].mxu1 }
 0x367   : >> { %v14994_v26 = vadd.f32 %v2595_v6, %v14720_v35  ;;  %v2597_v44 = vpop.f32.mrb[117].mxu1 }
 0x368   : >> { %v2598_v52 = vpop.f32.mrb[118].mxu1 }
 0x369   : >> { %v14998_v46 = vadd.f32 %v2598_v52, %v14722_v18  ;;  %v2600_v8 = vpop.f32.mrb[119].mxu1  ;;  %v3427_v52 = vld [vmem:[%s14792_s24 + $0xc0] sm:$0xff] }
 0x36a   : >> { %v3430_v8 = vld [vmem:[%s14792_s24 + $0xd8] sm:$0xff] }
 0x36b   : >> { %4014 = vmatmul.mubr.bf16.gmra.mrb[224].mxu1 %v3419_v63  ;;  %3837 = vmatmul.mubr.bf16.gmra.mrb[32].mxu0 %v3419_v63 }
 0x36c   : >> { %10751 = vmatprep.mubr.msk.bf16.mxu1 %vm392_vm0, %v3422_v57  ;;  %10735 = vmatprep.mubr.msk.bf16.mxu0 %vm392_vm0, %v3422_v57 }
 0x36e   : >> { %v2603_v13 = vpop.f32.mrb[120].mxu1 }
 0x36f   : >> { %v15004_v35 = vadd.f32 %v2603_v13, %v14728_v45  ;;  %v2605_v60 = vpop.f32.mrb[121].mxu1 }
 0x370   : >> { %v2606_v42 = vpop.f32.mrb[122].mxu1 }
 0x371   : >> { %v15008_v18 = vadd.f32 %v2606_v42, %v14730_v53  ;;  %v2608_v62 = vpop.f32.mrb[123].mxu1  ;;  %v3429_v42 = vld [vmem:[%s14792_s24 + $0xd0] sm:$0xff] }
 0x372   : >> { %v3432_v62 = vld [vmem:[%s14792_s24 + $0xe8] sm:$0xff] }
 0x373   : >> { %4022 = vmatmul.mubr.bf16.gmra.mrb[228].mxu1 %v3421_v30  ;;  %3847 = vmatmul.mubr.bf16.gmra.mrb[36].mxu0 %v3421_v30 }
 0x374   : >> { %10752 = vmatprep.mubr.msk.bf16.mxu1 %vm392_vm0, %v3424_v0  ;;  %10736 = vmatprep.mubr.msk.bf16.mxu0 %vm392_vm0, %v3424_v0 }
 0x376   : >> { %v2611_v15 = vpop.f32.mrb[124].mxu1 }
 0x377   : >> { %v15014_v45 = vadd.f32 %v2611_v15, %v14736_v31  ;;  %v2613_v10 = vpop.f32.mrb[125].mxu1 }
 0x378   : >> { %v2614_v37 = vpop.f32.mrb[126].mxu1 }
 0x379   : >> { %v15018_v53 = vadd.f32 %v2614_v37, %v14738_v29  ;;  %v2616_v61 = vpop.f32.mrb[127].mxu1  ;;  %v3431_v37 = vld [vmem:[%s14792_s24 + $0xe0] sm:$0xff] }
 0x37a   : >> { %v3434_v61 = vld [vmem:[%s14792_s24 + $0xf8] sm:$0xff] }
 0x37b   : >> { %4030 = vmatmul.mubr.bf16.gmra.mrb[232].mxu1 %v3423_v25  ;;  %3857 = vmatmul.mubr.bf16.gmra.mrb[40].mxu0 %v3423_v25 }
 0x37c   : >> { %10753 = vmatprep.mubr.msk.bf16.mxu1 %vm392_vm0, %v3426_v22  ;;  %10737 = vmatprep.mubr.msk.bf16.mxu0 %vm392_vm0, %v3426_v22 }
 0x37e   : >> { %v3173_v51 = vpop.f32.mrb[128].mxu1 }
 0x37f   : >> { %v15024_v31 = vadd.f32 %v3173_v51, %v14745_v9  ;;  %v3175_v19 = vpop.f32.mrb[129].mxu1 }
 0x380   : >> { %v3176_v23 = vpop.f32.mrb[130].mxu1 }
 0x381   : >> { %v15028_v29 = vadd.f32 %v3176_v23, %v14749_v5  ;;  %v3178_v14 = vpop.f32.mrb[131].mxu1  ;;  %v3433_v23 = vld [vmem:[%s14792_s24 + $0xf0] sm:$0xff]  ;;  %s11602_s24 = sshll.u32 %s13323_s22, 7  ;;  %s1254_s22 = sadd.s32 1, %s13323_s22  }
 0x382   : >> { %v4182_v14 = vld [vmem:[%s15071_s15 + $0x8] sm:$0xff]  ;;  %s15554_s14 = scalar_lea.vmem [#allocation3], %s11602_s24  ;;  %p1251_p6 = scmp.ge.s32.totalorder %s1254_s22, 10  }
 0x383   : >> { %4038 = vmatmul.mubr.bf16.gmra.mrb[236].mxu1 %v3425_v54  ;;  %3867 = vmatmul.mubr.bf16.gmra.mrb[44].mxu0 %v3425_v54 }
 0x384   : >> { %10754 = vmatprep.mubr.msk.bf16.mxu1 %vm392_vm0, %v3428_v50  ;;  %10738 = vmatprep.mubr.msk.bf16.mxu0 %vm392_vm0, %v3428_v50 }
 0x386   : >> { %v3181_v28 = vpop.f32.mrb[132].mxu1 }
 0x387   : >> { %v15034_v9 = vadd.f32 %v3181_v28, %v14755_v21  ;;  %v3183_v6 = vpop.f32.mrb[133].mxu1 }
 0x388   : >> { %v3184_v44 = vpop.f32.mrb[134].mxu1  ;;  %v4181_v6 = vld [vmem:[%s15071_s15] sm:$0xff] }
 0x389   : >> { %v15038_v5 = vadd.f32 %v3184_v44, %v14759_v33  ;;  %v3186_v63 = vpop.f32.mrb[135].mxu1 }
 0x38a   : >> { %v4184_v63 = vld [vmem:[%s15071_s15 + $0x18] sm:$0xff] }
 0x38b   : >> { %4046 = vmatmul.mubr.bf16.gmra.mrb[240].mxu1 %v3427_v52  ;;  %3877 = vmatmul.mubr.bf16.gmra.mrb[48].mxu0 %v3427_v52 }
 0x38c   : >> { %10755 = vmatprep.mubr.msk.bf16.mxu1 %vm392_vm0, %v3430_v8  ;;  %10739 = vmatprep.mubr.msk.bf16.mxu0 %vm392_vm0, %v3430_v8 }
 0x38e   : >> { %v3189_v57 = vpop.f32.mrb[136].mxu1 }
 0x38f   : >> { %v15044_v21 = vadd.f32 %v3189_v57, %v14765_v17  ;;  %v3191_v13 = vpop.f32.mrb[137].mxu1 }
 0x390   : >> { %v3192_v60 = vpop.f32.mrb[138].mxu1 }
 0x391   : >> { %v15048_v33 = vadd.f32 %v3192_v60, %v14769_v1  ;;  %v3194_v30 = vpop.f32.mrb[139].mxu1  ;;  %v4183_v60 = vld [vmem:[%s15071_s15 + $0x10] sm:$0xff] }
 0x392   : >> { %v4186_v30 = vld [vmem:[%s15071_s15 + $0x28] sm:$0xff] }
 0x393   : >> { %4054 = vmatmul.mubr.bf16.gmra.mrb[244].mxu1 %v3429_v42  ;;  %3887 = vmatmul.mubr.bf16.gmra.mrb[52].mxu0 %v3429_v42 }
 0x394   : >> { %10756 = vmatprep.mubr.msk.bf16.mxu1 %vm392_vm0, %v3432_v62  ;;  %10740 = vmatprep.mubr.msk.bf16.mxu0 %vm392_vm0, %v3432_v62 }
 0x396   : >> { %v3197_v0 = vpop.f32.mrb[140].mxu1 }
 0x397   : >> { %v15055_v17 = vadd.f32 %v3197_v0, %v14776_v4  ;;  %v3199_v15 = vpop.f32.mrb[141].mxu1 }
 0x398   : >> { %v3200_v10 = vpop.f32.mrb[142].mxu1 }
 0x399   : >> { %v15059_v1 = vadd.f32 %v3200_v10, %v14780_v12  ;;  %v3202_v25 = vpop.f32.mrb[143].mxu1  ;;  %v4185_v10 = vld [vmem:[%s15071_s15 + $0x20] sm:$0xff] }
 0x39a   : >> { %v4188_v25 = vld [vmem:[%s15071_s15 + $0x38] sm:$0xff] }
 0x39b   : >> { %4062 = vmatmul.mubr.bf16.gmra.mrb[248].mxu1 %v3431_v37  ;;  %3897 = vmatmul.mubr.bf16.gmra.mrb[56].mxu0 %v3431_v37 }
 0x39c   : >> { %10757 = vmatprep.mubr.msk.bf16.mxu1 %vm392_vm0, %v3434_v61  ;;  %10741 = vmatprep.mubr.msk.bf16.mxu0 %vm392_vm0, %v3434_v61 }
 0x39e   : >> { %v3205_v22 = vpop.f32.mrb[144].mxu1 }
 0x39f   : >> { %v15065_v4 = vadd.f32 %v3205_v22, %v14786_v40  ;;  %v3207_v51 = vpop.f32.mrb[145].mxu1 }
 0x3a0   : >> { %v3208_v19 = vpop.f32.mrb[146].mxu1 }
 0x3a1   : >> { %v15069_v54 = vadd.f32 %v3208_v19, %v14790_v47  ;;  %v3210_v12 = vpop.f32.mrb[147].mxu1  ;;  %v4187_v19 = vld [vmem:[%s15071_s15 + $0x30] sm:$0xff] }
 0x3a2   : >> { %v4190_v12 = vld [vmem:[%s15071_s15 + $0x48] sm:$0xff] }
 0x3a3   : >> { %4070 = vmatmul.mubr.bf16.gmra.mrb[252].mxu1 %v3433_v23  ;;  %3907 = vmatmul.mubr.bf16.gmra.mrb[60].mxu0 %v3433_v23 }
 0x3a4   : >> { %10861 = vmatprep.mubr.msk.bf16.mxu1 %vm392_vm0, %v4182_v14  ;;  %10845 = vmatprep.mubr.msk.bf16.mxu0 %vm392_vm0, %v4182_v14 }
 0x3a6   : >> { %v3213_v40 = vpop.f32.mrb[148].mxu1 }
 0x3a7   : >> { %v15077_v50 = vadd.f32 %v3213_v40, %v14798_v7  ;;  %v3215_v47 = vpop.f32.mrb[149].mxu1 }
 0x3a8   : >> { %v3216_v28 = vpop.f32.mrb[150].mxu1 }
 0x3a9   : >> { %v15081_v44 = vadd.f32 %v3216_v28, %v14805_v55  ;;  %v3218_v52 = vpop.f32.mrb[151].mxu1  ;;  %v4189_v28 = vld [vmem:[%s15071_s15 + $0x40] sm:$0xff] }
 0x3aa   : >> { %v4192_v52 = vld [vmem:[%s15071_s15 + $0x58] sm:$0xff] }
 0x3ab   : >> { %4728 = vmatmul.mubr.bf16.vlgmr.msra.gmra.mrb[0].mxu1 %v4181_v6  ;;  %4535 = vmatmul.mubr.bf16.vlgmr.msra.gmra.mrb[0].mxu0 %v4181_v6 }
 0x3ac   : >> { %10862 = vmatprep.mubr.msk.bf16.mxu1 %vm392_vm0, %v4184_v63  ;;  %10846 = vmatprep.mubr.msk.bf16.mxu0 %vm392_vm0, %v4184_v63 }
 0x3ae   : >> { %v3221_v8 = vpop.f32.mrb[152].mxu1 }
 0x3af   : >> { %v15087_v7 = vadd.f32 %v3221_v8, %v14827_v3  ;;  %v3223_v57 = vpop.f32.mrb[153].mxu1 }
 0x3b0   : >> { %v3224_v13 = vpop.f32.mrb[154].mxu1 }
 0x3b1   : >> { %v15091_v55 = vadd.f32 %v3224_v13, %v14831_v38  ;;  %v3226_v42 = vpop.f32.mrb[155].mxu1  ;;  %v4191_v13 = vld [vmem:[%s15071_s15 + $0x50] sm:$0xff] }
 0x3b2   : >> { %v4194_v42 = vld [vmem:[%s15071_s15 + $0x68] sm:$0xff] }
 0x3b3   : >> { %4736 = vmatmul.mubr.bf16.gmra.mrb[4].mxu1 %v4183_v60  ;;  %4545 = vmatmul.mubr.bf16.gmra.mrb[4].mxu0 %v4183_v60 }
 0x3b4   : >> { %10863 = vmatprep.mubr.msk.bf16.mxu1 %vm392_vm0, %v4186_v30  ;;  %10847 = vmatprep.mubr.msk.bf16.mxu0 %vm392_vm0, %v4186_v30 }
 0x3b6   : >> { %v3229_v62 = vpop.f32.mrb[156].mxu1 }
 0x3b7   : >> { %v15097_v3 = vadd.f32 %v3229_v62, %v14854_v20  ;;  %v3231_v0 = vpop.f32.mrb[157].mxu1 }
 0x3b8   : >> { %v3232_v15 = vpop.f32.mrb[158].mxu1 }
 0x3b9   : >> { %v15101_v38 = vadd.f32 %v3232_v15, %v14861_v56  ;;  %v3234_v37 = vpop.f32.mrb[159].mxu1  ;;  %v4193_v15 = vld [vmem:[%s15071_s15 + $0x60] sm:$0xff] }
 0x3ba   : >> { %v4196_v37 = vld [vmem:[%s15071_s15 + $0x78] sm:$0xff] }
 0x3bb   : >> { %4744 = vmatmul.mubr.bf16.gmra.mrb[8].mxu1 %v4185_v10  ;;  %4555 = vmatmul.mubr.bf16.gmra.mrb[8].mxu0 %v4185_v10 }
 0x3bc   : >> { %10864 = vmatprep.mubr.msk.bf16.mxu1 %vm392_vm0, %v4188_v25  ;;  %10848 = vmatprep.mubr.msk.bf16.mxu0 %vm392_vm0, %v4188_v25 }
 0x3be   : >> { %v3237_v61 = vpop.f32.mrb[160].mxu1 }
 0x3bf   : >> { %v15107_v20 = vadd.f32 %v3237_v61, %v14884_v39  ;;  %v3239_v22 = vpop.f32.mrb[161].mxu1 }
 0x3c0   : >> { %v3240_v51 = vpop.f32.mrb[162].mxu1 }
 0x3c1   : >> { %v15111_v56 = vadd.f32 %v3240_v51, %v14891_v24  ;;  %v3242_v23 = vpop.f32.mrb[163].mxu1  ;;  %v4195_v51 = vld [vmem:[%s15071_s15 + $0x70] sm:$0xff] }
 0x3c2   : >> { %v4198_v23 = vld [vmem:[%s15071_s15 + $0x88] sm:$0xff] }
 0x3c3   : >> { %4752 = vmatmul.mubr.bf16.gmra.mrb[12].mxu1 %v4187_v19  ;;  %4565 = vmatmul.mubr.bf16.gmra.mrb[12].mxu0 %v4187_v19 }
 0x3c4   : >> { %10865 = vmatprep.mubr.msk.bf16.mxu1 %vm392_vm0, %v4190_v12  ;;  %10849 = vmatprep.mubr.msk.bf16.mxu0 %vm392_vm0, %v4190_v12 }
 0x3c6   : >> { %v3245_v14 = vpop.f32.mrb[164].mxu1 }
 0x3c7   : >> { %v15117_v39 = vadd.f32 %v3245_v14, %v14914_v34  ;;  %v3247_v40 = vpop.f32.mrb[165].mxu1 }
 0x3c8   : >> { %v3248_v47 = vpop.f32.mrb[166].mxu1 }
 0x3c9   : >> { %v15121_v24 = vadd.f32 %v3248_v47, %v14921_v32  ;;  %v3250_v6 = vpop.f32.mrb[167].mxu1  ;;  %v4197_v47 = vld [vmem:[%s15071_s15 + $0x80] sm:$0xff] }
 0x3ca   : >> { %v4200_v6 = vld [vmem:[%s15071_s15 + $0x98] sm:$0xff] }
 0x3cb   : >> { %4760 = vmatmul.mubr.bf16.gmra.mrb[16].mxu1 %v4189_v28  ;;  %4575 = vmatmul.mubr.bf16.gmra.mrb[16].mxu0 %v4189_v28 }
 0x3cc   : >> { %10866 = vmatprep.mubr.msk.bf16.mxu1 %vm392_vm0, %v4192_v52  ;;  %10850 = vmatprep.mubr.msk.bf16.mxu0 %vm392_vm0, %v4192_v52 }
 0x3ce   : >> { %v3253_v63 = vpop.f32.mrb[168].mxu1 }
 0x3cf   : >> { %v15127_v34 = vadd.f32 %v3253_v63, %v14944_v27  ;;  %v3255_v8 = vpop.f32.mrb[169].mxu1 }
 0x3d0   : >> { %v3256_v57 = vpop.f32.mrb[170].mxu1 }
 0x3d1   : >> { %v15131_v32 = vadd.f32 %v3256_v57, %v14951_v41  ;;  %v3258_v60 = vpop.f32.mrb[171].mxu1  ;;  %v4199_v57 = vld [vmem:[%s15071_s15 + $0x90] sm:$0xff] }
 0x3d2   : >> { %v4202_v60 = vld [vmem:[%s15071_s15 + $0xa8] sm:$0xff] }
 0x3d3   : >> { %4768 = vmatmul.mubr.bf16.gmra.mrb[20].mxu1 %v4191_v13  ;;  %4585 = vmatmul.mubr.bf16.gmra.mrb[20].mxu0 %v4191_v13 }
 0x3d4   : >> { %10867 = vmatprep.mubr.msk.bf16.mxu1 %vm392_vm0, %v4194_v42  ;;  %10851 = vmatprep.mubr.msk.bf16.mxu0 %vm392_vm0, %v4194_v42 }
 0x3d6   : >> { %v3261_v30 = vpop.f32.mrb[172].mxu1 }
 0x3d7   : >> { %v15137_v27 = vadd.f32 %v3261_v30, %v14974_v16  ;;  %v3263_v62 = vpop.f32.mrb[173].mxu1 }
 0x3d8   : >> { %v3264_v0 = vpop.f32.mrb[174].mxu1 }
 0x3d9   : >> { %v15141_v41 = vadd.f32 %v3264_v0, %v14978_v48  ;;  %v3266_v10 = vpop.f32.mrb[175].mxu1  ;;  %v4201_v0 = vld [vmem:[%s15071_s15 + $0xa0] sm:$0xff] }
 0x3da   : >> { %v4204_v10 = vld [vmem:[%s15071_s15 + $0xb8] sm:$0xff] }
 0x3db   : >> { %4776 = vmatmul.mubr.bf16.gmra.mrb[24].mxu1 %v4193_v15  ;;  %4595 = vmatmul.mubr.bf16.gmra.mrb[24].mxu0 %v4193_v15 }
 0x3dc   : >> { %10868 = vmatprep.mubr.msk.bf16.mxu1 %vm392_vm0, %v4196_v37  ;;  %10852 = vmatprep.mubr.msk.bf16.mxu0 %vm392_vm0, %v4196_v37 }
 0x3de   : >> { %v3269_v25 = vpop.f32.mrb[176].mxu1 }
 0x3df   : >> { %v15147_v16 = vadd.f32 %v3269_v25, %v14984_v36  ;;  %v3271_v61 = vpop.f32.mrb[177].mxu1 }
 0x3e0   : >> { %v3272_v22 = vpop.f32.mrb[178].mxu1 }
 0x3e1   : >> { %v15151_v48 = vadd.f32 %v3272_v22, %v14988_v43  ;;  %v3274_v19 = vpop.f32.mrb[179].mxu1  ;;  %v4203_v22 = vld [vmem:[%s15071_s15 + $0xb0] sm:$0xff] }
 0x3e2   : >> { %v4206_v19 = vld [vmem:[%s15071_s15 + $0xc8] sm:$0xff] }
 0x3e3   : >> { %4784 = vmatmul.mubr.bf16.gmra.mrb[28].mxu1 %v4195_v51  ;;  %4605 = vmatmul.mubr.bf16.gmra.mrb[28].mxu0 %v4195_v51 }
 0x3e4   : >> { %10869 = vmatprep.mubr.msk.bf16.mxu1 %vm392_vm0, %v4198_v23  ;;  %10853 = vmatprep.mubr.msk.bf16.mxu0 %vm392_vm0, %v4198_v23 }
 0x3e6   : >> { %v3277_v12 = vpop.f32.mrb[180].mxu1 }
 0x3e7   : >> { %v15157_v36 = vadd.f32 %v3277_v12, %v14994_v26  ;;  %v3279_v14 = vpop.f32.mrb[181].mxu1 }
 0x3e8   : >> { %v3280_v40 = vpop.f32.mrb[182].mxu1 }
 0x3e9   : >> { %v15161_v43 = vadd.f32 %v3280_v40, %v14998_v46  ;;  %v3282_v28 = vpop.f32.mrb[183].mxu1  ;;  %v4205_v40 = vld [vmem:[%s15071_s15 + $0xc0] sm:$0xff] }
 0x3ea   : >> { %v4208_v28 = vld [vmem:[%s15071_s15 + $0xd8] sm:$0xff] }
 0x3eb   : >> { %4792 = vmatmul.mubr.bf16.gmra.mrb[32].mxu1 %v4197_v47  ;;  %4615 = vmatmul.mubr.bf16.gmra.mrb[32].mxu0 %v4197_v47 }
 0x3ec   : >> { %10870 = vmatprep.mubr.msk.bf16.mxu1 %vm392_vm0, %v4200_v6  ;;  %10854 = vmatprep.mubr.msk.bf16.mxu0 %vm392_vm0, %v4200_v6 }
 0x3ee   : >> { %v3285_v52 = vpop.f32.mrb[184].mxu1 }
 0x3ef   : >> { %v15167_v26 = vadd.f32 %v3285_v52, %v15004_v35  ;;  %v3287_v63 = vpop.f32.mrb[185].mxu1 }
 0x3f0   : >> { %v3288_v8 = vpop.f32.mrb[186].mxu1 }
 0x3f1   : >> { %v15171_v46 = vadd.f32 %v3288_v8, %v15008_v18  ;;  %v3290_v13 = vpop.f32.mrb[187].mxu1  ;;  %v4207_v8 = vld [vmem:[%s15071_s15 + $0xd0] sm:$0xff] }
 0x3f2   : >> { %v4210_v13 = vld [vmem:[%s15071_s15 + $0xe8] sm:$0xff] }
 0x3f3   : >> { %4800 = vmatmul.mubr.bf16.gmra.mrb[36].mxu1 %v4199_v57  ;;  %4625 = vmatmul.mubr.bf16.gmra.mrb[36].mxu0 %v4199_v57 }
 0x3f4   : >> { %10871 = vmatprep.mubr.msk.bf16.mxu1 %vm392_vm0, %v4202_v60  ;;  %10855 = vmatprep.mubr.msk.bf16.mxu0 %vm392_vm0, %v4202_v60 }
 0x3f6   : >> { %v3293_v42 = vpop.f32.mrb[188].mxu1 }
 0x3f7   : >> { %v15177_v35 = vadd.f32 %v3293_v42, %v15014_v45  ;;  %v3295_v30 = vpop.f32.mrb[189].mxu1 }
 0x3f8   : >> { %v3296_v62 = vpop.f32.mrb[190].mxu1 }
 0x3f9   : >> { %v15181_v18 = vadd.f32 %v3296_v62, %v15018_v53  ;;  %v3298_v15 = vpop.f32.mrb[191].mxu1  ;;  %v4209_v62 = vld [vmem:[%s15071_s15 + $0xe0] sm:$0xff] }
 0x3fa   : >> { %v4212_v15 = vld [vmem:[%s15071_s15 + $0xf8] sm:$0xff] }
 0x3fb   : >> { %4808 = vmatmul.mubr.bf16.gmra.mrb[40].mxu1 %v4201_v0  ;;  %4635 = vmatmul.mubr.bf16.gmra.mrb[40].mxu0 %v4201_v0 }
 0x3fc   : >> { %10872 = vmatprep.mubr.msk.bf16.mxu1 %vm392_vm0, %v4204_v10  ;;  %10856 = vmatprep.mubr.msk.bf16.mxu0 %vm392_vm0, %v4204_v10 }
 0x3fe   : >> { %v3951_v37 = vpop.f32.mrb[192].mxu1 }
 0x3ff   : >> { %v15187_v45 = vadd.f32 %v3951_v37, %v15024_v31  ;;  %v3953_v25 = vpop.f32.mrb[193].mxu1 }
 0x400   : >> { %v3954_v61 = vpop.f32.mrb[194].mxu1 }
 0x401   : >> { %v15191_v53 = vadd.f32 %v3954_v61, %v15028_v29  ;;  %v3956_v51 = vpop.f32.mrb[195].mxu1  ;;  %v4211_v61 = vld [vmem:[%s15071_s15 + $0xf0] sm:$0xff] }
 0x403   : >> { %4816 = vmatmul.mubr.bf16.gmra.mrb[44].mxu1 %v4203_v22  ;;  %4645 = vmatmul.mubr.bf16.gmra.mrb[44].mxu0 %v4203_v22 }
 0x404   : >> { %10873 = vmatprep.mubr.msk.bf16.mxu1 %vm392_vm0, %v4206_v19  ;;  %10857 = vmatprep.mubr.msk.bf16.mxu0 %vm392_vm0, %v4206_v19 }
 0x406   : >> { %v3959_v23 = vpop.f32.mrb[196].mxu1 }
 0x407   : >> { %v15197_v31 = vadd.f32 %v3959_v23, %v15034_v9  ;;  %v3961_v12 = vpop.f32.mrb[197].mxu1 }
 0x408   : >> { %v3962_v14 = vpop.f32.mrb[198].mxu1 }
 0x409   : >> { %v15201_v29 = vadd.f32 %v3962_v14, %v15038_v5  ;;  %v3964_v47 = vpop.f32.mrb[199].mxu1 }
 0x40b   : >> { %4824 = vmatmul.mubr.bf16.gmra.mrb[48].mxu1 %v4205_v40  ;;  %4655 = vmatmul.mubr.bf16.gmra.mrb[48].mxu0 %v4205_v40 }
 0x40c   : >> { %10874 = vmatprep.mubr.msk.bf16.mxu1 %vm392_vm0, %v4208_v28  ;;  %10858 = vmatprep.mubr.msk.bf16.mxu0 %vm392_vm0, %v4208_v28 }
 0x40e   : >> { %v3967_v6 = vpop.f32.mrb[200].mxu1 }
 0x40f   : >> { %v15207_v9 = vadd.f32 %v3967_v6, %v15044_v21  ;;  %v3969_v52 = vpop.f32.mrb[201].mxu1 }
 0x410   : >> { %v3970_v63 = vpop.f32.mrb[202].mxu1 }
 0x411   : >> { %v15211_v5 = vadd.f32 %v3970_v63, %v15048_v33  ;;  %v3972_v57 = vpop.f32.mrb[203].mxu1 }
 0x413   : >> { %4832 = vmatmul.mubr.bf16.gmra.mrb[52].mxu1 %v4207_v8  ;;  %4665 = vmatmul.mubr.bf16.gmra.mrb[52].mxu0 %v4207_v8 }
 0x414   : >> { %10875 = vmatprep.mubr.msk.bf16.mxu1 %vm392_vm0, %v4210_v13  ;;  %10859 = vmatprep.mubr.msk.bf16.mxu0 %vm392_vm0, %v4210_v13 }
 0x416   : >> { %v3975_v60 = vpop.f32.mrb[204].mxu1 }
 0x417   : >> { %v15217_v21 = vadd.f32 %v3975_v60, %v15055_v17  ;;  %v3977_v42 = vpop.f32.mrb[205].mxu1 }
 0x418   : >> { %v3978_v30 = vpop.f32.mrb[206].mxu1 }
 0x419   : >> { %v15221_v0 = vadd.f32 %v3978_v30, %v15059_v1  ;;  %v3980_v33 = vpop.f32.mrb[207].mxu1 }
 0x41b   : >> { %4840 = vmatmul.mubr.bf16.gmra.mrb[56].mxu1 %v4209_v62  ;;  %4675 = vmatmul.mubr.bf16.gmra.mrb[56].mxu0 %v4209_v62 }
 0x41c   : >> { %10876 = vmatprep.mubr.msk.bf16.mxu1 %vm392_vm0, %v4212_v15  ;;  %10860 = vmatprep.mubr.msk.bf16.mxu0 %vm392_vm0, %v4212_v15 }
 0x41e   : >> { %v3983_v10 = vpop.f32.mrb[208].mxu1 }
 0x41f   : >> { %v15227_v37 = vadd.f32 %v3983_v10, %v15065_v4  ;;  %v3985_v17 = vpop.f32.mrb[209].mxu1 }
 0x420   : >> { %v3986_v25 = vpop.f32.mrb[210].mxu1 }
 0x421   : >> { %v15231_v22 = vadd.f32 %v3986_v25, %v15069_v54  ;;  %v3988_v1 = vpop.f32.mrb[211].mxu1 }
 0x423   : >> { %4848 = vmatmul.mubr.bf16.gmra.mrb[60].mxu1 %v4211_v61  ;;  %4685 = vmatmul.mubr.bf16.gmra.mrb[60].mxu0 %v4211_v61 }
 0x426   : >> { %v3991_v51 = vpop.f32.mrb[212].mxu1 }
 0x427   : >> { %v15234_v19 = vadd.f32 %v3991_v51, %v15077_v50  ;;  %v3993_v23 = vpop.f32.mrb[213].mxu1 }
 0x428   : >> { %v3994_v12 = vpop.f32.mrb[214].mxu1 }
 0x429   : >> { %v15237_v14 = vadd.f32 %v3994_v12, %v15081_v44  ;;  %v3996_v4 = vpop.f32.mrb[215].mxu1 }
 0x42e   : >> { %v3999_v40 = vpop.f32.mrb[216].mxu1 }
 0x42f   : >> { %v15240_v47 = vadd.f32 %v3999_v40, %v15087_v7  ;;  %v4001_v28 = vpop.f32.mrb[217].mxu1 }
 0x430   : >> { %v4002_v54 = vpop.f32.mrb[218].mxu1 }
 0x431   : >> { %v15243_v6 = vadd.f32 %v4002_v54, %v15091_v55  ;;  %v4004_v52 = vpop.f32.mrb[219].mxu1 }
 0x436   : >> { %v4007_v63 = vpop.f32.mrb[220].mxu1 }
 0x437   : >> { %v15246_v50 = vadd.f32 %v4007_v63, %v15097_v3  ;;  %v4009_v8 = vpop.f32.mrb[221].mxu1 }
 0x438   : >> { %v4010_v57 = vpop.f32.mrb[222].mxu1 }
 0x439   : >> { %v15249_v44 = vadd.f32 %v4010_v57, %v15101_v38  ;;  %v4012_v13 = vpop.f32.mrb[223].mxu1 }
 0x43e   : >> { %v4015_v60 = vpop.f32.mrb[224].mxu1 }
 0x43f   : >> { %v15252_v7 = vadd.f32 %v4015_v60, %v15107_v20  ;;  %v4017_v42 = vpop.f32.mrb[225].mxu1 }
 0x440   : >> { %v4018_v30 = vpop.f32.mrb[226].mxu1 }
 0x441   : >> { %v15255_v55 = vadd.f32 %v4018_v30, %v15111_v56  ;;  %v4020_v62 = vpop.f32.mrb[227].mxu1 }
 0x446   : >> { %v4023_v33 = vpop.f32.mrb[228].mxu1 }
 0x447   : >> { %v15258_v3 = vadd.f32 %v4023_v33, %v15117_v39  ;;  %v4025_v15 = vpop.f32.mrb[229].mxu1 }
 0x448   : >> { %v4026_v10 = vpop.f32.mrb[230].mxu1 }
 0x449   : >> { %v15261_v38 = vadd.f32 %v4026_v10, %v15121_v24  ;;  %v4028_v17 = vpop.f32.mrb[231].mxu1 }
 0x44e   : >> { %v4031_v25 = vpop.f32.mrb[232].mxu1 }
 0x44f   : >> { %v15264_v20 = vadd.f32 %v4031_v25, %v15127_v34  ;;  %v4033_v61 = vpop.f32.mrb[233].mxu1 }
 0x450   : >> { %v4034_v1 = vpop.f32.mrb[234].mxu1 }
 0x451   : >> { %v15267_v56 = vadd.f32 %v4034_v1, %v15131_v32  ;;  %v4036_v51 = vpop.f32.mrb[235].mxu1 }
 0x456   : >> { %v4039_v23 = vpop.f32.mrb[236].mxu1 }
 0x457   : >> { %v15270_v39 = vadd.f32 %v4039_v23, %v15137_v27  ;;  %v4041_v12 = vpop.f32.mrb[237].mxu1 }
 0x458   : >> { %v4042_v4 = vpop.f32.mrb[238].mxu1 }
 0x459   : >> { %v15273_v24 = vadd.f32 %v4042_v4, %v15141_v41  ;;  %v4044_v40 = vpop.f32.mrb[239].mxu1 }
 0x45e   : >> { %v4047_v28 = vpop.f32.mrb[240].mxu1 }
 0x45f   : >> { %v15276_v34 = vadd.f32 %v4047_v28, %v15147_v16  ;;  %v4049_v54 = vpop.f32.mrb[241].mxu1 }
 0x460   : >> { %v4050_v52 = vpop.f32.mrb[242].mxu1 }
 0x461   : >> { %v15279_v32 = vadd.f32 %v4050_v52, %v15151_v48  ;;  %v4052_v63 = vpop.f32.mrb[243].mxu1 }
 0x463   : >> { %17548 = vst [vmem:[#allocation10_spill] sm:$0xff] %v15279_v32 }
 0x466   : >> { %v4055_v8 = vpop.f32.mrb[244].mxu1 }
 0x467   : >> { %v15282_v27 = vadd.f32 %v4055_v8, %v15157_v36  ;;  %v4057_v57 = vpop.f32.mrb[245].mxu1 }
 0x468   : >> { %v4058_v13 = vpop.f32.mrb[246].mxu1 }
 0x469   : >> { %17549 = vst [vmem:[#allocation11_spill] sm:$0xff] %v15282_v27  ;;  %v15285_v41 = vadd.f32 %v4058_v13, %v15161_v43  ;;  %v4060_v60 = vpop.f32.mrb[247].mxu1 }
 0x46b   : >> { %17550 = vst [vmem:[#allocation12_spill] sm:$0xff] %v15285_v41 }
 0x46e   : >> { %v4063_v42 = vpop.f32.mrb[248].mxu1 }
 0x46f   : >> { %v15288_v16 = vadd.f32 %v4063_v42, %v15167_v26  ;;  %v4065_v30 = vpop.f32.mrb[249].mxu1 }
 0x470   : >> { %v4066_v62 = vpop.f32.mrb[250].mxu1 }
 0x471   : >> { %17551 = vst [vmem:[#allocation13_spill] sm:$0xff] %v15288_v16  ;;  %v15291_v48 = vadd.f32 %v4066_v62, %v15171_v46  ;;  %v4068_v33 = vpop.f32.mrb[251].mxu1 }
 0x473   : >> { %17552 = vst [vmem:[#allocation14_spill] sm:$0xff] %v15291_v48 }
 0x476   : >> { %v4071_v15 = vpop.f32.mrb[252].mxu1 }
 0x477   : >> { %v15294_v36 = vadd.f32 %v4071_v15, %v15177_v35  ;;  %v4073_v10 = vpop.f32.mrb[253].mxu1 }
 0x478   : >> { %v4074_v17 = vpop.f32.mrb[254].mxu1 }
 0x479   : >> { %17553 = vst [vmem:[#allocation15_spill] sm:$0xff] %v15294_v36  ;;  %v15297_v43 = vadd.f32 %v4074_v17, %v15181_v18  ;;  %v4076_v25 = vpop.f32.mrb[255].mxu1 }
 0x47b   : >> { %17554 = vst [vmem:[#allocation16_spill] sm:$0xff] %v15297_v43 }
 0x47e   : >> { %v4729_v61 = vpop.f32.mrb[0].mxu1  ;;  %v15302_v1 = vpop.f32.mrb[0].mxu0 }
 0x47f   : >> { %v15300_v26 = vadd.f32 %v4729_v61, %v15187_v45  ;;  %v4731_v51 = vpop.f32.mrb[1].mxu1  ;;  %v15304_v46 = vpop.f32.mrb[1].mxu0 }
 0x480   : >> { %v4732_v23 = vpop.f32.mrb[2].mxu1  ;;  %v15309_v35 = vpop.f32.mrb[2].mxu0 }
 0x481   : >> { %v15307_v12 = vadd.f32 %v4732_v23, %v15191_v53  ;;  %v4734_v4 = vpop.f32.mrb[3].mxu1  ;;  %v15311_v40 = vpop.f32.mrb[3].mxu0 }
 0x486   : >> { %v4737_v18 = vpop.f32.mrb[4].mxu1  ;;  %v15316_v45 = vpop.f32.mrb[4].mxu0 }
 0x487   : >> { %v15314_v28 = vadd.f32 %v4737_v18, %v15197_v31  ;;  %v4739_v54 = vpop.f32.mrb[5].mxu1  ;;  %v15318_v52 = vpop.f32.mrb[5].mxu0 }
 0x488   : >> { %v4740_v63 = vpop.f32.mrb[6].mxu1  ;;  %v15323_v53 = vpop.f32.mrb[6].mxu0 }
 0x489   : >> { %v15321_v8 = vadd.f32 %v4740_v63, %v15201_v29  ;;  %v4742_v57 = vpop.f32.mrb[7].mxu1  ;;  %v15325_v13 = vpop.f32.mrb[7].mxu0 }
 0x48e   : >> { %v4745_v60 = vpop.f32.mrb[8].mxu1  ;;  %v15330_v31 = vpop.f32.mrb[8].mxu0 }
 0x48f   : >> { %v15328_v42 = vadd.f32 %v4745_v60, %v15207_v9  ;;  %v4747_v30 = vpop.f32.mrb[9].mxu1  ;;  %v15332_v62 = vpop.f32.mrb[9].mxu0 }
 0x490   : >> { %v4748_v33 = vpop.f32.mrb[10].mxu1  ;;  %v15337_v29 = vpop.f32.mrb[10].mxu0 }
 0x491   : >> { %v15335_v15 = vadd.f32 %v4748_v33, %v15211_v5  ;;  %v4750_v10 = vpop.f32.mrb[11].mxu1  ;;  %v15339_v17 = vpop.f32.mrb[11].mxu0 }
 0x496   : >> { %v4753_v25 = vpop.f32.mrb[12].mxu1  ;;  %v15344_v9 = vpop.f32.mrb[12].mxu0 }
 0x497   : >> { %v15342_v61 = vadd.f32 %v4753_v25, %v15217_v21  ;;  %v4755_v51 = vpop.f32.mrb[13].mxu1  ;;  %v15346_v23 = vpop.f32.mrb[13].mxu0 }
 0x498   : >> { %v4756_v4 = vpop.f32.mrb[14].mxu1  ;;  %v15351_v5 = vpop.f32.mrb[14].mxu0 }
 0x499   : >> { %v15349_v18 = vadd.f32 %v4756_v4, %v15221_v0  ;;  %v4758_v54 = vpop.f32.mrb[15].mxu1  ;;  %v15353_v63 = vpop.f32.mrb[15].mxu0 }
 0x49e   : >> { %v4761_v57 = vpop.f32.mrb[16].mxu1  ;;  %v15358_v21 = vpop.f32.mrb[16].mxu0 }
 0x49f   : >> { %v15356_v60 = vadd.f32 %v4761_v57, %v15227_v37  ;;  %v4763_v30 = vpop.f32.mrb[17].mxu1  ;;  %v15360_v33 = vpop.f32.mrb[17].mxu0 }
 0x4a0   : >> { %v4764_v10 = vpop.f32.mrb[18].mxu1  ;;  %v15365_v0 = vpop.f32.mrb[18].mxu0 }
 0x4a1   : >> { %v15363_v25 = vadd.f32 %v4764_v10, %v15231_v22  ;;  %v4766_v51 = vpop.f32.mrb[19].mxu1  ;;  %v15367_v4 = vpop.f32.mrb[19].mxu0 }
 0x4a6   : >> { %v4769_v54 = vpop.f32.mrb[20].mxu1  ;;  %v15372_v37 = vpop.f32.mrb[20].mxu0 }
 0x4a7   : >> { %v15370_v49 = vadd.f32 %v4769_v54, %v15234_v19  ;;  %v4771_v57 = vpop.f32.mrb[21].mxu1  ;;  %v15374_v43 = vpop.f32.mrb[21].mxu0 }
 0x4a8   : >> { %v4772_v30 = vpop.f32.mrb[22].mxu1  ;;  %v15379_v22 = vpop.f32.mrb[22].mxu0 }
 0x4a9   : >> { %v15377_v36 = vadd.f32 %v4772_v30, %v15237_v14  ;;  %v4774_v10 = vpop.f32.mrb[23].mxu1  ;;  %v15381_v48 = vpop.f32.mrb[23].mxu0 }
 0x4aa   : >> { %17556 = vst [vmem:[#allocation18_spill] sm:$0xff] %v15381_v48  ;;  %v15397_v10 = vrot.slane %v17547_v2, %v17562_v58 }
 0x4ab   : >> { %17555 = vst [vmem:[#allocation17_spill] sm:$0xff] %v15377_v36 }
 0x4ae   : >> { %v4777_v51 = vpop.f32.mrb[24].mxu1  ;;  %v15386_v19 = vpop.f32.mrb[24].mxu0 }
 0x4af   : >> { %v15384_v16 = vadd.f32 %v4777_v51, %v15240_v47  ;;  %17558 = vst [vmem:[#allocation20_spill] sm:$0xff] %v15386_v19  ;;  %v4779_v54 = vpop.f32.mrb[25].mxu1  ;;  %v15388_v41 = vpop.f32.mrb[25].mxu0  ;;  %v15403_v47 = vrot.slane %v17547_v2, %v17564_v11  ;;  %v15407_v51 = vrot.slane %v17547_v2, %v17565_v59  ;;  %v15428_v2 = vadd.f32 %v15397_v10, %v15309_v35 }
 0x4b0   : >> { %17559 = vst [vmem:[#allocation21_spill] sm:$0xff] %v15388_v41  ;;  %v4780_v57 = vpop.f32.mrb[26].mxu1  ;;  %v15393_v14 = vpop.f32.mrb[26].mxu0 }
 0x4b1   : >> { %17557 = vst [vmem:[#allocation19_spill] sm:$0xff] %v15384_v16  ;;  %v15391_v27 = vadd.f32 %v4780_v57, %v15243_v6  ;;  %17561 = vst [vmem:[#allocation23_spill] sm:$0xff] %v15393_v14  ;;  %v4782_v30 = vpop.f32.mrb[27].mxu1  ;;  %v15399_v48 = vpop.f32.mrb[27].mxu0  ;;  %v15411_v6 = vadd.f32 %v15397_v10, %v15302_v1  ;;  %v15415_v57 = vadd.f32 %v15403_v47, %v15300_v26 }
 0x4b2   : >> { %17563 = vst [vmem:[#allocation24_spill] sm:$0xff] %v15399_v48  ;;  %v15424_v48 = vadd.f32 %v15407_v51, %v15304_v46  ;;  %v15434_v26 = vadd.f32 %v15403_v47, %v15307_v12  ;;  %v15452_v12 = vadd.f32 %v15403_v47, %v15314_v28  ;;  %v15471_v28 = vadd.f32 %v15407_v51, %v15325_v13 }
 0x4b3   : >> { %17560 = vst [vmem:[#allocation22_spill] sm:$0xff] %v15391_v27 }
 0x4b6   : >> { %v4785_v54 = vpop.f32.mrb[28].mxu1  ;;  %v15420_v58 = vpop.f32.mrb[28].mxu0 }
 0x4b7   : >> { %v15418_v30 = vadd.f32 %v4785_v54, %v15246_v50  ;;  %17567 = vst [vmem:[#allocation26_spill] sm:$0xff] %v15420_v58  ;;  %v4787_v11 = vpop.f32.mrb[29].mxu1  ;;  %v15430_v1 = vpop.f32.mrb[29].mxu0  ;;  %v15438_v50 = vadd.f32 %v15407_v51, %v15311_v40  ;;  %v15456_v40 = vadd.f32 %v15407_v51, %v15318_v52  ;;  %v15475_v52 = vadd.f32 %v15397_v10, %v15330_v31 }
 0x4b8   : >> { %17568 = vst [vmem:[#allocation27_spill] sm:$0xff] %v15430_v1  ;;  %v4788_v59 = vpop.f32.mrb[30].mxu1  ;;  %v15442_v11 = vadd.f32 %v15397_v10, %v15316_v45  ;;  %v15447_v35 = vpop.f32.mrb[30].mxu0  ;;  %v5064_v1 = vmax.f32 %v15411_v6, 0.0  ;;  %v15460_v45 = vadd.f32 %v15397_v10, %v15323_v53  ;;  %v5065_v6 = vmax.f32 %v15424_v48, 0.0 }
 0x4b9   : >> { %17566 = vst [vmem:[#allocation25_spill] sm:$0xff] %v15418_v30  ;;  %v15445_v46 = vadd.f32 %v4788_v59, %v15249_v44  ;;  %17570 = vst [vmem:[#allocation29_spill] sm:$0xff] %v15447_v35  ;;  %v4790_v54 = vpop.f32.mrb[31].mxu1  ;;  %v15462_v30 = vpop.f32.mrb[31].mxu0  ;;  %v5066_v59 = vmax.f32 %v15415_v57, 0.0  ;;  %v15467_v44 = vadd.f32 %v15403_v47, %v15321_v8  ;;  %v5067_v53 = vmax.f32 %v15428_v2, 0.0 }
 0x4ba   : >> { %17571 = vst [vmem:[#allocation30_spill] sm:$0xff] %v15462_v30  ;;  %v15481_v54 = vadd.f32 %v15403_v47, %v15328_v42  ;;  %v15485_v8 = vadd.f32 %v15407_v51, %v15332_v62  ;;  %v5069_v57 = vmax.f32 %v15434_v26, 0.0  ;;  %v5068_v13 = vmax.f32 %v15438_v50, 0.0 }
 0x4bb   : >> { %17569 = vst [vmem:[#allocation28_spill] sm:$0xff] %v15445_v46  ;;  %v15492_v31 = vadd.f32 %v15397_v10, %v15337_v29  ;;  %v15499_v62 = vadd.f32 %v15403_v47, %v15335_v15  ;;  %v15509_v42 = vadd.f32 %v15407_v51, %v15339_v17  ;;  %v15519_v17 = vadd.f32 %v15397_v10, %v15344_v9 }
 0x4be   : >> { %v4793_v46 = vpop.f32.mrb[32].mxu1  ;;  %v4616_v35 = vpop.f32.mrb[32].mxu0 }
 0x4bf   : >> { %v4906_v29 = vadd.f32 %v4793_v46, %v15252_v7  ;;  %v4795_v58 = vpop.f32.mrb[33].mxu1  ;;  %v5016_v15 = vadd.f32 %v15397_v10, %v4616_v35  ;;  %v4618_v27 = vpop.f32.mrb[33].mxu0 }
 0x4c0   : >> { %v4796_v26 = vpop.f32.mrb[34].mxu1  ;;  %v5017_v7 = vadd.f32 %v15407_v51, %v4618_v27  ;;  %v4620_v46 = vpop.f32.mrb[34].mxu0 }
 0x4c1   : >> { %v5018_v30 = vadd.f32 %v15403_v47, %v4906_v29  ;;  %v4909_v58 = vadd.f32 %v4796_v26, %v15255_v55  ;;  %v4798_v2 = vpop.f32.mrb[35].mxu1  ;;  %v5112_v35 = vmax.f32 %v5016_v15, 0.0  ;;  %v5019_v14 = vadd.f32 %v15397_v10, %v4620_v46  ;;  %v4622_v41 = vpop.f32.mrb[35].mxu0 }
 0x4c2   : >> { %v5113_v16 = vmax.f32 %v5017_v7, 0.0  ;;  %v5020_v27 = vadd.f32 %v15407_v51, %v4622_v41  ;;  %v15526_v55 = vadd.f32 %v15403_v47, %v15342_v61  ;;  %v15530_v2 = vadd.f32 %v15407_v51, %v15346_v23 }
 0x4c3   : >> { %v5114_v50 = vmax.f32 %v5018_v30, 0.0  ;;  %v5021_v29 = vadd.f32 %v15403_v47, %v4909_v58  ;;  %v5160_v9 = vmax.f32 %v5064_v1, %v5112_v35  ;;  %v5115_v26 = vmax.f32 %v5019_v14, 0.0 }
 0x4c4   : >> { %v5161_v46 = vmax.f32 %v5065_v6, %v5113_v16  ;;  %v5116_v30 = vmax.f32 %v5020_v27, 0.0  ;;  %v5080_v7 = vmax.f32 %v15509_v42, 0.0  ;;  %v5082_v58 = vmax.f32 %v15519_v17, 0.0 }
 0x4c5   : >> { %v5162_v15 = vmax.f32 %v5066_v59, %v5114_v50  ;;  %v5117_v48 = vmax.f32 %v5021_v29, 0.0  ;;  %v15537_v41 = vadd.f32 %v15397_v10, %v15351_v5  ;;  %v5163_v61 = vmax.f32 %v5067_v53, %v5115_v26 }
 0x4c6   : >> { %v4801_v19 = vpop.f32.mrb[36].mxu1  ;;  %v5164_v36 = vmax.f32 %v5068_v13, %v5116_v30  ;;  %v4626_v1 = vpop.f32.mrb[36].mxu0  ;;  %v5084_v16 = vmax.f32 %v15526_v55, 0.0  ;;  %v5083_v6 = vmax.f32 %v15530_v2, 0.0 }
 0x4c7   : >> { %v5208_v32 = vmax.f32 %v5161_v46, %v5162_v15  ;;  %v5165_v23 = vmax.f32 %v5069_v57, %v5117_v48  ;;  %v4912_v14 = vadd.f32 %v4801_v19, %v15258_v3  ;;  %v4803_v59 = vpop.f32.mrb[37].mxu1  ;;  %v5224_v50 = vpack.c.bf16 %v5163_v61, %v5160_v9  ;;  %v4628_v29 = vpop.f32.mrb[37].mxu0 }
 0x4c8   : >> { %v5022_v35 = vadd.f32 %v15397_v10, %v4626_v1  ;;  %v4804_v27 = vpop.f32.mrb[38].mxu1  ;;  %v5023_v26 = vadd.f32 %v15407_v51, %v4628_v29  ;;  %v4630_v13 = vpop.f32.mrb[38].mxu0  ;;  %v15548_v19 = vadd.f32 %v15403_v47, %v15349_v18  ;;  %v15552_v48 = vadd.f32 %v15407_v51, %v15353_v63 }
 0x4c9   : >> { %v5209_v5 = vmax.f32 %v5164_v36, %v5165_v23  ;;  %v5024_v53 = vadd.f32 %v15403_v47, %v4912_v14  ;;  %v4915_v57 = vadd.f32 %v4804_v27, %v15261_v38  ;;  %v4806_v3 = vpop.f32.mrb[39].mxu1  ;;  %5243 = vst [vmem:[%s15554_s14] sm:$0xff] %v5224_v50  ;;  %v5025_v9 = vadd.f32 %v15397_v10, %v4630_v13  ;;  %v4632_v15 = vpop.f32.mrb[39].mxu0 }
 0x4ca   : >> { %v5118_v36 = vmax.f32 %v5022_v35, 0.0  ;;  %v5119_v30 = vmax.f32 %v5023_v26, 0.0  ;;  %v5085_v18 = vmax.f32 %v15537_v41, 0.0  ;;  %v17572_v23 = vmax.f32 %v15442_v11, 0.0 }
 0x4cb   : >> { %v5225_v38 = vpack.c.bf16 %v5209_v5, %v5208_v32  ;;  %v5120_v46 = vmax.f32 %v5024_v53, 0.0  ;;  %v5027_v61 = vadd.f32 %v15403_v47, %v4915_v57  ;;  %v5121_v14 = vmax.f32 %v5025_v9, 0.0 }
 0x4cc   : >> { %v5166_v63 = vmax.f32 %v17572_v23, %v5118_v36  ;;  %v5026_v1 = vadd.f32 %v15407_v51, %v4632_v15  ;;  %v15565_v59 = vadd.f32 %v15397_v10, %v15358_v21  ;;  %v17573_v50 = vmax.f32 %v15452_v12, 0.0 }
 0x4cd   : >> { %5244 = vst [vmem:[%s15554_s14 + $0x8] sm:$0xff] %v5225_v38  ;;  %v17574_v35 = vmax.f32 %v15456_v40, 0.0  ;;  %v5123_v27 = vmax.f32 %v5027_v61, 0.0  ;;  %v5087_v5 = vmax.f32 %v15548_v19, 0.0  ;;  %v5086_v11 = vmax.f32 %v15552_v48, 0.0 }
 0x4ce   : >> { %v5168_v32 = vmax.f32 %v17573_v50, %v5120_v46  ;;  %v17575_v53 = vmax.f32 %v15460_v45, 0.0  ;;  %v5122_v57 = vmax.f32 %v5026_v1, 0.0  ;;  %v4809_v13 = vpop.f32.mrb[40].mxu1  ;;  %v15578_v21 = vadd.f32 %v15403_v47, %v15356_v60  ;;  %v4636_v9 = vpop.f32.mrb[40].mxu0 }
 0x4cf   : >> { %v5167_v29 = vmax.f32 %v17574_v35, %v5119_v30  ;;  %v17576_v12 = vmax.f32 %v15467_v44, 0.0  ;;  %v4918_v40 = vadd.f32 %v4809_v13, %v15264_v20  ;;  %v4811_v15 = vpop.f32.mrb[41].mxu1  ;;  %v15585_v38 = vadd.f32 %v15407_v51, %v15360_v33  ;;  %v4638_v61 = vpop.f32.mrb[41].mxu0 }
 0x4d0   : >> { %v5169_v26 = vmax.f32 %v17575_v53, %v5121_v14  ;;  %v17577_v46 = vmax.f32 %v15471_v28, 0.0  ;;  %v5028_v60 = vadd.f32 %v15397_v10, %v4636_v9  ;;  %v4812_v23 = vpop.f32.mrb[42].mxu1  ;;  %v5088_v44 = vmax.f32 %v15565_v59, 0.0  ;;  %v4640_v50 = vpop.f32.mrb[42].mxu0 }
 0x4d1   : >> { %v5210_v3 = vmax.f32 %v5167_v29, %v5168_v32  ;;  %v5171_v36 = vmax.f32 %v17576_v12, %v5123_v27  ;;  %v5030_v14 = vadd.f32 %v15403_v47, %v4918_v40  ;;  %v5029_v20 = vadd.f32 %v15407_v51, %v4638_v61  ;;  %v4814_v32 = vpop.f32.mrb[43].mxu1  ;;  %v4642_v29 = vpop.f32.mrb[43].mxu0 }
 0x4d2   : >> { %v5226_v45 = vpack.c.bf16 %v5169_v26, %v5166_v63  ;;  %v5170_v30 = vmax.f32 %v17577_v46, %v5122_v57  ;;  %v4921_v1 = vadd.f32 %v4812_v23, %v15267_v56  ;;  %v15596_v33 = vadd.f32 %v15397_v10, %v15365_v0 }
 0x4d3   : >> { %v5124_v63 = vmax.f32 %v5028_v60, 0.0  ;;  %v5031_v35 = vadd.f32 %v15397_v10, %v4640_v50  ;;  %v5126_v27 = vmax.f32 %v5030_v14, 0.0  ;;  %v5125_v53 = vmax.f32 %v5029_v20, 0.0 }
 0x4d4   : >> { %5245 = vst [vmem:[%s15554_s14 + $0x10] sm:$0xff] %v5226_v45  ;;  %v5211_v28 = vmax.f32 %v5170_v30, %v5171_v36  ;;  %v5033_v26 = vadd.f32 %v15403_v47, %v4921_v1  ;;  %v5032_v57 = vadd.f32 %v15407_v51, %v4642_v29  ;;  %v15604_v56 = vadd.f32 %v15403_v47, %v15363_v25 }
 0x4d5   : >> { %v17578_v0 = vmax.f32 %v15475_v52, 0.0  ;;  %v5127_v36 = vmax.f32 %v5031_v35, 0.0  ;;  %v17579_v40 = vmax.f32 %v15481_v54, 0.0  ;;  %v17580_v15 = vmax.f32 %v15485_v8, 0.0 }
 0x4d6   : >> { %v5227_v13 = vpack.c.bf16 %v5211_v28, %v5210_v3  ;;  %v5129_v46 = vmax.f32 %v5033_v26, 0.0  ;;  %v5128_v30 = vmax.f32 %v5032_v57, 0.0  ;;  %v5090_v60 = vmax.f32 %v15578_v21, 0.0  ;;  %v4817_v23 = vpop.f32.mrb[44].mxu1  ;;  %v4646_v50 = vpop.f32.mrb[44].mxu0 }
 0x4d7   : >> { %v5172_v12 = vmax.f32 %v17578_v0, %v5124_v63  ;;  %v5174_v9 = vmax.f32 %v17579_v40, %v5126_v27  ;;  %v5173_v45 = vmax.f32 %v17580_v15, %v5125_v53  ;;  %v5089_v61 = vmax.f32 %v15585_v38, 0.0  ;;  %v4819_v32 = vpop.f32.mrb[45].mxu1  ;;  %v4648_v35 = vpop.f32.mrb[45].mxu0 }
 0x4d8   : >> { %v15616_v25 = vadd.f32 %v15407_v51, %v15367_v4  ;;  %5246 = vst [vmem:[%s15554_s14 + $0x18] sm:$0xff] %v5227_v13  ;;  %v17581_v52 = vmax.f32 %v15492_v31, 0.0  ;;  %v17582_v14 = vmax.f32 %v15499_v62, 0.0  ;;  %v5176_v20 = vmax.f32 %v5080_v7, %v5128_v30  ;;  %v4820_v29 = vpop.f32.mrb[46].mxu1 }
 0x4d9   : >> { %v5212_v54 = vmax.f32 %v5173_v45, %v5174_v9  ;;  %v4924_v1 = vadd.f32 %v4817_v23, %v15270_v39  ;;  %v5093_v4 = vmax.f32 %v15604_v56, 0.0  ;;  %v5091_v28 = vmax.f32 %v15596_v33, 0.0  ;;  %v4650_v39 = vpop.f32.mrb[46].mxu0  ;;  %v4822_v53 = vpop.f32.mrb[47].mxu1 }
 0x4da   : >> { %v5175_v3 = vmax.f32 %v17581_v52, %v5127_v36  ;;  %v5177_v8 = vmax.f32 %v17582_v14, %v5129_v46  ;;  %v5034_v31 = vadd.f32 %v15397_v10, %v4646_v50  ;;  %v5035_v42 = vadd.f32 %v15407_v51, %v4648_v35  ;;  %v17583_v50 = vld [vmem:[#allocation17_spill] sm:$0xff] }
 0x4db   : >> { %v5036_v62 = vadd.f32 %v15403_v47, %v4924_v1  ;;  %v4927_v7 = vadd.f32 %v4820_v29, %v15273_v24  ;;  %v15634_v26 = vadd.f32 %v15403_v47, %v15370_v49  ;;  %v15638_v57 = vadd.f32 %v15397_v10, %v15372_v37  ;;  %v17585_v29 = vld [vmem:[#allocation18_spill] sm:$0xff] }
 0x4dc   : >> { %v5228_v63 = vpack.c.bf16 %v5175_v3, %v5172_v12  ;;  %v5213_v27 = vmax.f32 %v5176_v20, %v5177_v8  ;;  %v5130_v13 = vmax.f32 %v5034_v31, 0.0  ;;  %v5037_v0 = vadd.f32 %v15397_v10, %v4650_v39  ;;  %v4652_v12 = vpop.f32.mrb[47].mxu0 }
 0x4dd   : >> { %v5132_v40 = vmax.f32 %v5036_v62, 0.0  ;;  %v5131_v9 = vmax.f32 %v5035_v42, 0.0  ;;  %v5039_v24 = vadd.f32 %v15403_v47, %v4927_v7  ;;  %v15645_v15 = vadd.f32 %v15407_v51, %v15374_v43 }
 0x4de   : >> { %5247 = vst [vmem:[%s15554_s14 + $0x20] sm:$0xff] %v5228_v63  ;;  %v5229_v36 = vpack.c.bf16 %v5213_v27, %v5212_v54  ;;  %v5178_v49 = vmax.f32 %v5082_v58, %v5130_v13  ;;  %v5133_v45 = vmax.f32 %v5037_v0, 0.0  ;;  %v5038_v37 = vadd.f32 %v15407_v51, %v4652_v12  ;;  %v4825_v54 = vpop.f32.mrb[48].mxu1 }
 0x4df   : >> { %v5092_v46 = vmax.f32 %v15616_v25, 0.0  ;;  %v5180_v30 = vmax.f32 %v5084_v16, %v5132_v40  ;;  %v5179_v52 = vmax.f32 %v5083_v6, %v5131_v9  ;;  %v5135_v3 = vmax.f32 %v5039_v24, 0.0  ;;  %v4656_v16 = vpop.f32.mrb[48].mxu0  ;;  %v4827_v6 = vpop.f32.mrb[49].mxu1 }
 0x4e0   : >> { %5248 = vst [vmem:[%s15554_s14 + $0x28] sm:$0xff] %v5229_v36  ;;  %v5094_v23 = vmax.f32 %v15638_v57, 0.0  ;;  %v15659_v43 = vadd.f32 %v15397_v10, %v15379_v22  ;;  %v5181_v17 = vmax.f32 %v5085_v18, %v5133_v45  ;;  %v5134_v58 = vmax.f32 %v5038_v37, 0.0  ;;  %v4658_v20 = vpop.f32.mrb[49].mxu0  ;;  %v4828_v1 = vpop.f32.mrb[50].mxu1 }
 0x4e1   : >> { %v5096_v25 = vmax.f32 %v15634_v26, 0.0  ;;  %v5214_v14 = vmax.f32 %v5179_v52, %v5180_v30  ;;  %v5183_v55 = vmax.f32 %v5087_v5, %v5135_v3  ;;  %v4930_v2 = vadd.f32 %v4825_v54, %v15276_v34  ;;  %v17584_v5 = vld [vmem:[#allocation10_spill] sm:$0xff]  ;;  %v4660_v31 = vpop.f32.mrb[50].mxu0  ;;  %v4830_v35 = vpop.f32.mrb[51].mxu1  ;;  %v17586_v52 = vld [vmem:[#allocation20_spill] sm:$0xff]  ;;  %v17588_v54 = vld [vmem:[#allocation19_spill] sm:$0xff] }
 0x4e2   : >> { %v5095_v8 = vmax.f32 %v15645_v15, 0.0  ;;  %v5230_v22 = vpack.c.bf16 %v5181_v17, %v5178_v49  ;;  %v5182_v41 = vmax.f32 %v5086_v11, %v5134_v58  ;;  %v5040_v18 = vadd.f32 %v15397_v10, %v4656_v16  ;;  %v4662_v42 = vpop.f32.mrb[51].mxu0 }
 0x4e3   : >> { %v15673_v32 = vadd.f32 %v15403_v47, %v17583_v50  ;;  %v5042_v19 = vadd.f32 %v15403_v47, %v4930_v2  ;;  %v5041_v34 = vadd.f32 %v15407_v51, %v4658_v20  ;;  %v4933_v63 = vadd.f32 %v4828_v1, %v17584_v5  ;;  %v17591_v50 = vld [vmem:[#allocation23_spill] sm:$0xff] }
 0x4e4   : >> { %v15680_v48 = vadd.f32 %v15407_v51, %v17585_v29  ;;  %5249 = vst [vmem:[%s15554_s14 + $0x30] sm:$0xff] %v5230_v22  ;;  %v5215_v11 = vmax.f32 %v5182_v41, %v5183_v55  ;;  %v5136_v27 = vmax.f32 %v5040_v18, 0.0  ;;  %v5043_v62 = vadd.f32 %v15397_v10, %v4660_v31  ;;  %v17589_v55 = vld [vmem:[#allocation21_spill] sm:$0xff]  ;;  %v17590_v22 = vld [vmem:[#allocation12_spill] sm:$0xff] }
 0x4e5   : >> { %v5138_v7 = vmax.f32 %v5042_v19, 0.0  ;;  %v5137_v39 = vmax.f32 %v5041_v34, 0.0  ;;  %v5045_v53 = vadd.f32 %v15403_v47, %v4933_v63  ;;  %v5044_v13 = vadd.f32 %v15407_v51, %v4662_v42 }
 0x4e6   : >> { %v5097_v0 = vmax.f32 %v15659_v43, 0.0  ;;  %v5231_v12 = vpack.c.bf16 %v5215_v11, %v5214_v14  ;;  %v5184_v36 = vmax.f32 %v5088_v44, %v5136_v27  ;;  %v5139_v40 = vmax.f32 %v5043_v62, 0.0  ;;  %v4833_v44 = vpop.f32.mrb[52].mxu1  ;;  %v4666_v17 = vpop.f32.mrb[52].mxu0 }
 0x4e7   : >> { %v5186_v9 = vmax.f32 %v5090_v60, %v5138_v7  ;;  %v5185_v24 = vmax.f32 %v5089_v61, %v5137_v39  ;;  %v5141_v49 = vmax.f32 %v5045_v53, 0.0  ;;  %v5140_v45 = vmax.f32 %v5044_v13, 0.0  ;;  %v17587_v61 = vld [vmem:[#allocation11_spill] sm:$0xff]  ;;  %v4835_v58 = vpop.f32.mrb[53].mxu1  ;;  %v4668_v16 = vpop.f32.mrb[53].mxu0  ;;  %v17593_v7 = vld [vmem:[#allocation24_spill] sm:$0xff] }
 0x4e8   : >> { %v5099_v37 = vmax.f32 %v15673_v32, 0.0  ;;  %v5098_v30 = vmax.f32 %v15680_v48, 0.0  ;;  %v15697_v3 = vadd.f32 %v15397_v10, %v17586_v52  ;;  %5250 = vst [vmem:[%s15554_s14 + $0x38] sm:$0xff] %v5231_v12  ;;  %v5187_v59 = vmax.f32 %v5091_v28, %v5139_v40  ;;  %v4836_v56 = vpop.f32.mrb[54].mxu1  ;;  %v4670_v18 = vpop.f32.mrb[54].mxu0  ;;  %v17592_v48 = vld [vmem:[#allocation22_spill] sm:$0xff] }
 0x4e9   : >> { %v5216_v21 = vmax.f32 %v5185_v24, %v5186_v9  ;;  %v5189_v38 = vmax.f32 %v5093_v4, %v5141_v49  ;;  %v5188_v60 = vmax.f32 %v5092_v46, %v5140_v45  ;;  %v4936_v43 = vadd.f32 %v4833_v44, %v17587_v61  ;;  %v4838_v20 = vpop.f32.mrb[55].mxu1  ;;  %v4672_v5 = vpop.f32.mrb[55].mxu0  ;;  %v17594_v52 = vld [vmem:[#allocation13_spill] sm:$0xff] }
 0x4ea   : >> { %v15707_v14 = vadd.f32 %v15403_v47, %v17588_v54  ;;  %v15711_v2 = vadd.f32 %v15407_v51, %v17589_v55  ;;  %v5232_v33 = vpack.c.bf16 %v5187_v59, %v5184_v36  ;;  %v5046_v28 = vadd.f32 %v15397_v10, %v4666_v17  ;;  %v17596_v54 = vld [vmem:[#allocation26_spill] sm:$0xff] }
 0x4eb   : >> { %v5217_v4 = vmax.f32 %v5188_v60, %v5189_v38  ;;  %v5048_v46 = vadd.f32 %v15403_v47, %v4936_v43  ;;  %v5047_v6 = vadd.f32 %v15407_v51, %v4668_v16  ;;  %v4939_v41 = vadd.f32 %v4836_v56, %v17590_v22  ;;  %v17595_v43 = vld [vmem:[#allocation14_spill] sm:$0xff] }
 0x4ec   : >> { %v5100_v1 = vmax.f32 %v15697_v3, 0.0  ;;  %v15720_v32 = vadd.f32 %v15397_v10, %v17591_v50  ;;  %5251 = vst [vmem:[%s15554_s14 + $0x40] sm:$0xff] %v5232_v33  ;;  %v5142_v19 = vmax.f32 %v5046_v28, 0.0  ;;  %v5049_v34 = vadd.f32 %v15397_v10, %v4670_v18 }
 0x4ed   : >> { %v5233_v63 = vpack.c.bf16 %v5217_v4, %v5216_v21  ;;  %v5144_v31 = vmax.f32 %v5048_v46, 0.0  ;;  %v5143_v35 = vmax.f32 %v5047_v6, 0.0  ;;  %v5051_v29 = vadd.f32 %v15403_v47, %v4939_v41  ;;  %v17597_v46 = vld [vmem:[#allocation25_spill] sm:$0xff] }
 0x4ee   : >> { %v5009_v11 = vadd.f32 %v15403_v47, %v17592_v48  ;;  %v5190_v27 = vmax.f32 %v5094_v23, %v5142_v19  ;;  %v5145_v62 = vmax.f32 %v5049_v34, 0.0  ;;  %v5050_v42 = vadd.f32 %v15407_v51, %v4672_v5  ;;  %v4841_v9 = vpop.f32.mrb[56].mxu1  ;;  %v4676_v26 = vpop.f32.mrb[56].mxu0  ;;  %v17598_v5 = vld [vmem:[#allocation27_spill] sm:$0xff] }
 0x4ef   : >> { %v5008_v39 = vadd.f32 %v15407_v51, %v17593_v7  ;;  %5252 = vst [vmem:[%s15554_s14 + $0x48] sm:$0xff] %v5233_v63  ;;  %v5192_v53 = vmax.f32 %v5096_v25, %v5144_v31  ;;  %v5191_v13 = vmax.f32 %v5095_v8, %v5143_v35  ;;  %v5147_v12 = vmax.f32 %v5051_v29, 0.0  ;;  %v4843_v25 = vpop.f32.mrb[57].mxu1  ;;  %v4678_v21 = vpop.f32.mrb[57].mxu0  ;;  %v17599_v31 = vld [vmem:[#allocation29_spill] sm:$0xff] }
 0x4f0   : >> { %v5102_v36 = vmax.f32 %v15707_v14, 0.0  ;;  %v5101_v40 = vmax.f32 %v15711_v2, 0.0  ;;  %v5193_v57 = vmax.f32 %v5097_v0, %v5145_v62  ;;  %v5146_v23 = vmax.f32 %v5050_v42, 0.0  ;;  %v4844_v38 = vpop.f32.mrb[58].mxu1  ;;  %v17600_v42 = vld [vmem:[#allocation15_spill] sm:$0xff] }
 0x4f1   : >> { %v5103_v24 = vmax.f32 %v15720_v32, 0.0  ;;  %v5218_v49 = vmax.f32 %v5191_v13, %v5192_v53  ;;  %v5195_v45 = vmax.f32 %v5099_v37, %v5147_v12  ;;  %v4942_v3 = vadd.f32 %v4841_v9, %v17594_v52  ;;  %v4680_v37 = vpop.f32.mrb[58].mxu0  ;;  %v4846_v58 = vpop.f32.mrb[59].mxu1  ;;  %v17601_v13 = vld [vmem:[#allocation28_spill] sm:$0xff] }
 0x4f2   : >> { %v5105_v59 = vmax.f32 %v5009_v11, 0.0  ;;  %v5234_v15 = vpack.c.bf16 %v5193_v57, %v5190_v27  ;;  %v5194_v8 = vmax.f32 %v5098_v30, %v5146_v23  ;;  %v5052_v44 = vadd.f32 %v15397_v10, %v4676_v26  ;;  %v4682_v33 = vpop.f32.mrb[59].mxu0 }
 0x4f3   : >> { %v5104_v60 = vmax.f32 %v5008_v39, 0.0  ;;  %v5054_v0 = vadd.f32 %v15403_v47, %v4942_v3  ;;  %v5053_v61 = vadd.f32 %v15407_v51, %v4678_v21  ;;  %v4945_v17 = vadd.f32 %v4844_v38, %v17595_v43 }
 0x4f4   : >> { %v5010_v14 = vadd.f32 %v15397_v10, %v17596_v54  ;;  %5253 = vst [vmem:[%s15554_s14 + $0x50] sm:$0xff] %v5234_v15  ;;  %v5219_v55 = vmax.f32 %v5194_v8, %v5195_v45  ;;  %v5148_v2 = vmax.f32 %v5052_v44, 0.0  ;;  %v5055_v30 = vadd.f32 %v15397_v10, %v4680_v37  ;;  %v17602_v45 = vld [vmem:[#allocation16_spill] sm:$0xff] }
 0x4f5   : >> { %v5150_v28 = vmax.f32 %v5054_v0, 0.0  ;;  %v5149_v16 = vmax.f32 %v5053_v61, 0.0  ;;  %v5057_v56 = vadd.f32 %v15403_v47, %v4945_v17  ;;  %v5056_v4 = vadd.f32 %v15407_v51, %v4682_v33 }
 0x4f6   : >> { %v5012_v6 = vadd.f32 %v15403_v47, %v17597_v46  ;;  %v5235_v22 = vpack.c.bf16 %v5219_v55, %v5218_v49  ;;  %v5196_v41 = vmax.f32 %v5100_v1, %v5148_v2  ;;  %v5151_v18 = vmax.f32 %v5055_v30, 0.0  ;;  %v4849_v48 = vpop.f32.mrb[60].mxu1  ;;  %v4686_v7 = vpop.f32.mrb[60].mxu0 }
 0x4f7   : >> { %v5198_v20 = vmax.f32 %v5102_v36, %v5150_v28  ;;  %v5197_v50 = vmax.f32 %v5101_v40, %v5149_v16  ;;  %v5153_v32 = vmax.f32 %v5057_v56, 0.0  ;;  %v5152_v19 = vmax.f32 %v5056_v4, 0.0  ;;  %v4851_v39 = vpop.f32.mrb[61].mxu1  ;;  %v4688_v57 = vpop.f32.mrb[61].mxu0 }
 0x4f8   : >> { %v5106_v34 = vmax.f32 %v5010_v14, 0.0  ;;  %v5011_v63 = vadd.f32 %v15407_v51, %v17598_v5  ;;  %v5013_v35 = vadd.f32 %v15397_v10, %v17599_v31  ;;  %5254 = vst [vmem:[%s15554_s14 + $0x58] sm:$0xff] %v5235_v22  ;;  %v5199_v29 = vmax.f32 %v5103_v24, %v5151_v18  ;;  %v4852_v23 = vpop.f32.mrb[62].mxu1  ;;  %v4690_v3 = vpop.f32.mrb[62].mxu0  ;;  %v12632_v22 = vld [vmem:[%s17506_s5 + $0x314] ss:$8 sps:$4 sm:$0xff] (%p1251_p6)  }
 0x4f9   : >> { %v5220_v11 = vmax.f32 %v5197_v50, %v5198_v20  ;;  %v5201_v27 = vmax.f32 %v5105_v59, %v5153_v32  ;;  %v5200_v62 = vmax.f32 %v5104_v60, %v5152_v19  ;;  %v4948_v1 = vadd.f32 %v4849_v48, %v17600_v42  ;;  %v4854_v26 = vpop.f32.mrb[63].mxu1  ;;  %v17603_v59 = vld [vmem:[#allocation30_spill] sm:$0xff]  ;;  %v4692_v21 = vpop.f32.mrb[63].mxu0  ;;  %v12635_v18 = vld [vmem:[%s17506_s5 + $0x324] ss:$8 sps:$4 sm:$0xff] (%p1251_p6)  }
 0x4fa   : >> { %v5108_v53 = vmax.f32 %v5012_v6, 0.0  ;;  %v5015_v12 = vadd.f32 %v15403_v47, %v17601_v13  ;;  %v5236_v36 = vpack.c.bf16 %v5199_v29, %v5196_v41  ;;  %v5058_v40 = vadd.f32 %v15397_v10, %v4686_v7  ;;  %v12631_v6 = vld [vmem:[%s17506_s5 + $0x300] ss:$8 sps:$4 sm:$0xff] (%p1251_p6)   ;;  %v12634_v41 = vld [vmem:[%s17506_s5 + $0x310] ss:$8 sps:$4 sm:$0xff] (%p1251_p6)  }
 0x4fb   : >> { %v5221_v9 = vmax.f32 %v5200_v62, %v5201_v27  ;;  %v5060_v24 = vadd.f32 %v15403_v47, %v4948_v1  ;;  %v5059_v49 = vadd.f32 %v15407_v51, %v4688_v57  ;;  %v4951_v52 = vadd.f32 %v4852_v23, %v17602_v45  ;;  %v12637_v20 = vld [vmem:[%s17506_s5 + $0x320] ss:$8 sps:$4 sm:$0xff] (%p1251_p6)   ;;  %v12638_v50 = vld [vmem:[%s17506_s5 + $0x334] ss:$8 sps:$4 sm:$0xff] (%p1251_p6)   ;;  %v12640_v32 = vld [vmem:[%s17506_s5 + $0x330] ss:$8 sps:$4 sm:$0xff] (%p1251_p6)  }
 0x4fc   : >> { %v5107_v25 = vmax.f32 %v5011_v63, 0.0  ;;  %v5014_v15 = vadd.f32 %v15407_v51, %v17603_v59  ;;  %5255 = vst [vmem:[%s15554_s14 + $0x60] sm:$0xff] %v5236_v36  ;;  %v5154_v8 = vmax.f32 %v5058_v40, 0.0  ;;  %v5061_v44 = vadd.f32 %v15397_v10, %v4690_v3  ;;  %v12641_v19 = vld [vmem:[%s17506_s5 + $0x344] ss:$8 sps:$4 sm:$0xff] (%p1251_p6)  }
 0x4fd   : >> { %v5237_v38 = vpack.c.bf16 %v5221_v9, %v5220_v11  ;;  %v5156_v60 = vmax.f32 %v5060_v24, 0.0  ;;  %v5155_v0 = vmax.f32 %v5059_v49, 0.0  ;;  %v5063_v61 = vadd.f32 %v15403_v47, %v4951_v52  ;;  %v12644_v5 = vld [vmem:[%s17506_s5 + $0x354] ss:$8 sps:$4 sm:$0xff] (%p1251_p6)   ;;  %v12646_v63 = vld [vmem:[%s17506_s5 + $0x350] ss:$8 sps:$4 sm:$0xff] (%p1251_p6)  }
 0x4fe   : >> { %v5109_v43 = vmax.f32 %v5013_v35, 0.0  ;;  %v5202_v17 = vmax.f32 %v5106_v34, %v5154_v8  ;;  %v5157_v37 = vmax.f32 %v5061_v44, 0.0  ;;  %v5062_v58 = vadd.f32 %v15407_v51, %v4692_v21  ;;  %v12629_v51 = vld [vmem:[%s17506_s5 + $0x304] ss:$8 sps:$4 sm:$0xff] (%p1251_p6)   ;;  %v12643_v34 = vld [vmem:[%s17506_s5 + $0x340] ss:$8 sps:$4 sm:$0xff] (%p1251_p6)  }
 0x4ff   : >> { %v5111_v54 = vmax.f32 %v5015_v12, 0.0  ;;  %5256 = vst [vmem:[%s15554_s14 + $0x68] sm:$0xff] %v5237_v38  ;;  %v5204_v14 = vmax.f32 %v5108_v53, %v5156_v60  ;;  %v5203_v55 = vmax.f32 %v5107_v25, %v5155_v0  ;;  %v5159_v2 = vmax.f32 %v5063_v61, 0.0  ;;  %6468 = vmatprep.subr.bf16.mxu0 (%p1251_p6), %v12629_v51  ;;  %v12647_v31 = vld [vmem:[%s17506_s5 + $0x364] ss:$8 sps:$4 sm:$0xff] (%p1251_p6)  }
 0x500   : >> { %v5110_v30 = vmax.f32 %v5014_v15, 0.0  ;;  %v5205_v10 = vmax.f32 %v5109_v43, %v5157_v37  ;;  %v5158_v33 = vmax.f32 %v5062_v58, 0.0  ;;  %6469 = vmatpush1.bf16.msra.mxu0 (%p1251_p6), %v12631_v6  ;;  %v12649_v29 = vld [vmem:[%s17506_s5 + $0x360] ss:$8 sps:$4 sm:$0xff] (%p1251_p6)   ;;  %v12650_v48 = vld [vmem:[%s17506_s5 + $0x374] ss:$8 sps:$4 sm:$0xff] (%p1251_p6)  }
 0x501   : >> { %v5222_v28 = vmax.f32 %v5203_v55, %v5204_v14  ;;  %v5207_v16 = vmax.f32 %v5111_v54, %v5159_v2  ;;  %6470 = vmatprep.subr.bf16.mxu0 (%p1251_p6), %v12632_v22  ;;  %v12652_v11 = vld [vmem:[%s17506_s5 + $0x370] ss:$8 sps:$4 sm:$0xff] (%p1251_p6)   ;;  %v12653_v27 = vld [vmem:[%s17506_s5 + $0x384] ss:$8 sps:$4 sm:$0xff] (%p1251_p6)   ;;  %v12655_v62 = vld [vmem:[%s17506_s5 + $0x380] ss:$8 sps:$4 sm:$0xff] (%p1251_p6)  }
 0x502   : >> { %v5238_v56 = vpack.c.bf16 %v5205_v10, %v5202_v17  ;;  %v5206_v4 = vmax.f32 %v5110_v30, %v5158_v33  ;;  %1253 = sbr.rel (!%p1251_p6) target bundleno = 378 (0x17a), region = 149  ;;  %v12656_v42 = vld [vmem:[%s17506_s5 + $0x394] ss:$8 sps:$4 sm:$0xff] (%p1251_p6)   ;;  %v12658_v1 = vld [vmem:[%s17506_s5 + $0x390] ss:$8 sps:$4 sm:$0xff] (%p1251_p6)  }
 0x503   : > { %v12659_v7 = vld [vmem:[%s17506_s5 + $0x3a4] ss:$8 sps:$4 sm:$0xff] (%p1251_p6)   ;;  %v12661_v39 = vld [vmem:[%s17506_s5 + $0x3a0] ss:$8 sps:$4 sm:$0xff] (%p1251_p6)   ;;  %v12662_v53 = vld [vmem:[%s17506_s5 + $0x3b4] ss:$8 sps:$4 sm:$0xff] (%p1251_p6)  }
 0x504   : >> { %5257 = vst [vmem:[%s15554_s14 + $0x70] sm:$0xff] %v5238_v56  ;;  %v5223_v47 = vmax.f32 %v5206_v4, %v5207_v16  ;;  %6471 = vmatpush1.bf16.msra.mxu0 (%p1251_p6), %v12634_v41  ;;  %v12664_v13 = vld [vmem:[%s17506_s5 + $0x3b0] ss:$8 sps:$4 sm:$0xff] (%p1251_p6)   ;;  %v12665_v12 = vld [vmem:[%s17506_s5 + $0x3c4] ss:$8 sps:$4 sm:$0xff] (%p1251_p6)  }
 0x505   : > { %6472 = vmatprep.subr.bf16.mxu0 (%p1251_p6), %v12635_v18  ;;  %v12667_v36 = vld [vmem:[%s17506_s5 + $0x3c0] ss:$8 sps:$4 sm:$0xff] (%p1251_p6)   ;;  %v12668_v40 = vld [vmem:[%s17506_s5 + $0x3d4] ss:$8 sps:$4 sm:$0xff] (%p1251_p6)   ;;  %v12725_v57 = vld [vmem:[%s17506_s5 + $0x104] ss:$8 sps:$4 sm:$0xff] (%p1251_p6)  }
 0x506   : >> { %v5239_v46 = vpack.c.bf16 %v5223_v47, %v5222_v28  ;;  %v12727_v23 = vld [vmem:[%s17506_s5 + $0x100] ss:$8 sps:$4 sm:$0xff] (%p1251_p6)   ;;  %v12670_v9 = vld [vmem:[%s17506_s5 + $0x3d0] ss:$8 sps:$4 sm:$0xff] (%p1251_p6)   ;;  %5517 = vmatprep.subr.bf16.mxu1 (%p1251_p6), %v12725_v57  ;;  %v12671_v24 = vld [vmem:[%s17506_s5 + $0x3e4] ss:$8 sps:$4 sm:$0xff] (%p1251_p6)  }
 0x507   : > { %5518 = vmatpush1.bf16.msra.mxu1 (%p1251_p6), %v12727_v23  ;;  %v12731_v49 = vld [vmem:[%s17506_s5 + $0x114] ss:$8 sps:$4 sm:$0xff] (%p1251_p6)   ;;  %v12733_v45 = vld [vmem:[%s17506_s5 + $0x110] ss:$8 sps:$4 sm:$0xff] (%p1251_p6)   ;;  %v12737_v52 = vld [vmem:[%s17506_s5 + $0x124] ss:$8 sps:$4 sm:$0xff] (%p1251_p6)  }
 0x508   : >> { %5258 = vst [vmem:[%s15554_s14 + $0x78] sm:$0xff] %v5239_v46  ;;  %6473 = vmatpush1.bf16.msra.mxu0 (%p1251_p6), %v12637_v20  ;;  %5519 = vmatprep.subr.bf16.mxu1 (%p1251_p6), %v12731_v49  ;;  %v12673_v3 = vld [vmem:[%s17506_s5 + $0x3e0] ss:$8 sps:$4 sm:$0xff] (%p1251_p6)   ;;  %v12674_v25 = vld [vmem:[%s17506_s5 + $0x3f4] ss:$8 sps:$4 sm:$0xff] (%p1251_p6)  }
 0x509   : > { %6474 = vmatprep.subr.bf16.mxu0 %v12638_v50  ;;  %v12739_v26 = vld [vmem:[%s17506_s5 + $0x120] ss:$8 sps:$4 sm:$0xff]   ;;  %v12676_v59 = vld [vmem:[%s17506_s5 + $0x3f0] ss:$8 sps:$4 sm:$0xff]   ;;  %v12743_v15 = vld [vmem:[%s17506_s5 + $0x134] ss:$8 sps:$4 sm:$0xff]  }
 0x50a   : > { %v12679_v8 = vld [vmem:[%s17506_s5 + $0x404] ss:$8 sps:$4 sm:$0xff]   ;;  %v12745_v44 = vld [vmem:[%s17506_s5 + $0x130] ss:$8 sps:$4 sm:$0xff]   ;;  %v12677_v60 = vld [vmem:[%s17506_s5 + $0x400] ss:$8 sps:$4 sm:$0xff]  }
 0x50b   : > { %5520 = vmatpush1.bf16.msra.mxu1 %v12733_v45  ;;  %v12749_v21 = vld [vmem:[%s17506_s5 + $0x144] ss:$8 sps:$4 sm:$0xff]   ;;  %v12682_v0 = vld [vmem:[%s17506_s5 + $0x414] ss:$8 sps:$4 sm:$0xff]   ;;  %v12751_v43 = vld [vmem:[%s17506_s5 + $0x140] ss:$8 sps:$4 sm:$0xff]  }
 0x50c   : > { %6475 = vmatpush1.bf16.msra.mxu0 %v12640_v32  ;;  %5521 = vmatprep.subr.bf16.mxu1 %v12737_v52  ;;  %v12755_v17 = vld [vmem:[%s17506_s5 + $0x154] ss:$8 sps:$4 sm:$0xff]   ;;  %v12680_v37 = vld [vmem:[%s17506_s5 + $0x410] ss:$8 sps:$4 sm:$0xff]   ;;  %v12685_v58 = vld [vmem:[%s17506_s5 + $0x424] ss:$8 sps:$4 sm:$0xff]  }
 0x50d   : > { %6476 = vmatprep.subr.bf16.mxu0 %v12641_v19  ;;  %v12757_v54 = vld [vmem:[%s17506_s5 + $0x150] ss:$8 sps:$4 sm:$0xff]   ;;  %v12761_v14 = vld [vmem:[%s17506_s5 + $0x164] ss:$8 sps:$4 sm:$0xff]   ;;  %v12683_v2 = vld [vmem:[%s17506_s5 + $0x420] ss:$8 sps:$4 sm:$0xff]  }
 0x50e   : > { %v12688_v30 = vld [vmem:[%s17506_s5 + $0x434] ss:$8 sps:$4 sm:$0xff]   ;;  %v12763_v33 = vld [vmem:[%s17506_s5 + $0x160] ss:$8 sps:$4 sm:$0xff]   ;;  %v12686_v16 = vld [vmem:[%s17506_s5 + $0x430] ss:$8 sps:$4 sm:$0xff]  }
 0x50f   : > { %v6260_v35 = vld [vmem:[#allocation3 + $0x188] sm:$0xff]  ;;  %5522 = vmatpush1.bf16.msra.mxu1 %v12739_v26  ;;  %v6259_v38 = vld [vmem:[#allocation3 + $0x180] sm:$0xff]  ;;  %v6262_v61 = vld [vmem:[#allocation3 + $0x198] sm:$0xff] }
 0x510   : > { %6477 = vmatpush1.bf16.msra.mxu0 %v12643_v34  ;;  %6500 = vmatprep.mubr.bf16.mxu0 %v6260_v35  ;;  %v6261_v55 = vld [vmem:[#allocation3 + $0x190] sm:$0xff]  ;;  %v6264_v10 = vld [vmem:[#allocation3 + $0x1a8] sm:$0xff]  ;;  %v6263_v46 = vld [vmem:[#allocation3 + $0x1a0] sm:$0xff] }
 0x511   : > { %6478 = vmatprep.subr.bf16.mxu0 %v12644_v5  ;;  %5523 = vmatprep.subr.bf16.mxu1 %v12743_v15  ;;  %v12767_v28 = vld [vmem:[%s17506_s5 + $0x174] ss:$8 sps:$4 sm:$0xff]   ;;  %v12691_v56 = vld [vmem:[%s17506_s5 + $0x444] ss:$8 sps:$4 sm:$0xff]   ;;  %v12769_v4 = vld [vmem:[%s17506_s5 + $0x170] ss:$8 sps:$4 sm:$0xff]  }
 0x512   : > { %v12773_v47 = vld [vmem:[%s17506_s5 + $0x184] ss:$8 sps:$4 sm:$0xff]   ;;  %v12689_v51 = vld [vmem:[%s17506_s5 + $0x440] ss:$8 sps:$4 sm:$0xff]   ;;  %v12694_v6 = vld [vmem:[%s17506_s5 + $0x454] ss:$8 sps:$4 sm:$0xff]  }
 0x513   : > { %5524 = vmatpush1.bf16.msra.mxu1 %v12745_v44  ;;  %v6266_v22 = vld [vmem:[#allocation3 + $0x1b8] sm:$0xff]  ;;  %v12775_v41 = vld [vmem:[%s17506_s5 + $0x180] ss:$8 sps:$4 sm:$0xff]   ;;  %v12697_v50 = vld [vmem:[%s17506_s5 + $0x464] ss:$8 sps:$4 sm:$0xff]  }
 0x514   : > { %6479 = vmatpush1.bf16.msra.mxu0 %v12646_v63  ;;  %5525 = vmatprep.subr.bf16.mxu1 %v12749_v21  ;;  %v12779_v18 = vld [vmem:[%s17506_s5 + $0x194] ss:$8 sps:$4 sm:$0xff]   ;;  %v12692_v20 = vld [vmem:[%s17506_s5 + $0x450] ss:$8 sps:$4 sm:$0xff]   ;;  %v12785_v34 = vld [vmem:[%s17506_s5 + $0x1a4] ss:$8 sps:$4 sm:$0xff]  }
 0x515   : > { %6480 = vmatprep.subr.bf16.mxu0 %v12647_v31  ;;  %v12781_v32 = vld [vmem:[%s17506_s5 + $0x190] ss:$8 sps:$4 sm:$0xff]   ;;  %v12695_v5 = vld [vmem:[%s17506_s5 + $0x460] ss:$8 sps:$4 sm:$0xff]   ;;  %v12700_v63 = vld [vmem:[%s17506_s5 + $0x474] ss:$8 sps:$4 sm:$0xff]  }
 0x516   : > { %v6265_v19 = vld [vmem:[#allocation3 + $0x1b0] sm:$0xff]  ;;  %v6268_v31 = vld [vmem:[#allocation3 + $0x1c8] sm:$0xff] }
 0x517   : > { %5526 = vmatpush1.bf16.msra.mxu1 %v12751_v43  ;;  %v12787_v35 = vld [vmem:[%s17506_s5 + $0x1a0] ss:$8 sps:$4 sm:$0xff]   ;;  %v12805_v57 = vld [vmem:[%s17506_s5 + $0x1d0] ss:$8 sps:$4 sm:$0xff]   ;;  %v12809_v23 = vld [vmem:[%s17506_s5 + $0x1e4] ss:$8 sps:$4 sm:$0xff]  }
 0x518   : > { %6481 = vmatpush1.bf16.msra.mxu0 %v12649_v29  ;;  %5527 = vmatprep.subr.bf16.mxu1 %v12755_v17  ;;  %v12791_v29 = vld [vmem:[%s17506_s5 + $0x1b4] ss:$8 sps:$4 sm:$0xff]   ;;  %v6272_v45 = vld [vmem:[#allocation3 + $0x1e8] sm:$0xff]  ;;  %v12710_v26 = vld [vmem:[%s17506_s5 + $0x4b0] ss:$8 sps:$4 sm:$0xff]  }
 0x519   : > { %6482 = vmatprep.subr.bf16.mxu0 %v12650_v48  ;;  %v12698_v48 = vld [vmem:[%s17506_s5 + $0x470] ss:$8 sps:$4 sm:$0xff]   ;;  %v12712_v49 = vld [vmem:[%s17506_s5 + $0x4b4] ss:$8 sps:$4 sm:$0xff]   ;;  %v12811_v52 = vld [vmem:[%s17506_s5 + $0x1e0] ss:$8 sps:$4 sm:$0xff]  }
 0x51a   : > { %v12823_v15 = vld [vmem:[%s17506_s5 + $0x4] ss:$8 sps:$4 sm:$0xff]   ;;  %v12713_v44 = vld [vmem:[%s17506_s5 + $0x4c0] ss:$8 sps:$4 sm:$0xff]   ;;  %v12718_v21 = vld [vmem:[%s17506_s5 + $0x4d4] ss:$8 sps:$4 sm:$0xff]  }
 0x51b   : > { %5528 = vmatpush1.bf16.msra.mxu1 %v12757_v54  ;;  %v5311_v43 = vld [vmem:[#allocation3 + $0x98] sm:$0xff] }
 0x51c   : > { %6483 = vmatpush1.bf16.msra.mxu0 %v12652_v11  ;;  %5529 = vmatprep.subr.bf16.mxu1 %v12761_v14  ;;  %v12703_v11 = vld [vmem:[%s17506_s5 + $0x484] ss:$8 sps:$4 sm:$0xff]   ;;  %v12716_v17 = vld [vmem:[%s17506_s5 + $0x4d0] ss:$8 sps:$4 sm:$0xff]   ;;  %v12719_v14 = vld [vmem:[%s17506_s5 + $0x4e0] ss:$8 sps:$4 sm:$0xff]  }
 0x51d   : > { %6484 = vmatprep.subr.bf16.mxu0 %v12653_v27  ;;  %v12793_v27 = vld [vmem:[%s17506_s5 + $0x1b0] ss:$8 sps:$4 sm:$0xff]  }
 0x51e   : > { %v12827_v54 = vld [vmem:[%s17506_s5 + $0x10] ss:$8 sps:$4 sm:$0xff]  }
 0x51f   : > { %5530 = vmatpush1.bf16.msra.mxu1 %v12763_v33  ;;  %v12833_v33 = vld [vmem:[%s17506_s5 + $0x20] ss:$8 sps:$4 sm:$0xff]  }
 0x520   : > { %6485 = vmatpush1.bf16.msra.mxu0 %v12655_v62  ;;  %5531 = vmatprep.subr.bf16.mxu1 %v12767_v28  ;;  %v12797_v62 = vld [vmem:[%s17506_s5 + $0x1c4] ss:$8 sps:$4 sm:$0xff]   ;;  %v12841_v28 = vld [vmem:[%s17506_s5 + $0x34] ss:$8 sps:$4 sm:$0xff]  }
 0x521   : > { %6486 = vmatprep.subr.bf16.mxu0 %v12656_v42  ;;  %v6267_v42 = vld [vmem:[#allocation3 + $0x1c0] sm:$0xff] }
 0x523   : > { %5532 = vmatpush1.bf16.msra.mxu1 %v12769_v4  ;;  %v12730_v4 = vld [vmem:[%s17506_s5 + $0x504] ss:$8 sps:$4 sm:$0xff]  }
 0x524   : > { %6487 = vmatpush1.bf16.msra.mxu0 %v12658_v1  ;;  %5533 = vmatprep.subr.bf16.mxu1 %v12773_v47  ;;  %v12701_v1 = vld [vmem:[%s17506_s5 + $0x480] ss:$8 sps:$4 sm:$0xff]   ;;  %v12839_v47 = vld [vmem:[%s17506_s5 + $0x30] ss:$8 sps:$4 sm:$0xff]  }
 0x525   : > { %6488 = vmatprep.subr.bf16.mxu0 %v12659_v7  ;;  %v12706_v7 = vld [vmem:[%s17506_s5 + $0x494] ss:$8 sps:$4 sm:$0xff]  }
 0x527   : > { %5534 = vmatpush1.bf16.msra.mxu1 %v12775_v41  ;;  %v6617_v41 = vld [vmem:[#allocation3 + $0x218] sm:$0xff] }
 0x528   : > { %6489 = vmatpush1.bf16.msra.mxu0 %v12661_v39  ;;  %5535 = vmatprep.subr.bf16.mxu1 %v12779_v18  ;;  %v6270_v39 = vld [vmem:[#allocation3 + $0x1d8] sm:$0xff]  ;;  %v5312_v18 = vld [vmem:[#allocation3 + $0xa0] sm:$0xff] }
 0x529   : > { %6490 = vmatprep.subr.bf16.mxu0 %v12662_v53  ;;  %v12799_v53 = vld [vmem:[%s17506_s5 + $0x1c0] ss:$8 sps:$4 sm:$0xff]  }
 0x52b   : > { %5536 = vmatpush1.bf16.msra.mxu1 %v12781_v32  ;;  %v5315_v32 = vld [vmem:[#allocation3 + $0xb8] sm:$0xff] }
 0x52c   : > { %6491 = vmatpush1.bf16.msra.mxu0 %v12664_v13  ;;  %5537 = vmatprep.subr.bf16.mxu1 %v12785_v34  ;;  %v5309_v13 = vld [vmem:[#allocation3 + $0x88] sm:$0xff] }
 0x52d   : > { %6492 = vmatprep.subr.bf16.mxu0 %v12665_v12  ;;  %v12803_v12 = vld [vmem:[%s17506_s5 + $0x1d4] ss:$8 sps:$4 sm:$0xff]   ;;  %5549 = vmatprep.mubr.bf16.mxu1 %v5309_v13  ;;  %v12742_v34 = vld [vmem:[%s17506_s5 + $0x524] ss:$8 sps:$4 sm:$0xff]  }
 0x52e   : > { %v12871_v13 = vld [vmem:[%s17506_s5 + $0x84] ss:$8 sps:$4 sm:$0xff]  }
 0x52f   : > { %5538 = vmatpush1.bf16.msra.mxu1 %v12787_v35  ;;  %v12740_v35 = vld [vmem:[%s17506_s5 + $0x520] ss:$8 sps:$4 sm:$0xff]  }
 0x530   : > { %6493 = vmatpush1.bf16.msra.mxu0 %v12667_v36  ;;  %5539 = vmatprep.subr.bf16.mxu1 %v12791_v29  ;;  %v12704_v36 = vld [vmem:[%s17506_s5 + $0x490] ss:$8 sps:$4 sm:$0xff]   ;;  %v12748_v29 = vld [vmem:[%s17506_s5 + $0x534] ss:$8 sps:$4 sm:$0xff]  }
 0x531   : > { %6494 = vmatprep.subr.bf16.mxu0 %v12668_v40  ;;  %v12709_v40 = vld [vmem:[%s17506_s5 + $0x4a4] ss:$8 sps:$4 sm:$0xff]  }
 0x533   : > { %5540 = vmatpush1.bf16.msra.mxu1 %v12793_v27  ;;  %v12857_v27 = vld [vmem:[%s17506_s5 + $0x60] ss:$8 sps:$4 sm:$0xff]  }
 0x534   : > { %6495 = vmatpush1.bf16.msra.mxu0 %v12670_v9  ;;  %5541 = vmatprep.subr.bf16.mxu1 %v12797_v62  ;;  %v6269_v9 = vld [vmem:[#allocation3 + $0x1d0] sm:$0xff] }
 0x535   : > { %6496 = vmatprep.subr.bf16.mxu0 %v12671_v24  ;;  %v12707_v24 = vld [vmem:[%s17506_s5 + $0x4a0] ss:$8 sps:$4 sm:$0xff]   ;;  %v12865_v62 = vld [vmem:[%s17506_s5 + $0x74] ss:$8 sps:$4 sm:$0xff]  }
 0x537   : > { %5542 = vmatpush1.bf16.msra.mxu1 %v12799_v53  ;;  %v6618_v53 = vld [vmem:[#allocation3 + $0x220] sm:$0xff] }
 0x538   : > { %6497 = vmatpush1.bf16.msra.mxu0 %v12673_v3  ;;  %5543 = vmatprep.subr.bf16.mxu1 %v12803_v12  ;;  %v12815_v3 = vld [vmem:[%s17506_s5 + $0x1f4] ss:$8 sps:$4 sm:$0xff]   ;;  %v12752_v12 = vld [vmem:[%s17506_s5 + $0x540] ss:$8 sps:$4 sm:$0xff]  }
 0x539   : > { %6498 = vmatprep.subr.bf16.mxu0 %v12674_v25  ;;  %v12715_v25 = vld [vmem:[%s17506_s5 + $0x4c4] ss:$8 sps:$4 sm:$0xff]  }
 0x53b   : > { %5544 = vmatpush1.bf16.msra.mxu1 %v12805_v57  ;;  %v5316_v57 = vld [vmem:[#allocation3 + $0xc0] sm:$0xff] }
 0x53c   : > { %6499 = vmatpush1.bf16.msra.mxu0 %v12676_v59  ;;  %5545 = vmatprep.subr.bf16.mxu1 %v12809_v23  ;;  %v12817_v59 = vld [vmem:[%s17506_s5 + $0x1f0] ss:$8 sps:$4 sm:$0xff]   ;;  %v12869_v23 = vld [vmem:[%s17506_s5 + $0x80] ss:$8 sps:$4 sm:$0xff]  }
 0x53d   : > { %6823 = vmatprep.subr.bf16.mxu0 %v12679_v8  ;;  %v6271_v8 = vld [vmem:[#allocation3 + $0x1e0] sm:$0xff] }
 0x53f   : > { %6501 = vmatmul.mubr.bf16.vlgmr.msra.gmra.mrb[0].mxu0 %v6259_v38  ;;  %5546 = vmatpush1.bf16.msra.mxu1 %v12811_v52  ;;  %v6274_v38 = vld [vmem:[#allocation3 + $0x1f8] sm:$0xff]  ;;  %v6620_v52 = vld [vmem:[#allocation3 + $0x230] sm:$0xff] }
 0x540   : > { %6824 = vmatpush1.bf16.msra.mxu0 %v12677_v60  ;;  %6510 = vmatprep.mubr.bf16.mxu0 %v6262_v61  ;;  %v5308_v60 = vld [vmem:[#allocation3 + $0x80] sm:$0xff]  ;;  %v12829_v61 = vld [vmem:[%s17506_s5 + $0x14] ss:$8 sps:$4 sm:$0xff]  }
 0x541   : > { %6825 = vmatprep.subr.bf16.mxu0 %v12682_v0  ;;  %5547 = vmatprep.subr.bf16.mxu1 %v12815_v3  ;;  %v12821_v0 = vld [vmem:[%s17506_s5] ss:$8 sps:$4 sm:$0xff]   ;;  %v12875_v3 = vld [vmem:[%s17506_s5 + $0x90] ss:$8 sps:$4 sm:$0xff]  }
 0x543   : > { %5548 = vmatpush1.bf16.msra.mxu1 %v12817_v59  ;;  %v12772_v59 = vld [vmem:[%s17506_s5 + $0x574] ss:$8 sps:$4 sm:$0xff]  }
 0x544   : > { %6826 = vmatpush1.bf16.msra.mxu0 %v12680_v37  ;;  %5790 = vmatprep.subr.bf16.mxu1 %v12823_v15  ;;  %v12721_v37 = vld [vmem:[%s17506_s5 + $0x4e4] ss:$8 sps:$4 sm:$0xff]  }
 0x545   : > { %6827 = vmatprep.subr.bf16.mxu0 %v12685_v58  ;;  %v6273_v58 = vld [vmem:[#allocation3 + $0x1f0] sm:$0xff]  ;;  %v6623_v15 = vld [vmem:[#allocation3 + $0x248] sm:$0xff] }
 0x546   : > { %5550 = vmatmul.mubr.bf16.vlgmr.msra.gmra.mrb[0].mxu1 %v5308_v60  ;;  %v12770_v60 = vld [vmem:[%s17506_s5 + $0x570] ss:$8 sps:$4 sm:$0xff]  }
 0x547   : > { %6511 = vmatmul.mubr.bf16.gmra.mrb[4].mxu0 %v6261_v55  ;;  %5791 = vmatpush1.bf16.msra.mxu1 %v12821_v0  ;;  %v12835_v55 = vld [vmem:[%s17506_s5 + $0x24] ss:$8 sps:$4 sm:$0xff]  }
 0x548   : > { %6828 = vmatpush1.bf16.msra.mxu0 %v12683_v2  ;;  %6520 = vmatprep.mubr.bf16.mxu0 %v6264_v10  ;;  %v12724_v2 = vld [vmem:[%s17506_s5 + $0x4f4] ss:$8 sps:$4 sm:$0xff]   ;;  %v12778_v0 = vld [vmem:[%s17506_s5 + $0x584] ss:$8 sps:$4 sm:$0xff]  }
 0x549   : > { %6829 = vmatprep.subr.bf16.mxu0 %v12688_v30  ;;  %5559 = vmatprep.mubr.bf16.mxu1 %v5311_v43  ;;  %v6615_v30 = vld [vmem:[#allocation3 + $0x208] sm:$0xff]  ;;  %v5310_v10 = vld [vmem:[#allocation3 + $0x90] sm:$0xff] }
 0x54a   : > { %5792 = vmatprep.subr.bf16.mxu1 %v12829_v61  ;;  %v6622_v61 = vld [vmem:[#allocation3 + $0x240] sm:$0xff]  ;;  %v12887_v43 = vld [vmem:[%s17506_s5 + $0xb0] ss:$8 sps:$4 sm:$0xff]  }
 0x54b   : > { %5793 = vmatpush1.bf16.msra.mxu1 %v12827_v54  ;;  %v6625_v54 = vld [vmem:[#allocation3 + $0x258] sm:$0xff] }
 0x54c   : > { %6830 = vmatpush1.bf16.msra.mxu0 %v12686_v16  ;;  %5794 = vmatprep.subr.bf16.mxu1 %v12835_v55  ;;  %v5313_v16 = vld [vmem:[#allocation3 + $0xa8] sm:$0xff] }
 0x54d   : > { %6831 = vmatprep.subr.bf16.mxu0 %v12691_v56  ;;  %v12722_v56 = vld [vmem:[%s17506_s5 + $0x4f0] ss:$8 sps:$4 sm:$0xff]   ;;  %v12893_v55 = vld [vmem:[%s17506_s5 + $0xc0] ss:$8 sps:$4 sm:$0xff]  }
 0x54e   : > { %5560 = vmatmul.mubr.bf16.gmra.mrb[4].mxu1 %v5310_v10  ;;  %v12782_v10 = vld [vmem:[%s17506_s5 + $0x590] ss:$8 sps:$4 sm:$0xff]  }
 0x54f   : > { %6521 = vmatmul.mubr.bf16.gmra.mrb[8].mxu0 %v6263_v46  ;;  %5795 = vmatpush1.bf16.msra.mxu1 %v12833_v33  ;;  %v6614_v46 = vld [vmem:[#allocation3 + $0x200] sm:$0xff] }
 0x550   : > { %6832 = vmatpush1.bf16.msra.mxu0 %v12689_v51  ;;  %6530 = vmatprep.mubr.bf16.mxu0 %v6266_v22  ;;  %v12847_v51 = vld [vmem:[%s17506_s5 + $0x44] ss:$8 sps:$4 sm:$0xff]   ;;  %v12736_v22 = vld [vmem:[%s17506_s5 + $0x514] ss:$8 sps:$4 sm:$0xff]  }
 0x551   : > { %6833 = vmatprep.subr.bf16.mxu0 %v12694_v6  ;;  %5569 = vmatprep.mubr.bf16.mxu1 %v5313_v16  ;;  %v12728_v6 = vld [vmem:[%s17506_s5 + $0x500] ss:$8 sps:$4 sm:$0xff]   ;;  %v12790_v33 = vld [vmem:[%s17506_s5 + $0x5a4] ss:$8 sps:$4 sm:$0xff]   ;;  %v6624_v16 = vld [vmem:[#allocation3 + $0x250] sm:$0xff] }
 0x552   : > { %5796 = vmatprep.subr.bf16.mxu1 %v12841_v28  ;;  %v12899_v28 = vld [vmem:[%s17506_s5 + $0xd0] ss:$8 sps:$4 sm:$0xff]  }
 0x553   : > { %5797 = vmatpush1.bf16.msra.mxu1 %v12839_v47  ;;  %v12796_v47 = vld [vmem:[%s17506_s5 + $0x5b4] ss:$8 sps:$4 sm:$0xff]  }
 0x554   : > { %6834 = vmatpush1.bf16.msra.mxu0 %v12692_v20  ;;  %v12845_v20 = vld [vmem:[%s17506_s5 + $0x40] ss:$8 sps:$4 sm:$0xff]   ;;  %5798 = vmatprep.subr.bf16.mxu1 %v12847_v51  ;;  %v5322_v51 = vld [vmem:[#allocation3 + $0xf0] sm:$0xff] }
 0x555   : > { %6835 = vmatprep.subr.bf16.mxu0 %v12697_v50  ;;  %v12853_v50 = vld [vmem:[%s17506_s5 + $0x54] ss:$8 sps:$4 sm:$0xff]  }
 0x556   : > { %5570 = vmatmul.mubr.bf16.gmra.mrb[8].mxu1 %v5312_v18  ;;  %v12794_v18 = vld [vmem:[%s17506_s5 + $0x5b0] ss:$8 sps:$4 sm:$0xff]  }
 0x557   : > { %6531 = vmatmul.mubr.bf16.gmra.mrb[12].mxu0 %v6265_v19  ;;  %v12734_v19 = vld [vmem:[%s17506_s5 + $0x510] ss:$8 sps:$4 sm:$0xff]   ;;  %5799 = vmatpush1.bf16.msra.mxu1 %v12845_v20  ;;  %v12802_v20 = vld [vmem:[%s17506_s5 + $0x5c4] ss:$8 sps:$4 sm:$0xff]  }
 0x558   : > { %6836 = vmatpush1.bf16.msra.mxu0 %v12695_v5  ;;  %6540 = vmatprep.mubr.bf16.mxu0 %v6268_v31  ;;  %v12851_v5 = vld [vmem:[%s17506_s5 + $0x50] ss:$8 sps:$4 sm:$0xff]  }
 0x559   : > { %6837 = vmatprep.subr.bf16.mxu0 %v12700_v63  ;;  %5579 = vmatprep.mubr.bf16.mxu1 %v5315_v32  ;;  %v12859_v63 = vld [vmem:[%s17506_s5 + $0x64] ss:$8 sps:$4 sm:$0xff]   ;;  %v6616_v31 = vld [vmem:[#allocation3 + $0x210] sm:$0xff] }
 0x55a   : > { %5800 = vmatprep.subr.bf16.mxu1 %v12853_v50  ;;  %v12911_v50 = vld [vmem:[%s17506_s5 + $0xf0] ss:$8 sps:$4 sm:$0xff]   ;;  %v12919_v32 = vld [vmem:[%s17506_s5 + $0x204] ss:$8 sps:$4 sm:$0xff]  }
 0x55b   : > { %5801 = vmatpush1.bf16.msra.mxu1 %v12851_v5  ;;  %v12808_v5 = vld [vmem:[%s17506_s5 + $0x5d4] ss:$8 sps:$4 sm:$0xff]  }
 0x55c   : > { %6838 = vmatpush1.bf16.msra.mxu0 %v12698_v48  ;;  %v6619_v48 = vld [vmem:[#allocation3 + $0x228] sm:$0xff]  ;;  %5802 = vmatprep.subr.bf16.mxu1 %v12859_v63  ;;  %v6629_v63 = vld [vmem:[#allocation3 + $0x278] sm:$0xff] }
 0x55d   : > { %6839 = vmatprep.subr.bf16.mxu0 %v12703_v11  ;;  %v5314_v11 = vld [vmem:[#allocation3 + $0xb0] sm:$0xff] }
 0x55e   : > { %5580 = vmatmul.mubr.bf16.gmra.mrb[12].mxu1 %v5314_v11  ;;  %v12806_v11 = vld [vmem:[%s17506_s5 + $0x5d0] ss:$8 sps:$4 sm:$0xff]  }
 0x55f   : > { %6541 = vmatmul.mubr.bf16.gmra.mrb[16].mxu0 %v6267_v42  ;;  %v5317_v42 = vld [vmem:[#allocation3 + $0xc8] sm:$0xff]  ;;  %5803 = vmatpush1.bf16.msra.mxu1 %v12857_v27 }
 0x560   : > { %6840 = vmatpush1.bf16.msra.mxu0 %v12701_v1  ;;  %6550 = vmatprep.mubr.bf16.mxu0 %v6270_v39  ;;  %v12746_v1 = vld [vmem:[%s17506_s5 + $0x530] ss:$8 sps:$4 sm:$0xff]   ;;  %v12814_v27 = vld [vmem:[%s17506_s5 + $0x5e4] ss:$8 sps:$4 sm:$0xff]  }
 0x561   : > { %6841 = vmatprep.subr.bf16.mxu0 %v12706_v7  ;;  %v12754_v7 = vld [vmem:[%s17506_s5 + $0x544] ss:$8 sps:$4 sm:$0xff]   ;;  %v12863_v39 = vld [vmem:[%s17506_s5 + $0x70] ss:$8 sps:$4 sm:$0xff]   ;;  %5589 = vmatprep.mubr.bf16.mxu1 %v5317_v42 }
 0x562   : > { %5804 = vmatprep.subr.bf16.mxu1 %v12865_v62  ;;  %v12923_v62 = vld [vmem:[%s17506_s5 + $0x210] ss:$8 sps:$4 sm:$0xff]  }
 0x563   : > { %5805 = vmatpush1.bf16.msra.mxu1 %v12863_v39  ;;  %v6628_v42 = vld [vmem:[#allocation3 + $0x270] sm:$0xff] }
 0x564   : > { %6842 = vmatpush1.bf16.msra.mxu0 %v12704_v36  ;;  %v12760_v36 = vld [vmem:[%s17506_s5 + $0x554] ss:$8 sps:$4 sm:$0xff]   ;;  %5806 = vmatprep.subr.bf16.mxu1 %v12871_v13 }
 0x565   : > { %6843 = vmatprep.subr.bf16.mxu0 %v12709_v40  ;;  %v6621_v40 = vld [vmem:[#allocation3 + $0x238] sm:$0xff]  ;;  %v5261_v13 = vld [vmem:[#allocation3 + $0x10] sm:$0xff] }
 0x566   : > { %5590 = vmatmul.mubr.bf16.gmra.mrb[16].mxu1 %v5316_v57  ;;  %v12820_v39 = vld [vmem:[%s17506_s5 + $0x5f4] ss:$8 sps:$4 sm:$0xff]   ;;  %v12818_v57 = vld [vmem:[%s17506_s5 + $0x5f0] ss:$8 sps:$4 sm:$0xff]  }
 0x567   : > { %6551 = vmatmul.mubr.bf16.gmra.mrb[20].mxu0 %v6269_v9  ;;  %v12877_v9 = vld [vmem:[%s17506_s5 + $0x94] ss:$8 sps:$4 sm:$0xff]   ;;  %5807 = vmatpush1.bf16.msra.mxu1 %v12869_v23  ;;  %v12826_v23 = vld [vmem:[%s17506_s5 + $0x604] ss:$8 sps:$4 sm:$0xff]  }
 0x568   : > { %6844 = vmatpush1.bf16.msra.mxu0 %v12707_v24  ;;  %6560 = vmatprep.mubr.bf16.mxu0 %v6272_v45  ;;  %v5319_v24 = vld [vmem:[#allocation3 + $0xd8] sm:$0xff]  ;;  %v12766_v45 = vld [vmem:[%s17506_s5 + $0x564] ss:$8 sps:$4 sm:$0xff]  }
 0x569   : > { %6845 = vmatprep.subr.bf16.mxu0 %v12712_v49  ;;  %v12758_v49 = vld [vmem:[%s17506_s5 + $0x550] ss:$8 sps:$4 sm:$0xff]   ;;  %5599 = vmatprep.mubr.bf16.mxu1 %v5319_v24 }
 0x56a   : > { %5808 = vmatprep.subr.bf16.mxu1 %v12877_v9  ;;  %v6969_v9 = vld [vmem:[#allocation3 + $0x280] sm:$0xff]  ;;  %v12935_v24 = vld [vmem:[%s17506_s5 + $0x230] ss:$8 sps:$4 sm:$0xff]  }
 0x56b   : > { %5809 = vmatpush1.bf16.msra.mxu1 %v12875_v3  ;;  %v6972_v3 = vld [vmem:[#allocation3 + $0x298] sm:$0xff] }
 0x56c   : > { %6846 = vmatpush1.bf16.msra.mxu0 %v12710_v26  ;;  %v12883_v26 = vld [vmem:[%s17506_s5 + $0xa4] ss:$8 sps:$4 sm:$0xff]  }
 0x56d   : > { %6847 = vmatprep.subr.bf16.mxu0 %v12715_v25  ;;  %v12764_v25 = vld [vmem:[%s17506_s5 + $0x560] ss:$8 sps:$4 sm:$0xff]   ;;  %5810 = vmatprep.subr.bf16.mxu1 %v12883_v26 }
 0x56e   : > { %v5263_v26 = vld [vmem:[#allocation3 + $0x20] sm:$0xff] }
 0x56f   : > { %6561 = vmatmul.mubr.bf16.gmra.mrb[24].mxu0 %v6271_v8  ;;  %v5318_v8 = vld [vmem:[#allocation3 + $0xd0] sm:$0xff] }
 0x570   : > { %6848 = vmatpush1.bf16.msra.mxu0 %v12713_v44  ;;  %6570 = vmatprep.mubr.bf16.mxu0 %v6274_v38  ;;  %v12881_v44 = vld [vmem:[%s17506_s5 + $0xa0] ss:$8 sps:$4 sm:$0xff]  }
 0x571   : > { %6849 = vmatprep.subr.bf16.mxu0 %v12718_v21  ;;  %v12889_v21 = vld [vmem:[%s17506_s5 + $0xb4] ss:$8 sps:$4 sm:$0xff]   ;;  %v5321_v38 = vld [vmem:[#allocation3 + $0xe8] sm:$0xff]  ;;  %5600 = vmatmul.mubr.bf16.gmra.mrb[20].mxu1 %v5318_v8  ;;  %v12830_v8 = vld [vmem:[%s17506_s5 + $0x610] ss:$8 sps:$4 sm:$0xff]  }
 0x572   : > { %5811 = vmatpush1.bf16.msra.mxu1 %v12881_v44  ;;  %5609 = vmatprep.mubr.bf16.mxu1 %v5321_v38  ;;  %v12838_v44 = vld [vmem:[%s17506_s5 + $0x624] ss:$8 sps:$4 sm:$0xff]   ;;  %v12947_v38 = vld [vmem:[%s17506_s5 + $0x250] ss:$8 sps:$4 sm:$0xff]  }
 0x573   : > { %5812 = vmatprep.subr.bf16.mxu1 %v12889_v21  ;;  %v6971_v21 = vld [vmem:[#allocation3 + $0x290] sm:$0xff] }
 0x574   : > { %6850 = vmatpush1.bf16.msra.mxu0 %v12716_v17  ;;  %v12776_v17 = vld [vmem:[%s17506_s5 + $0x580] ss:$8 sps:$4 sm:$0xff]  }
 0x575   : > { %6851 = vmatprep.subr.bf16.mxu0 %v12721_v37  ;;  %v12895_v37 = vld [vmem:[%s17506_s5 + $0xc4] ss:$8 sps:$4 sm:$0xff]  }
 0x576   : > { %5813 = vmatpush1.bf16.msra.mxu1 %v12887_v43  ;;  %v6974_v43 = vld [vmem:[#allocation3 + $0x2a8] sm:$0xff] }
 0x577   : > { %6571 = vmatmul.mubr.bf16.gmra.mrb[28].mxu0 %v6273_v58  ;;  %v12784_v58 = vld [vmem:[%s17506_s5 + $0x594] ss:$8 sps:$4 sm:$0xff]   ;;  %5814 = vmatprep.subr.bf16.mxu1 %v12895_v37  ;;  %v12953_v37 = vld [vmem:[%s17506_s5 + $0x260] ss:$8 sps:$4 sm:$0xff]  }
 0x578   : > { %6852 = vmatpush1.bf16.msra.mxu0 %v12719_v14  ;;  %6855 = vmatprep.mubr.bf16.mxu0 %v6615_v30  ;;  %v5320_v14 = vld [vmem:[#allocation3 + $0xe0] sm:$0xff]  ;;  %v5323_v30 = vld [vmem:[#allocation3 + $0xf8] sm:$0xff] }
 0x579   : > { %6853 = vmatprep.subr.bf16.mxu0 %v12724_v2  ;;  %v12901_v2 = vld [vmem:[%s17506_s5 + $0xd4] ss:$8 sps:$4 sm:$0xff]   ;;  %5610 = vmatmul.mubr.bf16.gmra.mrb[24].mxu1 %v5320_v14  ;;  %v12842_v14 = vld [vmem:[%s17506_s5 + $0x630] ss:$8 sps:$4 sm:$0xff]  }
 0x57a   : > { %5815 = vmatpush1.bf16.msra.mxu1 %v12893_v55  ;;  %5619 = vmatprep.mubr.bf16.mxu1 %v5323_v30  ;;  %v12850_v55 = vld [vmem:[%s17506_s5 + $0x644] ss:$8 sps:$4 sm:$0xff]  }
 0x57b   : > { %5816 = vmatprep.subr.bf16.mxu1 %v12901_v2  ;;  %v12959_v2 = vld [vmem:[%s17506_s5 + $0x270] ss:$8 sps:$4 sm:$0xff]   ;;  %v6973_v30 = vld [vmem:[#allocation3 + $0x2a0] sm:$0xff] }
 0x57c   : > { %6854 = vmatpush1.bf16.msra.mxu0 %v12722_v56  ;;  %v12907_v56 = vld [vmem:[%s17506_s5 + $0xe4] ss:$8 sps:$4 sm:$0xff]  }
 0x57d   : > { %7178 = vmatprep.subr.bf16.mxu0 %v12730_v4  ;;  %v12788_v4 = vld [vmem:[%s17506_s5 + $0x5a0] ss:$8 sps:$4 sm:$0xff]  }
 0x57e   : > { %5817 = vmatpush1.bf16.msra.mxu1 %v12899_v28  ;;  %v12856_v28 = vld [vmem:[%s17506_s5 + $0x654] ss:$8 sps:$4 sm:$0xff]  }
 0x57f   : > { %6856 = vmatmul.mubr.bf16.vlgmr.msra.gmra.mrb[0].mxu0 %v6614_v46  ;;  %v6627_v46 = vld [vmem:[#allocation3 + $0x268] sm:$0xff]  ;;  %5818 = vmatprep.subr.bf16.mxu1 %v12907_v56  ;;  %v5267_v56 = vld [vmem:[#allocation3 + $0x40] sm:$0xff] }
 0x580   : > { %7179 = vmatpush1.bf16.msra.mxu0 %v12728_v6  ;;  %6865 = vmatprep.mubr.bf16.mxu0 %v6617_v41  ;;  %v12905_v6 = vld [vmem:[%s17506_s5 + $0xe0] ss:$8 sps:$4 sm:$0xff]  }
 0x581   : > { %7180 = vmatprep.subr.bf16.mxu0 %v12736_v22  ;;  %v12913_v22 = vld [vmem:[%s17506_s5 + $0xf4] ss:$8 sps:$4 sm:$0xff]   ;;  %v5260_v41 = vld [vmem:[#allocation3 + $0x8] sm:$0xff]  ;;  %5620 = vmatmul.mubr.bf16.gmra.mrb[28].mxu1 %v5322_v51  ;;  %v12854_v51 = vld [vmem:[%s17506_s5 + $0x650] ss:$8 sps:$4 sm:$0xff]  }
 0x582   : > { %5819 = vmatpush1.bf16.msra.mxu1 %v12905_v6  ;;  %5822 = vmatprep.mubr.bf16.mxu1 %v5260_v41  ;;  %v12862_v6 = vld [vmem:[%s17506_s5 + $0x664] ss:$8 sps:$4 sm:$0xff]   ;;  %v12971_v41 = vld [vmem:[%s17506_s5 + $0x290] ss:$8 sps:$4 sm:$0xff]  }
 0x583   : > { %5820 = vmatprep.subr.bf16.mxu1 %v12913_v22  ;;  %v6975_v22 = vld [vmem:[#allocation3 + $0x2b0] sm:$0xff] }
 0x584   : > { %7181 = vmatpush1.bf16.msra.mxu0 %v12734_v19  ;;  %v6626_v19 = vld [vmem:[#allocation3 + $0x260] sm:$0xff] }
 0x585   : > { %7182 = vmatprep.subr.bf16.mxu0 %v12742_v34  ;;  %v12800_v34 = vld [vmem:[%s17506_s5 + $0x5c0] ss:$8 sps:$4 sm:$0xff]  }
 0x586   : > { %5821 = vmatpush1.bf16.msra.mxu1 %v12911_v50  ;;  %v12979_v50 = vld [vmem:[%s17506_s5 + $0x2a4] ss:$8 sps:$4 sm:$0xff]  }
 0x587   : > { %6866 = vmatmul.mubr.bf16.gmra.mrb[4].mxu0 %v6616_v31  ;;  %v5259_v31 = vld [vmem:[#allocation3] sm:$0xff]  ;;  %6113 = vmatprep.subr.bf16.mxu1 %v12919_v32  ;;  %v6978_v32 = vld [vmem:[#allocation3 + $0x2c8] sm:$0xff] }
 0x588   : > { %7183 = vmatpush1.bf16.msra.mxu0 %v12740_v35  ;;  %6875 = vmatprep.mubr.bf16.mxu0 %v6619_v48  ;;  %v12917_v35 = vld [vmem:[%s17506_s5 + $0x200] ss:$8 sps:$4 sm:$0xff]   ;;  %v5262_v48 = vld [vmem:[#allocation3 + $0x18] sm:$0xff] }
 0x589   : > { %7184 = vmatprep.subr.bf16.mxu0 %v12748_v29  ;;  %v12925_v29 = vld [vmem:[%s17506_s5 + $0x214] ss:$8 sps:$4 sm:$0xff]   ;;  %5823 = vmatmul.mubr.bf16.vlgmr.msra.gmra.mrb[0].mxu1 %v5259_v31  ;;  %v12866_v31 = vld [vmem:[%s17506_s5 + $0x670] ss:$8 sps:$4 sm:$0xff]  }
 0x58a   : > { %6114 = vmatpush1.bf16.msra.mxu1 %v12917_v35  ;;  %5832 = vmatprep.mubr.bf16.mxu1 %v5262_v48  ;;  %v12874_v35 = vld [vmem:[%s17506_s5 + $0x684] ss:$8 sps:$4 sm:$0xff]  }
 0x58b   : > { %6115 = vmatprep.subr.bf16.mxu1 %v12925_v29  ;;  %v12983_v29 = vld [vmem:[%s17506_s5 + $0x2b0] ss:$8 sps:$4 sm:$0xff]   ;;  %v6977_v48 = vld [vmem:[#allocation3 + $0x2c0] sm:$0xff] }
 0x58c   : > { %7185 = vmatpush1.bf16.msra.mxu0 %v12746_v1  ;;  %v12931_v1 = vld [vmem:[%s17506_s5 + $0x224] ss:$8 sps:$4 sm:$0xff]  }
 0x58d   : > { %7186 = vmatprep.subr.bf16.mxu0 %v12754_v7  ;;  %v12812_v7 = vld [vmem:[%s17506_s5 + $0x5e0] ss:$8 sps:$4 sm:$0xff]  }
 0x58e   : > { %6116 = vmatpush1.bf16.msra.mxu1 %v12923_v62  ;;  %v6980_v62 = vld [vmem:[#allocation3 + $0x2d8] sm:$0xff] }
 0x58f   : > { %6876 = vmatmul.mubr.bf16.gmra.mrb[8].mxu0 %v6618_v53  ;;  %v6970_v53 = vld [vmem:[#allocation3 + $0x288] sm:$0xff]  ;;  %6117 = vmatprep.subr.bf16.mxu1 %v12931_v1  ;;  %v5271_v1 = vld [vmem:[#allocation3 + $0x60] sm:$0xff] }
 0x590   : > { %7187 = vmatpush1.bf16.msra.mxu0 %v12752_v12  ;;  %6885 = vmatprep.mubr.bf16.mxu0 %v6621_v40  ;;  %v12929_v12 = vld [vmem:[%s17506_s5 + $0x220] ss:$8 sps:$4 sm:$0xff]  }
 0x591   : > { %7188 = vmatprep.subr.bf16.mxu0 %v12760_v36  ;;  %v12937_v36 = vld [vmem:[%s17506_s5 + $0x234] ss:$8 sps:$4 sm:$0xff]   ;;  %v5264_v40 = vld [vmem:[#allocation3 + $0x28] sm:$0xff]  ;;  %5833 = vmatmul.mubr.bf16.gmra.mrb[4].mxu1 %v5261_v13  ;;  %v12878_v13 = vld [vmem:[%s17506_s5 + $0x690] ss:$8 sps:$4 sm:$0xff]  }
 0x592   : > { %6118 = vmatpush1.bf16.msra.mxu1 %v12929_v12  ;;  %5842 = vmatprep.mubr.bf16.mxu1 %v5264_v40  ;;  %v12886_v12 = vld [vmem:[%s17506_s5 + $0x6a4] ss:$8 sps:$4 sm:$0xff]   ;;  %v6979_v40 = vld [vmem:[#allocation3 + $0x2d0] sm:$0xff] }
 0x593   : > { %6119 = vmatprep.subr.bf16.mxu1 %v12937_v36  ;;  %v12995_v36 = vld [vmem:[%s17506_s5 + $0x2d0] ss:$8 sps:$4 sm:$0xff]  }
 0x594   : > { %7189 = vmatpush1.bf16.msra.mxu0 %v12758_v49  ;;  %v12943_v49 = vld [vmem:[%s17506_s5 + $0x244] ss:$8 sps:$4 sm:$0xff]  }
 0x595   : > { %7190 = vmatprep.subr.bf16.mxu0 %v12766_v45  ;;  %v12824_v45 = vld [vmem:[%s17506_s5 + $0x600] ss:$8 sps:$4 sm:$0xff]  }
 0x596   : > { %6120 = vmatpush1.bf16.msra.mxu1 %v12935_v24  ;;  %v13003_v24 = vld [vmem:[%s17506_s5 + $0x2e4] ss:$8 sps:$4 sm:$0xff]  }
 0x597   : > { %6886 = vmatmul.mubr.bf16.gmra.mrb[12].mxu0 %v6620_v52  ;;  %v12832_v52 = vld [vmem:[%s17506_s5 + $0x614] ss:$8 sps:$4 sm:$0xff]   ;;  %6121 = vmatprep.subr.bf16.mxu1 %v12943_v49 }
 0x598   : > { %7191 = vmatpush1.bf16.msra.mxu0 %v12764_v25  ;;  %6895 = vmatprep.mubr.bf16.mxu0 %v6623_v15  ;;  %v12941_v25 = vld [vmem:[%s17506_s5 + $0x240] ss:$8 sps:$4 sm:$0xff]   ;;  %v5266_v15 = vld [vmem:[#allocation3 + $0x38] sm:$0xff]  ;;  %v5273_v49 = vld [vmem:[#allocation3 + $0x70] sm:$0xff] }
 0x599   : > { %7192 = vmatprep.subr.bf16.mxu0 %v12772_v59  ;;  %v12949_v59 = vld [vmem:[%s17506_s5 + $0x254] ss:$8 sps:$4 sm:$0xff]   ;;  %5843 = vmatmul.mubr.bf16.gmra.mrb[8].mxu1 %v5263_v26  ;;  %v12890_v26 = vld [vmem:[%s17506_s5 + $0x6b0] ss:$8 sps:$4 sm:$0xff]  }
 0x59a   : > { %6122 = vmatpush1.bf16.msra.mxu1 %v12941_v25  ;;  %5852 = vmatprep.mubr.bf16.mxu1 %v5266_v15  ;;  %v12898_v25 = vld [vmem:[%s17506_s5 + $0x6c4] ss:$8 sps:$4 sm:$0xff]  }
 0x59b   : > { %6123 = vmatprep.subr.bf16.mxu1 %v12949_v59  ;;  %v13007_v59 = vld [vmem:[%s17506_s5 + $0x2f0] ss:$8 sps:$4 sm:$0xff]   ;;  %v6981_v15 = vld [vmem:[#allocation3 + $0x2e0] sm:$0xff] }
 0x59c   : > { %7193 = vmatpush1.bf16.msra.mxu0 %v12770_v60  ;;  %v12836_v60 = vld [vmem:[%s17506_s5 + $0x620] ss:$8 sps:$4 sm:$0xff]  }
 0x59d   : > { %7194 = vmatprep.subr.bf16.mxu0 %v12778_v0  ;;  %v12955_v0 = vld [vmem:[%s17506_s5 + $0x264] ss:$8 sps:$4 sm:$0xff]  }
 0x59e   : > { %6124 = vmatpush1.bf16.msra.mxu1 %v12947_v38  ;;  %v5904_v38 = vld [vmem:[#allocation3 + $0x100] sm:$0xff] }
 0x59f   : > { %6896 = vmatmul.mubr.bf16.gmra.mrb[16].mxu0 %v6622_v61  ;;  %v12844_v61 = vld [vmem:[%s17506_s5 + $0x634] ss:$8 sps:$4 sm:$0xff]   ;;  %6125 = vmatprep.subr.bf16.mxu1 %v12955_v0  ;;  %v12902_v0 = vld [vmem:[%s17506_s5 + $0x6d0] ss:$8 sps:$4 sm:$0xff]  }
 0x5a0   : > { %7195 = vmatpush1.bf16.msra.mxu0 %v12776_v17  ;;  %6905 = vmatprep.mubr.bf16.mxu0 %v6625_v54  ;;  %v5265_v17 = vld [vmem:[#allocation3 + $0x30] sm:$0xff]  ;;  %v5268_v54 = vld [vmem:[#allocation3 + $0x48] sm:$0xff] }
 0x5a1   : > { %7196 = vmatprep.subr.bf16.mxu0 %v12784_v58  ;;  %v12961_v58 = vld [vmem:[%s17506_s5 + $0x274] ss:$8 sps:$4 sm:$0xff]   ;;  %5853 = vmatmul.mubr.bf16.gmra.mrb[12].mxu1 %v5265_v17  ;;  %v12908_v17 = vld [vmem:[%s17506_s5 + $0x6e0] ss:$8 sps:$4 sm:$0xff]  }
 0x5a2   : > { %6126 = vmatpush1.bf16.msra.mxu1 %v12953_v37  ;;  %5862 = vmatprep.mubr.bf16.mxu1 %v5268_v54  ;;  %v12916_v37 = vld [vmem:[%s17506_s5 + $0x6f4] ss:$8 sps:$4 sm:$0xff]  }
 0x5a3   : > { %6127 = vmatprep.subr.bf16.mxu1 %v12961_v58  ;;  %v7325_v58 = vld [vmem:[#allocation3 + $0x308] sm:$0xff]  ;;  %v5906_v54 = vld [vmem:[#allocation3 + $0x110] sm:$0xff] }
 0x5a4   : > { %7197 = vmatpush1.bf16.msra.mxu0 %v12782_v10  ;;  %v12967_v10 = vld [vmem:[%s17506_s5 + $0x284] ss:$8 sps:$4 sm:$0xff]  }
 0x5a5   : > { %7198 = vmatprep.subr.bf16.mxu0 %v12790_v33  ;;  %v12848_v33 = vld [vmem:[%s17506_s5 + $0x640] ss:$8 sps:$4 sm:$0xff]  }
 0x5a6   : > { %6128 = vmatpush1.bf16.msra.mxu1 %v12959_v2  ;;  %v12922_v2 = vld [vmem:[%s17506_s5 + $0x704] ss:$8 sps:$4 sm:$0xff]  }
 0x5a7   : > { %6906 = vmatmul.mubr.bf16.gmra.mrb[20].mxu0 %v6624_v16  ;;  %v6976_v16 = vld [vmem:[#allocation3 + $0x2b8] sm:$0xff]  ;;  %6129 = vmatprep.subr.bf16.mxu1 %v12967_v10  ;;  %v12920_v10 = vld [vmem:[%s17506_s5 + $0x700] ss:$8 sps:$4 sm:$0xff]  }
 0x5a8   : > { %7199 = vmatpush1.bf16.msra.mxu0 %v12788_v4  ;;  %6915 = vmatprep.mubr.bf16.mxu0 %v6627_v46  ;;  %v12965_v4 = vld [vmem:[%s17506_s5 + $0x280] ss:$8 sps:$4 sm:$0xff]   ;;  %v5270_v46 = vld [vmem:[#allocation3 + $0x58] sm:$0xff] }
 0x5a9   : > { %7200 = vmatprep.subr.bf16.mxu0 %v12796_v47  ;;  %v12973_v47 = vld [vmem:[%s17506_s5 + $0x294] ss:$8 sps:$4 sm:$0xff]   ;;  %5863 = vmatmul.mubr.bf16.gmra.mrb[16].mxu1 %v5267_v56 }
 0x5aa   : > { %6130 = vmatpush1.bf16.msra.mxu1 %v12965_v4  ;;  %5872 = vmatprep.mubr.bf16.mxu1 %v5270_v46  ;;  %v5911_v56 = vld [vmem:[#allocation3 + $0x138] sm:$0xff]  ;;  %v7326_v46 = vld [vmem:[#allocation3 + $0x310] sm:$0xff] }
 0x5ab   : > { %6131 = vmatprep.subr.bf16.mxu1 %v12973_v47  ;;  %v12926_v4 = vld [vmem:[%s17506_s5 + $0x710] ss:$8 sps:$4 sm:$0xff]   ;;  %v12934_v47 = vld [vmem:[%s17506_s5 + $0x724] ss:$8 sps:$4 sm:$0xff]  }
 0x5ac   : > { %7201 = vmatpush1.bf16.msra.mxu0 %v12794_v18  ;;  %v12860_v18 = vld [vmem:[%s17506_s5 + $0x660] ss:$8 sps:$4 sm:$0xff]  }
 0x5ad   : > { %7202 = vmatprep.subr.bf16.mxu0 %v12802_v20  ;;  %v12868_v20 = vld [vmem:[%s17506_s5 + $0x674] ss:$8 sps:$4 sm:$0xff]  }
 0x5ae   : > { %6132 = vmatpush1.bf16.msra.mxu1 %v12971_v41  ;;  %v5910_v41 = vld [vmem:[#allocation3 + $0x130] sm:$0xff] }
 0x5af   : > { %6916 = vmatmul.mubr.bf16.gmra.mrb[24].mxu0 %v6626_v19  ;;  %v5269_v19 = vld [vmem:[#allocation3 + $0x50] sm:$0xff]  ;;  %6133 = vmatprep.subr.bf16.mxu1 %v12979_v50  ;;  %v12946_v50 = vld [vmem:[%s17506_s5 + $0x744] ss:$8 sps:$4 sm:$0xff]  }
 0x5b0   : > { %7203 = vmatpush1.bf16.msra.mxu0 %v12800_v34  ;;  %6925 = vmatprep.mubr.bf16.mxu0 %v6629_v63  ;;  %v12977_v34 = vld [vmem:[%s17506_s5 + $0x2a0] ss:$8 sps:$4 sm:$0xff]  }
 0x5b1   : > { %7204 = vmatprep.subr.bf16.mxu0 %v12808_v5  ;;  %v12985_v5 = vld [vmem:[%s17506_s5 + $0x2b4] ss:$8 sps:$4 sm:$0xff]   ;;  %v5272_v63 = vld [vmem:[#allocation3 + $0x68] sm:$0xff]  ;;  %5873 = vmatmul.mubr.bf16.gmra.mrb[20].mxu1 %v5269_v19 }
 0x5b2   : > { %6134 = vmatpush1.bf16.msra.mxu1 %v12977_v34  ;;  %5882 = vmatprep.mubr.bf16.mxu1 %v5272_v63  ;;  %v12944_v19 = vld [vmem:[%s17506_s5 + $0x740] ss:$8 sps:$4 sm:$0xff]   ;;  %v12952_v34 = vld [vmem:[%s17506_s5 + $0x754] ss:$8 sps:$4 sm:$0xff]  }
 0x5b3   : > { %6135 = vmatprep.subr.bf16.mxu1 %v12985_v5  ;;  %v7331_v5 = vld [vmem:[#allocation3 + $0x338] sm:$0xff]  ;;  %v5912_v63 = vld [vmem:[#allocation3 + $0x140] sm:$0xff] }
 0x5b4   : > { %7205 = vmatpush1.bf16.msra.mxu0 %v12806_v11  ;;  %v12872_v11 = vld [vmem:[%s17506_s5 + $0x680] ss:$8 sps:$4 sm:$0xff]  }
 0x5b5   : > { %7206 = vmatprep.subr.bf16.mxu0 %v12814_v27  ;;  %v12880_v27 = vld [vmem:[%s17506_s5 + $0x694] ss:$8 sps:$4 sm:$0xff]  }
 0x5b6   : > { %6136 = vmatpush1.bf16.msra.mxu1 %v12983_v29  ;;  %v12958_v29 = vld [vmem:[%s17506_s5 + $0x764] ss:$8 sps:$4 sm:$0xff]  }
 0x5b7   : > { %6926 = vmatmul.mubr.bf16.gmra.mrb[28].mxu0 %v6628_v42  ;;  %v12991_v42 = vld [vmem:[%s17506_s5 + $0x2c4] ss:$8 sps:$4 sm:$0xff]  }
 0x5b8   : > { %7207 = vmatpush1.bf16.msra.mxu0 %v12812_v7  ;;  %7210 = vmatprep.mubr.bf16.mxu0 %v6970_v53  ;;  %v12989_v7 = vld [vmem:[%s17506_s5 + $0x2c0] ss:$8 sps:$4 sm:$0xff]   ;;  %v5274_v53 = vld [vmem:[#allocation3 + $0x78] sm:$0xff] }
 0x5b9   : > { %7208 = vmatprep.subr.bf16.mxu0 %v12820_v39  ;;  %v12997_v39 = vld [vmem:[%s17506_s5 + $0x2d4] ss:$8 sps:$4 sm:$0xff]   ;;  %6137 = vmatprep.subr.bf16.mxu1 %v12991_v42 }
 0x5ba   : > { %5883 = vmatmul.mubr.bf16.gmra.mrb[24].mxu1 %v5271_v1  ;;  %v5914_v42 = vld [vmem:[#allocation3 + $0x150] sm:$0xff]  ;;  %v5917_v1 = vld [vmem:[#allocation3 + $0x168] sm:$0xff] }
 0x5bb   : > { %6138 = vmatpush1.bf16.msra.mxu1 %v12989_v7  ;;  %5892 = vmatprep.mubr.bf16.mxu1 %v5274_v53  ;;  %v12962_v7 = vld [vmem:[%s17506_s5 + $0x770] ss:$8 sps:$4 sm:$0xff]   ;;  %v7332_v53 = vld [vmem:[#allocation3 + $0x340] sm:$0xff] }
 0x5bc   : > { %7209 = vmatpush1.bf16.msra.mxu0 %v12818_v57  ;;  %v12884_v57 = vld [vmem:[%s17506_s5 + $0x6a0] ss:$8 sps:$4 sm:$0xff]   ;;  %6139 = vmatprep.subr.bf16.mxu1 %v12997_v39  ;;  %v12970_v39 = vld [vmem:[%s17506_s5 + $0x784] ss:$8 sps:$4 sm:$0xff]  }
 0x5bd   : > { %7533 = vmatprep.subr.bf16.mxu0 %v12826_v23  ;;  %v12892_v23 = vld [vmem:[%s17506_s5 + $0x6b4] ss:$8 sps:$4 sm:$0xff]  }
 0x5bf   : > { %7211 = vmatmul.mubr.bf16.vlgmr.msra.gmra.mrb[0].mxu0 %v6969_v9  ;;  %v6982_v9 = vld [vmem:[#allocation3 + $0x2e8] sm:$0xff]  ;;  %6140 = vmatpush1.bf16.msra.mxu1 %v12995_v36  ;;  %v7335_v36 = vld [vmem:[#allocation3 + $0x358] sm:$0xff] }
 0x5c0   : > { %7534 = vmatpush1.bf16.msra.mxu0 %v12824_v45  ;;  %7220 = vmatprep.mubr.bf16.mxu0 %v6972_v3  ;;  %v13001_v45 = vld [vmem:[%s17506_s5 + $0x2e0] ss:$8 sps:$4 sm:$0xff]  }
 0x5c1   : > { %7535 = vmatprep.subr.bf16.mxu0 %v12832_v52  ;;  %v13009_v52 = vld [vmem:[%s17506_s5 + $0x2f4] ss:$8 sps:$4 sm:$0xff]   ;;  %v5905_v3 = vld [vmem:[#allocation3 + $0x108] sm:$0xff]  ;;  %6141 = vmatprep.subr.bf16.mxu1 %v13003_v24 }
 0x5c2   : > { %5893 = vmatmul.mubr.bf16.gmra.mrb[28].mxu1 %v5273_v49  ;;  %v7334_v24 = vld [vmem:[#allocation3 + $0x350] sm:$0xff]  ;;  %v12980_v49 = vld [vmem:[%s17506_s5 + $0x7a0] ss:$8 sps:$4 sm:$0xff]  }
 0x5c3   : > { %6142 = vmatpush1.bf16.msra.mxu1 %v13001_v45  ;;  %6145 = vmatprep.mubr.bf16.mxu1 %v5905_v3  ;;  %v12988_v45 = vld [vmem:[%s17506_s5 + $0x7b4] ss:$8 sps:$4 sm:$0xff]  }
 0x5c4   : > { %7536 = vmatpush1.bf16.msra.mxu0 %v12830_v8  ;;  %v12896_v8 = vld [vmem:[%s17506_s5 + $0x6c0] ss:$8 sps:$4 sm:$0xff]   ;;  %6143 = vmatprep.subr.bf16.mxu1 %v13009_v52  ;;  %v5918_v3 = vld [vmem:[#allocation3 + $0x170] sm:$0xff] }
 0x5c5   : > { %7537 = vmatprep.subr.bf16.mxu0 %v12838_v44  ;;  %v12904_v44 = vld [vmem:[%s17506_s5 + $0x6d4] ss:$8 sps:$4 sm:$0xff]   ;;  %v7337_v52 = vld [vmem:[#allocation3 + $0x368] sm:$0xff] }
 0x5c7   : > { %7221 = vmatmul.mubr.bf16.gmra.mrb[4].mxu0 %v6971_v21  ;;  %v6984_v21 = vld [vmem:[#allocation3 + $0x2f8] sm:$0xff]  ;;  %6144 = vmatpush1.bf16.msra.mxu1 %v13007_v59  ;;  %v7336_v59 = vld [vmem:[#allocation3 + $0x360] sm:$0xff] }
 0x5c8   : > { %7538 = vmatpush1.bf16.msra.mxu0 %v12836_v60  ;;  %7230 = vmatprep.mubr.bf16.mxu0 %v6974_v43  ;;  %v5907_v60 = vld [vmem:[#allocation3 + $0x118] sm:$0xff]  ;;  %v6983_v43 = vld [vmem:[#allocation3 + $0x2f0] sm:$0xff] }
 0x5c9   : > { %7539 = vmatprep.subr.bf16.mxu0 %v12844_v61  ;;  %v12910_v61 = vld [vmem:[%s17506_s5 + $0x6e4] ss:$8 sps:$4 sm:$0xff]  }
 0x5ca   : > { %6146 = vmatmul.mubr.bf16.vlgmr.msra.gmra.mrb[0].mxu1 %v5904_v38  ;;  %v13006_v38 = vld [vmem:[%s17506_s5 + $0x7e4] ss:$8 sps:$4 sm:$0xff]  }
 0x5cb   : > { %6155 = vmatprep.mubr.bf16.mxu1 %v5907_v60  ;;  %v7338_v60 = vld [vmem:[#allocation3 + $0x370] sm:$0xff] }
 0x5cc   : > { %7540 = vmatpush1.bf16.msra.mxu0 %v12842_v14  ;;  %v5909_v14 = vld [vmem:[#allocation3 + $0x128] sm:$0xff] }
 0x5cd   : > { %7541 = vmatprep.subr.bf16.mxu0 %v12850_v55  ;;  %v12914_v55 = vld [vmem:[%s17506_s5 + $0x6f0] ss:$8 sps:$4 sm:$0xff]  }
 0x5cf   : > { %7231 = vmatmul.mubr.bf16.gmra.mrb[8].mxu0 %v6973_v30  ;;  %v7324_v30 = vld [vmem:[#allocation3 + $0x300] sm:$0xff] }
 0x5d0   : > { %7542 = vmatpush1.bf16.msra.mxu0 %v12848_v33  ;;  %7240 = vmatprep.mubr.bf16.mxu0 %v6976_v16  ;;  %v12928_v33 = vld [vmem:[%s17506_s5 + $0x714] ss:$8 sps:$4 sm:$0xff]   ;;  %v5908_v16 = vld [vmem:[#allocation3 + $0x120] sm:$0xff] }
 0x5d1   : > { %7543 = vmatprep.subr.bf16.mxu0 %v12856_v28  ;;  %v7327_v28 = vld [vmem:[#allocation3 + $0x318] sm:$0xff] }
 0x5d2   : > { %6156 = vmatmul.mubr.bf16.gmra.mrb[4].mxu1 %v5906_v54  ;;  %v13013_v54 = vld [vmem:[%s17506_s5 + $0x800] ss:$8 sps:$4 sm:$0xff]  }
 0x5d3   : > { %6165 = vmatprep.mubr.bf16.mxu1 %v5909_v14  ;;  %v13018_v14 = vld [vmem:[%s17506_s5 + $0x814] ss:$8 sps:$4 sm:$0xff]  }
 0x5d4   : > { %7544 = vmatpush1.bf16.msra.mxu0 %v12854_v51  ;;  %v12932_v51 = vld [vmem:[%s17506_s5 + $0x720] ss:$8 sps:$4 sm:$0xff]  }
 0x5d5   : > { %7545 = vmatprep.subr.bf16.mxu0 %v12862_v6  ;;  %v12940_v6 = vld [vmem:[%s17506_s5 + $0x734] ss:$8 sps:$4 sm:$0xff]  }
 0x5d7   : > { %7241 = vmatmul.mubr.bf16.gmra.mrb[12].mxu0 %v6975_v22  ;;  %v7329_v22 = vld [vmem:[#allocation3 + $0x328] sm:$0xff] }
 0x5d8   : > { %7546 = vmatpush1.bf16.msra.mxu0 %v12860_v18  ;;  %7250 = vmatprep.mubr.bf16.mxu0 %v6978_v32  ;;  %v5913_v18 = vld [vmem:[#allocation3 + $0x148] sm:$0xff]  ;;  %v7328_v32 = vld [vmem:[#allocation3 + $0x320] sm:$0xff] }
 0x5d9   : > { %7547 = vmatprep.subr.bf16.mxu0 %v12868_v20  ;;  %v12938_v20 = vld [vmem:[%s17506_s5 + $0x730] ss:$8 sps:$4 sm:$0xff]  }
 0x5da   : > { %6166 = vmatmul.mubr.bf16.gmra.mrb[8].mxu1 %v5908_v16  ;;  %v7684_v16 = vld [vmem:[#allocation3 + $0x3a8] sm:$0xff] }
 0x5db   : > { %6175 = vmatprep.mubr.bf16.mxu1 %v5911_v56  ;;  %v13022_v56 = vld [vmem:[%s17506_s5 + $0x830] ss:$8 sps:$4 sm:$0xff]  }
 0x5dc   : > { %7548 = vmatpush1.bf16.msra.mxu0 %v12866_v31  ;;  %v5915_v31 = vld [vmem:[#allocation3 + $0x158] sm:$0xff] }
 0x5dd   : > { %7549 = vmatprep.subr.bf16.mxu0 %v12874_v35  ;;  %v12950_v35 = vld [vmem:[%s17506_s5 + $0x750] ss:$8 sps:$4 sm:$0xff]  }
 0x5df   : > { %7251 = vmatmul.mubr.bf16.gmra.mrb[16].mxu0 %v6977_v48  ;;  %v7330_v48 = vld [vmem:[#allocation3 + $0x330] sm:$0xff] }
 0x5e0   : > { %7550 = vmatpush1.bf16.msra.mxu0 %v12872_v11  ;;  %7260 = vmatprep.mubr.bf16.mxu0 %v6980_v62  ;;  %v12956_v11 = vld [vmem:[%s17506_s5 + $0x760] ss:$8 sps:$4 sm:$0xff]  }
 0x5e1   : > { %7551 = vmatprep.subr.bf16.mxu0 %v12880_v27  ;;  %v12964_v27 = vld [vmem:[%s17506_s5 + $0x774] ss:$8 sps:$4 sm:$0xff]   ;;  %v7333_v62 = vld [vmem:[#allocation3 + $0x348] sm:$0xff] }
 0x5e2   : > { %6176 = vmatmul.mubr.bf16.gmra.mrb[12].mxu1 %v5910_v41  ;;  %v13033_v41 = vld [vmem:[%s17506_s5 + $0x864] ss:$8 sps:$4 sm:$0xff]  }
 0x5e3   : > { %6185 = vmatprep.mubr.bf16.mxu1 %v5913_v18  ;;  %v7685_v18 = vld [vmem:[#allocation3 + $0x3b0] sm:$0xff] }
 0x5e4   : > { %7552 = vmatpush1.bf16.msra.mxu0 %v12878_v13  ;;  %v12968_v13 = vld [vmem:[%s17506_s5 + $0x780] ss:$8 sps:$4 sm:$0xff]  }
 0x5e5   : > { %7553 = vmatprep.subr.bf16.mxu0 %v12886_v12  ;;  %v12976_v12 = vld [vmem:[%s17506_s5 + $0x794] ss:$8 sps:$4 sm:$0xff]  }
 0x5e7   : > { %7261 = vmatmul.mubr.bf16.gmra.mrb[20].mxu0 %v6979_v40  ;;  %v5916_v40 = vld [vmem:[#allocation3 + $0x160] sm:$0xff] }
 0x5e8   : > { %7554 = vmatpush1.bf16.msra.mxu0 %v12884_v57  ;;  %7270 = vmatprep.mubr.bf16.mxu0 %v6982_v9  ;;  %v5919_v57 = vld [vmem:[#allocation3 + $0x178] sm:$0xff]  ;;  %v12982_v9 = vld [vmem:[%s17506_s5 + $0x7a4] ss:$8 sps:$4 sm:$0xff]  }
 0x5e9   : > { %7555 = vmatprep.subr.bf16.mxu0 %v12892_v23  ;;  %v12974_v23 = vld [vmem:[%s17506_s5 + $0x790] ss:$8 sps:$4 sm:$0xff]  }
 0x5ea   : > { %6186 = vmatmul.mubr.bf16.gmra.mrb[16].mxu1 %v5912_v63  ;;  %v13037_v63 = vld [vmem:[%s17506_s5 + $0x880] ss:$8 sps:$4 sm:$0xff]  }
 0x5eb   : > { %6195 = vmatprep.mubr.bf16.mxu1 %v5915_v31  ;;  %v13042_v31 = vld [vmem:[%s17506_s5 + $0x894] ss:$8 sps:$4 sm:$0xff]  }
 0x5ec   : > { %7556 = vmatpush1.bf16.msra.mxu0 %v12890_v26  ;;  %v12986_v26 = vld [vmem:[%s17506_s5 + $0x7b0] ss:$8 sps:$4 sm:$0xff]  }
 0x5ed   : > { %7557 = vmatprep.subr.bf16.mxu0 %v12898_v25  ;;  %v12994_v25 = vld [vmem:[%s17506_s5 + $0x7c4] ss:$8 sps:$4 sm:$0xff]  }
 0x5ef   : > { %7271 = vmatmul.mubr.bf16.gmra.mrb[24].mxu0 %v6981_v15  ;;  %v12992_v15 = vld [vmem:[%s17506_s5 + $0x7c0] ss:$8 sps:$4 sm:$0xff]  }
 0x5f0   : > { %7558 = vmatpush1.bf16.msra.mxu0 %v12896_v8  ;;  %7280 = vmatprep.mubr.bf16.mxu0 %v6984_v21  ;;  %v13000_v8 = vld [vmem:[%s17506_s5 + $0x7d4] ss:$8 sps:$4 sm:$0xff]   ;;  %v12998_v21 = vld [vmem:[%s17506_s5 + $0x7d0] ss:$8 sps:$4 sm:$0xff]  }
 0x5f1   : > { %7559 = vmatprep.subr.bf16.mxu0 %v12904_v44  ;;  %v7339_v44 = vld [vmem:[#allocation3 + $0x378] sm:$0xff] }
 0x5f2   : > { %6196 = vmatmul.mubr.bf16.gmra.mrb[20].mxu1 %v5914_v42  ;;  %v7692_v42 = vld [vmem:[#allocation3 + $0x3e8] sm:$0xff] }
 0x5f3   : > { %6205 = vmatprep.mubr.bf16.mxu1 %v5917_v1  ;;  %v13046_v1 = vld [vmem:[%s17506_s5 + $0x8b0] ss:$8 sps:$4 sm:$0xff]  }
 0x5f4   : > { %7560 = vmatpush1.bf16.msra.mxu0 %v12902_v0  ;;  %v13004_v0 = vld [vmem:[%s17506_s5 + $0x7e0] ss:$8 sps:$4 sm:$0xff]  }
 0x5f5   : > { %7561 = vmatprep.subr.bf16.mxu0 %v12910_v61  ;;  %v13012_v61 = vld [vmem:[%s17506_s5 + $0x7f4] ss:$8 sps:$4 sm:$0xff]  }
 0x5f7   : > { %7281 = vmatmul.mubr.bf16.gmra.mrb[28].mxu0 %v6983_v43  ;;  %v7680_v43 = vld [vmem:[#allocation3 + $0x388] sm:$0xff] }
 0x5f8   : > { %7562 = vmatpush1.bf16.msra.mxu0 %v12908_v17  ;;  %7565 = vmatprep.mubr.bf16.mxu0 %v7325_v58  ;;  %v13010_v17 = vld [vmem:[%s17506_s5 + $0x7f0] ss:$8 sps:$4 sm:$0xff]   ;;  %v7679_v58 = vld [vmem:[#allocation3 + $0x380] sm:$0xff] }
 0x5f9   : > { %7563 = vmatprep.subr.bf16.mxu0 %v12916_v37  ;;  %v13015_v37 = vld [vmem:[%s17506_s5 + $0x804] ss:$8 sps:$4 sm:$0xff]  }
 0x5fa   : > { %6206 = vmatmul.mubr.bf16.gmra.mrb[24].mxu1 %v5916_v40  ;;  %v13057_v40 = vld [vmem:[%s17506_s5 + $0x8e4] ss:$8 sps:$4 sm:$0xff]  }
 0x5fb   : > { %6215 = vmatprep.mubr.bf16.mxu1 %v5919_v57  ;;  %v7693_v57 = vld [vmem:[#allocation3 + $0x3f0] sm:$0xff] }
 0x5fc   : > { %7564 = vmatpush1.bf16.msra.mxu0 %v12914_v55  ;;  %v7682_v55 = vld [vmem:[#allocation3 + $0x398] sm:$0xff] }
 0x5fd   : > { %7888 = vmatprep.subr.bf16.mxu0 %v12922_v2  ;;  %v13016_v2 = vld [vmem:[%s17506_s5 + $0x810] ss:$8 sps:$4 sm:$0xff]  }
 0x5ff   : > { %7566 = vmatmul.mubr.bf16.vlgmr.msra.gmra.mrb[0].mxu0 %v7324_v30  ;;  %v13021_v30 = vld [vmem:[%s17506_s5 + $0x824] ss:$8 sps:$4 sm:$0xff]  }
 0x600   : > { %7889 = vmatpush1.bf16.msra.mxu0 %v12920_v10  ;;  %7575 = vmatprep.mubr.bf16.mxu0 %v7327_v28  ;;  %v7681_v10 = vld [vmem:[#allocation3 + $0x390] sm:$0xff] }
 0x601   : > { %7890 = vmatprep.subr.bf16.mxu0 %v12928_v33  ;;  %v13019_v33 = vld [vmem:[%s17506_s5 + $0x820] ss:$8 sps:$4 sm:$0xff]   ;;  %v13024_v28 = vld [vmem:[%s17506_s5 + $0x834] ss:$8 sps:$4 sm:$0xff]  }
 0x602   : > { %6216 = vmatmul.mubr.bf16.gmra.mrb[28].mxu1 %v5918_v3  ;;  %v13061_v3 = vld [vmem:[%s17506_s5 + $0x900] ss:$8 sps:$4 sm:$0xff]  }
 0x604   : > { %7891 = vmatpush1.bf16.msra.mxu0 %v12926_v4  ;;  %v13027_v4 = vld [vmem:[%s17506_s5 + $0x844] ss:$8 sps:$4 sm:$0xff]  }
 0x605   : > { %7892 = vmatprep.subr.bf16.mxu0 %v12934_v47  ;;  %v7683_v47 = vld [vmem:[#allocation3 + $0x3a0] sm:$0xff] }
 0x607   : > { %7576 = vmatmul.mubr.bf16.gmra.mrb[4].mxu0 %v7326_v46  ;;  %v13025_v46 = vld [vmem:[%s17506_s5 + $0x840] ss:$8 sps:$4 sm:$0xff]  }
 0x608   : > { %7893 = vmatpush1.bf16.msra.mxu0 %v12932_v51  ;;  %7585 = vmatprep.mubr.bf16.mxu0 %v7329_v22  ;;  %v13030_v51 = vld [vmem:[%s17506_s5 + $0x854] ss:$8 sps:$4 sm:$0xff]   ;;  %v13028_v22 = vld [vmem:[%s17506_s5 + $0x850] ss:$8 sps:$4 sm:$0xff]  }
 0x609   : > { %7894 = vmatprep.subr.bf16.mxu0 %v12940_v6  ;;  %v7686_v6 = vld [vmem:[#allocation3 + $0x3b8] sm:$0xff] }
 0x60c   : > { %7895 = vmatpush1.bf16.msra.mxu0 %v12938_v20  ;;  %v13031_v20 = vld [vmem:[%s17506_s5 + $0x860] ss:$8 sps:$4 sm:$0xff]  }
 0x60d   : > { %7896 = vmatprep.subr.bf16.mxu0 %v12946_v50  ;;  %v13036_v50 = vld [vmem:[%s17506_s5 + $0x874] ss:$8 sps:$4 sm:$0xff]  }
 0x60f   : > { %7586 = vmatmul.mubr.bf16.gmra.mrb[8].mxu0 %v7328_v32  ;;  %v7688_v32 = vld [vmem:[#allocation3 + $0x3c8] sm:$0xff] }
 0x610   : > { %7897 = vmatpush1.bf16.msra.mxu0 %v12944_v19  ;;  %7595 = vmatprep.mubr.bf16.mxu0 %v7331_v5  ;;  %v13034_v19 = vld [vmem:[%s17506_s5 + $0x870] ss:$8 sps:$4 sm:$0xff]   ;;  %v7687_v5 = vld [vmem:[#allocation3 + $0x3c0] sm:$0xff] }
 0x611   : > { %7898 = vmatprep.subr.bf16.mxu0 %v12952_v34  ;;  %v13039_v34 = vld [vmem:[%s17506_s5 + $0x884] ss:$8 sps:$4 sm:$0xff]  }
 0x614   : > { %7899 = vmatpush1.bf16.msra.mxu0 %v12950_v35  ;;  %v7690_v35 = vld [vmem:[#allocation3 + $0x3d8] sm:$0xff] }
 0x615   : > { %7900 = vmatprep.subr.bf16.mxu0 %v12958_v29  ;;  %v13040_v29 = vld [vmem:[%s17506_s5 + $0x890] ss:$8 sps:$4 sm:$0xff]  }
 0x617   : > { %7596 = vmatmul.mubr.bf16.gmra.mrb[12].mxu0 %v7330_v48  ;;  %v13045_v48 = vld [vmem:[%s17506_s5 + $0x8a4] ss:$8 sps:$4 sm:$0xff]  }
 0x618   : > { %7901 = vmatpush1.bf16.msra.mxu0 %v12956_v11  ;;  %7605 = vmatprep.mubr.bf16.mxu0 %v7333_v62  ;;  %v7689_v11 = vld [vmem:[#allocation3 + $0x3d0] sm:$0xff] }
 0x619   : > { %7902 = vmatprep.subr.bf16.mxu0 %v12964_v27  ;;  %v13043_v27 = vld [vmem:[%s17506_s5 + $0x8a0] ss:$8 sps:$4 sm:$0xff]   ;;  %v13048_v62 = vld [vmem:[%s17506_s5 + $0x8b4] ss:$8 sps:$4 sm:$0xff]  }
 0x61c   : > { %7903 = vmatpush1.bf16.msra.mxu0 %v12962_v7  ;;  %v13051_v7 = vld [vmem:[%s17506_s5 + $0x8c4] ss:$8 sps:$4 sm:$0xff]  }
 0x61d   : > { %7904 = vmatprep.subr.bf16.mxu0 %v12970_v39  ;;  %v7691_v39 = vld [vmem:[#allocation3 + $0x3e0] sm:$0xff] }
 0x61f   : > { %7606 = vmatmul.mubr.bf16.gmra.mrb[16].mxu0 %v7332_v53  ;;  %v13049_v53 = vld [vmem:[%s17506_s5 + $0x8c0] ss:$8 sps:$4 sm:$0xff]  }
 0x620   : > { %7905 = vmatpush1.bf16.msra.mxu0 %v12968_v13  ;;  %7615 = vmatprep.mubr.bf16.mxu0 %v7335_v36  ;;  %v13054_v13 = vld [vmem:[%s17506_s5 + $0x8d4] ss:$8 sps:$4 sm:$0xff]   ;;  %v13052_v36 = vld [vmem:[%s17506_s5 + $0x8d0] ss:$8 sps:$4 sm:$0xff]  }
 0x621   : > { %7906 = vmatprep.subr.bf16.mxu0 %v12976_v12  ;;  %v7694_v12 = vld [vmem:[#allocation3 + $0x3f8] sm:$0xff] }
 0x624   : > { %7907 = vmatpush1.bf16.msra.mxu0 %v12974_v23  ;;  %v13055_v23 = vld [vmem:[%s17506_s5 + $0x8e0] ss:$8 sps:$4 sm:$0xff]  }
 0x625   : > { %7908 = vmatprep.subr.bf16.mxu0 %v12982_v9  ;;  %v13060_v9 = vld [vmem:[%s17506_s5 + $0x8f4] ss:$8 sps:$4 sm:$0xff]  }
 0x627   : > { %7616 = vmatmul.mubr.bf16.gmra.mrb[20].mxu0 %v7334_v24  ;;  %v8035_v24 = vld [vmem:[#allocation3 + $0x408] sm:$0xff] }
 0x628   : > { %7909 = vmatpush1.bf16.msra.mxu0 %v12980_v49  ;;  %7625 = vmatprep.mubr.bf16.mxu0 %v7337_v52  ;;  %v13058_v49 = vld [vmem:[%s17506_s5 + $0x8f0] ss:$8 sps:$4 sm:$0xff]   ;;  %v8034_v52 = vld [vmem:[#allocation3 + $0x400] sm:$0xff] }
 0x629   : > { %7910 = vmatprep.subr.bf16.mxu0 %v12988_v45  ;;  %v13063_v45 = vld [vmem:[%s17506_s5 + $0x904] ss:$8 sps:$4 sm:$0xff]  }
 0x62c   : > { %7911 = vmatpush1.bf16.msra.mxu0 %v12986_v26  ;;  %v13066_v26 = vld [vmem:[%s17506_s5 + $0x914] ss:$8 sps:$4 sm:$0xff]  }
 0x62d   : > { %7912 = vmatprep.subr.bf16.mxu0 %v12994_v25  ;;  %v8037_v25 = vld [vmem:[#allocation3 + $0x418] sm:$0xff] }
 0x62f   : > { %7626 = vmatmul.mubr.bf16.gmra.mrb[24].mxu0 %v7336_v59  ;;  %v13109_v59 = vld [vmem:[%s17508_s7] ss:$16 sps:$4 sm:$0xff]  }
 0x630   : > { %7913 = vmatpush1.bf16.msra.mxu0 %v12992_v15  ;;  %7635 = vmatprep.mubr.bf16.mxu0 %v7339_v44  ;;  %v13111_v15 = vld [vmem:[%s17508_s7 + $0x4] ss:$16 sps:$4 sm:$0xff]  }
 0x631   : > { %7914 = vmatprep.subr.bf16.mxu0 %v13000_v8  ;;  %v13064_v8 = vld [vmem:[%s17506_s5 + $0x910] ss:$8 sps:$4 sm:$0xff]   ;;  %v13114_v44 = vld [vmem:[%s17508_s7 + $0x24] ss:$16 sps:$4 sm:$0xff]   ;;  %9241 = vmatprep.subr.bf16.mxu1 %v13111_v15  ;;  %v13103_v15 = vld [vmem:[%s17506_s5 + $0x9e0] ss:$8 sps:$4 sm:$0xff]  }
 0x632   : > { %9242 = vmatpush1.bf16.msra.mxu1 %v13109_v59  ;;  %v8048_v59 = vld [vmem:[#allocation3 + $0x470] sm:$0xff] }
 0x633   : > { %9243 = vmatprep.subr.bf16.mxu1 %v13114_v44  ;;  %v8390_v44 = vld [vmem:[#allocation3 + $0x488] sm:$0xff] }
 0x634   : > { %7915 = vmatpush1.bf16.msra.mxu0 %v12998_v21  ;;  %v13069_v21 = vld [vmem:[%s17506_s5 + $0x924] ss:$8 sps:$4 sm:$0xff]  }
 0x635   : > { %7916 = vmatprep.subr.bf16.mxu0 %v13006_v38  ;;  %v13112_v38 = vld [vmem:[%s17508_s7 + $0x20] ss:$16 sps:$4 sm:$0xff]  }
 0x636   : > { %9244 = vmatpush1.bf16.msra.mxu1 %v13112_v38  ;;  %v8389_v38 = vld [vmem:[#allocation3 + $0x480] sm:$0xff] }
 0x637   : > { %7636 = vmatmul.mubr.bf16.gmra.mrb[28].mxu0 %v7338_v60  ;;  %v13117_v60 = vld [vmem:[%s17508_s7 + $0x44] ss:$16 sps:$4 sm:$0xff]  }
 0x638   : > { %7917 = vmatpush1.bf16.msra.mxu0 %v13004_v0  ;;  %7920 = vmatprep.mubr.bf16.mxu0 %v7680_v43  ;;  %v8036_v0 = vld [vmem:[#allocation3 + $0x410] sm:$0xff] }
 0x639   : > { %7918 = vmatprep.subr.bf16.mxu0 %v13012_v61  ;;  %v13067_v61 = vld [vmem:[%s17506_s5 + $0x920] ss:$8 sps:$4 sm:$0xff]   ;;  %v13072_v43 = vld [vmem:[%s17506_s5 + $0x934] ss:$8 sps:$4 sm:$0xff]   ;;  %9245 = vmatprep.subr.bf16.mxu1 %v13117_v60 }
 0x63a   : > { %v8392_v60 = vld [vmem:[#allocation3 + $0x498] sm:$0xff] }
 0x63c   : > { %7919 = vmatpush1.bf16.msra.mxu0 %v13010_v17  ;;  %v8039_v17 = vld [vmem:[#allocation3 + $0x428] sm:$0xff] }
 0x63d   : > { %8243 = vmatprep.subr.bf16.mxu0 %v13015_v37  ;;  %v13115_v37 = vld [vmem:[%s17508_s7 + $0x40] ss:$16 sps:$4 sm:$0xff]  }
 0x63e   : > { %9246 = vmatpush1.bf16.msra.mxu1 %v13115_v37 }
 0x63f   : > { %7921 = vmatmul.mubr.bf16.vlgmr.msra.gmra.mrb[0].mxu0 %v7679_v58  ;;  %v13120_v58 = vld [vmem:[%s17508_s7 + $0x64] ss:$16 sps:$4 sm:$0xff]  }
 0x640   : > { %8244 = vmatpush1.bf16.msra.mxu0 %v13013_v54  ;;  %7930 = vmatprep.mubr.bf16.mxu0 %v7682_v55  ;;  %v13070_v54 = vld [vmem:[%s17506_s5 + $0x930] ss:$8 sps:$4 sm:$0xff]  }
 0x641   : > { %8245 = vmatprep.subr.bf16.mxu0 %v13018_v14  ;;  %v13075_v14 = vld [vmem:[%s17506_s5 + $0x944] ss:$8 sps:$4 sm:$0xff]   ;;  %v13118_v55 = vld [vmem:[%s17508_s7 + $0x60] ss:$16 sps:$4 sm:$0xff]   ;;  %9247 = vmatprep.subr.bf16.mxu1 %v13120_v58 }
 0x642   : > { %9248 = vmatpush1.bf16.msra.mxu1 %v13118_v55  ;;  %v8396_v55 = vld [vmem:[#allocation3 + $0x4b8] sm:$0xff] }
 0x644   : > { %8246 = vmatpush1.bf16.msra.mxu0 %v13016_v2  ;;  %v13123_v2 = vld [vmem:[%s17508_s7 + $0x84] ss:$16 sps:$4 sm:$0xff]  }
 0x645   : > { %8247 = vmatprep.subr.bf16.mxu0 %v13021_v30  ;;  %v8038_v30 = vld [vmem:[#allocation3 + $0x420] sm:$0xff]  ;;  %9249 = vmatprep.subr.bf16.mxu1 %v13123_v2 }
 0x647   : > { %7931 = vmatmul.mubr.bf16.gmra.mrb[4].mxu0 %v7681_v10  ;;  %v13073_v10 = vld [vmem:[%s17506_s5 + $0x940] ss:$8 sps:$4 sm:$0xff]  }
 0x648   : > { %8248 = vmatpush1.bf16.msra.mxu0 %v13019_v33  ;;  %7940 = vmatprep.mubr.bf16.mxu0 %v7684_v16  ;;  %v13078_v33 = vld [vmem:[%s17506_s5 + $0x954] ss:$8 sps:$4 sm:$0xff]   ;;  %v13121_v16 = vld [vmem:[%s17508_s7 + $0x80] ss:$16 sps:$4 sm:$0xff]  }
 0x649   : > { %8249 = vmatprep.subr.bf16.mxu0 %v13024_v28  ;;  %v8041_v28 = vld [vmem:[#allocation3 + $0x438] sm:$0xff]  ;;  %9250 = vmatpush1.bf16.msra.mxu1 %v13121_v16  ;;  %v8398_v16 = vld [vmem:[#allocation3 + $0x4c8] sm:$0xff] }
 0x64c   : > { %8250 = vmatpush1.bf16.msra.mxu0 %v13022_v56  ;;  %v13126_v56 = vld [vmem:[%s17508_s7 + $0xa4] ss:$16 sps:$4 sm:$0xff]  }
 0x64d   : > { %8251 = vmatprep.subr.bf16.mxu0 %v13027_v4  ;;  %v13076_v4 = vld [vmem:[%s17506_s5 + $0x950] ss:$8 sps:$4 sm:$0xff]   ;;  %9251 = vmatprep.subr.bf16.mxu1 %v13126_v56 }
 0x64f   : > { %7941 = vmatmul.mubr.bf16.gmra.mrb[8].mxu0 %v7683_v47  ;;  %v13081_v47 = vld [vmem:[%s17506_s5 + $0x964] ss:$8 sps:$4 sm:$0xff]  }
 0x650   : > { %8252 = vmatpush1.bf16.msra.mxu0 %v13025_v46  ;;  %7950 = vmatprep.mubr.bf16.mxu0 %v7686_v6  ;;  %v13124_v46 = vld [vmem:[%s17508_s7 + $0xa0] ss:$16 sps:$4 sm:$0xff]  }
 0x651   : > { %8253 = vmatprep.subr.bf16.mxu0 %v13030_v51  ;;  %v13129_v51 = vld [vmem:[%s17508_s7 + $0xc4] ss:$16 sps:$4 sm:$0xff]   ;;  %9252 = vmatpush1.bf16.msra.mxu1 %v13124_v46 }
 0x652   : > { %v8040_v6 = vld [vmem:[#allocation3 + $0x430] sm:$0xff]  ;;  %9253 = vmatprep.subr.bf16.mxu1 %v13129_v51  ;;  %v8397_v46 = vld [vmem:[#allocation3 + $0x4c0] sm:$0xff] }
 0x654   : > { %8254 = vmatpush1.bf16.msra.mxu0 %v13028_v22  ;;  %v13079_v22 = vld [vmem:[%s17506_s5 + $0x960] ss:$8 sps:$4 sm:$0xff]  }
 0x655   : > { %8255 = vmatprep.subr.bf16.mxu0 %v13033_v41  ;;  %v13084_v41 = vld [vmem:[%s17506_s5 + $0x974] ss:$8 sps:$4 sm:$0xff]  }
 0x657   : > { %7951 = vmatmul.mubr.bf16.gmra.mrb[12].mxu0 %v7685_v18  ;;  %v8043_v18 = vld [vmem:[#allocation3 + $0x448] sm:$0xff] }
 0x658   : > { %8256 = vmatpush1.bf16.msra.mxu0 %v13031_v20  ;;  %7960 = vmatprep.mubr.bf16.mxu0 %v7688_v32  ;;  %v13127_v20 = vld [vmem:[%s17508_s7 + $0xc0] ss:$16 sps:$4 sm:$0xff]  }
 0x659   : > { %8257 = vmatprep.subr.bf16.mxu0 %v13036_v50  ;;  %v13132_v50 = vld [vmem:[%s17508_s7 + $0xe4] ss:$16 sps:$4 sm:$0xff]   ;;  %v13082_v32 = vld [vmem:[%s17506_s5 + $0x970] ss:$8 sps:$4 sm:$0xff]   ;;  %9254 = vmatpush1.bf16.msra.mxu1 %v13127_v20 }
 0x65a   : > { %9255 = vmatprep.subr.bf16.mxu1 %v13132_v50  ;;  %v8399_v20 = vld [vmem:[#allocation3 + $0x4d0] sm:$0xff] }
 0x65c   : > { %8258 = vmatpush1.bf16.msra.mxu0 %v13034_v19  ;;  %v13087_v19 = vld [vmem:[%s17506_s5 + $0x984] ss:$8 sps:$4 sm:$0xff]  }
 0x65d   : > { %8259 = vmatprep.subr.bf16.mxu0 %v13039_v34  ;;  %v13130_v34 = vld [vmem:[%s17508_s7 + $0xe0] ss:$16 sps:$4 sm:$0xff]  }
 0x65e   : > { %9256 = vmatpush1.bf16.msra.mxu1 %v13130_v34 }
 0x65f   : > { %7961 = vmatmul.mubr.bf16.gmra.mrb[16].mxu0 %v7687_v5  ;;  %v13135_v5 = vld [vmem:[%s17508_s7 + $0x104] ss:$16 sps:$4 sm:$0xff]  }
 0x660   : > { %8260 = vmatpush1.bf16.msra.mxu0 %v13037_v63  ;;  %7970 = vmatprep.mubr.bf16.mxu0 %v7690_v35  ;;  %v8042_v63 = vld [vmem:[#allocation3 + $0x440] sm:$0xff]  ;;  %v13090_v35 = vld [vmem:[%s17506_s5 + $0x994] ss:$8 sps:$4 sm:$0xff]  }
 0x661   : > { %8261 = vmatprep.subr.bf16.mxu0 %v13042_v31  ;;  %v13085_v31 = vld [vmem:[%s17506_s5 + $0x980] ss:$8 sps:$4 sm:$0xff]   ;;  %9257 = vmatprep.subr.bf16.mxu1 %v13135_v5 }
 0x664   : > { %8262 = vmatpush1.bf16.msra.mxu0 %v13040_v29  ;;  %v8045_v29 = vld [vmem:[#allocation3 + $0x458] sm:$0xff] }
 0x665   : > { %8263 = vmatprep.subr.bf16.mxu0 %v13045_v48  ;;  %v13133_v48 = vld [vmem:[%s17508_s7 + $0x100] ss:$16 sps:$4 sm:$0xff]  }
 0x666   : > { %9258 = vmatpush1.bf16.msra.mxu1 %v13133_v48 }
 0x667   : > { %7971 = vmatmul.mubr.bf16.gmra.mrb[20].mxu0 %v7689_v11  ;;  %v13138_v11 = vld [vmem:[%s17508_s7 + $0x124] ss:$16 sps:$4 sm:$0xff]  }
 0x668   : > { %8264 = vmatpush1.bf16.msra.mxu0 %v13043_v27  ;;  %7980 = vmatprep.mubr.bf16.mxu0 %v7692_v42  ;;  %v13088_v27 = vld [vmem:[%s17506_s5 + $0x990] ss:$8 sps:$4 sm:$0xff]  }
 0x669   : > { %8265 = vmatprep.subr.bf16.mxu0 %v13048_v62  ;;  %v13093_v62 = vld [vmem:[%s17506_s5 + $0x9a4] ss:$8 sps:$4 sm:$0xff]   ;;  %v13136_v42 = vld [vmem:[%s17508_s7 + $0x120] ss:$16 sps:$4 sm:$0xff]   ;;  %9259 = vmatprep.subr.bf16.mxu1 %v13138_v11 }
 0x66a   : > { %9260 = vmatpush1.bf16.msra.mxu1 %v13136_v42 }
 0x66c   : > { %8266 = vmatpush1.bf16.msra.mxu0 %v13046_v1  ;;  %v13141_v1 = vld [vmem:[%s17508_s7 + $0x144] ss:$16 sps:$4 sm:$0xff]  }
 0x66d   : > { %8267 = vmatprep.subr.bf16.mxu0 %v13051_v7  ;;  %v8044_v7 = vld [vmem:[#allocation3 + $0x450] sm:$0xff]  ;;  %9261 = vmatprep.subr.bf16.mxu1 %v13141_v1 }
 0x66f   : > { %7981 = vmatmul.mubr.bf16.gmra.mrb[24].mxu0 %v7691_v39  ;;  %v13091_v39 = vld [vmem:[%s17506_s5 + $0x9a0] ss:$8 sps:$4 sm:$0xff]  }
 0x670   : > { %8268 = vmatpush1.bf16.msra.mxu0 %v13049_v53  ;;  %7990 = vmatprep.mubr.bf16.mxu0 %v7694_v12  ;;  %v13096_v53 = vld [vmem:[%s17506_s5 + $0x9b4] ss:$8 sps:$4 sm:$0xff]   ;;  %v13139_v12 = vld [vmem:[%s17508_s7 + $0x140] ss:$16 sps:$4 sm:$0xff]  }
 0x671   : > { %8269 = vmatprep.subr.bf16.mxu0 %v13054_v13  ;;  %v8047_v13 = vld [vmem:[#allocation3 + $0x468] sm:$0xff]  ;;  %9262 = vmatpush1.bf16.msra.mxu1 %v13139_v12 }
 0x674   : > { %8270 = vmatpush1.bf16.msra.mxu0 %v13052_v36  ;;  %v13144_v36 = vld [vmem:[%s17508_s7 + $0x164] ss:$16 sps:$4 sm:$0xff]  }
 0x675   : > { %8271 = vmatprep.subr.bf16.mxu0 %v13057_v40  ;;  %v13094_v40 = vld [vmem:[%s17506_s5 + $0x9b0] ss:$8 sps:$4 sm:$0xff]   ;;  %9263 = vmatprep.subr.bf16.mxu1 %v13144_v36  ;;  %v13150_v36 = vld [vmem:[%s17508_s7 + $0x1a4] ss:$16 sps:$4 sm:$0xff]  }
 0x677   : > { %7991 = vmatmul.mubr.bf16.gmra.mrb[28].mxu0 %v7693_v57  ;;  %v13099_v57 = vld [vmem:[%s17506_s5 + $0x9c4] ss:$8 sps:$4 sm:$0xff]  }
 0x678   : > { %8272 = vmatpush1.bf16.msra.mxu0 %v13055_v23  ;;  %8275 = vmatprep.mubr.bf16.mxu0 %v8035_v24  ;;  %v13142_v23 = vld [vmem:[%s17508_s7 + $0x160] ss:$16 sps:$4 sm:$0xff]  }
 0x679   : > { %8273 = vmatprep.subr.bf16.mxu0 %v13060_v9  ;;  %v13147_v9 = vld [vmem:[%s17508_s7 + $0x184] ss:$16 sps:$4 sm:$0xff]   ;;  %9264 = vmatpush1.bf16.msra.mxu1 %v13142_v23  ;;  %v13151_v23 = vld [vmem:[%s17508_s7 + $0x1c0] ss:$16 sps:$4 sm:$0xff]  }
 0x67a   : > { %v8046_v24 = vld [vmem:[#allocation3 + $0x460] sm:$0xff]  ;;  %9265 = vmatprep.subr.bf16.mxu1 %v13147_v9 }
 0x67b   : > { %v13156_v9 = vld [vmem:[%s17508_s7 + $0x1e4] ss:$16 sps:$4 sm:$0xff]  }
 0x67c   : > { %8274 = vmatpush1.bf16.msra.mxu0 %v13058_v49  ;;  %v13097_v49 = vld [vmem:[%s17506_s5 + $0x9c0] ss:$8 sps:$4 sm:$0xff]  }
 0x67d   : > { %8598 = vmatprep.subr.bf16.mxu0 %v13063_v45  ;;  %v13102_v45 = vld [vmem:[%s17506_s5 + $0x9d4] ss:$8 sps:$4 sm:$0xff]  }
 0x67f   : > { %8276 = vmatmul.mubr.bf16.vlgmr.msra.gmra.mrb[0].mxu0 %v8034_v52  ;;  %v8049_v52 = vld [vmem:[#allocation3 + $0x478] sm:$0xff] }
 0x680   : > { %8599 = vmatpush1.bf16.msra.mxu0 %v13061_v3  ;;  %8285 = vmatprep.mubr.bf16.mxu0 %v8037_v25  ;;  %v13145_v3 = vld [vmem:[%s17508_s7 + $0x180] ss:$16 sps:$4 sm:$0xff]   ;;  %v13105_v25 = vld [vmem:[%s17506_s5 + $0x9e4] ss:$8 sps:$4 sm:$0xff]  }
 0x681   : > { %8600 = vmatprep.subr.bf16.mxu0 %v13066_v26  ;;  %v13100_v26 = vld [vmem:[%s17506_s5 + $0x9d0] ss:$8 sps:$4 sm:$0xff]   ;;  %9266 = vmatpush1.bf16.msra.mxu1 %v13145_v3 }
 0x682   : > { %9267 = vmatprep.subr.bf16.mxu1 %v13150_v36 }
 0x684   : > { %8601 = vmatpush1.bf16.msra.mxu0 %v13064_v8  ;;  %v13108_v8 = vld [vmem:[%s17506_s5 + $0x9f4] ss:$8 sps:$4 sm:$0xff]  }
 0x685   : > { %8602 = vmatprep.subr.bf16.mxu0 %v13069_v21  ;;  %v13106_v21 = vld [vmem:[%s17506_s5 + $0x9f0] ss:$8 sps:$4 sm:$0xff]  }
 0x687   : > { %8286 = vmatmul.mubr.bf16.gmra.mrb[4].mxu0 %v8036_v0  ;;  %v8391_v0 = vld [vmem:[#allocation3 + $0x490] sm:$0xff] }
 0x688   : > { %8603 = vmatpush1.bf16.msra.mxu0 %v13067_v61  ;;  %8295 = vmatprep.mubr.bf16.mxu0 %v8039_v17 }
 0x689   : > { %8604 = vmatprep.subr.bf16.mxu0 %v13072_v43  ;;  %v8394_v43 = vld [vmem:[#allocation3 + $0x4a8] sm:$0xff] }
 0x68c   : > { %8605 = vmatpush1.bf16.msra.mxu0 %v13070_v54  ;;  %v8393_v54 = vld [vmem:[#allocation3 + $0x4a0] sm:$0xff] }
 0x68d   : > { %8606 = vmatprep.subr.bf16.mxu0 %v13075_v14 }
 0x68f   : > { %8296 = vmatmul.mubr.bf16.gmra.mrb[8].mxu0 %v8038_v30 }
 0x690   : > { %8607 = vmatpush1.bf16.msra.mxu0 %v13073_v10  ;;  %8305 = vmatprep.mubr.bf16.mxu0 %v8041_v28 }
 0x691   : > { %8608 = vmatprep.subr.bf16.mxu0 %v13078_v33  ;;  %v8395_v33 = vld [vmem:[#allocation3 + $0x4b0] sm:$0xff] }
 0x694   : > { %8609 = vmatpush1.bf16.msra.mxu0 %v13076_v4 }
 0x695   : > { %8610 = vmatprep.subr.bf16.mxu0 %v13081_v47 }
 0x697   : > { %8306 = vmatmul.mubr.bf16.gmra.mrb[12].mxu0 %v8040_v6  ;;  %v8400_v6 = vld [vmem:[#allocation3 + $0x4d8] sm:$0xff] }
 0x698   : > { %8611 = vmatpush1.bf16.msra.mxu0 %v13079_v22  ;;  %8315 = vmatprep.mubr.bf16.mxu0 %v8043_v18 }
 0x699   : > { %8612 = vmatprep.subr.bf16.mxu0 %v13084_v41 }
 0x69c   : > { %8613 = vmatpush1.bf16.msra.mxu0 %v13082_v32  ;;  %v8402_v32 = vld [vmem:[#allocation3 + $0x4e8] sm:$0xff] }
 0x69d   : > { %8614 = vmatprep.subr.bf16.mxu0 %v13087_v19  ;;  %v16815_v61 = vpop.f32.mrb[0].mxu1 }
 0x69e   : > { %v16817_v17 = vpop.f32.mrb[1].mxu1 }
 0x69f   : > { %8316 = vmatmul.mubr.bf16.gmra.mrb[16].mxu0 %v8042_v63  ;;  %v16819_v37 = vpop.f32.mrb[2].mxu1  ;;  %v8401_v63 = vld [vmem:[#allocation3 + $0x4e0] sm:$0xff] }
 0x6a0   : > { %8615 = vmatpush1.bf16.msra.mxu0 %v13085_v31  ;;  %8325 = vmatprep.mubr.bf16.mxu0 %v8045_v29  ;;  %v16821_v58 = vpop.f32.mrb[3].mxu1 }
 0x6a1   : > { %8616 = vmatprep.subr.bf16.mxu0 %v13090_v35  ;;  %v8404_v35 = vld [vmem:[#allocation3 + $0x4f8] sm:$0xff] }
 0x6a4   : > { %8617 = vmatpush1.bf16.msra.mxu0 %v13088_v27  ;;  %v8403_v27 = vld [vmem:[#allocation3 + $0x4f0] sm:$0xff] }
 0x6a5   : > { %8618 = vmatprep.subr.bf16.mxu0 %v13093_v62  ;;  %v16823_v14 = vpop.f32.mrb[4].mxu1 }
 0x6a6   : > { %v16825_v2 = vpop.f32.mrb[5].mxu1 }
 0x6a7   : > { %8326 = vmatmul.mubr.bf16.gmra.mrb[20].mxu0 %v8044_v7  ;;  %v16827_v30 = vpop.f32.mrb[6].mxu1 }
 0x6a8   : > { %8619 = vmatpush1.bf16.msra.mxu0 %v13091_v39  ;;  %8335 = vmatprep.mubr.bf16.mxu0 %v8047_v13  ;;  %v16829_v10 = vpop.f32.mrb[7].mxu1 }
 0x6a9   : > { %8620 = vmatprep.subr.bf16.mxu0 %v13096_v53 }
 0x6ac   : > { %8621 = vmatpush1.bf16.msra.mxu0 %v13094_v40  ;;  %v13148_v40 = vld [vmem:[%s17508_s7 + $0x1a0] ss:$16 sps:$4 sm:$0xff]  }
 0x6ad   : > { %8622 = vmatprep.subr.bf16.mxu0 %v13099_v57  ;;  %v16831_v28 = vpop.f32.mrb[8].mxu1  ;;  %9268 = vmatpush1.bf16.msra.mxu1 %v13148_v40  ;;  %v13153_v57 = vld [vmem:[%s17508_s7 + $0x1c4] ss:$16 sps:$4 sm:$0xff]  }
 0x6ae   : > { %v16833_v56 = vpop.f32.mrb[9].mxu1  ;;  %9269 = vmatprep.subr.bf16.mxu1 %v13153_v57 }
 0x6af   : > { %8336 = vmatmul.mubr.bf16.gmra.mrb[24].mxu0 %v8046_v24  ;;  %v16835_v4 = vpop.f32.mrb[10].mxu1  ;;  %v13154_v24 = vld [vmem:[%s17508_s7 + $0x1e0] ss:$16 sps:$4 sm:$0xff]  }
 0x6b0   : > { %8623 = vmatpush1.bf16.msra.mxu0 %v13097_v49  ;;  %8345 = vmatprep.mubr.bf16.mxu0 %v8049_v52  ;;  %v16837_v47 = vpop.f32.mrb[11].mxu1  ;;  %v13159_v49 = vld [vmem:[%s17508_s7 + $0xc] ss:$16 sps:$4 sm:$0xff]  }
 0x6b1   : > { %8624 = vmatprep.subr.bf16.mxu0 %v13102_v45  ;;  %9270 = vmatpush1.bf16.msra.mxu1 %v13151_v23  ;;  %v8743_v45 = vld [vmem:[%s17507_s6] sm:$0x3]  ;;  %v17604_v52 = vld [vmem:[#allocation7_spill] sm:$0xff] }
 0x6b2   : > { %9271 = vmatprep.subr.bf16.mxu1 %v13156_v9  ;;  %v16904_v3 = vrot.slane %v8743_v45, %v17604_v52  ;;  %v13162_v23 = vld [vmem:[%s17508_s7 + $0x2c] ss:$16 sps:$4 sm:$0xff]  }
 0x6b4   : > { %8625 = vmatpush1.bf16.msra.mxu0 %v13100_v26 }
 0x6b5   : > { %8626 = vmatprep.subr.bf16.mxu0 %v13105_v25  ;;  %v16839_v51 = vpop.f32.mrb[12].mxu1  ;;  %9272 = vmatpush1.bf16.msra.mxu1 %v13154_v24  ;;  %v17605_v25 = vld [vmem:[#allocation8_spill] sm:$0xff] }
 0x6b6   : > { %v16841_v22 = vpop.f32.mrb[13].mxu1  ;;  %9354 = vmatprep.subr.bf16.mxu1 %v13159_v49 }
 0x6b7   : > { %8346 = vmatmul.mubr.bf16.gmra.mrb[28].mxu0 %v8048_v59  ;;  %v16843_v41 = vpop.f32.mrb[14].mxu1  ;;  %v16907_v59 = vrot.slane %v8743_v45, %v17605_v25 }
 0x6b8   : > { %8627 = vmatpush1.bf16.msra.mxu0 %v13103_v15  ;;  %8630 = vmatprep.mubr.bf16.mxu0 %v8390_v44  ;;  %v16845_v18 = vpop.f32.mrb[15].mxu1 }
 0x6b9   : > { %8628 = vmatprep.subr.bf16.mxu0 %v13108_v8 }
 0x6bc   : > { %8629 = vmatpush1.bf16.msra.mxu0 %v13106_v21 }
 0x6bd   : > { %v16847_v50 = vpop.f32.mrb[16].mxu1 }
 0x6be   : > { %v16849_v19 = vpop.f32.mrb[17].mxu1 }
 0x6bf   : > { %8631 = vmatmul.mubr.bf16.vlgmr.msra.gmra.mrb[0].mxu0 %v8389_v38  ;;  %v16851_v34 = vpop.f32.mrb[18].mxu1 }
 0x6c0   : > { %8640 = vmatprep.mubr.bf16.mxu0 %v8392_v60  ;;  %v16853_v5 = vpop.f32.mrb[19].mxu1 }
 0x6c5   : > { %v16855_v31 = vpop.f32.mrb[20].mxu1 }
 0x6c6   : > { %v16857_v29 = vpop.f32.mrb[21].mxu1 }
 0x6c7   : > { %8641 = vmatmul.mubr.bf16.gmra.mrb[4].mxu0 %v8391_v0  ;;  %v16859_v48 = vpop.f32.mrb[22].mxu1 }
 0x6c8   : > { %8650 = vmatprep.mubr.bf16.mxu0 %v8394_v43  ;;  %v16861_v11 = vpop.f32.mrb[23].mxu1 }
 0x6cd   : > { %v16863_v62 = vpop.f32.mrb[24].mxu1 }
 0x6ce   : > { %v16865_v42 = vpop.f32.mrb[25].mxu1 }
 0x6cf   : > { %8651 = vmatmul.mubr.bf16.gmra.mrb[8].mxu0 %v8393_v54  ;;  %v16867_v1 = vpop.f32.mrb[26].mxu1 }
 0x6d0   : > { %8660 = vmatprep.mubr.bf16.mxu0 %v8396_v55  ;;  %v16869_v7 = vpop.f32.mrb[27].mxu1 }
 0x6d5   : > { %v16871_v39 = vpop.f32.mrb[28].mxu1 }
 0x6d6   : > { %v16873_v53 = vpop.f32.mrb[29].mxu1 }
 0x6d7   : > { %8661 = vmatmul.mubr.bf16.gmra.mrb[12].mxu0 %v8395_v33  ;;  %v16875_v13 = vpop.f32.mrb[30].mxu1 }
 0x6d8   : > { %8670 = vmatprep.mubr.bf16.mxu0 %v8398_v16  ;;  %v16877_v12 = vpop.f32.mrb[31].mxu1 }
 0x6df   : > { %8671 = vmatmul.mubr.bf16.gmra.mrb[16].mxu0 %v8397_v46 }
 0x6e0   : > { %8680 = vmatprep.mubr.bf16.mxu0 %v8400_v6 }
 0x6e7   : > { %8681 = vmatmul.mubr.bf16.gmra.mrb[20].mxu0 %v8399_v20 }
 0x6e8   : > { %8690 = vmatprep.mubr.bf16.mxu0 %v8402_v32 }
 0x6ef   : > { %8691 = vmatmul.mubr.bf16.gmra.mrb[24].mxu0 %v8401_v63 }
 0x6f0   : > { %8700 = vmatprep.mubr.bf16.mxu0 %v8404_v35 }
 0x6f7   : > { %8701 = vmatmul.mubr.bf16.gmra.mrb[28].mxu0 %v8403_v27 }
 0x792   : > { %v8632_v26 = vpop.f32.mrb[0].mxu0 }
 0x793   : > { %v12049_v15 = vadd.f32 %v8632_v26, %v16815_v61  ;;  %v8634_v8 = vpop.f32.mrb[1].mxu0 }
 0x794   : > { %v12050_v44 = vadd.f32 %v8634_v8, %v16817_v17  ;;  %v8636_v21 = vpop.f32.mrb[2].mxu0 }
 0x795   : > { %v8755_v38 = vadd.f32 %v12049_v15, %v16904_v3  ;;  %v12051_v60 = vadd.f32 %v8636_v21, %v16819_v37  ;;  %v8638_v0 = vpop.f32.mrb[3].mxu0 }
 0x796   : > { %v8756_v43 = vadd.f32 %v12050_v44, %v16907_v59  ;;  %v12052_v54 = vadd.f32 %v8638_v0, %v16821_v58  ;;  %v13157_v58 = vld [vmem:[%s17508_s7 + $0x8] ss:$16 sps:$4 sm:$0xff]  }
 0x797   : > { %v8757_v55 = vadd.f32 %v12051_v60, %v16904_v3  ;;  %v8787_v16 = vmax.f32 %v8755_v38, 0.0 }
 0x798   : > { %v8758_v33 = vadd.f32 %v12052_v54, %v16907_v59  ;;  %v8788_v61 = vmax.f32 %v8756_v43, 0.0  ;;  %v13163_v54 = vld [vmem:[%s17508_s7 + $0x48] ss:$16 sps:$4 sm:$0xff]  }
 0x799   : > { %v8789_v46 = vmax.f32 %v8757_v55, 0.0 }
 0x79a   : > { %v8790_v6 = vmax.f32 %v8758_v33, 0.0  ;;  %v8642_v20 = vpop.f32.mrb[4].mxu0 }
 0x79b   : > { %v16917_v17 = vpack.c.bf16 %v8789_v46, %v8787_v16  ;;  %v12053_v32 = vadd.f32 %v8642_v20, %v16823_v14  ;;  %v8644_v63 = vpop.f32.mrb[5].mxu0 }
 0x79c   : > { %v12054_v37 = vadd.f32 %v8644_v63, %v16825_v2  ;;  %v8646_v35 = vpop.f32.mrb[6].mxu0  ;;  %v16921_v27 = vpack.c.bf16 %v8790_v6, %v8788_v61 }
 0x79d   : > { %v8759_v36 = vadd.f32 %v12053_v32, %v16904_v3  ;;  %v12055_v40 = vadd.f32 %v8646_v35, %v16827_v30  ;;  %v8648_v57 = vpop.f32.mrb[7].mxu0  ;;  %v13160_v30 = vld [vmem:[%s17508_s7 + $0x28] ss:$16 sps:$4 sm:$0xff]  }
 0x79e   : > { %v8760_v14 = vadd.f32 %v12054_v37, %v16907_v59  ;;  %v12056_v2 = vadd.f32 %v8648_v57, %v16829_v10  ;;  %9273 = vmatprep.mubr.bf16.mxu1 %v16921_v27  ;;  %v13165_v10 = vld [vmem:[%s17508_s7 + $0x4c] ss:$16 sps:$4 sm:$0xff]  }
 0x79f   : > { %v8761_v9 = vadd.f32 %v12055_v40, %v16904_v3  ;;  %9274 = vmatmul.mubr.bf16.vlgmr.msra.gmra.mrb[32].mxu1 %v16917_v17  ;;  %v8791_v49 = vmax.f32 %v8759_v36, 0.0 }
 0x7a0   : > { %v8762_v24 = vadd.f32 %v12056_v2, %v16907_v59  ;;  %9355 = vmatpush1.bf16.msra.mxu1 %v13157_v58  ;;  %v8792_v26 = vmax.f32 %v8760_v14, 0.0  ;;  %v13169_v2 = vld [vmem:[%s17508_s7 + $0x88] ss:$16 sps:$4 sm:$0xff]  }
 0x7a1   : > { %v8793_v45 = vmax.f32 %v8761_v9, 0.0  ;;  %9356 = vmatprep.subr.bf16.mxu1 %v13162_v23 }
 0x7a2   : > { %v8794_v15 = vmax.f32 %v8762_v24, 0.0  ;;  %v8652_v8 = vpop.f32.mrb[8].mxu0 }
 0x7a3   : > { %v12057_v44 = vadd.f32 %v8652_v8, %v16831_v28  ;;  %v8654_v21 = vpop.f32.mrb[9].mxu0  ;;  %v16944_v38 = vpack.c.bf16 %v8793_v45, %v8791_v49  ;;  %v13168_v28 = vld [vmem:[%s17508_s7 + $0x6c] ss:$16 sps:$4 sm:$0xff]  }
 0x7a4   : > { %v12058_v60 = vadd.f32 %v8654_v21, %v16833_v56  ;;  %v8656_v0 = vpop.f32.mrb[10].mxu0  ;;  %9357 = vmatpush1.bf16.msra.mxu1 %v13160_v30  ;;  %v16947_v43 = vpack.c.bf16 %v8794_v15, %v8792_v26 }
 0x7a5   : > { %v8763_v55 = vadd.f32 %v12057_v44, %v16904_v3  ;;  %v12059_v33 = vadd.f32 %v8656_v0, %v16835_v4  ;;  %v8658_v16 = vpop.f32.mrb[11].mxu0  ;;  %9358 = vmatprep.subr.bf16.mxu1 %v13165_v10  ;;  %v13166_v4 = vld [vmem:[%s17508_s7 + $0x68] ss:$16 sps:$4 sm:$0xff]  }
 0x7a6   : > { %v8764_v56 = vadd.f32 %v12058_v60, %v16907_v59  ;;  %v12060_v46 = vadd.f32 %v8658_v16, %v16837_v47  ;;  %9283 = vmatprep.mubr.bf16.mxu1 %v16947_v43  ;;  %v13171_v47 = vld [vmem:[%s17508_s7 + $0x8c] ss:$16 sps:$4 sm:$0xff]  }
 0x7a7   : > { %v8765_v61 = vadd.f32 %v12059_v33, %v16904_v3  ;;  %9284 = vmatmul.mubr.bf16.gmra.mrb[36].mxu1 %v16944_v38  ;;  %v8795_v20 = vmax.f32 %v8763_v55, 0.0 }
 0x7a8   : > { %v8766_v6 = vadd.f32 %v12060_v46, %v16907_v59  ;;  %9359 = vmatpush1.bf16.msra.mxu1 %v13163_v54  ;;  %v8796_v63 = vmax.f32 %v8764_v56, 0.0 }
 0x7a9   : > { %v8797_v32 = vmax.f32 %v8765_v61, 0.0  ;;  %9360 = vmatprep.subr.bf16.mxu1 %v13168_v28  ;;  %v13175_v28 = vld [vmem:[%s17508_s7 + $0xc8] ss:$16 sps:$4 sm:$0xff]  }
 0x7aa   : > { %v8798_v37 = vmax.f32 %v8766_v6, 0.0  ;;  %v8662_v35 = vpop.f32.mrb[12].mxu0 }
 0x7ab   : > { %v12061_v58 = vadd.f32 %v8662_v35, %v16839_v51  ;;  %v8664_v36 = vpop.f32.mrb[13].mxu0  ;;  %v16970_v40 = vpack.c.bf16 %v8797_v32, %v8795_v20  ;;  %v13174_v51 = vld [vmem:[%s17508_s7 + $0xac] ss:$16 sps:$4 sm:$0xff]  }
 0x7ac   : > { %v12062_v57 = vadd.f32 %v8664_v36, %v16841_v22  ;;  %v8666_v23 = vpop.f32.mrb[14].mxu0  ;;  %9361 = vmatpush1.bf16.msra.mxu1 %v13166_v4  ;;  %v16973_v14 = vpack.c.bf16 %v8798_v37, %v8796_v63 }
 0x7ad   : > { %v8767_v9 = vadd.f32 %v12061_v58, %v16904_v3  ;;  %v12063_v24 = vadd.f32 %v8666_v23, %v16843_v41  ;;  %v8668_v30 = vpop.f32.mrb[15].mxu0  ;;  %9362 = vmatprep.subr.bf16.mxu1 %v13171_v47  ;;  %v13172_v41 = vld [vmem:[%s17508_s7 + $0xa8] ss:$16 sps:$4 sm:$0xff]  }
 0x7ae   : > { %v8768_v22 = vadd.f32 %v12062_v57, %v16907_v59  ;;  %v12064_v49 = vadd.f32 %v8668_v30, %v16845_v18  ;;  %9293 = vmatprep.mubr.bf16.mxu1 %v16973_v14  ;;  %v13177_v18 = vld [vmem:[%s17508_s7 + $0xcc] ss:$16 sps:$4 sm:$0xff]  }
 0x7af   : > { %v8769_v45 = vadd.f32 %v12063_v24, %v16904_v3  ;;  %9294 = vmatmul.mubr.bf16.gmra.mrb[40].mxu1 %v16970_v40  ;;  %v8799_v26 = vmax.f32 %v8767_v9, 0.0  ;;  %v13181_v24 = vld [vmem:[%s17508_s7 + $0x108] ss:$16 sps:$4 sm:$0xff]  }
 0x7b0   : > { %v8770_v10 = vadd.f32 %v12064_v49, %v16907_v59  ;;  %9363 = vmatpush1.bf16.msra.mxu1 %v13169_v2  ;;  %v8800_v8 = vmax.f32 %v8768_v22, 0.0 }
 0x7b1   : > { %v8801_v15 = vmax.f32 %v8769_v45, 0.0  ;;  %9364 = vmatprep.subr.bf16.mxu1 %v13174_v51 }
 0x7b2   : > { %v8802_v44 = vmax.f32 %v8770_v10, 0.0  ;;  %v8672_v21 = vpop.f32.mrb[16].mxu0 }
 0x7b3   : > { %v12065_v60 = vadd.f32 %v8672_v21, %v16847_v50  ;;  %v8674_v0 = vpop.f32.mrb[17].mxu0  ;;  %v16996_v54 = vpack.c.bf16 %v8801_v15, %v8799_v26  ;;  %v13180_v50 = vld [vmem:[%s17508_s7 + $0xec] ss:$16 sps:$4 sm:$0xff]  }
 0x7b4   : > { %v12066_v55 = vadd.f32 %v8674_v0, %v16849_v19  ;;  %v8676_v33 = vpop.f32.mrb[18].mxu0  ;;  %9365 = vmatpush1.bf16.msra.mxu1 %v13172_v41  ;;  %v16999_v16 = vpack.c.bf16 %v8802_v44, %v8800_v8 }
 0x7b5   : > { %v8771_v56 = vadd.f32 %v12065_v60, %v16904_v3  ;;  %v12067_v46 = vadd.f32 %v8676_v33, %v16851_v34  ;;  %v8678_v61 = vpop.f32.mrb[19].mxu0  ;;  %9366 = vmatprep.subr.bf16.mxu1 %v13177_v18  ;;  %v13178_v34 = vld [vmem:[%s17508_s7 + $0xe8] ss:$16 sps:$4 sm:$0xff]  }
 0x7b6   : > { %v8772_v19 = vadd.f32 %v12066_v55, %v16907_v59  ;;  %v12068_v6 = vadd.f32 %v8678_v61, %v16853_v5  ;;  %9303 = vmatprep.mubr.bf16.mxu1 %v16999_v16  ;;  %v13183_v5 = vld [vmem:[%s17508_s7 + $0x10c] ss:$16 sps:$4 sm:$0xff]  }
 0x7b7   : > { %v8773_v4 = vadd.f32 %v12067_v46, %v16904_v3  ;;  %9304 = vmatmul.mubr.bf16.gmra.mrb[44].mxu1 %v16996_v54  ;;  %v8803_v32 = vmax.f32 %v8771_v56, 0.0 }
 0x7b8   : > { %v8774_v20 = vadd.f32 %v12068_v6, %v16907_v59  ;;  %9367 = vmatpush1.bf16.msra.mxu1 %v13175_v28  ;;  %v8804_v63 = vmax.f32 %v8772_v19, 0.0  ;;  %v13187_v28 = vld [vmem:[%s17508_s7 + $0x148] ss:$16 sps:$4 sm:$0xff]  }
 0x7b9   : > { %v8805_v47 = vmax.f32 %v8773_v4, 0.0  ;;  %9368 = vmatprep.subr.bf16.mxu1 %v13180_v50 }
 0x7ba   : > { %v8806_v37 = vmax.f32 %v8774_v20, 0.0  ;;  %v8682_v35 = vpop.f32.mrb[20].mxu0 }
 0x7bb   : > { %v12069_v58 = vadd.f32 %v8682_v35, %v16855_v31  ;;  %v8684_v36 = vpop.f32.mrb[21].mxu0  ;;  %v17022_v57 = vpack.c.bf16 %v8805_v47, %v8803_v32  ;;  %v13186_v31 = vld [vmem:[%s17508_s7 + $0x12c] ss:$16 sps:$4 sm:$0xff]  }
 0x7bc   : > { %v12070_v23 = vadd.f32 %v8684_v36, %v16857_v29  ;;  %v8686_v2 = vpop.f32.mrb[22].mxu0  ;;  %9369 = vmatpush1.bf16.msra.mxu1 %v13178_v34  ;;  %v17025_v9 = vpack.c.bf16 %v8806_v37, %v8804_v63 }
 0x7bd   : > { %v8775_v30 = vadd.f32 %v12069_v58, %v16904_v3  ;;  %v12071_v51 = vadd.f32 %v8686_v2, %v16859_v48  ;;  %v8688_v22 = vpop.f32.mrb[23].mxu0  ;;  %9370 = vmatprep.subr.bf16.mxu1 %v13183_v5  ;;  %v13184_v48 = vld [vmem:[%s17508_s7 + $0x128] ss:$16 sps:$4 sm:$0xff]  }
 0x7be   : > { %v8776_v29 = vadd.f32 %v12070_v23, %v16907_v59  ;;  %v12072_v49 = vadd.f32 %v8688_v22, %v16861_v11  ;;  %9313 = vmatprep.mubr.bf16.mxu1 %v17025_v9  ;;  %v13189_v11 = vld [vmem:[%s17508_s7 + $0x14c] ss:$16 sps:$4 sm:$0xff]   ;;  %v13193_v23 = vld [vmem:[%s17508_s7 + $0x188] ss:$16 sps:$4 sm:$0xff]  }
 0x7bf   : > { %v8777_v45 = vadd.f32 %v12071_v51, %v16904_v3  ;;  %9314 = vmatmul.mubr.bf16.gmra.mrb[48].mxu1 %v17022_v57  ;;  %v8807_v41 = vmax.f32 %v8775_v30, 0.0 }
 0x7c0   : > { %v8778_v10 = vadd.f32 %v12072_v49, %v16907_v59  ;;  %9371 = vmatpush1.bf16.msra.mxu1 %v13181_v24  ;;  %v8808_v15 = vmax.f32 %v8776_v29, 0.0 }
 0x7c1   : > { %v8809_v26 = vmax.f32 %v8777_v45, 0.0  ;;  %9372 = vmatprep.subr.bf16.mxu1 %v13186_v31 }
 0x7c2   : > { %v8810_v18 = vmax.f32 %v8778_v10, 0.0  ;;  %v8692_v8 = vpop.f32.mrb[24].mxu0 }
 0x7c3   : > { %v12073_v44 = vadd.f32 %v8692_v8, %v16863_v62  ;;  %v8694_v21 = vpop.f32.mrb[25].mxu0  ;;  %v17048_v60 = vpack.c.bf16 %v8809_v26, %v8807_v41  ;;  %v13192_v62 = vld [vmem:[%s17508_s7 + $0x16c] ss:$16 sps:$4 sm:$0xff]   ;;  %v13202_v26 = vld [vmem:[%s17508_s7 + $0x1e8] ss:$16 sps:$4 sm:$0xff]   ;;  %v13209_v8 = vld [vmem:[%s17510_s9 + $0x50] sm:$0xff]  }
 0x7c4   : > { %v12074_v0 = vadd.f32 %v8694_v21, %v16865_v42  ;;  %v8696_v55 = vpop.f32.mrb[26].mxu0  ;;  %9373 = vmatpush1.bf16.msra.mxu1 %v13184_v48  ;;  %v17051_v33 = vpack.c.bf16 %v8810_v18, %v8808_v15  ;;  %v13204_v41 = vld [vmem:[%s17508_s7 + $0x1ec] ss:$16 sps:$4 sm:$0xff]   ;;  %v13206_v15 = vld [vmem:[%s17510_s9] sm:$0xff]  }
 0x7c5   : > { %v8779_v56 = vadd.f32 %v12073_v44, %v16904_v3  ;;  %v12075_v46 = vadd.f32 %v8696_v55, %v16867_v1  ;;  %v8698_v61 = vpop.f32.mrb[27].mxu0  ;;  %9374 = vmatprep.subr.bf16.mxu1 %v13189_v11  ;;  %v13190_v1 = vld [vmem:[%s17508_s7 + $0x168] ss:$16 sps:$4 sm:$0xff]   ;;  %v13205_v11 = vld [vmem:[%s17510_s9 + $0x40] sm:$0xff]   ;;  %v13210_v44 = vld [vmem:[%s17510_s9 + $0x10] sm:$0xff]  }
 0x7c6   : > { %v8780_v42 = vadd.f32 %v12074_v0, %v16907_v59  ;;  %v12076_v50 = vadd.f32 %v8698_v61, %v16869_v7  ;;  %9323 = vmatprep.mubr.bf16.mxu1 %v17051_v33  ;;  %v13195_v7 = vld [vmem:[%s17508_s7 + $0x18c] ss:$16 sps:$4 sm:$0xff]   ;;  %v13213_v21 = vld [vmem:[%s17510_s9 + $0x60] sm:$0xff]   ;;  %v13217_v55 = vld [vmem:[%s17510_s9 + $0x70] sm:$0xff]  }
 0x7c7   : > { %v8781_v19 = vadd.f32 %v12075_v46, %v16904_v3  ;;  %9324 = vmatmul.mubr.bf16.gmra.mrb[52].mxu1 %v17048_v60  ;;  %v8811_v4 = vmax.f32 %v8779_v56, 0.0  ;;  %v13207_v18 = vld [vmem:[%s17510_s9 + $0x48] sm:$0xff]   ;;  %v13214_v0 = vld [vmem:[%s17510_s9 + $0x20] sm:$0xff]  }
 0x7c8   : > { %v8782_v6 = vadd.f32 %v12076_v50, %v16907_v59  ;;  %9375 = vmatpush1.bf16.msra.mxu1 %v13187_v28  ;;  %v8812_v34 = vmax.f32 %v8780_v42, 0.0  ;;  %v13218_v28 = vld [vmem:[%s17510_s9 + $0x30] sm:$0xff]  }
 0x7c9   : > { %v8813_v20 = vmax.f32 %v8781_v19, 0.0  ;;  %9376 = vmatprep.subr.bf16.mxu1 %v13192_v62 }
 0x7ca   : > { %v8814_v32 = vmax.f32 %v8782_v6, 0.0  ;;  %v8702_v47 = vpop.f32.mrb[28].mxu0 }
 0x7cb   : > { %v12077_v5 = vadd.f32 %v8702_v47, %v16871_v39  ;;  %v8704_v63 = vpop.f32.mrb[29].mxu0  ;;  %v17074_v37 = vpack.c.bf16 %v8813_v20, %v8811_v4  ;;  %v13198_v39 = vld [vmem:[%s17508_s7 + $0x1ac] ss:$16 sps:$4 sm:$0xff]  }
 0x7cc   : > { %v12078_v35 = vadd.f32 %v8704_v63, %v16873_v53  ;;  %v8706_v58 = vpop.f32.mrb[30].mxu0  ;;  %9377 = vmatpush1.bf16.msra.mxu1 %v13190_v1  ;;  %v17077_v36 = vpack.c.bf16 %v8814_v32, %v8812_v34  ;;  %v13222_v34 = vld [vmem:[%s17510_s9 + $0x80] sm:$0xff]  }
 0x7cd   : > { %v8783_v2 = vadd.f32 %v12077_v5, %v16904_v3  ;;  %v12079_v24 = vadd.f32 %v8706_v58, %v16875_v13  ;;  %v8708_v30 = vpop.f32.mrb[31].mxu0  ;;  %9378 = vmatprep.subr.bf16.mxu1 %v13195_v7  ;;  %v13196_v13 = vld [vmem:[%s17508_s7 + $0x1a8] ss:$16 sps:$4 sm:$0xff]  }
 0x7ce   : > { %v8784_v53 = vadd.f32 %v12078_v35, %v16907_v59  ;;  %v12080_v51 = vadd.f32 %v8708_v30, %v16877_v12  ;;  %9333 = vmatprep.mubr.bf16.mxu1 %v17077_v36  ;;  %v13201_v12 = vld [vmem:[%s17508_s7 + $0x1cc] ss:$16 sps:$4 sm:$0xff]   ;;  %v13225_v30 = vld [vmem:[%s17510_s9 + $0xd0] sm:$0xff]  }
 0x7cf   : > { %v8785_v22 = vadd.f32 %v12079_v24, %v16904_v3  ;;  %9334 = vmatmul.mubr.bf16.gmra.mrb[56].mxu1 %v17074_v37  ;;  %v8815_v29 = vmax.f32 %v8783_v2, 0.0  ;;  %v13223_v5 = vld [vmem:[%s17510_s9 + $0xc8] sm:$0xff]  }
 0x7d0   : > { %v8786_v31 = vadd.f32 %v12080_v51, %v16907_v59  ;;  %9379 = vmatpush1.bf16.msra.mxu1 %v13193_v23  ;;  %v8816_v45 = vmax.f32 %v8784_v53, 0.0  ;;  %v13199_v59 = vld [vmem:[%s17508_s7 + $0x1c8] ss:$16 sps:$4 sm:$0xff]  }
 0x7d1   : > { %v8817_v49 = vmax.f32 %v8785_v22, 0.0  ;;  %9380 = vmatprep.subr.bf16.mxu1 %v13198_v39  ;;  %v13224_v23 = vld [vmem:[%s17510_s9 + $0x88] sm:$0xff]  }
 0x7d2   : > { %v8818_v10 = vmax.f32 %v8786_v31, 0.0 }
 0x7d3   : > { %v8833_v48 = vpack.c.bf16 %v8817_v49, %v8815_v29 }
 0x7d4   : > { %9381 = vmatpush1.bf16.msra.mxu1 %v13196_v13  ;;  %v8834_v3 = vpack.c.bf16 %v8818_v10, %v8816_v45  ;;  %v13226_v13 = vld [vmem:[%s17510_s9 + $0x90] sm:$0xff]  }
 0x7d5   : > { %9382 = vmatprep.subr.bf16.mxu1 %v13201_v12  ;;  %v13227_v12 = vld [vmem:[%s17510_s9 + $0xd8] sm:$0xff]  }
 0x7d6   : > { %9343 = vmatprep.mubr.bf16.mxu1 %v8834_v3 }
 0x7d7   : > { %9344 = vmatmul.mubr.bf16.gmra.mrb[60].mxu1 %v8833_v48 }
 0x7d8   : > { %9383 = vmatpush1.bf16.msra.mxu1 %v13199_v59  ;;  %9386 = vmatprep.mubr.bf16.mxu1 %v16921_v27  ;;  %v13208_v27 = vld [vmem:[%s17510_s9 + $0x8] sm:$0xff]  }
 0x7d9   : > { %9384 = vmatprep.subr.bf16.mxu1 %v13204_v41  ;;  %v13228_v41 = vld [vmem:[%s17510_s9 + $0x98] sm:$0xff]  }
 0x7dc   : > { %9385 = vmatpush1.bf16.msra.mxu1 %v13202_v26 }
 0x7dd   : > { %11625 = vmatprep.subr.bf16.mxu1 %v13205_v11 }
 0x7df   : > { %9387 = vmatmul.mubr.bf16.vlgmr.msra.gmra.mrb[64].mxu1 %v16917_v17  ;;  %v13211_v17 = vld [vmem:[%s17510_s9 + $0x58] sm:$0xff]  }
 0x7e0   : > { %9396 = vmatprep.mubr.bf16.mxu1 %v16947_v43  ;;  %11626 = vmatpush3.bf16.msra.mxu1 %v13206_v15  ;;  %v13212_v43 = vld [vmem:[%s17510_s9 + $0x18] sm:$0xff]   ;;  %v13229_v15 = vld [vmem:[%s17510_s9 + $0xe0] sm:$0xff]  }
 0x7e1   : > { %11627 = vmatprep.subr.bf16.mxu1 %v13207_v18 }
 0x7e4   : > { %11628 = vmatpush3.bf16.msra.mxu1 %v13208_v27 }
 0x7e5   : > { %11629 = vmatprep.subr.bf16.mxu1 %v13209_v8 }
 0x7e7   : > { %9397 = vmatmul.mubr.bf16.gmra.mrb[68].mxu1 %v16944_v38  ;;  %v13215_v38 = vld [vmem:[%s17510_s9 + $0x68] sm:$0xff]  }
 0x7e8   : > { %9406 = vmatprep.mubr.bf16.mxu1 %v16973_v14  ;;  %11630 = vmatpush3.bf16.msra.mxu1 %v13210_v44  ;;  %v13216_v14 = vld [vmem:[%s17510_s9 + $0x28] sm:$0xff]  }
 0x7e9   : > { %11631 = vmatprep.subr.bf16.mxu1 %v13211_v17 }
 0x7ec   : > { %11632 = vmatpush3.bf16.msra.mxu1 %v13212_v43  ;;  %v13230_v43 = vld [vmem:[%s17510_s9 + $0xa0] sm:$0xff]  }
 0x7ed   : > { %11633 = vmatprep.subr.bf16.mxu1 %v13213_v21 }
 0x7ef   : > { %9407 = vmatmul.mubr.bf16.gmra.mrb[72].mxu1 %v16970_v40  ;;  %v13219_v40 = vld [vmem:[%s17510_s9 + $0x78] sm:$0xff]  }
 0x7f0   : > { %9416 = vmatprep.mubr.bf16.mxu1 %v16999_v16  ;;  %11634 = vmatpush3.bf16.msra.mxu1 %v13214_v0  ;;  %v13220_v16 = vld [vmem:[%s17510_s9 + $0x38] sm:$0xff]  }
 0x7f1   : > { %11635 = vmatprep.subr.bf16.mxu1 %v13215_v38  ;;  %v13231_v38 = vld [vmem:[%s17510_s9 + $0xe8] sm:$0xff]  }
 0x7f4   : > { %11636 = vmatpush3.bf16.msra.mxu1 %v13216_v14 }
 0x7f5   : > { %11637 = vmatprep.subr.bf16.mxu1 %v13217_v55 }
 0x7f7   : > { %9417 = vmatmul.mubr.bf16.gmra.mrb[76].mxu1 %v16996_v54  ;;  %v13221_v54 = vld [vmem:[%s17510_s9 + $0xc0] sm:$0xff]  }
 0x7f8   : > { %9426 = vmatprep.mubr.bf16.mxu1 %v17025_v9  ;;  %11638 = vmatpush3.bf16.msra.mxu1 %v13218_v28  ;;  %v17176_v9 = vld [vmem:[%s17509_s8] sm:$0xf] }
 0x7f9   : > { %11639 = vmatprep.subr.bf16.mxu1 %v13219_v40 }
 0x7fc   : > { %11640 = vmatpush3.bf16.msra.mxu1 %v13220_v16 }
 0x7fd   : > { %11689 = vmatprep.subr.bf16.mxu1 %v13221_v54  ;;  %v13232_v54 = vld [vmem:[%s17510_s9 + $0xa8] sm:$0xff]  }
 0x7ff   : > { %9427 = vmatmul.mubr.bf16.gmra.mrb[80].mxu1 %v17022_v57  ;;  %v17180_v57 = vrot.slane %v17176_v9, %v17604_v52 }
 0x800   : > { %9436 = vmatprep.mubr.bf16.mxu1 %v17051_v33  ;;  %v17184_v33 = vrot.slane %v17176_v9, %v17605_v25 }
 0x807   : > { %9437 = vmatmul.mubr.bf16.gmra.mrb[84].mxu1 %v17048_v60 }
 0x808   : > { %9446 = vmatprep.mubr.bf16.mxu1 %v17077_v36 }
 0x80f   : > { %9447 = vmatmul.mubr.bf16.gmra.mrb[88].mxu1 %v17074_v37 }
 0x810   : > { %9456 = vmatprep.mubr.bf16.mxu1 %v8834_v3 }
 0x817   : > { %9457 = vmatmul.mubr.bf16.gmra.mrb[92].mxu1 %v8833_v48 }
 0x872   : > { %v9275_v60 = vpop.f32.mrb[32].mxu1 }
 0x873   : > { %v9276_v56 = vadd.f32 %v9275_v60, %v17180_v57  ;;  %v9277_v46 = vpop.f32.mrb[33].mxu1 }
 0x874   : > { %v9278_v61 = vadd.f32 %v9277_v46, %v17184_v33  ;;  %v9279_v62 = vpop.f32.mrb[34].mxu1  ;;  %v13233_v46 = vld [vmem:[%s17510_s9 + $0xf0] sm:$0xff]  }
 0x875   : > { %v9280_v42 = vadd.f32 %v9279_v62, %v17180_v57  ;;  %v9281_v50 = vpop.f32.mrb[35].mxu1  ;;  %v9467_v6 = vmax.f32 %v9276_v56, 0.0 }
 0x876   : > { %v9282_v19 = vadd.f32 %v9281_v50, %v17184_v33  ;;  %v9468_v52 = vmax.f32 %v9278_v61, 0.0 }
 0x877   : > { %v9471_v1 = vmax.f32 %v9280_v42, 0.0 }
 0x878   : > { %v9472_v4 = vmax.f32 %v9282_v19, 0.0 }
 0x879   : > { %v9531_v20 = vpack.c.bf16 %v9471_v1, %v9467_v6  ;;  %v13234_v6 = vld [vmem:[%s17510_s9 + $0xb0] sm:$0xff]  }
 0x87a   : > { %v9532_v7 = vpack.c.bf16 %v9472_v4, %v9468_v52  ;;  %v9285_v25 = vpop.f32.mrb[36].mxu1  ;;  %v13235_v4 = vld [vmem:[%s17510_s9 + $0xf8] sm:$0xff]  }
 0x87b   : > { %v9286_v32 = vadd.f32 %v9285_v25, %v17180_v57  ;;  %v9287_v47 = vpop.f32.mrb[37].mxu1 }
 0x87c   : > { %v9288_v63 = vadd.f32 %v9287_v47, %v17184_v33  ;;  %v9289_v37 = vpop.f32.mrb[38].mxu1  ;;  %9858 = vmatprep.mubr.bf16.mxu1 %v9532_v7  ;;  %v13236_v47 = vld [vmem:[%s17510_s9 + $0xb8] sm:$0xff]  }
 0x87d   : > { %v9290_v35 = vadd.f32 %v9289_v37, %v17180_v57  ;;  %v9291_v58 = vpop.f32.mrb[39].mxu1  ;;  %9859 = vmatmul.mubr.bf16.vlgmr.msra.gmra.mrb[96].mxu1 %v9531_v20  ;;  %v9475_v2 = vmax.f32 %v9286_v32, 0.0 }
 0x87e   : > { %v9292_v36 = vadd.f32 %v9291_v58, %v17184_v33  ;;  %11690 = vmatpush3.bf16.msra.mxu1 %v13222_v34  ;;  %v9476_v39 = vmax.f32 %v9288_v63, 0.0 }
 0x87f   : > { %v9479_v24 = vmax.f32 %v9290_v35, 0.0  ;;  %11691 = vmatprep.subr.bf16.mxu1 %v13223_v5 }
 0x880   : > { %v9480_v53 = vmax.f32 %v9292_v36, 0.0 }
 0x881   : > { %v9535_v51 = vpack.c.bf16 %v9479_v24, %v9475_v2 }
 0x882   : > { %v9536_v22 = vpack.c.bf16 %v9480_v53, %v9476_v39  ;;  %v9295_v31 = vpop.f32.mrb[40].mxu1  ;;  %11692 = vmatpush3.bf16.msra.mxu1 %v13224_v23 }
 0x883   : > { %v9296_v29 = vadd.f32 %v9295_v31, %v17180_v57  ;;  %v9297_v49 = vpop.f32.mrb[41].mxu1  ;;  %11693 = vmatprep.subr.bf16.mxu1 %v13225_v30 }
 0x884   : > { %v9298_v45 = vadd.f32 %v9297_v49, %v17184_v33  ;;  %v9299_v10 = vpop.f32.mrb[42].mxu1  ;;  %9866 = vmatprep.mubr.bf16.mxu1 %v9536_v22 }
 0x885   : > { %v9300_v48 = vadd.f32 %v9299_v10, %v17180_v57  ;;  %v9301_v3 = vpop.f32.mrb[43].mxu1  ;;  %9867 = vmatmul.mubr.bf16.gmra.mrb[100].mxu1 %v9535_v51  ;;  %v9483_v26 = vmax.f32 %v9296_v29, 0.0 }
 0x886   : > { %v9302_v59 = vadd.f32 %v9301_v3, %v17184_v33  ;;  %11694 = vmatpush3.bf16.msra.mxu1 %v13226_v13  ;;  %v9484_v18 = vmax.f32 %v9298_v45, 0.0 }
 0x887   : > { %v9487_v11 = vmax.f32 %v9300_v48, 0.0  ;;  %11695 = vmatprep.subr.bf16.mxu1 %v13227_v12 }
 0x888   : > { %v9488_v27 = vmax.f32 %v9302_v59, 0.0 }
 0x889   : > { %v9539_v8 = vpack.c.bf16 %v9487_v11, %v9483_v26 }
 0x88a   : > { %v9540_v44 = vpack.c.bf16 %v9488_v27, %v9484_v18  ;;  %v9305_v17 = vpop.f32.mrb[44].mxu1  ;;  %11696 = vmatpush3.bf16.msra.mxu1 %v13228_v41 }
 0x88b   : > { %v9306_v21 = vadd.f32 %v9305_v17, %v17180_v57  ;;  %v9307_v0 = vpop.f32.mrb[45].mxu1  ;;  %11697 = vmatprep.subr.bf16.mxu1 %v13229_v15 }
 0x88c   : > { %v9308_v14 = vadd.f32 %v9307_v0, %v17184_v33  ;;  %v9309_v55 = vpop.f32.mrb[46].mxu1  ;;  %9874 = vmatprep.mubr.bf16.mxu1 %v9540_v44 }
 0x88d   : > { %v9310_v28 = vadd.f32 %v9309_v55, %v17180_v57  ;;  %v9311_v40 = vpop.f32.mrb[47].mxu1  ;;  %9875 = vmatmul.mubr.bf16.gmra.mrb[104].mxu1 %v9539_v8  ;;  %v9491_v60 = vmax.f32 %v9306_v21, 0.0 }
 0x88e   : > { %v9312_v16 = vadd.f32 %v9311_v40, %v17184_v33  ;;  %11698 = vmatpush3.bf16.msra.mxu1 %v13230_v43  ;;  %v9492_v61 = vmax.f32 %v9308_v14, 0.0 }
 0x88f   : > { %v9495_v56 = vmax.f32 %v9310_v28, 0.0  ;;  %11699 = vmatprep.subr.bf16.mxu1 %v13231_v38  ;;  %v17606_v28 = vld [vmem:[#allocation6_spill] sm:$0xff] }
 0x890   : > { %v9496_v62 = vmax.f32 %v9312_v16, 0.0  ;;  %v8915_v40 = vsub.s32 3, %v17606_v28 }
 0x891   : > { %v9543_v42 = vpack.c.bf16 %v9495_v56, %v9491_v60 }
 0x892   : > { %v9544_v50 = vpack.c.bf16 %v9496_v62, %v9492_v61  ;;  %v9315_v19 = vpop.f32.mrb[48].mxu1  ;;  %11700 = vmatpush3.bf16.msra.mxu1 %v13232_v54  ;;  %v17607_v61 = vld [vmem:[#allocation9_spill] sm:$0xff] }
 0x893   : > { %v9316_v1 = vadd.f32 %v9315_v19, %v17180_v57  ;;  %v9317_v52 = vpop.f32.mrb[49].mxu1  ;;  %11701 = vmatprep.subr.bf16.mxu1 %v13233_v46  ;;  %v17266_v62 = vrot.slane %v17176_v9, %v17607_v61  ;;  %v17269_v19 = vrot.slane %v17176_v9, %v8915_v40 }
 0x894   : > { %v9318_v20 = vadd.f32 %v9317_v52, %v17184_v33  ;;  %v9319_v7 = vpop.f32.mrb[50].mxu1  ;;  %9882 = vmatprep.mubr.bf16.mxu1 %v9544_v50 }
 0x895   : > { %v9320_v25 = vadd.f32 %v9319_v7, %v17180_v57  ;;  %v9321_v34 = vpop.f32.mrb[51].mxu1  ;;  %9883 = vmatmul.mubr.bf16.gmra.mrb[108].mxu1 %v9543_v42  ;;  %v9499_v5 = vmax.f32 %v9316_v1, 0.0 }
 0x896   : > { %v9322_v32 = vadd.f32 %v9321_v34, %v17184_v33  ;;  %11702 = vmatpush3.bf16.msra.mxu1 %v13234_v6  ;;  %v9500_v37 = vmax.f32 %v9318_v20, 0.0 }
 0x897   : > { %v9503_v63 = vmax.f32 %v9320_v25, 0.0  ;;  %11703 = vmatprep.subr.bf16.mxu1 %v13235_v4 }
 0x898   : > { %v9504_v35 = vmax.f32 %v9322_v32, 0.0 }
 0x899   : > { %v9547_v58 = vpack.c.bf16 %v9503_v63, %v9499_v5 }
 0x89a   : > { %v9548_v36 = vpack.c.bf16 %v9504_v35, %v9500_v37  ;;  %v9325_v23 = vpop.f32.mrb[52].mxu1  ;;  %11704 = vmatpush3.bf16.msra.mxu1 %v13236_v47 }
 0x89b   : > { %v9326_v2 = vadd.f32 %v9325_v23, %v17180_v57  ;;  %v9327_v24 = vpop.f32.mrb[53].mxu1 }
 0x89c   : > { %v9328_v30 = vadd.f32 %v9327_v24, %v17184_v33  ;;  %v9329_v39 = vpop.f32.mrb[54].mxu1  ;;  %9890 = vmatprep.mubr.bf16.mxu1 %v9548_v36 }
 0x89d   : > { %v9330_v53 = vadd.f32 %v9329_v39, %v17180_v57  ;;  %v9331_v51 = vpop.f32.mrb[55].mxu1  ;;  %9891 = vmatmul.mubr.bf16.gmra.mrb[112].mxu1 %v9547_v58  ;;  %v9507_v31 = vmax.f32 %v9326_v2, 0.0 }
 0x89e   : > { %v9332_v22 = vadd.f32 %v9331_v51, %v17184_v33  ;;  %v9508_v29 = vmax.f32 %v9328_v30, 0.0 }
 0x89f   : > { %v9511_v13 = vmax.f32 %v9330_v53, 0.0 }
 0x8a0   : > { %v9512_v49 = vmax.f32 %v9332_v22, 0.0 }
 0x8a1   : > { %v9551_v12 = vpack.c.bf16 %v9511_v13, %v9507_v31 }
 0x8a2   : > { %v9552_v45 = vpack.c.bf16 %v9512_v49, %v9508_v29  ;;  %v9335_v10 = vpop.f32.mrb[56].mxu1 }
 0x8a3   : > { %v9336_v48 = vadd.f32 %v9335_v10, %v17180_v57  ;;  %v9337_v3 = vpop.f32.mrb[57].mxu1 }
 0x8a4   : > { %v9338_v59 = vadd.f32 %v9337_v3, %v17184_v33  ;;  %v9339_v41 = vpop.f32.mrb[58].mxu1  ;;  %9898 = vmatprep.mubr.bf16.mxu1 %v9552_v45 }
 0x8a5   : > { %v9340_v26 = vadd.f32 %v9339_v41, %v17180_v57  ;;  %v9341_v11 = vpop.f32.mrb[59].mxu1  ;;  %9899 = vmatmul.mubr.bf16.gmra.mrb[116].mxu1 %v9551_v12  ;;  %v9515_v18 = vmax.f32 %v9336_v48, 0.0 }
 0x8a6   : > { %v9342_v15 = vadd.f32 %v9341_v11, %v17184_v33  ;;  %v9516_v8 = vmax.f32 %v9338_v59, 0.0 }
 0x8a7   : > { %v9519_v27 = vmax.f32 %v9340_v26, 0.0 }
 0x8a8   : > { %v9520_v44 = vmax.f32 %v9342_v15, 0.0 }
 0x8a9   : > { %v9555_v17 = vpack.c.bf16 %v9519_v27, %v9515_v18 }
 0x8aa   : > { %v9556_v43 = vpack.c.bf16 %v9520_v44, %v9516_v8  ;;  %v9345_v21 = vpop.f32.mrb[60].mxu1 }
 0x8ab   : > { %v9346_v0 = vadd.f32 %v9345_v21, %v17180_v57  ;;  %v9347_v38 = vpop.f32.mrb[61].mxu1 }
 0x8ac   : > { %v9348_v14 = vadd.f32 %v9347_v38, %v17184_v33  ;;  %v9349_v55 = vpop.f32.mrb[62].mxu1  ;;  %9906 = vmatprep.mubr.bf16.mxu1 %v9556_v43 }
 0x8ad   : > { %v9350_v16 = vadd.f32 %v9349_v55, %v17180_v57  ;;  %v9351_v54 = vpop.f32.mrb[63].mxu1  ;;  %9907 = vmatmul.mubr.bf16.gmra.mrb[120].mxu1 %v9555_v17  ;;  %v9523_v56 = vmax.f32 %v9346_v0, 0.0 }
 0x8ae   : > { %v9352_v60 = vadd.f32 %v9351_v54, %v17184_v33  ;;  %v9524_v42 = vmax.f32 %v9348_v14, 0.0 }
 0x8af   : > { %v9527_v46 = vmax.f32 %v9350_v16, 0.0 }
 0x8b0   : > { %v9528_v50 = vmax.f32 %v9352_v60, 0.0 }
 0x8b1   : > { %v9559_v6 = vpack.c.bf16 %v9527_v46, %v9523_v56 }
 0x8b2   : > { %v9560_v1 = vpack.c.bf16 %v9528_v50, %v9524_v42  ;;  %v9388_v52 = vpop.f32.mrb[64].mxu1 }
 0x8b3   : > { %v9389_v57 = vadd.f32 %v9388_v52, %v17266_v62  ;;  %v9390_v4 = vpop.f32.mrb[65].mxu1 }
 0x8b4   : > { %v9391_v20 = vadd.f32 %v9390_v4, %v17269_v19  ;;  %v9392_v33 = vpop.f32.mrb[66].mxu1  ;;  %9914 = vmatprep.mubr.bf16.mxu1 %v9560_v1 }
 0x8b5   : > { %v9393_v7 = vadd.f32 %v9392_v33, %v17266_v62  ;;  %v9394_v25 = vpop.f32.mrb[67].mxu1  ;;  %9915 = vmatmul.mubr.bf16.gmra.mrb[124].mxu1 %v9559_v6  ;;  %v9469_v32 = vmax.f32 %v9389_v57, 0.0 }
 0x8b6   : > { %v9395_v34 = vadd.f32 %v9394_v25, %v17269_v19  ;;  %v9470_v9 = vmax.f32 %v9391_v20, 0.0 }
 0x8b7   : > { %v9473_v47 = vmax.f32 %v9393_v7, 0.0 }
 0x8b8   : > { %v9474_v5 = vmax.f32 %v9395_v34, 0.0 }
 0x8b9   : > { %v9533_v63 = vpack.c.bf16 %v9473_v47, %v9469_v32 }
 0x8ba   : > { %v9534_v37 = vpack.c.bf16 %v9474_v5, %v9470_v9  ;;  %v9398_v35 = vpop.f32.mrb[68].mxu1 }
 0x8bb   : > { %v9399_v58 = vadd.f32 %v9398_v35, %v17266_v62  ;;  %v9400_v36 = vpop.f32.mrb[69].mxu1 }
 0x8bc   : > { %v9401_v23 = vadd.f32 %v9400_v36, %v17269_v19  ;;  %v9402_v2 = vpop.f32.mrb[70].mxu1  ;;  %9955 = vmatprep.mubr.bf16.mxu1 %v9534_v37 }
 0x8bd   : > { %v9403_v24 = vadd.f32 %v9402_v2, %v17266_v62  ;;  %v9404_v30 = vpop.f32.mrb[71].mxu1  ;;  %9956 = vmatmul.mubr.bf16.vlgmr.msra.gmra.mrb[128].mxu1 %v9533_v63  ;;  %v9477_v53 = vmax.f32 %v9399_v58, 0.0 }
 0x8be   : > { %v9405_v39 = vadd.f32 %v9404_v30, %v17269_v19  ;;  %v9478_v22 = vmax.f32 %v9401_v23, 0.0 }
 0x8bf   : > { %v9481_v51 = vmax.f32 %v9403_v24, 0.0 }
 0x8c0   : > { %v9482_v31 = vmax.f32 %v9405_v39, 0.0 }
 0x8c1   : > { %v9537_v13 = vpack.c.bf16 %v9481_v51, %v9477_v53 }
 0x8c2   : > { %v9538_v29 = vpack.c.bf16 %v9482_v31, %v9478_v22  ;;  %v9408_v49 = vpop.f32.mrb[72].mxu1 }
 0x8c3   : > { %v9409_v12 = vadd.f32 %v9408_v49, %v17266_v62  ;;  %v9410_v45 = vpop.f32.mrb[73].mxu1 }
 0x8c4   : > { %v9411_v10 = vadd.f32 %v9410_v45, %v17269_v19  ;;  %v9412_v48 = vpop.f32.mrb[74].mxu1  ;;  %9963 = vmatprep.mubr.bf16.mxu1 %v9538_v29 }
 0x8c5   : > { %v9413_v3 = vadd.f32 %v9412_v48, %v17266_v62  ;;  %v9414_v59 = vpop.f32.mrb[75].mxu1  ;;  %9964 = vmatmul.mubr.bf16.gmra.mrb[132].mxu1 %v9537_v13  ;;  %v9485_v26 = vmax.f32 %v9409_v12, 0.0 }
 0x8c6   : > { %v9415_v41 = vadd.f32 %v9414_v59, %v17269_v19  ;;  %v9486_v15 = vmax.f32 %v9411_v10, 0.0 }
 0x8c7   : > { %v9489_v11 = vmax.f32 %v9413_v3, 0.0 }
 0x8c8   : > { %v9490_v18 = vmax.f32 %v9415_v41, 0.0 }
 0x8c9   : > { %v9541_v27 = vpack.c.bf16 %v9489_v11, %v9485_v26 }
 0x8ca   : > { %v9542_v8 = vpack.c.bf16 %v9490_v18, %v9486_v15  ;;  %v9418_v44 = vpop.f32.mrb[76].mxu1 }
 0x8cb   : > { %v9419_v17 = vadd.f32 %v9418_v44, %v17266_v62  ;;  %v9420_v43 = vpop.f32.mrb[77].mxu1 }
 0x8cc   : > { %v9421_v21 = vadd.f32 %v9420_v43, %v17269_v19  ;;  %v9422_v0 = vpop.f32.mrb[78].mxu1  ;;  %9971 = vmatprep.mubr.bf16.mxu1 %v9542_v8 }
 0x8cd   : > { %v9423_v38 = vadd.f32 %v9422_v0, %v17266_v62  ;;  %v9424_v14 = vpop.f32.mrb[79].mxu1  ;;  %9972 = vmatmul.mubr.bf16.gmra.mrb[136].mxu1 %v9541_v27  ;;  %v9493_v28 = vmax.f32 %v9419_v17, 0.0 }
 0x8ce   : > { %v9425_v55 = vadd.f32 %v9424_v14, %v17269_v19  ;;  %v9494_v16 = vmax.f32 %v9421_v21, 0.0 }
 0x8cf   : > { %v9497_v40 = vmax.f32 %v9423_v38, 0.0 }
 0x8d0   : > { %v9498_v54 = vmax.f32 %v9425_v55, 0.0 }
 0x8d1   : > { %v9545_v60 = vpack.c.bf16 %v9497_v40, %v9493_v28 }
 0x8d2   : > { %v9546_v56 = vpack.c.bf16 %v9498_v54, %v9494_v16  ;;  %v9428_v46 = vpop.f32.mrb[80].mxu1 }
 0x8d3   : > { %v9429_v61 = vadd.f32 %v9428_v46, %v17266_v62  ;;  %v9430_v42 = vpop.f32.mrb[81].mxu1 }
 0x8d4   : > { %v9431_v50 = vadd.f32 %v9430_v42, %v17269_v19  ;;  %v9432_v6 = vpop.f32.mrb[82].mxu1  ;;  %9979 = vmatprep.mubr.bf16.mxu1 %v9546_v56 }
 0x8d5   : > { %v9433_v1 = vadd.f32 %v9432_v6, %v17266_v62  ;;  %v9434_v52 = vpop.f32.mrb[83].mxu1  ;;  %9980 = vmatmul.mubr.bf16.gmra.mrb[140].mxu1 %v9545_v60  ;;  %v9501_v4 = vmax.f32 %v9429_v61, 0.0 }
 0x8d6   : > { %v9435_v57 = vadd.f32 %v9434_v52, %v17269_v19  ;;  %v9502_v33 = vmax.f32 %v9431_v50, 0.0 }
 0x8d7   : > { %v9505_v20 = vmax.f32 %v9433_v1, 0.0 }
 0x8d8   : > { %v9506_v7 = vmax.f32 %v9435_v57, 0.0 }
 0x8d9   : > { %v9549_v25 = vpack.c.bf16 %v9505_v20, %v9501_v4 }
 0x8da   : > { %v9550_v34 = vpack.c.bf16 %v9506_v7, %v9502_v33  ;;  %v9438_v32 = vpop.f32.mrb[84].mxu1 }
 0x8db   : > { %v9439_v47 = vadd.f32 %v9438_v32, %v17266_v62  ;;  %v9440_v9 = vpop.f32.mrb[85].mxu1 }
 0x8dc   : > { %v9441_v5 = vadd.f32 %v9440_v9, %v17269_v19  ;;  %v9442_v63 = vpop.f32.mrb[86].mxu1  ;;  %9987 = vmatprep.mubr.bf16.mxu1 %v9550_v34 }
 0x8dd   : > { %v9443_v37 = vadd.f32 %v9442_v63, %v17266_v62  ;;  %v9444_v35 = vpop.f32.mrb[87].mxu1  ;;  %9988 = vmatmul.mubr.bf16.gmra.mrb[144].mxu1 %v9549_v25  ;;  %v9509_v36 = vmax.f32 %v9439_v47, 0.0 }
 0x8de   : > { %v9445_v58 = vadd.f32 %v9444_v35, %v17269_v19  ;;  %v9510_v2 = vmax.f32 %v9441_v5, 0.0 }
 0x8df   : > { %v9513_v23 = vmax.f32 %v9443_v37, 0.0 }
 0x8e0   : > { %v9514_v24 = vmax.f32 %v9445_v58, 0.0 }
 0x8e1   : > { %v9553_v30 = vpack.c.bf16 %v9513_v23, %v9509_v36 }
 0x8e2   : > { %v9554_v39 = vpack.c.bf16 %v9514_v24, %v9510_v2  ;;  %v9448_v53 = vpop.f32.mrb[88].mxu1 }
 0x8e3   : > { %v9449_v51 = vadd.f32 %v9448_v53, %v17266_v62  ;;  %v9450_v22 = vpop.f32.mrb[89].mxu1 }
 0x8e4   : > { %v9451_v31 = vadd.f32 %v9450_v22, %v17269_v19  ;;  %v9452_v13 = vpop.f32.mrb[90].mxu1  ;;  %9995 = vmatprep.mubr.bf16.mxu1 %v9554_v39 }
 0x8e5   : > { %v9453_v29 = vadd.f32 %v9452_v13, %v17266_v62  ;;  %v9454_v49 = vpop.f32.mrb[91].mxu1  ;;  %9996 = vmatmul.mubr.bf16.gmra.mrb[148].mxu1 %v9553_v30  ;;  %v9517_v45 = vmax.f32 %v9449_v51, 0.0 }
 0x8e6   : > { %v9455_v12 = vadd.f32 %v9454_v49, %v17269_v19  ;;  %v9518_v48 = vmax.f32 %v9451_v31, 0.0 }
 0x8e7   : > { %v9521_v10 = vmax.f32 %v9453_v29, 0.0 }
 0x8e8   : > { %v9522_v3 = vmax.f32 %v9455_v12, 0.0 }
 0x8e9   : > { %v9557_v59 = vpack.c.bf16 %v9521_v10, %v9517_v45 }
 0x8ea   : > { %v9558_v41 = vpack.c.bf16 %v9522_v3, %v9518_v48  ;;  %v9458_v26 = vpop.f32.mrb[92].mxu1 }
 0x8eb   : > { %v9459_v11 = vadd.f32 %v9458_v26, %v17266_v62  ;;  %v9460_v15 = vpop.f32.mrb[93].mxu1 }
 0x8ec   : > { %v9461_v18 = vadd.f32 %v9460_v15, %v17269_v19  ;;  %v9462_v27 = vpop.f32.mrb[94].mxu1  ;;  %10003 = vmatprep.mubr.bf16.mxu1 %v9558_v41 }
 0x8ed   : > { %v9463_v8 = vadd.f32 %v9462_v27, %v17266_v62  ;;  %v9464_v44 = vpop.f32.mrb[95].mxu1  ;;  %10004 = vmatmul.mubr.bf16.gmra.mrb[152].mxu1 %v9557_v59  ;;  %v9525_v43 = vmax.f32 %v9459_v11, 0.0  ;;  %v17326_v59 = vld [vmem:[%s17511_s10] ss:$0 sm:$0xff] }
 0x8ee   : > { %v9465_v17 = vadd.f32 %v9464_v44, %v17269_v19  ;;  %v9526_v0 = vmax.f32 %v9461_v18, 0.0 }
 0x8ef   : > { %v9529_v21 = vmax.f32 %v9463_v8, 0.0 }
 0x8f0   : > { %v9530_v38 = vmax.f32 %v9465_v17, 0.0 }
 0x8f1   : > { %v9561_v14 = vpack.c.bf16 %v9529_v21, %v9525_v43 }
 0x8f2   : > { %v9562_v55 = vpack.c.bf16 %v9530_v38, %v9526_v0 }
 0x8f4   : > { %10011 = vmatprep.mubr.bf16.mxu1 %v9562_v55 }
 0x8f5   : > { %10012 = vmatmul.mubr.bf16.gmra.mrb[156].mxu1 %v9561_v14 }
 0x950   : > { %v11641_v28 = vpop.f32.mrb[96].mxu1 }
 0x951   : > { %v11642_v40 = vpop.f32.mrb[97].mxu1 }
 0x952   : > { %v11643_v16 = vadd.f32 %v11642_v40, %v11641_v28  ;;  %v11644_v54 = vpop.f32.mrb[98].mxu1 }
 0x953   : > { %v11645_v60 = vpop.f32.mrb[99].mxu1 }
 0x954   : > { %v11646_v56 = vadd.f32 %v11645_v60, %v11644_v54  ;;  %v9861_v11 = vadd.f32 %v11643_v16, %v17326_v59 }
 0x956   : > { %v9864_v8 = vadd.f32 %v11646_v56, %v17326_v59 }
 0x958   : > { %v11647_v46 = vpop.f32.mrb[100].mxu1 }
 0x959   : > { %v11648_v62 = vpop.f32.mrb[101].mxu1 }
 0x95a   : > { %v11649_v61 = vadd.f32 %v11648_v62, %v11647_v46  ;;  %v11650_v42 = vpop.f32.mrb[102].mxu1 }
 0x95b   : > { %v11651_v50 = vpop.f32.mrb[103].mxu1 }
 0x95c   : > { %v11652_v19 = vadd.f32 %v11651_v50, %v11650_v42  ;;  %v9869_v38 = vadd.f32 %v11649_v61, %v17326_v59 }
 0x95e   : > { %v9872_v40 = vadd.f32 %v11652_v19, %v17326_v59 }
 0x960   : > { %v11653_v6 = vpop.f32.mrb[104].mxu1 }
 0x961   : > { %v11654_v1 = vpop.f32.mrb[105].mxu1 }
 0x962   : > { %v11655_v52 = vadd.f32 %v11654_v1, %v11653_v6  ;;  %v11656_v57 = vpop.f32.mrb[106].mxu1 }
 0x963   : > { %v11657_v4 = vpop.f32.mrb[107].mxu1 }
 0x964   : > { %v11658_v20 = vadd.f32 %v11657_v4, %v11656_v57  ;;  %v9877_v62 = vadd.f32 %v11655_v52, %v17326_v59 }
 0x966   : > { %v9880_v6 = vadd.f32 %v11658_v20, %v17326_v59 }
 0x968   : > { %v11659_v33 = vpop.f32.mrb[108].mxu1 }
 0x969   : > { %v11660_v7 = vpop.f32.mrb[109].mxu1 }
 0x96a   : > { %v17303_v25 = vadd.f32 %v11660_v7, %v11659_v33  ;;  %v11662_v34 = vpop.f32.mrb[110].mxu1 }
 0x96b   : > { %v11663_v32 = vpop.f32.mrb[111].mxu1 }
 0x96c   : > { %v17305_v47 = vadd.f32 %v11663_v32, %v11662_v34  ;;  %v9885_v52 = vadd.f32 %v17303_v25, %v17326_v59 }
 0x96e   : > { %v9888_v20 = vadd.f32 %v17305_v47, %v17326_v59 }
 0x970   : > { %v11665_v9 = vpop.f32.mrb[112].mxu1 }
 0x971   : > { %v11666_v5 = vpop.f32.mrb[113].mxu1 }
 0x972   : > { %v17307_v63 = vadd.f32 %v11666_v5, %v11665_v9  ;;  %v11668_v37 = vpop.f32.mrb[114].mxu1 }
 0x973   : > { %v11669_v35 = vpop.f32.mrb[115].mxu1 }
 0x974   : > { %v17309_v58 = vadd.f32 %v11669_v35, %v11668_v37  ;;  %v9893_v25 = vadd.f32 %v17307_v63, %v17326_v59 }
 0x976   : > { %v9896_v47 = vadd.f32 %v17309_v58, %v17326_v59 }
 0x978   : > { %v11671_v36 = vpop.f32.mrb[116].mxu1 }
 0x979   : > { %v11672_v23 = vpop.f32.mrb[117].mxu1 }
 0x97a   : > { %v17311_v2 = vadd.f32 %v11672_v23, %v11671_v36  ;;  %v11674_v24 = vpop.f32.mrb[118].mxu1 }
 0x97b   : > { %v11675_v30 = vpop.f32.mrb[119].mxu1 }
 0x97c   : > { %v17313_v39 = vadd.f32 %v11675_v30, %v11674_v24  ;;  %v9901_v63 = vadd.f32 %v17311_v2, %v17326_v59 }
 0x97e   : > { %v9904_v58 = vadd.f32 %v17313_v39, %v17326_v59 }
 0x980   : > { %v11677_v53 = vpop.f32.mrb[120].mxu1 }
 0x981   : > { %v11678_v51 = vpop.f32.mrb[121].mxu1 }
 0x982   : > { %v17315_v22 = vadd.f32 %v11678_v51, %v11677_v53  ;;  %v11680_v31 = vpop.f32.mrb[122].mxu1 }
 0x983   : > { %v11681_v13 = vpop.f32.mrb[123].mxu1 }
 0x984   : > { %v17317_v29 = vadd.f32 %v11681_v13, %v11680_v31  ;;  %v9909_v2 = vadd.f32 %v17315_v22, %v17326_v59 }
 0x986   : > { %v9912_v39 = vadd.f32 %v17317_v29, %v17326_v59 }
 0x988   : > { %v11683_v49 = vpop.f32.mrb[124].mxu1 }
 0x989   : > { %v11684_v12 = vpop.f32.mrb[125].mxu1 }
 0x98a   : > { %v17319_v45 = vadd.f32 %v11684_v12, %v11683_v49  ;;  %v11686_v10 = vpop.f32.mrb[126].mxu1 }
 0x98b   : > { %v11687_v48 = vpop.f32.mrb[127].mxu1 }
 0x98c   : > { %v17321_v3 = vadd.f32 %v11687_v48, %v11686_v10  ;;  %v9917_v22 = vadd.f32 %v17319_v45, %v17326_v59 }
 0x98e   : > { %v9920_v29 = vadd.f32 %v17321_v3, %v17326_v59 }
 0x990   : > { %v11705_v41 = vpop.f32.mrb[128].mxu1 }
 0x991   : > { %v11706_v26 = vpop.f32.mrb[129].mxu1 }
 0x992   : > { %v11707_v15 = vadd.f32 %v11706_v26, %v11705_v41  ;;  %v11708_v18 = vpop.f32.mrb[130].mxu1 }
 0x993   : > { %v11709_v27 = vpop.f32.mrb[131].mxu1 }
 0x994   : > { %v11710_v44 = vadd.f32 %v11709_v27, %v11708_v18  ;;  %v17330_v17 = vadd.f32 %v11707_v15, %v9861_v11 }
 0x996   : > { %10020 = vmax.xlane.f32.xlu0 %v17330_v17  ;;  %v17333_v43 = vadd.f32 %v11710_v44, %v9864_v8 }
 0x998   : > { %v11711_v21 = vpop.f32.mrb[132].mxu1 }
 0x999   : > { %v11712_v0 = vpop.f32.mrb[133].mxu1 }
 0x99a   : > { %v11713_v14 = vadd.f32 %v11712_v0, %v11711_v21  ;;  %v11714_v55 = vpop.f32.mrb[134].mxu1  ;;  %10022 = vmax.xlane.f32.xlu0 %v17333_v43 }
 0x99b   : > { %v11715_v28 = vpop.f32.mrb[135].mxu1 }
 0x99c   : > { %v11716_v16 = vadd.f32 %v11715_v28, %v11714_v55  ;;  %v17338_v54 = vadd.f32 %v11713_v14, %v9869_v38 }
 0x99e   : > { %10024 = vmax.xlane.f32.xlu1 %v17338_v54  ;;  %v17341_v60 = vadd.f32 %v11716_v16, %v9872_v40 }
 0x9a0   : > { %v11717_v56 = vpop.f32.mrb[136].mxu1 }
 0x9a1   : > { %v11718_v46 = vpop.f32.mrb[137].mxu1 }
 0x9a2   : > { %v11719_v42 = vadd.f32 %v11718_v46, %v11717_v56  ;;  %v11720_v61 = vpop.f32.mrb[138].mxu1  ;;  %10026 = vmax.xlane.f32.xlu1 %v17341_v60 }
 0x9a3   : > { %v11721_v50 = vpop.f32.mrb[139].mxu1 }
 0x9a4   : > { %v11722_v1 = vadd.f32 %v11721_v50, %v11720_v61  ;;  %v17346_v19 = vadd.f32 %v11719_v42, %v9877_v62 }
 0x9a6   : > { %10028 = vmax.xlane.f32.xlu0 %v17346_v19  ;;  %v17349_v57 = vadd.f32 %v11722_v1, %v9880_v6 }
 0x9a8   : > { %v11723_v4 = vpop.f32.mrb[140].mxu1  ;;  %10030 = vmax.xlane.f32.xlu1 %v17349_v57 }
 0x9a9   : > { %v11724_v33 = vpop.f32.mrb[141].mxu1 }
 0x9aa   : > { %v11725_v7 = vadd.f32 %v11724_v33, %v11723_v4  ;;  %v11726_v34 = vpop.f32.mrb[142].mxu1 }
 0x9ab   : > { %v11727_v32 = vpop.f32.mrb[143].mxu1 }
 0x9ac   : > { %v11728_v9 = vadd.f32 %v11727_v32, %v11726_v34  ;;  %v17356_v5 = vadd.f32 %v11725_v7, %v9885_v52 }
 0x9ae   : > { %10032 = vmax.xlane.f32.xlu0 %v17356_v5  ;;  %v17359_v37 = vadd.f32 %v11728_v9, %v9888_v20 }
 0x9b0   : > { %v11729_v35 = vpop.f32.mrb[144].mxu1  ;;  %10034 = vmax.xlane.f32.xlu1 %v17359_v37 }
 0x9b1   : > { %v11730_v36 = vpop.f32.mrb[145].mxu1 }
 0x9b2   : > { %v11731_v23 = vadd.f32 %v11730_v36, %v11729_v35  ;;  %v11732_v24 = vpop.f32.mrb[146].mxu1 }
 0x9b3   : > { %v11733_v30 = vpop.f32.mrb[147].mxu1 }
 0x9b4   : > { %v11734_v53 = vadd.f32 %v11733_v30, %v11732_v24  ;;  %v17366_v51 = vadd.f32 %v11731_v23, %v9893_v25 }
 0x9b6   : > { %10036 = vmax.xlane.f32.xlu0 %v17366_v51  ;;  %v17369_v31 = vadd.f32 %v11734_v53, %v9896_v47 }
 0x9b8   : > { %v11735_v13 = vpop.f32.mrb[148].mxu1  ;;  %10038 = vmax.xlane.f32.xlu1 %v17369_v31 }
 0x9b9   : > { %v11736_v49 = vpop.f32.mrb[149].mxu1 }
 0x9ba   : > { %v11737_v12 = vadd.f32 %v11736_v49, %v11735_v13  ;;  %v11738_v10 = vpop.f32.mrb[150].mxu1 }
 0x9bb   : > { %v11739_v48 = vpop.f32.mrb[151].mxu1 }
 0x9bc   : > { %v11740_v41 = vadd.f32 %v11739_v48, %v11738_v10  ;;  %v17376_v26 = vadd.f32 %v11737_v12, %v9901_v63 }
 0x9be   : > { %10040 = vmax.xlane.f32.xlu0 %v17376_v26  ;;  %v17379_v11 = vadd.f32 %v11740_v41, %v9904_v58 }
 0x9c0   : > { %v11741_v15 = vpop.f32.mrb[152].mxu1  ;;  %10042 = vmax.xlane.f32.xlu1 %v17379_v11 }
 0x9c1   : > { %v11742_v18 = vpop.f32.mrb[153].mxu1 }
 0x9c2   : > { %v11743_v27 = vadd.f32 %v11742_v18, %v11741_v15  ;;  %v11744_v8 = vpop.f32.mrb[154].mxu1 }
 0x9c3   : > { %v11745_v44 = vpop.f32.mrb[155].mxu1 }
 0x9c4   : > { %v11746_v21 = vadd.f32 %v11745_v44, %v11744_v8  ;;  %v17386_v0 = vadd.f32 %v11743_v27, %v9909_v2 }
 0x9c6   : > { %10044 = vmax.xlane.f32.xlu0 %v17386_v0  ;;  %v17389_v38 = vadd.f32 %v11746_v21, %v9912_v39 }
 0x9c8   : > { %v11747_v14 = vpop.f32.mrb[156].mxu1  ;;  %10046 = vmax.xlane.f32.xlu1 %v17389_v38 }
 0x9c9   : > { %v11748_v55 = vpop.f32.mrb[157].mxu1 }
 0x9ca   : > { %v11749_v28 = vadd.f32 %v11748_v55, %v11747_v14  ;;  %v11750_v40 = vpop.f32.mrb[158].mxu1 }
 0x9cb   : > { %v11751_v16 = vpop.f32.mrb[159].mxu1 }
 0x9cc   : > { %v11752_v56 = vadd.f32 %v11751_v16, %v11750_v40  ;;  %v17396_v46 = vadd.f32 %v11749_v28, %v9917_v22 }
 0x9ce   : > { %10048 = vmax.xlane.f32.xlu0 %v17396_v46  ;;  %v17399_v62 = vadd.f32 %v11752_v56, %v9920_v29 }
 0x9d0   : > { %10050 = vmax.xlane.f32.xlu1 %v17399_v62 }
 0xa23   : > { %v10021_v42 = vpop.xlane.xlu0 %10020 }
 0xa24   : > { %v10052_v61 = vsub.f32 %v17330_v17, %v10021_v42 }
 0xa26   : > { %v10068_v50 = vmul.f32 1.442695, %v10052_v61 }
 0xa27   : > { %v10023_v45 = vpop.xlane.xlu0 %10022 }
 0xa28   : > { %13237 = vpow2.f32 %v10068_v50  ;;  %v10053_v6 = vsub.f32 %v17333_v43, %v10023_v45 }
 0xa2a   : > { %v10070_v1 = vmul.f32 1.442695, %v10053_v6 }
 0xa2b   : > { %v10025_v4 = vpop.xlane.xlu1 %10024 }
 0xa2c   : > { %13239 = vpow2.f32 %v10070_v1  ;;  %v10054_v3 = vsub.f32 %v17338_v54, %v10025_v4 }
 0xa2e   : > { %v10072_v59 = vmul.f32 1.442695, %v10054_v3 }
 0xa2f   : > { %v10027_v33 = vpop.xlane.xlu1 %10026 }
 0xa30   : > { %13241 = vpow2.f32 %v10072_v59  ;;  %v10055_v52 = vsub.f32 %v17341_v60, %v10027_v33 }
 0xa32   : > { %v17406_v7 = vpop.eup %13237  ;;  %v10074_v34 = vmul.f32 1.442695, %v10055_v52 }
 0xa33   : > { %v10029_v32 = vpop.xlane.xlu0 %10028  ;;  %10100 = vadd.xlane.f32.xlu0 %v17406_v7 }
 0xa34   : > { %13243 = vpow2.f32 %v10074_v34  ;;  %v10056_v17 = vsub.f32 %v17346_v19, %v10029_v32 }
 0xa35   : > { %v10031_v43 = vpop.xlane.xlu1 %10030 }
 0xa36   : > { %v17410_v20 = vpop.eup %13239  ;;  %v10076_v9 = vmul.f32 1.442695, %v10056_v17  ;;  %v10057_v54 = vsub.f32 %v17349_v57, %v10031_v43 }
 0xa37   : > { %10102 = vadd.xlane.f32.xlu1 %v17410_v20 }
 0xa38   : > { %13245 = vpow2.f32 %v10076_v9  ;;  %v10078_v35 = vmul.f32 1.442695, %v10057_v54 }
 0xa3a   : > { %v17414_v60 = vpop.eup %13241  ;;  %13247 = vpow2.f32 %v10078_v35 }
 0xa3b   : > { %v10033_v36 = vpop.xlane.xlu0 %10032  ;;  %10104 = vadd.xlane.f32.xlu0 %v17414_v60 }
 0xa3c   : > { %v10058_v25 = vsub.f32 %v17356_v5, %v10033_v36 }
 0xa3d   : > { %v10035_v23 = vpop.xlane.xlu1 %10034 }
 0xa3e   : > { %v17418_v19 = vpop.eup %13243  ;;  %v10080_v24 = vmul.f32 1.442695, %v10058_v25  ;;  %v10059_v30 = vsub.f32 %v17359_v37, %v10035_v23 }
 0xa3f   : > { %10106 = vadd.xlane.f32.xlu1 %v17418_v19 }
 0xa40   : > { %13249 = vpow2.f32 %v10080_v24  ;;  %v10082_v57 = vmul.f32 1.442695, %v10059_v30 }
 0xa42   : > { %v17422_v47 = vpop.eup %13245  ;;  %13251 = vpow2.f32 %v10082_v57 }
 0xa43   : > { %v10037_v53 = vpop.xlane.xlu0 %10036  ;;  %10108 = vadd.xlane.f32.xlu0 %v17422_v47 }
 0xa44   : > { %v17425_v13 = vpop.eup %13247  ;;  %v10060_v5 = vsub.f32 %v17366_v51, %v10037_v53 }
 0xa45   : > { %v10039_v49 = vpop.xlane.xlu1 %10038  ;;  %10110 = vadd.xlane.f32.xlu1 %v17425_v13 }
 0xa46   : > { %v10084_v63 = vmul.f32 1.442695, %v10060_v5  ;;  %v10061_v37 = vsub.f32 %v17369_v31, %v10039_v49 }
 0xa48   : > { %13253 = vpow2.f32 %v10084_v63  ;;  %v10086_v12 = vmul.f32 1.442695, %v10061_v37 }
 0xa4a   : > { %v17430_v10 = vpop.eup %13249  ;;  %13255 = vpow2.f32 %v10086_v12 }
 0xa4b   : > { %v10041_v48 = vpop.xlane.xlu0 %10040  ;;  %10112 = vadd.xlane.f32.xlu0 %v17430_v10 }
 0xa4c   : > { %v17433_v58 = vpop.eup %13251  ;;  %v10062_v41 = vsub.f32 %v17376_v26, %v10041_v48 }
 0xa4d   : > { %v10043_v15 = vpop.xlane.xlu1 %10042  ;;  %10114 = vadd.xlane.f32.xlu1 %v17433_v58 }
 0xa4e   : > { %v10088_v51 = vmul.f32 1.442695, %v10062_v41  ;;  %v10063_v18 = vsub.f32 %v17379_v11, %v10043_v15 }
 0xa50   : > { %13257 = vpow2.f32 %v10088_v51  ;;  %v10090_v31 = vmul.f32 1.442695, %v10063_v18 }
 0xa52   : > { %v17438_v2 = vpop.eup %13253  ;;  %13259 = vpow2.f32 %v10090_v31 }
 0xa53   : > { %v10045_v27 = vpop.xlane.xlu0 %10044  ;;  %10116 = vadd.xlane.f32.xlu0 %v17438_v2 }
 0xa54   : > { %v17441_v8 = vpop.eup %13255  ;;  %v10064_v44 = vsub.f32 %v17386_v0, %v10045_v27 }
 0xa55   : > { %v10047_v39 = vpop.xlane.xlu1 %10046  ;;  %10118 = vadd.xlane.f32.xlu1 %v17441_v8 }
 0xa56   : > { %v10092_v26 = vmul.f32 1.442695, %v10064_v44  ;;  %v10065_v21 = vsub.f32 %v17389_v38, %v10047_v39 }
 0xa58   : > { %13261 = vpow2.f32 %v10092_v26  ;;  %v10094_v11 = vmul.f32 1.442695, %v10065_v21 }
 0xa5a   : > { %v17446_v14 = vpop.eup %13257  ;;  %13263 = vpow2.f32 %v10094_v11 }
 0xa5b   : > { %10120 = vadd.xlane.f32.xlu0 %v17446_v14  ;;  %v10049_v55 = vpop.xlane.xlu0 %10048 }
 0xa5c   : > { %v17449_v22 = vpop.eup %13259  ;;  %v10066_v28 = vsub.f32 %v17396_v46, %v10049_v55 }
 0xa5d   : > { %10122 = vadd.xlane.f32.xlu1 %v17449_v22  ;;  %v10051_v0 = vpop.xlane.xlu1 %10050 }
 0xa5e   : > { %v10096_v40 = vmul.f32 1.442695, %v10066_v28  ;;  %v10067_v16 = vsub.f32 %v17399_v62, %v10051_v0 }
 0xa60   : > { %13265 = vpow2.f32 %v10096_v40  ;;  %v10098_v38 = vmul.f32 1.442695, %v10067_v16 }
 0xa62   : > { %v17454_v29 = vpop.eup %13261  ;;  %13267 = vpow2.f32 %v10098_v38 }
 0xa63   : > { %10124 = vadd.xlane.f32.xlu0 %v17454_v29 }
 0xa64   : > { %v17457_v56 = vpop.eup %13263 }
 0xa65   : > { %10126 = vadd.xlane.f32.xlu1 %v17457_v56 }
 0xa6a   : > { %v17460_v42 = vpop.eup %13265 }
 0xa6b   : > { %10128 = vadd.xlane.f32.xlu0 %v17460_v42 }
 0xa6c   : > { %v17463_v46 = vpop.eup %13267 }
 0xa6d   : > { %10130 = vadd.xlane.f32.xlu1 %v17463_v46 }
 0xac0   : > { %v10101_v62 = vpop.xlane.xlu0 %10100 }
 0xac1   : > { %13269 = vrcp.f32 %v10101_v62 }
 0xac4   : > { %v10103_v61 = vpop.xlane.xlu1 %10102 }
 0xac5   : > { %13271 = vrcp.f32 %v10103_v61 }
 0xac8   : > { %v10105_v50 = vpop.xlane.xlu0 %10104 }
 0xac9   : > { %13273 = vrcp.f32 %v10105_v50 }
 0xacb   : > { %v13270_v45 = vpop.eup %13269 }
 0xacc   : > { %v10133_v6 = vmul.f32 %v13270_v45, %v17406_v7  ;;  %v10107_v1 = vpop.xlane.xlu1 %10106 }
 0xacd   : > { %13275 = vrcp.f32 %v10107_v1 }
 0xace   : > { %10164 = vst [vmem:[%s13516_s29] sm:$0xff] %v10133_v6 }
 0xacf   : > { %v13272_v4 = vpop.eup %13271 }
 0xad0   : > { %v10135_v3 = vmul.f32 %v13272_v4, %v17410_v20  ;;  %v10109_v59 = vpop.xlane.xlu0 %10108 }
 0xad1   : > { %13277 = vrcp.f32 %v10109_v59 }
 0xad2   : > { %10165 = vst [vmem:[%s13516_s29 + $0x8] sm:$0xff] %v10135_v3  ;;  %v10111_v33 = vpop.xlane.xlu1 %10110 }
 0xad3   : > { %v13274_v52 = vpop.eup %13273  ;;  %13279 = vrcp.f32 %v10111_v33 }
 0xad4   : > { %v10137_v34 = vmul.f32 %v13274_v52, %v17414_v60 }
 0xad6   : > { %10166 = vst [vmem:[%s13516_s29 + $0x10] sm:$0xff] %v10137_v34 }
 0xad7   : > { %v13276_v32 = vpop.eup %13275 }
 0xad8   : > { %v10139_v7 = vmul.f32 %v13276_v32, %v17418_v19  ;;  %v10113_v17 = vpop.xlane.xlu0 %10112 }
 0xad9   : > { %13281 = vrcp.f32 %v10113_v17 }
 0xada   : > { %10167 = vst [vmem:[%s13516_s29 + $0x18] sm:$0xff] %v10139_v7  ;;  %v10115_v43 = vpop.xlane.xlu1 %10114 }
 0xadb   : > { %v13278_v20 = vpop.eup %13277  ;;  %13283 = vrcp.f32 %v10115_v43 }
 0xadc   : > { %v10141_v9 = vmul.f32 %v13278_v20, %v17422_v47 }
 0xadd   : > { %v13280_v54 = vpop.eup %13279 }
 0xade   : > { %10168 = vst [vmem:[%s13516_s29 + $0x20] sm:$0xff] %v10141_v9  ;;  %v10143_v35 = vmul.f32 %v13280_v54, %v17425_v13 }
 0xae0   : > { %10169 = vst [vmem:[%s13516_s29 + $0x28] sm:$0xff] %v10143_v35  ;;  %v10117_v60 = vpop.xlane.xlu0 %10116 }
 0xae1   : > { %13285 = vrcp.f32 %v10117_v60 }
 0xae2   : > { %v10119_v36 = vpop.xlane.xlu1 %10118 }
 0xae3   : > { %v13282_v25 = vpop.eup %13281  ;;  %13287 = vrcp.f32 %v10119_v36 }
 0xae4   : > { %v10145_v23 = vmul.f32 %v13282_v25, %v17430_v10 }
 0xae5   : > { %v13284_v19 = vpop.eup %13283 }
 0xae6   : > { %10170 = vst [vmem:[%s13516_s29 + $0x30] sm:$0xff] %v10145_v23  ;;  %v10147_v24 = vmul.f32 %v13284_v19, %v17433_v58 }
 0xae8   : > { %10171 = vst [vmem:[%s13516_s29 + $0x38] sm:$0xff] %v10147_v24  ;;  %v10121_v30 = vpop.xlane.xlu0 %10120 }
 0xae9   : > { %13289 = vrcp.f32 %v10121_v30 }
 0xaea   : > { %v10123_v57 = vpop.xlane.xlu1 %10122 }
 0xaeb   : > { %v13286_v47 = vpop.eup %13285  ;;  %13291 = vrcp.f32 %v10123_v57 }
 0xaec   : > { %v10149_v53 = vmul.f32 %v13286_v47, %v17438_v2 }
 0xaed   : > { %v13288_v13 = vpop.eup %13287 }
 0xaee   : > { %10172 = vst [vmem:[%s13516_s29 + $0x40] sm:$0xff] %v10149_v53  ;;  %v10151_v5 = vmul.f32 %v13288_v13, %v17441_v8 }
 0xaf0   : > { %10173 = vst [vmem:[%s13516_s29 + $0x48] sm:$0xff] %v10151_v5  ;;  %v10125_v49 = vpop.xlane.xlu0 %10124 }
 0xaf1   : > { %13293 = vrcp.f32 %v10125_v49 }
 0xaf2   : > { %v10127_v63 = vpop.xlane.xlu1 %10126 }
 0xaf3   : > { %v13290_v37 = vpop.eup %13289  ;;  %13295 = vrcp.f32 %v10127_v63 }
 0xaf4   : > { %v10153_v12 = vmul.f32 %v13290_v37, %v17446_v14 }
 0xaf5   : > { %v13292_v10 = vpop.eup %13291 }
 0xaf6   : > { %10174 = vst [vmem:[%s13516_s29 + $0x50] sm:$0xff] %v10153_v12  ;;  %v10155_v48 = vmul.f32 %v13292_v10, %v17449_v22 }
 0xaf8   : > { %10175 = vst [vmem:[%s13516_s29 + $0x58] sm:$0xff] %v10155_v48  ;;  %v10129_v58 = vpop.xlane.xlu0 %10128 }
 0xaf9   : > { %13297 = vrcp.f32 %v10129_v58 }
 0xafa   : > { %v10131_v41 = vpop.xlane.xlu1 %10130 }
 0xafb   : > { %v13294_v15 = vpop.eup %13293  ;;  %13299 = vrcp.f32 %v10131_v41 }
 0xafc   : > { %v10157_v51 = vmul.f32 %v13294_v15, %v17454_v29 }
 0xafd   : > { %v13296_v18 = vpop.eup %13295 }
 0xafe   : > { %10176 = vst [vmem:[%s13516_s29 + $0x60] sm:$0xff] %v10157_v51  ;;  %v10159_v31 = vmul.f32 %v13296_v18, %v17457_v56 }
 0xb00   : > { %10177 = vst [vmem:[%s13516_s29 + $0x68] sm:$0xff] %v10159_v31 }
 0xb03   : > { %v13298_v2 = vpop.eup %13297 }
 0xb04   : > { %v10161_v27 = vmul.f32 %v13298_v2, %v17460_v42 }
 0xb05   : > { %v13300_v8 = vpop.eup %13299 }
 0xb06   : > { %10178 = vst [vmem:[%s13516_s29 + $0x70] sm:$0xff] %v10161_v27  ;;  %v10163_v44 = vmul.f32 %v13300_v8, %v17463_v46 }
 0xb08   : > { %10179 = vst [vmem:[%s13516_s29 + $0x78] sm:$0xff] %v10163_v44 }
 0xb09 PF: > { %s21_s17 = sadd.s32 1, %s13315_s17  }
 0xb0a   : > { %p18_p7 = scmp.ge.s32.totalorder %s21_s17, 4  }
 0xb0c   :  { %20 = sbr.rel (!%p18_p7) target bundleno = 1 (0x1), region = 160 }

</bundles_post_ra>
